<compile_context>
chip_gen: v5e
topology: v5e:2x2
jax: 0.10.0
libtpu: 0.0.40
codegen_flags: <defaults>
</compile_context>

<pallas_src>
import functools
import numpy as np

import jax
import jax.numpy as jnp
from jax.experimental import pallas as pl
from jax.experimental.pallas import tpu as pltpu

# ----------------------------- config ---------------------------------------
NUM_INPUT = 2          # (x, y) coordinates
CTRL = 32              # controller_size
NUM_HEADS = 2
N_MEM = 8              # memory_n
M_MEM = 16             # memory_m
LEN_FUTURE = 4
EMB = 16               # embed_past output dim
CM = CTRL + M_MEM      # decoder hidden size

PARAM_KEYS = [
    'w1x', 'w1r', 'b1', 'w2', 'b2',
    'w_gi_emb', 'w_gi_reads', 'b_gi',
    'w_gh_h', 'b_gh_h', 'w_gh_hr', 'b_gh_hr',
    'w_dec_h', 'w_dec_r', 'b_dec_i', 'w_dec_hh', 'b_dec_hh',
    'w_out', 'b_out',
    'rw_w', 'rw_b',
]


# ----------------------------- shared step math ------------------------------
def _gru(gi, gh, hprev, Hd):
    """PyTorch GRU cell combine (gate order r, z, n)."""
    r = jax.nn.sigmoid(gi[:, 0:Hd] + gh[:, 0:Hd])
    z = jax.nn.sigmoid(gi[:, Hd:2 * Hd] + gh[:, Hd:2 * Hd])
    n = jnp.tanh(gi[:, 2 * Hd:3 * Hd] + r * gh[:, 2 * Hd:3 * Hd])
    return (1.0 - z) * n + z * hprev


def _step(x, xr, reads, h, hr, hf, mem, member, head_mask, pr,
          Gfc, Gmem, compute_out):
    """One fused recurrent step (values in, values out).  `pr` holds param refs."""
    f32 = jnp.float32
    B = x.shape[0]
    C, M, N = CTRL, M_MEM, N_MEM

    def mm(a, wref):
        return jnp.dot(a, wref[...], preferred_element_type=f32)

    # fused embed_past / embed_past_rel : Linear -> ReLU -> Linear, block-diag
    h1 = jnp.maximum(mm(x, pr['w1x']) + mm(xr, pr['w1r']) + pr['b1'][...], 0.0)
    emb = mm(h1, pr['w2']) + pr['b2'][...]                 # (B, 32) = [e | e_rel]

    # fused encoder GRU input projections (encoder_past ++ encoder_past_rel)
    gi = mm(emb, pr['w_gi_emb']) + mm(reads, pr['w_gi_reads']) + pr['b_gi'][...]
    gh_e = mm(h, pr['w_gh_h']) + pr['b_gh_h'][...]
    gh_r = mm(hr, pr['w_gh_hr']) + pr['b_gh_hr'][...]
    new_h = _gru(gi[:, 0:3 * C], gh_e, h, C)               # encoder_past
    new_hr = _gru(gi[:, 3 * C:6 * C], gh_r, hr, C)         # encoder_past_rel

    # gather per-agent memory rows (repeat_interleave by scene/group membership)
    mem_rows = jnp.zeros((B, N, M), f32)
    for g in range(Gmem):
        mem_rows = mem_rows + member[:, g:g + 1, None] * mem[g][None, :, :]
    mr = mem_rows + 1e-16
    nrm_m = jnp.sqrt(jnp.sum(mr * mr, axis=-1))            # (B, N) — hoisted, shared

    # fused read+write head projection (block-wise over head-blocked rows)
    RW = 4 * M + 2
    if Gfc == 1:
        rw = jnp.dot(new_h, pr['rw_w'][0], preferred_element_type=f32) + pr['rw_b'][0:1, :]
    else:
        rw = jnp.zeros((B, RW), f32)
        for g in range(Gfc):
            og = (jnp.dot(new_h, pr['rw_w'][g], preferred_element_type=f32)
                  + pr['rw_b'][g:g + 1, :])
            rw = rw + og * head_mask[:, g:g + 1]

    k_r = rw[:, 0:M]
    beta_r = jax.nn.softplus(rw[:, M:M + 1])
    k_w = rw[:, M + 1:2 * M + 1]
    beta_w = jax.nn.softplus(rw[:, 2 * M + 1:2 * M + 2])
    e_w = jax.nn.sigmoid(rw[:, 2 * M + 2:3 * M + 2])
    a_w = rw[:, 3 * M + 2:4 * M + 2]

    # NTM content addressing: softmax(beta * cosine(mem, k)), shared mem norms
    def address(k, beta):
        kk = k[:, None, :] + 1e-16                         # (B, 1, M)
        dots = jnp.sum(mr * kk, axis=-1)                   # (B, N)
        nrm_k = jnp.sqrt(jnp.sum(kk * kk, axis=-1))        # (B, 1)
        cos = dots / jnp.maximum(nrm_m * nrm_k, 1e-8)
        return jax.nn.softmax(beta * cos, axis=1)          # (B, N)

    w_read = address(k_r, beta_r)
    reading = jnp.sum(w_read[:, :, None] * mem_rows, axis=1)    # (B, M)

    # decoder GRU on [encoder_rel output, reading]  +  FC_output
    gi_d = mm(new_hr, pr['w_dec_h']) + mm(reading, pr['w_dec_r']) + pr['b_dec_i'][...]
    gh_d = mm(hf, pr['w_dec_hh']) + pr['b_dec_hh'][...]
    new_hf = _gru(gi_d, gh_d, hf, C + M)
    out = (mm(new_hf, pr['w_out']) + pr['b_out'][...]) if compute_out else None

    # write head -> erase/add outer products -> group-wise scatter-max update
    w_write = address(k_w, beta_w)
    erase = w_write[:, :, None] * e_w[:, None, :]          # (B, N, M)
    add = w_write[:, :, None] * a_w[:, None, :]            # (B, N, M)
    neg = jnp.float32(-1e30)
    new_mem = []
    for g in range(Gmem):
        msk = member[:, g:g + 1, None] > 0.5
        oe = jnp.maximum(jnp.max(jnp.where(msk, erase, neg), axis=0), 0.0)
        oa = jnp.maximum(jnp.max(jnp.where(msk, add, neg), axis=0), 0.0)
        new_mem.append((1.0 - oe) * mem[g] + oa)

    return out, reading, new_h, new_hr, new_hf, new_mem


# ----------------------------- Pallas kernels --------------------------------
def make_past_kernel(S):
    """Observed-past recurrence, grid=(T-1,).  Final state written to outputs
    (constant-index output accumulators, VMEM-resident across the grid)."""
    n_par = len(PARAM_KEYS)

    def kernel(*refs):
        (xs_ref, xrs_ref, reads0_ref, h0_ref, hr0_ref, hf0_ref,
         mem0_ref, member_ref) = refs[:8]
        pr = dict(zip(PARAM_KEYS, refs[8:8 + n_par]))
        reads_ref, h_ref, hr_ref, hf_ref, mem_ref = refs[8 + n_par:]

        t = pl.program_id(0)

        @pl.when(t == 0)
        def _init():
            reads_ref[...] = reads0_ref[...]
            h_ref[...] = h0_ref[...]
            hr_ref[...] = hr0_ref[...]
            hf_ref[...] = hf0_ref[...]
            mem_ref[...] = mem0_ref[...]

        member = member_ref[...]
        _, reading, new_h, new_hr, new_hf, new_mem = _step(
            xs_ref[0], xrs_ref[0], reads_ref[...], h_ref[...], hr_ref[...],
            hf_ref[...], mem_ref[...], member, None, pr,
            Gfc=1, Gmem=S, compute_out=False)

        reads_ref[...] = reading
        h_ref[...] = new_h
        hr_ref[...] = new_hr
        hf_ref[...] = new_hf
        for g in range(S):
            mem_ref[g] = new_mem[g]

    return kernel


def make_future_kernel(A, H, Gmem):
    """Autoregressive future, grid=(LEN_FUTURE,).  State lives in VMEM scratch;
    the torch agent-major re-flatten between steps is a one-hot permutation."""
    n_par = len(PARAM_KEYS)

    def kernel(*refs):
        (xf_ref, xrf_ref, xbase_ref, reads0_ref, h0_ref, hr0_ref, hf0_ref,
         mem0_ref, member_ref, hmask_ref, perm_ref) = refs[:11]
        pr = dict(zip(PARAM_KEYS, refs[11:11 + n_par]))
        out_ref = refs[11 + n_par]
        (reads_s, h_s, hr_s, hf_s, mem_s, x_s, xr_s, pres_s) = refs[12 + n_par:]

        t = pl.program_id(0)

        @pl.when(t == 0)
        def _init():
            reads_s[...] = reads0_ref[...]
            h_s[...] = h0_ref[...]
            hr_s[...] = hr0_ref[...]
            hf_s[...] = hf0_ref[...]
            mem_s[...] = mem0_ref[...]
            x_s[...] = xf_ref[...]
            xr_s[...] = xrf_ref[...]
            pres_s[...] = jnp.zeros(pres_s.shape, jnp.float32)

        member = member_ref[...]
        hmask = hmask_ref[...]
        out, reading, new_h, new_hr, new_hf, new_mem = _step(
            x_s[...], xr_s[...], reads_s[...], h_s[...], hr_s[...], hf_s[...],
            mem_s[...], member, hmask, pr, Gfc=H, Gmem=Gmem, compute_out=True)

        out_ref[0] = out
        reads_s[...] = reading
        h_s[...] = new_h
        hr_s[...] = new_hr
        hf_s[...] = new_hf
        for g in range(Gmem):
            mem_s[g] = new_mem[g]

        # next-step inputs: torch flattens the (A, H, 2) "present" agent-major,
        # while kernel rows (state) are head-major -> fixed permutation P.
        out_perm = jnp.dot(perm_ref[...], out, preferred_element_type=jnp.float32)
        pres_s[...] = pres_s[...] + out_perm
        x_s[...] = xbase_ref[...] + pres_s[...]
        xr_s[...] = out_perm

    return kernel


def _const_spec(shape):
    nd = len(shape)
    return pl.BlockSpec(tuple(shape), lambda t, _nd=nd: (0,) * _nd)


def build_past_call(A, S, T_obs, packed):
    kernel = make_past_kernel(S)
    state_shapes = [(A, M_MEM), (A, CTRL), (A, CTRL), (A, CM), (S, N_MEM, M_MEM)]
    in_specs = [
        pl.BlockSpec((1, A, 2), lambda t: (t, 0, 0)),
        pl.BlockSpec((1, A, 2), lambda t: (t, 0, 0)),
        _const_spec((A, M_MEM)), _const_spec((A, CTRL)), _const_spec((A, CTRL)),
        _const_spec((A, CM)), _const_spec((S, N_MEM, M_MEM)), _const_spec((A, S)),
    ] + [_const_spec(tuple(packed[k].shape)) for k in PARAM_KEYS]
    out_specs = tuple(_const_spec(s) for s in state_shapes)
    out_shape = tuple(jax.ShapeDtypeStruct(s, jnp.float32) for s in state_shapes)
    return pl.pallas_call(
        kernel,
        grid=(T_obs,),
        in_specs=in_specs,
        out_specs=out_specs,
        out_shape=out_shape,
        compiler_params=pltpu.CompilerParams(dimension_semantics=("arbitrary",)),
    )


def build_future_call(A, S, H, packed):
    B = H * A
    Gmem = H * S
    kernel = make_future_kernel(A, H, Gmem)
    in_specs = [
        _const_spec((B, 2)), _const_spec((B, 2)), _const_spec((B, 2)),
        _const_spec((B, M_MEM)), _const_spec((B, CTRL)), _const_spec((B, CTRL)),
        _const_spec((B, CM)), _const_spec((Gmem, N_MEM, M_MEM)),
        _const_spec((B, Gmem)), _const_spec((B, H)), _const_spec((B, B)),
    ] + [_const_spec(tuple(packed[k].shape)) for k in PARAM_KEYS]
    out_specs = pl.BlockSpec((1, B, 2), lambda t: (t, 0, 0))
    out_shape = jax.ShapeDtypeStruct((LEN_FUTURE, B, 2), jnp.float32)
    scratch_shapes = [
        pltpu.VMEM((B, M_MEM), jnp.float32),
        pltpu.VMEM((B, CTRL), jnp.float32),
        pltpu.VMEM((B, CTRL), jnp.float32),
        pltpu.VMEM((B, CM), jnp.float32),
        pltpu.VMEM((Gmem, N_MEM, M_MEM), jnp.float32),
        pltpu.VMEM((B, 2), jnp.float32),
        pltpu.VMEM((B, 2), jnp.float32),
        pltpu.VMEM((B, 2), jnp.float32),
    ]
    # TODO(synk): on v7x the two heads could additionally be split across the
    # two TensorCores (head-parallel grid axis); kept single-core for safety.
    return pl.pallas_call(
        kernel,
        grid=(LEN_FUTURE,),
        in_specs=in_specs,
        out_specs=out_specs,
        out_shape=out_shape,
        scratch_shapes=scratch_shapes,
        compiler_params=pltpu.CompilerParams(dimension_semantics=("arbitrary",)),
    )


# ----------------------------- params ----------------------------------------
def init_params(key):
    keys = iter(jax.random.split(key, 48))
    C, M, N = CTRL, M_MEM, N_MEM
    G3, D3 = 3 * C, 3 * (C + M)

    def nrm(shape, scale):
        return (scale * jax.random.normal(next(keys), shape)).astype(jnp.float32)

    def zeros(shape):
        return jnp.zeros(shape, jnp.float32)

    p = {
        'ep_w1': nrm((2, 8), 0.5), 'ep_b1': zeros((1, 8)),
        'ep_w2': nrm((8, EMB), 0.3), 'ep_b2': zeros((1, EMB)),
        'er_w1': nrm((2, 8), 0.5), 'er_b1': zeros((1, 8)),
        'er_w2': nrm((8, EMB), 0.3), 'er_b2': zeros((1, EMB)),
        # encoder_past: GRU(16 + M, C) — input weight split [embed | reads]
        'enc_wih_e': nrm((EMB, G3), 0.15), 'enc_wih_r': nrm((M, G3), 0.15),
        'enc_whh': nrm((C, G3), 0.15), 'enc_bih': zeros((1, G3)), 'enc_bhh': zeros((1, G3)),
        # encoder_past_rel: GRU(16, C)
        'encr_wih': nrm((EMB, G3), 0.15), 'encr_whh': nrm((C, G3), 0.15),
        'encr_bih': zeros((1, G3)), 'encr_bhh': zeros((1, G3)),
        # decoder: GRU(C + M, C + M) — input weight split [enc_rel_out | reading]
        'dec_wih_h': nrm((C, D3), 0.12), 'dec_wih_r': nrm((M, D3), 0.12),
        'dec_whh': nrm((C + M, D3), 0.12), 'dec_bih': zeros((1, D3)), 'dec_bhh': zeros((1, D3)),
        'fco_w': nrm((C + M, 2), 0.2), 'fco_b': zeros((1, 2)),
        # read/write FCs (stacked per head; "past" variants have a single head)
        'fc_read_past_w': nrm((1, C, M + 1), 0.2), 'fc_read_past_b': zeros((1, M + 1)),
        'fc_reads_w': nrm((NUM_HEADS, C, M + 1), 0.2), 'fc_reads_b': zeros((NUM_HEADS, M + 1)),
        'fc_write_past_w': nrm((1, C, 3 * M + 1), 0.2), 'fc_write_past_b': zeros((1, 3 * M + 1)),
        'fc_writes_w': nrm((NUM_HEADS, C, 3 * M + 1), 0.2), 'fc_writes_b': zeros((NUM_HEADS, 3 * M + 1)),
        # state biases / initial read / memory bias
        'h_bias': nrm((1, C), 0.05), 'h_bias_rel': nrm((1, C), 0.05),
        'h_bias_fut': nrm((1, C + M), 0.05),
        'init_r': nrm((1, M), 0.01),
        'mem_bias': (jax.random.uniform(next(keys), (N, M), minval=-1.0, maxval=1.0)
                     / np.sqrt(N + M)).astype(jnp.float32),
    }
    return p


def pack_params(p):
    """Pack per-layer params into fused / block-diagonal matmul weights."""
    C, M = CTRL, M_MEM
    G3 = 3 * C

    def npf(x):
        return np.asarray(x, np.float32)

    # fused embedding MLPs
    w1x = np.zeros((2, 16), np.float32); w1x[:, 0:8] = npf(p['ep_w1'])
    w1r = np.zeros((2, 16), np.float32); w1r[:, 8:16] = npf(p['er_w1'])
    b1 = np.concatenate([npf(p['ep_b1']), npf(p['er_b1'])], axis=1)
    w2 = np.zeros((16, 32), np.float32)
    w2[0:8, 0:16] = npf(p['ep_w2']); w2[8:16, 16:32] = npf(p['er_w2'])
    b2 = np.concatenate([npf(p['ep_b2']), npf(p['er_b2'])], axis=1)

    # fused encoder GRU input projections (cols 0:96 -> encoder_past, 96:192 -> rel)
    w_gi_emb = np.zeros((32, 2 * G3), np.float32)
    w_gi_emb[0:16, 0:G3] = npf(p['enc_wih_e'])
    w_gi_emb[16:32, G3:2 * G3] = npf(p['encr_wih'])
    w_gi_reads = np.zeros((M, 2 * G3), np.float32)
    w_gi_reads[:, 0:G3] = npf(p['enc_wih_r'])
    b_gi = np.concatenate([npf(p['enc_bih']), npf(p['encr_bih'])], axis=1)

    common = dict(
        w1x=w1x, w1r=w1r, b1=b1, w2=w2, b2=b2,
        w_gi_emb=w_gi_emb, w_gi_reads=w_gi_reads, b_gi=b_gi,
        w_gh_h=npf(p['enc_whh']), b_gh_h=npf(p['enc_bhh']),
        w_gh_hr=npf(p['encr_whh']), b_gh_hr=npf(p['encr_bhh']),
        w_dec_h=npf(p['dec_wih_h']), w_dec_r=npf(p['dec_wih_r']),
        b_dec_i=npf(p['dec_bih']), w_dec_hh=npf(p['dec_whh']), b_dec_hh=npf(p['dec_bhh']),
        w_out=npf(p['fco_w']), b_out=npf(p['fco_b']),
    )

    def pack_rw(rw_w, rw_b, ww_w, ww_b):
        G = npf(rw_w).shape[0]
        w = np.zeros((G, C, 4 * M + 2), np.float32)
        b = np.zeros((G, 4 * M + 2), np.float32)
        w[:, :, 0:M + 1] = npf(rw_w); w[:, :, M + 1:] = npf(ww_w)
        b[:, 0:M + 1] = npf(rw_b); b[:, M + 1:] = npf(ww_b)
        return w, b

    rw_w_p, rw_b_p = pack_rw(p['fc_read_past_w'], p['fc_read_past_b'],
                             p['fc_write_past_w'], p['fc_write_past_b'])
    rw_w_f, rw_b_f = pack_rw(p['fc_reads_w'], p['fc_reads_b'],
                             p['fc_writes_w'], p['fc_writes_b'])

    common = {k: jnp.asarray(v) for k, v in common.items()}
    packed_past = dict(common, rw_w=jnp.asarray(rw_w_p), rw_b=jnp.asarray(rw_b_p))
    packed_future = dict(common, rw_w=jnp.asarray(rw_w_f), rw_b=jnp.asarray(rw_b_f))
    return packed_past, packed_future


# ----------------------------- forward ---------------------------------------
def build_forward(params, length, T_past):
    S = len(length)
    A = int(sum(length))
    H = NUM_HEADS
    B = H * A

    # host-side one-hot bookkeeping matrices
    scene = np.repeat(np.arange(S), length)
    member_single = (scene[:, None] == np.arange(S)[None, :]).astype(np.float32)  # (A, S)
    member_future = np.zeros((B, H * S), np.float32)
    head_mask = np.zeros((B, H), np.float32)
    for h_i in range(H):
        member_future[h_i * A:(h_i + 1) * A, h_i * S:(h_i + 1) * S] = member_single
        head_mask[h_i * A:(h_i + 1) * A, h_i] = 1.0
    perm = np.zeros((B, B), np.float32)        # head-major row r <- out row P(r)
    for r in range(B):
        perm[r, (r % H) * A + (r // H)] = 1.0

    packed_past, packed_future = pack_params(params)
    past_call = build_past_call(A, S, T_past - 1, packed_past) if T_past > 1 else None
    fut_call = build_future_call(A, S, H, packed_future)

    member_single_j = jnp.asarray(member_single)
    member_future_j = jnp.asarray(member_future)
    head_mask_j = jnp.asarray(head_mask)
    perm_j = jnp.asarray(perm)
    past_plist = [packed_past[k] for k in PARAM_KEYS]
    fut_plist = [packed_future[k] for k in PARAM_KEYS]

    @jax.jit
    def fwd(past, past_rel):
        # init_sequence / create_new_state
        mem0 = jnp.tile(params['mem_bias'][None], (S, 1, 1))        # (S, N, M)
        reads0 = jnp.tile(params['init_r'], (A, 1))
        h0 = jnp.tile(params['h_bias'], (A, 1))
        hr0 = jnp.tile(params['h_bias_rel'], (A, 1))
        hf0 = jnp.tile(params['h_bias_fut'], (A, 1))

        # observed past (all but last step): fused forward_single recurrence
        if T_past > 1:
            x_seq = past[:, :T_past - 1].transpose(1, 0, 2)          # (T-1, A, 2)
            xr_seq = past_rel[:, :T_past - 1].transpose(1, 0, 2)
            reads0, h0, hr0, hf0, mem0 = past_call(
                x_seq, xr_seq, reads0, h0, hr0, hf0, mem0, member_single_j,
                *past_plist)

        # future phase: first=True state tiling done host-side, then one fused
        # kernel runs the whole autoregressive rollout.
        past_last = past[:, -1]                                      # (A, 2)
        past_rel_last = past_rel[:, -1]
        x_first = jnp.tile(past_last, (H, 1))                        # head-major
        xr_first = jnp.tile(past_rel_last, (H, 1))
        x_base = jnp.repeat(past_last, H, axis=0)                    # agent-major base

        out_seq = fut_call(
            x_first, xr_first, x_base,
            jnp.tile(reads0, (H, 1)), jnp.tile(h0, (H, 1)),
            jnp.tile(hr0, (H, 1)), jnp.tile(hf0, (H, 1)),
            jnp.tile(mem0, (H, 1, 1)),
            member_future_j, head_mask_j, perm_j, *fut_plist)        # (T_f, H*A, 2)

        out_p = out_seq.reshape(LEN_FUTURE, H, A, 2).transpose(0, 2, 1, 3)  # (T_f, A, H, 2)
        cum = jnp.cumsum(out_p, axis=0)
        preds = past_last[None, :, None, :] + cum                    # (T_f, A, H, 2)
        return preds.transpose(1, 2, 0, 3)                           # (A, H, T_f, 2)

    return fwd


# ----------------------------- main ------------------------------------------
if __name__ == "__main__":
    key = jax.random.PRNGKey(0)
    kp, kx, kxr = jax.random.split(key, 3)
    params = init_params(kp)

    length = [3, 2]                 # two scenes with 3 and 2 agents
    A = sum(length)
    T_PAST = 6
    past = jax.random.normal(kx, (A, T_PAST, NUM_INPUT), jnp.float32)
    past_rel = jax.random.normal(kxr, (A, T_PAST, NUM_INPUT), jnp.float32)

    fwd = build_forward(params, length, T_PAST)
    pred = fwd(past, past_rel)
    pred = jax.block_until_ready(pred)

    assert pred.shape == (A, NUM_HEADS, LEN_FUTURE, 2), pred.shape
    assert bool(jnp.all(jnp.isfinite(pred)))
    print("KERNEL_OK")
</pallas_src>

<mosaic_0001>
module attributes {stable_mosaic.version = 11 : i64} {
  func.func @kernel(%arg0: i32, %arg1: memref<1x5x2xf32, #tpu.memory_space<vmem>>, %arg2: memref<1x5x2xf32, #tpu.memory_space<vmem>>, %arg3: memref<5x16xf32, #tpu.memory_space<vmem>>, %arg4: memref<5x32xf32, #tpu.memory_space<vmem>>, %arg5: memref<5x32xf32, #tpu.memory_space<vmem>>, %arg6: memref<5x48xf32, #tpu.memory_space<vmem>>, %arg7: memref<2x8x16xf32, #tpu.memory_space<vmem>>, %arg8: memref<5x2xf32, #tpu.memory_space<vmem>>, %arg9: memref<2x16xf32, #tpu.memory_space<vmem>>, %arg10: memref<2x16xf32, #tpu.memory_space<vmem>>, %arg11: memref<1x16xf32, #tpu.memory_space<vmem>>, %arg12: memref<16x32xf32, #tpu.memory_space<vmem>>, %arg13: memref<1x32xf32, #tpu.memory_space<vmem>>, %arg14: memref<32x192xf32, #tpu.memory_space<vmem>>, %arg15: memref<16x192xf32, #tpu.memory_space<vmem>>, %arg16: memref<1x192xf32, #tpu.memory_space<vmem>>, %arg17: memref<32x96xf32, #tpu.memory_space<vmem>>, %arg18: memref<1x96xf32, #tpu.memory_space<vmem>>, %arg19: memref<32x96xf32, #tpu.memory_space<vmem>>, %arg20: memref<1x96xf32, #tpu.memory_space<vmem>>, %arg21: memref<32x144xf32, #tpu.memory_space<vmem>>, %arg22: memref<16x144xf32, #tpu.memory_space<vmem>>, %arg23: memref<1x144xf32, #tpu.memory_space<vmem>>, %arg24: memref<48x144xf32, #tpu.memory_space<vmem>>, %arg25: memref<1x144xf32, #tpu.memory_space<vmem>>, %arg26: memref<48x2xf32, #tpu.memory_space<vmem>>, %arg27: memref<1x2xf32, #tpu.memory_space<vmem>>, %arg28: memref<1x32x66xf32, #tpu.memory_space<vmem>>, %arg29: memref<1x66xf32, #tpu.memory_space<vmem>>, %arg30: memref<5x16xf32, #tpu.memory_space<vmem>>, %arg31: memref<5x32xf32, #tpu.memory_space<vmem>>, %arg32: memref<5x32xf32, #tpu.memory_space<vmem>>, %arg33: memref<5x48xf32, #tpu.memory_space<vmem>>, %arg34: memref<2x8x16xf32, #tpu.memory_space<vmem>>) attributes {dimension_semantics = [#tpu.dimension_semantics<arbitrary>], iteration_bounds = array<i64: 5>, scalar_prefetch = 0 : i64, scratch_operands = 0 : i64, tpu.core_type = #tpu.core_type<tc>, window_params = [{transform_indices = @transform_0, window_bounds = array<i64: 1, 5, 2>}, {transform_indices = @transform_1, window_bounds = array<i64: 1, 5, 2>}, {pipeline_mode = #tpu.pipeline_mode<synchronous>, transform_indices = @transform_2, window_bounds = array<i64: 5, 16>}, {pipeline_mode = #tpu.pipeline_mode<synchronous>, transform_indices = @transform_3, window_bounds = array<i64: 5, 32>}, {pipeline_mode = #tpu.pipeline_mode<synchronous>, transform_indices = @transform_4, window_bounds = array<i64: 5, 32>}, {pipeline_mode = #tpu.pipeline_mode<synchronous>, transform_indices = @transform_5, window_bounds = array<i64: 5, 48>}, {pipeline_mode = #tpu.pipeline_mode<synchronous>, transform_indices = @transform_6, window_bounds = array<i64: 2, 8, 16>}, {pipeline_mode = #tpu.pipeline_mode<synchronous>, transform_indices = @transform_7, window_bounds = array<i64: 5, 2>}, {pipeline_mode = #tpu.pipeline_mode<synchronous>, transform_indices = @transform_8, window_bounds = array<i64: 2, 16>}, {pipeline_mode = #tpu.pipeline_mode<synchronous>, transform_indices = @transform_9, window_bounds = array<i64: 2, 16>}, {pipeline_mode = #tpu.pipeline_mode<synchronous>, transform_indices = @transform_10, window_bounds = array<i64: 1, 16>}, {pipeline_mode = #tpu.pipeline_mode<synchronous>, transform_indices = @transform_11, window_bounds = array<i64: 16, 32>}, {pipeline_mode = #tpu.pipeline_mode<synchronous>, transform_indices = @transform_12, window_bounds = array<i64: 1, 32>}, {pipeline_mode = #tpu.pipeline_mode<synchronous>, transform_indices = @transform_13, window_bounds = array<i64: 32, 192>}, {pipeline_mode = #tpu.pipeline_mode<synchronous>, transform_indices = @transform_14, window_bounds = array<i64: 16, 192>}, {pipeline_mode = #tpu.pipeline_mode<synchronous>, transform_indices = @transform_15, window_bounds = array<i64: 1, 192>}, {pipeline_mode = #tpu.pipeline_mode<synchronous>, transform_indices = @transform_16, window_bounds = array<i64: 32, 96>}, {pipeline_mode = #tpu.pipeline_mode<synchronous>, transform_indices = @transform_17, window_bounds = array<i64: 1, 96>}, {pipeline_mode = #tpu.pipeline_mode<synchronous>, transform_indices = @transform_18, window_bounds = array<i64: 32, 96>}, {pipeline_mode = #tpu.pipeline_mode<synchronous>, transform_indices = @transform_19, window_bounds = array<i64: 1, 96>}, {pipeline_mode = #tpu.pipeline_mode<synchronous>, transform_indices = @transform_20, window_bounds = array<i64: 32, 144>}, {pipeline_mode = #tpu.pipeline_mode<synchronous>, transform_indices = @transform_21, window_bounds = array<i64: 16, 144>}, {pipeline_mode = #tpu.pipeline_mode<synchronous>, transform_indices = @transform_22, window_bounds = array<i64: 1, 144>}, {pipeline_mode = #tpu.pipeline_mode<synchronous>, transform_indices = @transform_23, window_bounds = array<i64: 48, 144>}, {pipeline_mode = #tpu.pipeline_mode<synchronous>, transform_indices = @transform_24, window_bounds = array<i64: 1, 144>}, {pipeline_mode = #tpu.pipeline_mode<synchronous>, transform_indices = @transform_25, window_bounds = array<i64: 48, 2>}, {pipeline_mode = #tpu.pipeline_mode<synchronous>, transform_indices = @transform_26, window_bounds = array<i64: 1, 2>}, {pipeline_mode = #tpu.pipeline_mode<synchronous>, transform_indices = @transform_27, window_bounds = array<i64: 1, 32, 66>}, {pipeline_mode = #tpu.pipeline_mode<synchronous>, transform_indices = @transform_28, window_bounds = array<i64: 1, 66>}, {pipeline_mode = #tpu.pipeline_mode<synchronous>, transform_indices = @transform_29, window_bounds = array<i64: 5, 16>}, {pipeline_mode = #tpu.pipeline_mode<synchronous>, transform_indices = @transform_30, window_bounds = array<i64: 5, 32>}, {pipeline_mode = #tpu.pipeline_mode<synchronous>, transform_indices = @transform_31, window_bounds = array<i64: 5, 32>}, {pipeline_mode = #tpu.pipeline_mode<synchronous>, transform_indices = @transform_32, window_bounds = array<i64: 5, 48>}, {pipeline_mode = #tpu.pipeline_mode<synchronous>, transform_indices = @transform_33, window_bounds = array<i64: 2, 8, 16>}]} {
    %c0_i32 = arith.constant 0 : i32
    %0 = arith.cmpi eq, %arg0, %c0_i32 : i32
    %1 = arith.extui %0 : i1 to i32
    %c0_i32_0 = arith.constant 0 : i32
    %2 = arith.cmpi ne, %1, %c0_i32_0 : i32
    scf.if %2 {
      %c0_130 = arith.constant 0 : index
      %c0_131 = arith.constant 0 : index
      %334 = vector.load %arg3[%c0_130, %c0_131] : memref<5x16xf32, #tpu.memory_space<vmem>>, vector<5x16xf32>
      %c0_132 = arith.constant 0 : index
      %c0_133 = arith.constant 0 : index
      %335 = vector.load %arg30[%c0_132, %c0_133] : memref<5x16xf32, #tpu.memory_space<vmem>>, vector<5x16xf32>
      tpu.vector_store %arg30[%c0_132, %c0_133], %334 {strides = array<i32>} : memref<5x16xf32, #tpu.memory_space<vmem>>, vector<5x16xf32>,
      %c0_134 = arith.constant 0 : index
      %c0_135 = arith.constant 0 : index
      %336 = vector.load %arg4[%c0_134, %c0_135] : memref<5x32xf32, #tpu.memory_space<vmem>>, vector<5x32xf32>
      %c0_136 = arith.constant 0 : index
      %c0_137 = arith.constant 0 : index
      %337 = vector.load %arg31[%c0_136, %c0_137] : memref<5x32xf32, #tpu.memory_space<vmem>>, vector<5x32xf32>
      tpu.vector_store %arg31[%c0_136, %c0_137], %336 {strides = array<i32>} : memref<5x32xf32, #tpu.memory_space<vmem>>, vector<5x32xf32>,
      %c0_138 = arith.constant 0 : index
      %c0_139 = arith.constant 0 : index
      %338 = vector.load %arg5[%c0_138, %c0_139] : memref<5x32xf32, #tpu.memory_space<vmem>>, vector<5x32xf32>
      %c0_140 = arith.constant 0 : index
      %c0_141 = arith.constant 0 : index
      %339 = vector.load %arg32[%c0_140, %c0_141] : memref<5x32xf32, #tpu.memory_space<vmem>>, vector<5x32xf32>
      tpu.vector_store %arg32[%c0_140, %c0_141], %338 {strides = array<i32>} : memref<5x32xf32, #tpu.memory_space<vmem>>, vector<5x32xf32>,
      %c0_142 = arith.constant 0 : index
      %c0_143 = arith.constant 0 : index
      %340 = vector.load %arg6[%c0_142, %c0_143] : memref<5x48xf32, #tpu.memory_space<vmem>>, vector<5x48xf32>
      %c0_144 = arith.constant 0 : index
      %c0_145 = arith.constant 0 : index
      %341 = vector.load %arg33[%c0_144, %c0_145] : memref<5x48xf32, #tpu.memory_space<vmem>>, vector<5x48xf32>
      tpu.vector_store %arg33[%c0_144, %c0_145], %340 {strides = array<i32>} : memref<5x48xf32, #tpu.memory_space<vmem>>, vector<5x48xf32>,
      %c0_146 = arith.constant 0 : index
      %c0_147 = arith.constant 0 : index
      %c0_148 = arith.constant 0 : index
      %342 = vector.load %arg7[%c0_146, %c0_147, %c0_148] : memref<2x8x16xf32, #tpu.memory_space<vmem>>, vector<2x8x16xf32>
      %c0_149 = arith.constant 0 : index
      %c0_150 = arith.constant 0 : index
      %c0_151 = arith.constant 0 : index
      %343 = vector.load %arg34[%c0_149, %c0_150, %c0_151] : memref<2x8x16xf32, #tpu.memory_space<vmem>>, vector<2x8x16xf32>
      tpu.vector_store %arg34[%c0_149, %c0_150, %c0_151], %342 {strides = array<i32>} : memref<2x8x16xf32, #tpu.memory_space<vmem>>, vector<2x8x16xf32>,
    } else {
    }
    %c0 = arith.constant 0 : index
    %c0_1 = arith.constant 0 : index
    %3 = vector.load %arg8[%c0, %c0_1] : memref<5x2xf32, #tpu.memory_space<vmem>>, vector<5x2xf32>
    %c0_2 = arith.constant 0 : index
    %c0_3 = arith.constant 0 : index
    %c0_4 = arith.constant 0 : index
    %4 = vector.load %arg1[%c0_2, %c0_3, %c0_4] : memref<1x5x2xf32, #tpu.memory_space<vmem>>, vector<1x5x2xf32>
    %5 = vector.shape_cast %4 : vector<1x5x2xf32> to vector<5x2xf32>
    %c0_5 = arith.constant 0 : index
    %c0_6 = arith.constant 0 : index
    %c0_7 = arith.constant 0 : index
    %6 = vector.load %arg2[%c0_5, %c0_6, %c0_7] : memref<1x5x2xf32, #tpu.memory_space<vmem>>, vector<1x5x2xf32>
    %7 = vector.shape_cast %6 : vector<1x5x2xf32> to vector<5x2xf32>
    %c0_8 = arith.constant 0 : index
    %c0_9 = arith.constant 0 : index
    %8 = vector.load %arg30[%c0_8, %c0_9] : memref<5x16xf32, #tpu.memory_space<vmem>>, vector<5x16xf32>
    %c0_10 = arith.constant 0 : index
    %c0_11 = arith.constant 0 : index
    %9 = vector.load %arg31[%c0_10, %c0_11] : memref<5x32xf32, #tpu.memory_space<vmem>>, vector<5x32xf32>
    %c0_12 = arith.constant 0 : index
    %c0_13 = arith.constant 0 : index
    %10 = vector.load %arg32[%c0_12, %c0_13] : memref<5x32xf32, #tpu.memory_space<vmem>>, vector<5x32xf32>
    %c0_14 = arith.constant 0 : index
    %c0_15 = arith.constant 0 : index
    %11 = vector.load %arg33[%c0_14, %c0_15] : memref<5x48xf32, #tpu.memory_space<vmem>>, vector<5x48xf32>
    %c0_16 = arith.constant 0 : index
    %c0_17 = arith.constant 0 : index
    %c0_18 = arith.constant 0 : index
    %12 = vector.load %arg34[%c0_16, %c0_17, %c0_18] : memref<2x8x16xf32, #tpu.memory_space<vmem>>, vector<2x8x16xf32>
    %c0_19 = arith.constant 0 : index
    %c0_20 = arith.constant 0 : index
    %13 = vector.load %arg9[%c0_19, %c0_20] : memref<2x16xf32, #tpu.memory_space<vmem>>, vector<2x16xf32>
    %cst = arith.constant dense<0.000000e+00> : vector<5x16xf32>
    %14 = tpu.matmul %5, %13, %cst {dimension_numbers = #tpu.dot_dimension_numbers<[1], [0], [0], [1], [0, 0, 1, 1], [], []>} : vector<5x2xf32>, vector<2x16xf32>, vector<5x16xf32> -> vector<5x16xf32>
    %c0_21 = arith.constant 0 : index
    %c0_22 = arith.constant 0 : index
    %15 = vector.load %arg10[%c0_21, %c0_22] : memref<2x16xf32, #tpu.memory_space<vmem>>, vector<2x16xf32>
    %cst_23 = arith.constant dense<0.000000e+00> : vector<5x16xf32>
    %16 = tpu.matmul %7, %15, %cst_23 {dimension_numbers = #tpu.dot_dimension_numbers<[1], [0], [0], [1], [0, 0, 1, 1], [], []>} : vector<5x2xf32>, vector<2x16xf32>, vector<5x16xf32> -> vector<5x16xf32>
    %17 = arith.addf %14, %16 : vector<5x16xf32>
    %c0_24 = arith.constant 0 : index
    %c0_25 = arith.constant 0 : index
    %18 = vector.load %arg11[%c0_24, %c0_25] : memref<1x16xf32, #tpu.memory_space<vmem>>, vector<1x16xf32>
    %19 = vector.broadcast %18 : vector<1x16xf32> to vector<5x16xf32>
    %20 = arith.addf %17, %19 : vector<5x16xf32>
    %cst_26 = arith.constant 0.000000e+00 : f32
    %21 = vector.broadcast %cst_26 : f32 to vector<5x16xf32>
    %22 = arith.maximumf %20, %21 : vector<5x16xf32>
    %c0_27 = arith.constant 0 : index
    %c0_28 = arith.constant 0 : index
    %23 = vector.load %arg12[%c0_27, %c0_28] : memref<16x32xf32, #tpu.memory_space<vmem>>, vector<16x32xf32>
    %cst_29 = arith.constant dense<0.000000e+00> : vector<5x32xf32>
    %24 = tpu.matmul %22, %23, %cst_29 {dimension_numbers = #tpu.dot_dimension_numbers<[1], [0], [0], [1], [0, 0, 1, 1], [], []>} : vector<5x16xf32>, vector<16x32xf32>, vector<5x32xf32> -> vector<5x32xf32>
    %c0_30 = arith.constant 0 : index
    %c0_31 = arith.constant 0 : index
    %25 = vector.load %arg13[%c0_30, %c0_31] : memref<1x32xf32, #tpu.memory_space<vmem>>, vector<1x32xf32>
    %26 = vector.broadcast %25 : vector<1x32xf32> to vector<5x32xf32>
    %27 = arith.addf %24, %26 : vector<5x32xf32>
    %c0_32 = arith.constant 0 : index
    %c0_33 = arith.constant 0 : index
    %28 = vector.load %arg14[%c0_32, %c0_33] : memref<32x192xf32, #tpu.memory_space<vmem>>, vector<32x192xf32>
    %cst_34 = arith.constant dense<0.000000e+00> : vector<5x192xf32>
    %29 = tpu.matmul %27, %28, %cst_34 {dimension_numbers = #tpu.dot_dimension_numbers<[1], [0], [0], [1], [0, 0, 1, 1], [], []>} : vector<5x32xf32>, vector<32x192xf32>, vector<5x192xf32> -> vector<5x192xf32>
    %c0_35 = arith.constant 0 : index
    %c0_36 = arith.constant 0 : index
    %30 = vector.load %arg15[%c0_35, %c0_36] : memref<16x192xf32, #tpu.memory_space<vmem>>, vector<16x192xf32>
    %cst_37 = arith.constant dense<0.000000e+00> : vector<5x192xf32>
    %31 = tpu.matmul %8, %30, %cst_37 {dimension_numbers = #tpu.dot_dimension_numbers<[1], [0], [0], [1], [0, 0, 1, 1], [], []>} : vector<5x16xf32>, vector<16x192xf32>, vector<5x192xf32> -> vector<5x192xf32>
    %32 = arith.addf %29, %31 : vector<5x192xf32>
    %c0_38 = arith.constant 0 : index
    %c0_39 = arith.constant 0 : index
    %33 = vector.load %arg16[%c0_38, %c0_39] : memref<1x192xf32, #tpu.memory_space<vmem>>, vector<1x192xf32>
    %34 = vector.broadcast %33 : vector<1x192xf32> to vector<5x192xf32>
    %35 = arith.addf %32, %34 : vector<5x192xf32>
    %c0_40 = arith.constant 0 : index
    %c0_41 = arith.constant 0 : index
    %36 = vector.load %arg17[%c0_40, %c0_41] : memref<32x96xf32, #tpu.memory_space<vmem>>, vector<32x96xf32>
    %cst_42 = arith.constant dense<0.000000e+00> : vector<5x96xf32>
    %37 = tpu.matmul %9, %36, %cst_42 {dimension_numbers = #tpu.dot_dimension_numbers<[1], [0], [0], [1], [0, 0, 1, 1], [], []>} : vector<5x32xf32>, vector<32x96xf32>, vector<5x96xf32> -> vector<5x96xf32>
    %c0_43 = arith.constant 0 : index
    %c0_44 = arith.constant 0 : index
    %38 = vector.load %arg18[%c0_43, %c0_44] : memref<1x96xf32, #tpu.memory_space<vmem>>, vector<1x96xf32>
    %39 = vector.broadcast %38 : vector<1x96xf32> to vector<5x96xf32>
    %40 = arith.addf %37, %39 : vector<5x96xf32>
    %c0_45 = arith.constant 0 : index
    %c0_46 = arith.constant 0 : index
    %41 = vector.load %arg19[%c0_45, %c0_46] : memref<32x96xf32, #tpu.memory_space<vmem>>, vector<32x96xf32>
    %cst_47 = arith.constant dense<0.000000e+00> : vector<5x96xf32>
    %42 = tpu.matmul %10, %41, %cst_47 {dimension_numbers = #tpu.dot_dimension_numbers<[1], [0], [0], [1], [0, 0, 1, 1], [], []>} : vector<5x32xf32>, vector<32x96xf32>, vector<5x96xf32> -> vector<5x96xf32>
    %c0_48 = arith.constant 0 : index
    %c0_49 = arith.constant 0 : index
    %43 = vector.load %arg20[%c0_48, %c0_49] : memref<1x96xf32, #tpu.memory_space<vmem>>, vector<1x96xf32>
    %44 = vector.broadcast %43 : vector<1x96xf32> to vector<5x96xf32>
    %45 = arith.addf %42, %44 : vector<5x96xf32>
    %46 = vector.extract_strided_slice %35 {offsets = [0, 0], sizes = [5, 96], strides = [1, 1]} : vector<5x192xf32> to vector<5x96xf32>
    %47 = vector.extract_strided_slice %46 {offsets = [0, 0], sizes = [5, 32], strides = [1, 1]} : vector<5x96xf32> to vector<5x32xf32>
    %48 = vector.extract_strided_slice %40 {offsets = [0, 0], sizes = [5, 32], strides = [1, 1]} : vector<5x96xf32> to vector<5x32xf32>
    %49 = arith.addf %47, %48 : vector<5x32xf32>
    %50 = arith.negf %49 : vector<5x32xf32>
    %51 = math.exp %50 : vector<5x32xf32>
    %cst_50 = arith.constant 1.000000e+00 : f32
    %52 = vector.broadcast %cst_50 : f32 to vector<5x32xf32>
    %53 = arith.addf %52, %51 : vector<5x32xf32>
    %54 = arith.divf %52, %53 : vector<5x32xf32>
    %55 = vector.extract_strided_slice %46 {offsets = [0, 32], sizes = [5, 32], strides = [1, 1]} : vector<5x96xf32> to vector<5x32xf32>
    %56 = vector.extract_strided_slice %40 {offsets = [0, 32], sizes = [5, 32], strides = [1, 1]} : vector<5x96xf32> to vector<5x32xf32>
    %57 = arith.addf %55, %56 : vector<5x32xf32>
    %58 = arith.negf %57 : vector<5x32xf32>
    %59 = math.exp %58 : vector<5x32xf32>
    %cst_51 = arith.constant 1.000000e+00 : f32
    %60 = vector.broadcast %cst_51 : f32 to vector<5x32xf32>
    %61 = arith.addf %60, %59 : vector<5x32xf32>
    %62 = arith.divf %60, %61 : vector<5x32xf32>
    %63 = vector.extract_strided_slice %46 {offsets = [0, 64], sizes = [5, 32], strides = [1, 1]} : vector<5x96xf32> to vector<5x32xf32>
    %64 = vector.extract_strided_slice %40 {offsets = [0, 64], sizes = [5, 32], strides = [1, 1]} : vector<5x96xf32> to vector<5x32xf32>
    %65 = arith.mulf %54, %64 : vector<5x32xf32>
    %66 = arith.addf %63, %65 : vector<5x32xf32>
    %67 = math.tanh %66 : vector<5x32xf32>
    %cst_52 = arith.constant 1.000000e+00 : f32
    %68 = vector.broadcast %cst_52 : f32 to vector<5x32xf32>
    %69 = arith.subf %68, %62 : vector<5x32xf32>
    %70 = arith.mulf %69, %67 : vector<5x32xf32>
    %71 = arith.mulf %62, %9 : vector<5x32xf32>
    %72 = arith.addf %70, %71 : vector<5x32xf32>
    %73 = vector.extract_strided_slice %35 {offsets = [0, 96], sizes = [5, 96], strides = [1, 1]} : vector<5x192xf32> to vector<5x96xf32>
    %74 = vector.extract_strided_slice %73 {offsets = [0, 0], sizes = [5, 32], strides = [1, 1]} : vector<5x96xf32> to vector<5x32xf32>
    %75 = vector.extract_strided_slice %45 {offsets = [0, 0], sizes = [5, 32], strides = [1, 1]} : vector<5x96xf32> to vector<5x32xf32>
    %76 = arith.addf %74, %75 : vector<5x32xf32>
    %77 = arith.negf %76 : vector<5x32xf32>
    %78 = math.exp %77 : vector<5x32xf32>
    %cst_53 = arith.constant 1.000000e+00 : f32
    %79 = vector.broadcast %cst_53 : f32 to vector<5x32xf32>
    %80 = arith.addf %79, %78 : vector<5x32xf32>
    %81 = arith.divf %79, %80 : vector<5x32xf32>
    %82 = vector.extract_strided_slice %73 {offsets = [0, 32], sizes = [5, 32], strides = [1, 1]} : vector<5x96xf32> to vector<5x32xf32>
    %83 = vector.extract_strided_slice %45 {offsets = [0, 32], sizes = [5, 32], strides = [1, 1]} : vector<5x96xf32> to vector<5x32xf32>
    %84 = arith.addf %82, %83 : vector<5x32xf32>
    %85 = arith.negf %84 : vector<5x32xf32>
    %86 = math.exp %85 : vector<5x32xf32>
    %cst_54 = arith.constant 1.000000e+00 : f32
    %87 = vector.broadcast %cst_54 : f32 to vector<5x32xf32>
    %88 = arith.addf %87, %86 : vector<5x32xf32>
    %89 = arith.divf %87, %88 : vector<5x32xf32>
    %90 = vector.extract_strided_slice %73 {offsets = [0, 64], sizes = [5, 32], strides = [1, 1]} : vector<5x96xf32> to vector<5x32xf32>
    %91 = vector.extract_strided_slice %45 {offsets = [0, 64], sizes = [5, 32], strides = [1, 1]} : vector<5x96xf32> to vector<5x32xf32>
    %92 = arith.mulf %81, %91 : vector<5x32xf32>
    %93 = arith.addf %90, %92 : vector<5x32xf32>
    %94 = math.tanh %93 : vector<5x32xf32>
    %cst_55 = arith.constant 1.000000e+00 : f32
    %95 = vector.broadcast %cst_55 : f32 to vector<5x32xf32>
    %96 = arith.subf %95, %89 : vector<5x32xf32>
    %97 = arith.mulf %96, %94 : vector<5x32xf32>
    %98 = arith.mulf %89, %10 : vector<5x32xf32>
    %99 = arith.addf %97, %98 : vector<5x32xf32>
    %cst_56 = arith.constant 0.000000e+00 : f32
    %100 = vector.broadcast %cst_56 : f32 to vector<5x8x16xf32>
    %101 = vector.extract_strided_slice %3 {offsets = [0, 0], sizes = [5, 1], strides = [1, 1]} : vector<5x2xf32> to vector<5x1xf32>
    %102 = vector.shape_cast %101 : vector<5x1xf32> to vector<5x1x1xf32>
    %103 = vector.extract_strided_slice %12 {offsets = [0, 0, 0], sizes = [1, 8, 16], strides = [1, 1, 1]} : vector<2x8x16xf32> to vector<1x8x16xf32>
    %104 = vector.shape_cast %103 : vector<1x8x16xf32> to vector<8x16xf32>
    %105 = vector.shape_cast %104 : vector<8x16xf32> to vector<1x8x16xf32>
    %106 = vector.broadcast %102 : vector<5x1x1xf32> to vector<5x8x16xf32>
    %107 = vector.broadcast %105 : vector<1x8x16xf32> to vector<5x8x16xf32>
    %108 = arith.mulf %106, %107 : vector<5x8x16xf32>
    %109 = arith.addf %100, %108 : vector<5x8x16xf32>
    %110 = vector.extract_strided_slice %3 {offsets = [0, 1], sizes = [5, 1], strides = [1, 1]} : vector<5x2xf32> to vector<5x1xf32>
    %111 = vector.shape_cast %110 : vector<5x1xf32> to vector<5x1x1xf32>
    %112 = vector.extract_strided_slice %12 {offsets = [1, 0, 0], sizes = [1, 8, 16], strides = [1, 1, 1]} : vector<2x8x16xf32> to vector<1x8x16xf32>
    %113 = vector.shape_cast %112 : vector<1x8x16xf32> to vector<8x16xf32>
    %114 = vector.shape_cast %113 : vector<8x16xf32> to vector<1x8x16xf32>
    %115 = vector.broadcast %111 : vector<5x1x1xf32> to vector<5x8x16xf32>
    %116 = vector.broadcast %114 : vector<1x8x16xf32> to vector<5x8x16xf32>
    %117 = arith.mulf %115, %116 : vector<5x8x16xf32>
    %118 = arith.addf %109, %117 : vector<5x8x16xf32>
    %cst_57 = arith.constant 1.000000e-16 : f32
    %119 = vector.broadcast %cst_57 : f32 to vector<5x8x16xf32>
    %120 = arith.addf %118, %119 : vector<5x8x16xf32>
    %121 = arith.mulf %120, %120 : vector<5x8x16xf32>
    %cst_58 = arith.constant dense<0.000000e+00> : vector<5x8xf32>
    %122 = vector.multi_reduction <add>, %121, %cst_58 [2] : vector<5x8x16xf32> to vector<5x8xf32>
    %123 = math.sqrt %122 : vector<5x8xf32>
    %c0_59 = arith.constant 0 : index
    %c0_60 = arith.constant 0 : index
    %c0_61 = arith.constant 0 : index
    %124 = vector.load %arg28[%c0_59, %c0_60, %c0_61] : memref<1x32x66xf32, #tpu.memory_space<vmem>>, vector<1x32x66xf32>
    %125 = vector.shape_cast %124 : vector<1x32x66xf32> to vector<32x66xf32>
    %cst_62 = arith.constant dense<0.000000e+00> : vector<5x66xf32>
    %126 = tpu.matmul %72, %125, %cst_62 {dimension_numbers = #tpu.dot_dimension_numbers<[1], [0], [0], [1], [0, 0, 1, 1], [], []>} : vector<5x32xf32>, vector<32x66xf32>, vector<5x66xf32> -> vector<5x66xf32>
    %c0_63 = arith.constant 0 : index
    %c0_64 = arith.constant 0 : index
    %127 = vector.load %arg29[%c0_63, %c0_64] : memref<1x66xf32, #tpu.memory_space<vmem>>, vector<1x66xf32>
    %128 = vector.broadcast %127 : vector<1x66xf32> to vector<5x66xf32>
    %129 = arith.addf %126, %128 : vector<5x66xf32>
    %130 = vector.extract_strided_slice %129 {offsets = [0, 0], sizes = [5, 16], strides = [1, 1]} : vector<5x66xf32> to vector<5x16xf32>
    %131 = vector.extract_strided_slice %129 {offsets = [0, 16], sizes = [5, 1], strides = [1, 1]} : vector<5x66xf32> to vector<5x1xf32>
    %cst_65 = arith.constant 0.000000e+00 : f32
    %132 = vector.broadcast %cst_65 : f32 to vector<5x1xf32>
    %133 = arith.maximumf %131, %132 : vector<5x1xf32>
    %134 = vector.broadcast %cst_65 : f32 to vector<5x1xf32>
    %135 = arith.subf %131, %134 : vector<5x1xf32>
    %136 = arith.cmpf one, %135, %135 : vector<5x1xf32>
    %137 = vector.broadcast %cst_65 : f32 to vector<5x1xf32>
    %138 = arith.addf %131, %137 : vector<5x1xf32>
    %139 = math.absf %135 : vector<5x1xf32>
    %cst_66 = arith.constant 0.000000e+00 : f32
    %140 = vector.broadcast %cst_66 : f32 to vector<5x1xf32>
    %141 = arith.subf %140, %139 : vector<5x1xf32>
    %142 = math.exp %141 : vector<5x1xf32>
    %143 = math.log1p %142 : vector<5x1xf32>
    %144 = arith.addf %133, %143 : vector<5x1xf32>
    %145 = arith.select %136, %138, %144 : vector<5x1xi1>, vector<5x1xf32>
    %146 = vector.extract_strided_slice %129 {offsets = [0, 17], sizes = [5, 16], strides = [1, 1]} : vector<5x66xf32> to vector<5x16xf32>
    %147 = vector.extract_strided_slice %129 {offsets = [0, 33], sizes = [5, 1], strides = [1, 1]} : vector<5x66xf32> to vector<5x1xf32>
    %cst_67 = arith.constant 0.000000e+00 : f32
    %148 = vector.broadcast %cst_67 : f32 to vector<5x1xf32>
    %149 = arith.maximumf %147, %148 : vector<5x1xf32>
    %150 = vector.broadcast %cst_67 : f32 to vector<5x1xf32>
    %151 = arith.subf %147, %150 : vector<5x1xf32>
    %152 = arith.cmpf one, %151, %151 : vector<5x1xf32>
    %153 = vector.broadcast %cst_67 : f32 to vector<5x1xf32>
    %154 = arith.addf %147, %153 : vector<5x1xf32>
    %155 = math.absf %151 : vector<5x1xf32>
    %cst_68 = arith.constant 0.000000e+00 : f32
    %156 = vector.broadcast %cst_68 : f32 to vector<5x1xf32>
    %157 = arith.subf %156, %155 : vector<5x1xf32>
    %158 = math.exp %157 : vector<5x1xf32>
    %159 = math.log1p %158 : vector<5x1xf32>
    %160 = arith.addf %149, %159 : vector<5x1xf32>
    %161 = arith.select %152, %154, %160 : vector<5x1xi1>, vector<5x1xf32>
    %162 = vector.extract_strided_slice %129 {offsets = [0, 34], sizes = [5, 16], strides = [1, 1]} : vector<5x66xf32> to vector<5x16xf32>
    %163 = arith.negf %162 : vector<5x16xf32>
    %164 = math.exp %163 : vector<5x16xf32>
    %cst_69 = arith.constant 1.000000e+00 : f32
    %165 = vector.broadcast %cst_69 : f32 to vector<5x16xf32>
    %166 = arith.addf %165, %164 : vector<5x16xf32>
    %167 = arith.divf %165, %166 : vector<5x16xf32>
    %168 = vector.extract_strided_slice %129 {offsets = [0, 50], sizes = [5, 16], strides = [1, 1]} : vector<5x66xf32> to vector<5x16xf32>
    %169 = vector.shape_cast %130 : vector<5x16xf32> to vector<5x1x16xf32>
    %cst_70 = arith.constant 1.000000e-16 : f32
    %170 = vector.broadcast %cst_70 : f32 to vector<5x1x16xf32>
    %171 = arith.addf %169, %170 : vector<5x1x16xf32>
    %172 = vector.broadcast %171 : vector<5x1x16xf32> to vector<5x8x16xf32>
    %173 = arith.mulf %120, %172 : vector<5x8x16xf32>
    %cst_71 = arith.constant dense<0.000000e+00> : vector<5x8xf32>
    %174 = vector.multi_reduction <add>, %173, %cst_71 [2] : vector<5x8x16xf32> to vector<5x8xf32>
    %175 = arith.mulf %171, %171 : vector<5x1x16xf32>
    %cst_72 = arith.constant dense<0.000000e+00> : vector<5x1xf32>
    %176 = vector.multi_reduction <add>, %175, %cst_72 [2] : vector<5x1x16xf32> to vector<5x1xf32>
    %177 = math.sqrt %176 : vector<5x1xf32>
    %178 = vector.broadcast %177 : vector<5x1xf32> to vector<5x8xf32>
    %179 = arith.mulf %123, %178 : vector<5x8xf32>
    %cst_73 = arith.constant 9.99999993E-9 : f32
    %180 = vector.broadcast %cst_73 : f32 to vector<5x8xf32>
    %181 = arith.maximumf %179, %180 : vector<5x8xf32>
    %182 = arith.divf %174, %181 : vector<5x8xf32>
    %183 = vector.broadcast %145 : vector<5x1xf32> to vector<5x8xf32>
    %184 = arith.mulf %183, %182 : vector<5x8xf32>
    %cst_74 = arith.constant dense<0xFF800000> : vector<5xf32>
    %185 = vector.multi_reduction <maximumf>, %184, %cst_74 [1] : vector<5x8xf32> to vector<5xf32>
    %cst_75 = arith.constant 0xFF800000 : f32
    %186 = vector.broadcast %cst_75 : f32 to vector<5xf32>
    %187 = arith.maximumf %186, %185 : vector<5xf32>
    %188 = vector.shape_cast %187 : vector<5xf32> to vector<5x1xf32>
    %189 = vector.broadcast %188 : vector<5x1xf32> to vector<5x8xf32>
    %190 = arith.subf %184, %189 : vector<5x8xf32>
    %191 = math.exp %190 : vector<5x8xf32>
    %cst_76 = arith.constant dense<0.000000e+00> : vector<5xf32>
    %192 = vector.multi_reduction <add>, %191, %cst_76 [1] : vector<5x8xf32> to vector<5xf32>
    %193 = vector.shape_cast %192 : vector<5xf32> to vector<5x1xf32>
    %194 = vector.broadcast %193 : vector<5x1xf32> to vector<5x8xf32>
    %195 = arith.divf %191, %194 : vector<5x8xf32>
    %196 = vector.shape_cast %195 : vector<5x8xf32> to vector<5x8x1xf32>
    %197 = vector.broadcast %196 : vector<5x8x1xf32> to vector<5x8x16xf32>
    %198 = arith.mulf %197, %118 : vector<5x8x16xf32>
    %cst_77 = arith.constant dense<0.000000e+00> : vector<5x16xf32>
    %199 = vector.multi_reduction <add>, %198, %cst_77 [1] : vector<5x8x16xf32> to vector<5x16xf32>
    %c0_78 = arith.constant 0 : index
    %c0_79 = arith.constant 0 : index
    %200 = vector.load %arg21[%c0_78, %c0_79] : memref<32x144xf32, #tpu.memory_space<vmem>>, vector<32x144xf32>
    %cst_80 = arith.constant dense<0.000000e+00> : vector<5x144xf32>
    %201 = tpu.matmul %99, %200, %cst_80 {dimension_numbers = #tpu.dot_dimension_numbers<[1], [0], [0], [1], [0, 0, 1, 1], [], []>} : vector<5x32xf32>, vector<32x144xf32>, vector<5x144xf32> -> vector<5x144xf32>
    %c0_81 = arith.constant 0 : index
    %c0_82 = arith.constant 0 : index
    %202 = vector.load %arg22[%c0_81, %c0_82] : memref<16x144xf32, #tpu.memory_space<vmem>>, vector<16x144xf32>
    %cst_83 = arith.constant dense<0.000000e+00> : vector<5x144xf32>
    %203 = tpu.matmul %199, %202, %cst_83 {dimension_numbers = #tpu.dot_dimension_numbers<[1], [0], [0], [1], [0, 0, 1, 1], [], []>} : vector<5x16xf32>, vector<16x144xf32>, vector<5x144xf32> -> vector<5x144xf32>
    %204 = arith.addf %201, %203 : vector<5x144xf32>
    %c0_84 = arith.constant 0 : index
    %c0_85 = arith.constant 0 : index
    %205 = vector.load %arg23[%c0_84, %c0_85] : memref<1x144xf32, #tpu.memory_space<vmem>>, vector<1x144xf32>
    %206 = vector.broadcast %205 : vector<1x144xf32> to vector<5x144xf32>
    %207 = arith.addf %204, %206 : vector<5x144xf32>
    %c0_86 = arith.constant 0 : index
    %c0_87 = arith.constant 0 : index
    %208 = vector.load %arg24[%c0_86, %c0_87] : memref<48x144xf32, #tpu.memory_space<vmem>>, vector<48x144xf32>
    %cst_88 = arith.constant dense<0.000000e+00> : vector<5x144xf32>
    %209 = tpu.matmul %11, %208, %cst_88 {dimension_numbers = #tpu.dot_dimension_numbers<[1], [0], [0], [1], [0, 0, 1, 1], [], []>} : vector<5x48xf32>, vector<48x144xf32>, vector<5x144xf32> -> vector<5x144xf32>
    %c0_89 = arith.constant 0 : index
    %c0_90 = arith.constant 0 : index
    %210 = vector.load %arg25[%c0_89, %c0_90] : memref<1x144xf32, #tpu.memory_space<vmem>>, vector<1x144xf32>
    %211 = vector.broadcast %210 : vector<1x144xf32> to vector<5x144xf32>
    %212 = arith.addf %209, %211 : vector<5x144xf32>
    %213 = vector.extract_strided_slice %207 {offsets = [0, 0], sizes = [5, 48], strides = [1, 1]} : vector<5x144xf32> to vector<5x48xf32>
    %214 = vector.extract_strided_slice %212 {offsets = [0, 0], sizes = [5, 48], strides = [1, 1]} : vector<5x144xf32> to vector<5x48xf32>
    %215 = arith.addf %213, %214 : vector<5x48xf32>
    %216 = arith.negf %215 : vector<5x48xf32>
    %217 = math.exp %216 : vector<5x48xf32>
    %cst_91 = arith.constant 1.000000e+00 : f32
    %218 = vector.broadcast %cst_91 : f32 to vector<5x48xf32>
    %219 = arith.addf %218, %217 : vector<5x48xf32>
    %220 = arith.divf %218, %219 : vector<5x48xf32>
    %221 = vector.extract_strided_slice %207 {offsets = [0, 48], sizes = [5, 48], strides = [1, 1]} : vector<5x144xf32> to vector<5x48xf32>
    %222 = vector.extract_strided_slice %212 {offsets = [0, 48], sizes = [5, 48], strides = [1, 1]} : vector<5x144xf32> to vector<5x48xf32>
    %223 = arith.addf %221, %222 : vector<5x48xf32>
    %224 = arith.negf %223 : vector<5x48xf32>
    %225 = math.exp %224 : vector<5x48xf32>
    %cst_92 = arith.constant 1.000000e+00 : f32
    %226 = vector.broadcast %cst_92 : f32 to vector<5x48xf32>
    %227 = arith.addf %226, %225 : vector<5x48xf32>
    %228 = arith.divf %226, %227 : vector<5x48xf32>
    %229 = vector.extract_strided_slice %207 {offsets = [0, 96], sizes = [5, 48], strides = [1, 1]} : vector<5x144xf32> to vector<5x48xf32>
    %230 = vector.extract_strided_slice %212 {offsets = [0, 96], sizes = [5, 48], strides = [1, 1]} : vector<5x144xf32> to vector<5x48xf32>
    %231 = arith.mulf %220, %230 : vector<5x48xf32>
    %232 = arith.addf %229, %231 : vector<5x48xf32>
    %233 = math.tanh %232 : vector<5x48xf32>
    %cst_93 = arith.constant 1.000000e+00 : f32
    %234 = vector.broadcast %cst_93 : f32 to vector<5x48xf32>
    %235 = arith.subf %234, %228 : vector<5x48xf32>
    %236 = arith.mulf %235, %233 : vector<5x48xf32>
    %237 = arith.mulf %228, %11 : vector<5x48xf32>
    %238 = arith.addf %236, %237 : vector<5x48xf32>
    %239 = vector.shape_cast %146 : vector<5x16xf32> to vector<5x1x16xf32>
    %cst_94 = arith.constant 1.000000e-16 : f32
    %240 = vector.broadcast %cst_94 : f32 to vector<5x1x16xf32>
    %241 = arith.addf %239, %240 : vector<5x1x16xf32>
    %242 = vector.broadcast %241 : vector<5x1x16xf32> to vector<5x8x16xf32>
    %243 = arith.mulf %120, %242 : vector<5x8x16xf32>
    %cst_95 = arith.constant dense<0.000000e+00> : vector<5x8xf32>
    %244 = vector.multi_reduction <add>, %243, %cst_95 [2] : vector<5x8x16xf32> to vector<5x8xf32>
    %245 = arith.mulf %241, %241 : vector<5x1x16xf32>
    %cst_96 = arith.constant dense<0.000000e+00> : vector<5x1xf32>
    %246 = vector.multi_reduction <add>, %245, %cst_96 [2] : vector<5x1x16xf32> to vector<5x1xf32>
    %247 = math.sqrt %246 : vector<5x1xf32>
    %248 = vector.broadcast %247 : vector<5x1xf32> to vector<5x8xf32>
    %249 = arith.mulf %123, %248 : vector<5x8xf32>
    %cst_97 = arith.constant 9.99999993E-9 : f32
    %250 = vector.broadcast %cst_97 : f32 to vector<5x8xf32>
    %251 = arith.maximumf %249, %250 : vector<5x8xf32>
    %252 = arith.divf %244, %251 : vector<5x8xf32>
    %253 = vector.broadcast %161 : vector<5x1xf32> to vector<5x8xf32>
    %254 = arith.mulf %253, %252 : vector<5x8xf32>
    %cst_98 = arith.constant dense<0xFF800000> : vector<5xf32>
    %255 = vector.multi_reduction <maximumf>, %254, %cst_98 [1] : vector<5x8xf32> to vector<5xf32>
    %cst_99 = arith.constant 0xFF800000 : f32
    %256 = vector.broadcast %cst_99 : f32 to vector<5xf32>
    %257 = arith.maximumf %256, %255 : vector<5xf32>
    %258 = vector.shape_cast %257 : vector<5xf32> to vector<5x1xf32>
    %259 = vector.broadcast %258 : vector<5x1xf32> to vector<5x8xf32>
    %260 = arith.subf %254, %259 : vector<5x8xf32>
    %261 = math.exp %260 : vector<5x8xf32>
    %cst_100 = arith.constant dense<0.000000e+00> : vector<5xf32>
    %262 = vector.multi_reduction <add>, %261, %cst_100 [1] : vector<5x8xf32> to vector<5xf32>
    %263 = vector.shape_cast %262 : vector<5xf32> to vector<5x1xf32>
    %264 = vector.broadcast %263 : vector<5x1xf32> to vector<5x8xf32>
    %265 = arith.divf %261, %264 : vector<5x8xf32>
    %266 = vector.shape_cast %265 : vector<5x8xf32> to vector<5x8x1xf32>
    %267 = vector.shape_cast %167 : vector<5x16xf32> to vector<5x1x16xf32>
    %268 = vector.broadcast %266 : vector<5x8x1xf32> to vector<5x8x16xf32>
    %269 = vector.broadcast %267 : vector<5x1x16xf32> to vector<5x8x16xf32>
    %270 = arith.mulf %268, %269 : vector<5x8x16xf32>
    %271 = vector.shape_cast %265 : vector<5x8xf32> to vector<5x8x1xf32>
    %272 = vector.shape_cast %168 : vector<5x16xf32> to vector<5x1x16xf32>
    %273 = vector.broadcast %271 : vector<5x8x1xf32> to vector<5x8x16xf32>
    %274 = vector.broadcast %272 : vector<5x1x16xf32> to vector<5x8x16xf32>
    %275 = arith.mulf %273, %274 : vector<5x8x16xf32>
    %276 = vector.extract_strided_slice %3 {offsets = [0, 0], sizes = [5, 1], strides = [1, 1]} : vector<5x2xf32> to vector<5x1xf32>
    %277 = vector.shape_cast %276 : vector<5x1xf32> to vector<5x1x1xf32>
    %cst_101 = arith.constant 5.000000e-01 : f32
    %278 = vector.broadcast %cst_101 : f32 to vector<5x1x1xf32>
    %279 = arith.cmpf ogt, %277, %278 : vector<5x1x1xf32>
    %cst_102 = arith.constant -1.000000e+30 : f32
    %280 = vector.shape_cast %279 : vector<5x1x1xi1> to vector<5x1x1xi1>
    %281 = vector.broadcast %280 : vector<5x1x1xi1> to vector<5x8x16xi1>
    %282 = vector.broadcast %cst_102 : f32 to vector<5x8x16xf32>
    %283 = arith.select %281, %270, %282 : vector<5x8x16xi1>, vector<5x8x16xf32>
    %cst_103 = arith.constant dense<0xFF800000> : vector<8x16xf32>
    %284 = vector.multi_reduction <maximumf>, %283, %cst_103 [0] : vector<5x8x16xf32> to vector<8x16xf32>
    %cst_104 = arith.constant 0.000000e+00 : f32
    %285 = vector.broadcast %cst_104 : f32 to vector<8x16xf32>
    %286 = arith.maximumf %284, %285 : vector<8x16xf32>
    %cst_105 = arith.constant -1.000000e+30 : f32
    %287 = vector.shape_cast %279 : vector<5x1x1xi1> to vector<5x1x1xi1>
    %288 = vector.broadcast %287 : vector<5x1x1xi1> to vector<5x8x16xi1>
    %289 = vector.broadcast %cst_105 : f32 to vector<5x8x16xf32>
    %290 = arith.select %288, %275, %289 : vector<5x8x16xi1>, vector<5x8x16xf32>
    %cst_106 = arith.constant dense<0xFF800000> : vector<8x16xf32>
    %291 = vector.multi_reduction <maximumf>, %290, %cst_106 [0] : vector<5x8x16xf32> to vector<8x16xf32>
    %cst_107 = arith.constant 0.000000e+00 : f32
    %292 = vector.broadcast %cst_107 : f32 to vector<8x16xf32>
    %293 = arith.maximumf %291, %292 : vector<8x16xf32>
    %cst_108 = arith.constant 1.000000e+00 : f32
    %294 = vector.broadcast %cst_108 : f32 to vector<8x16xf32>
    %295 = arith.subf %294, %286 : vector<8x16xf32>
    %296 = vector.extract_strided_slice %12 {offsets = [0, 0, 0], sizes = [1, 8, 16], strides = [1, 1, 1]} : vector<2x8x16xf32> to vector<1x8x16xf32>
    %297 = vector.shape_cast %296 : vector<1x8x16xf32> to vector<8x16xf32>
    %298 = arith.mulf %295, %297 : vector<8x16xf32>
    %299 = arith.addf %298, %293 : vector<8x16xf32>
    %300 = vector.extract_strided_slice %3 {offsets = [0, 1], sizes = [5, 1], strides = [1, 1]} : vector<5x2xf32> to vector<5x1xf32>
    %301 = vector.shape_cast %300 : vector<5x1xf32> to vector<5x1x1xf32>
    %cst_109 = arith.constant 5.000000e-01 : f32
    %302 = vector.broadcast %cst_109 : f32 to vector<5x1x1xf32>
    %303 = arith.cmpf ogt, %301, %302 : vector<5x1x1xf32>
    %cst_110 = arith.constant -1.000000e+30 : f32
    %304 = vector.shape_cast %303 : vector<5x1x1xi1> to vector<5x1x1xi1>
    %305 = vector.broadcast %304 : vector<5x1x1xi1> to vector<5x8x16xi1>
    %306 = vector.broadcast %cst_110 : f32 to vector<5x8x16xf32>
    %307 = arith.select %305, %270, %306 : vector<5x8x16xi1>, vector<5x8x16xf32>
    %cst_111 = arith.constant dense<0xFF800000> : vector<8x16xf32>
    %308 = vector.multi_reduction <maximumf>, %307, %cst_111 [0] : vector<5x8x16xf32> to vector<8x16xf32>
    %cst_112 = arith.constant 0.000000e+00 : f32
    %309 = vector.broadcast %cst_112 : f32 to vector<8x16xf32>
    %310 = arith.maximumf %308, %309 : vector<8x16xf32>
    %cst_113 = arith.constant -1.000000e+30 : f32
    %311 = vector.shape_cast %303 : vector<5x1x1xi1> to vector<5x1x1xi1>
    %312 = vector.broadcast %311 : vector<5x1x1xi1> to vector<5x8x16xi1>
    %313 = vector.broadcast %cst_113 : f32 to vector<5x8x16xf32>
    %314 = arith.select %312, %275, %313 : vector<5x8x16xi1>, vector<5x8x16xf32>
    %cst_114 = arith.constant dense<0xFF800000> : vector<8x16xf32>
    %315 = vector.multi_reduction <maximumf>, %314, %cst_114 [0] : vector<5x8x16xf32> to vector<8x16xf32>
    %cst_115 = arith.constant 0.000000e+00 : f32
    %316 = vector.broadcast %cst_115 : f32 to vector<8x16xf32>
    %317 = arith.maximumf %315, %316 : vector<8x16xf32>
    %cst_116 = arith.constant 1.000000e+00 : f32
    %318 = vector.broadcast %cst_116 : f32 to vector<8x16xf32>
    %319 = arith.subf %318, %310 : vector<8x16xf32>
    %320 = vector.extract_strided_slice %12 {offsets = [1, 0, 0], sizes = [1, 8, 16], strides = [1, 1, 1]} : vector<2x8x16xf32> to vector<1x8x16xf32>
    %321 = vector.shape_cast %320 : vector<1x8x16xf32> to vector<8x16xf32>
    %322 = arith.mulf %319, %321 : vector<8x16xf32>
    %323 = arith.addf %322, %317 : vector<8x16xf32>
    %c0_117 = arith.constant 0 : index
    %c0_118 = arith.constant 0 : index
    %324 = vector.load %arg30[%c0_117, %c0_118] : memref<5x16xf32, #tpu.memory_space<vmem>>, vector<5x16xf32>
    tpu.vector_store %arg30[%c0_117, %c0_118], %199 {strides = array<i32>} : memref<5x16xf32, #tpu.memory_space<vmem>>, vector<5x16xf32>,
    %c0_119 = arith.constant 0 : index
    %c0_120 = arith.constant 0 : index
    %325 = vector.load %arg31[%c0_119, %c0_120] : memref<5x32xf32, #tpu.memory_space<vmem>>, vector<5x32xf32>
    tpu.vector_store %arg31[%c0_119, %c0_120], %72 {strides = array<i32>} : memref<5x32xf32, #tpu.memory_space<vmem>>, vector<5x32xf32>,
    %c0_121 = arith.constant 0 : index
    %c0_122 = arith.constant 0 : index
    %326 = vector.load %arg32[%c0_121, %c0_122] : memref<5x32xf32, #tpu.memory_space<vmem>>, vector<5x32xf32>
    tpu.vector_store %arg32[%c0_121, %c0_122], %99 {strides = array<i32>} : memref<5x32xf32, #tpu.memory_space<vmem>>, vector<5x32xf32>,
    %c0_123 = arith.constant 0 : index
    %c0_124 = arith.constant 0 : index
    %327 = vector.load %arg33[%c0_123, %c0_124] : memref<5x48xf32, #tpu.memory_space<vmem>>, vector<5x48xf32>
    tpu.vector_store %arg33[%c0_123, %c0_124], %238 {strides = array<i32>} : memref<5x48xf32, #tpu.memory_space<vmem>>, vector<5x48xf32>,
    %c0_125 = arith.constant 0 : index
    %c0_126 = arith.constant 0 : index
    %c0_127 = arith.constant 0 : index
    %328 = vector.load %arg34[%c0_125, %c0_126, %c0_127] : memref<2x8x16xf32, #tpu.memory_space<vmem>>, vector<1x8x16xf32>
    %329 = vector.shape_cast %328 : vector<1x8x16xf32> to vector<8x16xf32>
    %330 = vector.shape_cast %299 : vector<8x16xf32> to vector<1x8x16xf32>
    tpu.vector_store %arg34[%c0_125, %c0_126, %c0_127], %330 {strides = array<i32>} : memref<2x8x16xf32, #tpu.memory_space<vmem>>, vector<1x8x16xf32>,
    %c1 = arith.constant 1 : index
    %c0_128 = arith.constant 0 : index
    %c0_129 = arith.constant 0 : index
    %331 = vector.load %arg34[%c1, %c0_128, %c0_129] : memref<2x8x16xf32, #tpu.memory_space<vmem>>, vector<1x8x16xf32>
    %332 = vector.shape_cast %331 : vector<1x8x16xf32> to vector<8x16xf32>
    %333 = vector.shape_cast %323 : vector<8x16xf32> to vector<1x8x16xf32>
    tpu.vector_store %arg34[%c1, %c0_128, %c0_129], %333 {strides = array<i32>} : memref<2x8x16xf32, #tpu.memory_space<vmem>>, vector<1x8x16xf32>,
    return
  }
  func.func @transform_0(%arg0: i32) -> (i32, i32, i32) {
    %c0_i32 = arith.constant 0 : i32
    %c0_i32_0 = arith.constant 0 : i32
    %c0_i32_1 = arith.constant 0 : i32
    return %arg0, %c0_i32, %c0_i32_0 : i32, i32, i32
  }
  func.func @transform_1(%arg0: i32) -> (i32, i32, i32) {
    %c0_i32 = arith.constant 0 : i32
    %c0_i32_0 = arith.constant 0 : i32
    %c0_i32_1 = arith.constant 0 : i32
    return %arg0, %c0_i32, %c0_i32_0 : i32, i32, i32
  }
  func.func @transform_2(%arg0: i32) -> (i32, i32) {
    %c0_i32 = arith.constant 0 : i32
    %c0_i32_0 = arith.constant 0 : i32
    %c0_i32_1 = arith.constant 0 : i32
    return %c0_i32, %c0_i32_0 : i32, i32
  }
  func.func @transform_3(%arg0: i32) -> (i32, i32) {
    %c0_i32 = arith.constant 0 : i32
    %c0_i32_0 = arith.constant 0 : i32
    %c0_i32_1 = arith.constant 0 : i32
    return %c0_i32, %c0_i32_0 : i32, i32
  }
  func.func @transform_4(%arg0: i32) -> (i32, i32) {
    %c0_i32 = arith.constant 0 : i32
    %c0_i32_0 = arith.constant 0 : i32
    %c0_i32_1 = arith.constant 0 : i32
    return %c0_i32, %c0_i32_0 : i32, i32
  }
  func.func @transform_5(%arg0: i32) -> (i32, i32) {
    %c0_i32 = arith.constant 0 : i32
    %c0_i32_0 = arith.constant 0 : i32
    %c0_i32_1 = arith.constant 0 : i32
    return %c0_i32, %c0_i32_0 : i32, i32
  }
  func.func @transform_6(%arg0: i32) -> (i32, i32, i32) {
    %c0_i32 = arith.constant 0 : i32
    %c0_i32_0 = arith.constant 0 : i32
    %c0_i32_1 = arith.constant 0 : i32
    %c0_i32_2 = arith.constant 0 : i32
    return %c0_i32, %c0_i32_0, %c0_i32_1 : i32, i32, i32
  }
  func.func @transform_7(%arg0: i32) -> (i32, i32) {
    %c0_i32 = arith.constant 0 : i32
    %c0_i32_0 = arith.constant 0 : i32
    %c0_i32_1 = arith.constant 0 : i32
    return %c0_i32, %c0_i32_0 : i32, i32
  }
  func.func @transform_8(%arg0: i32) -> (i32, i32) {
    %c0_i32 = arith.constant 0 : i32
    %c0_i32_0 = arith.constant 0 : i32
    %c0_i32_1 = arith.constant 0 : i32
    return %c0_i32, %c0_i32_0 : i32, i32
  }
  func.func @transform_9(%arg0: i32) -> (i32, i32) {
    %c0_i32 = arith.constant 0 : i32
    %c0_i32_0 = arith.constant 0 : i32
    %c0_i32_1 = arith.constant 0 : i32
    return %c0_i32, %c0_i32_0 : i32, i32
  }
  func.func @transform_10(%arg0: i32) -> (i32, i32) {
    %c0_i32 = arith.constant 0 : i32
    %c0_i32_0 = arith.constant 0 : i32
    %c0_i32_1 = arith.constant 0 : i32
    return %c0_i32, %c0_i32_0 : i32, i32
  }
  func.func @transform_11(%arg0: i32) -> (i32, i32) {
    %c0_i32 = arith.constant 0 : i32
    %c0_i32_0 = arith.constant 0 : i32
    %c0_i32_1 = arith.constant 0 : i32
    return %c0_i32, %c0_i32_0 : i32, i32
  }
  func.func @transform_12(%arg0: i32) -> (i32, i32) {
    %c0_i32 = arith.constant 0 : i32
    %c0_i32_0 = arith.constant 0 : i32
    %c0_i32_1 = arith.constant 0 : i32
    return %c0_i32, %c0_i32_0 : i32, i32
  }
  func.func @transform_13(%arg0: i32) -> (i32, i32) {
    %c0_i32 = arith.constant 0 : i32
    %c0_i32_0 = arith.constant 0 : i32
    %c0_i32_1 = arith.constant 0 : i32
    return %c0_i32, %c0_i32_0 : i32, i32
  }
  func.func @transform_14(%arg0: i32) -> (i32, i32) {
    %c0_i32 = arith.constant 0 : i32
    %c0_i32_0 = arith.constant 0 : i32
    %c0_i32_1 = arith.constant 0 : i32
    return %c0_i32, %c0_i32_0 : i32, i32
  }
  func.func @transform_15(%arg0: i32) -> (i32, i32) {
    %c0_i32 = arith.constant 0 : i32
    %c0_i32_0 = arith.constant 0 : i32
    %c0_i32_1 = arith.constant 0 : i32
    return %c0_i32, %c0_i32_0 : i32, i32
  }
  func.func @transform_16(%arg0: i32) -> (i32, i32) {
    %c0_i32 = arith.constant 0 : i32
    %c0_i32_0 = arith.constant 0 : i32
    %c0_i32_1 = arith.constant 0 : i32
    return %c0_i32, %c0_i32_0 : i32, i32
  }
  func.func @transform_17(%arg0: i32) -> (i32, i32) {
    %c0_i32 = arith.constant 0 : i32
    %c0_i32_0 = arith.constant 0 : i32
    %c0_i32_1 = arith.constant 0 : i32
    return %c0_i32, %c0_i32_0 : i32, i32
  }
  func.func @transform_18(%arg0: i32) -> (i32, i32) {
    %c0_i32 = arith.constant 0 : i32
    %c0_i32_0 = arith.constant 0 : i32
    %c0_i32_1 = arith.constant 0 : i32
    return %c0_i32, %c0_i32_0 : i32, i32
  }
  func.func @transform_19(%arg0: i32) -> (i32, i32) {
    %c0_i32 = arith.constant 0 : i32
    %c0_i32_0 = arith.constant 0 : i32
    %c0_i32_1 = arith.constant 0 : i32
    return %c0_i32, %c0_i32_0 : i32, i32
  }
  func.func @transform_20(%arg0: i32) -> (i32, i32) {
    %c0_i32 = arith.constant 0 : i32
    %c0_i32_0 = arith.constant 0 : i32
    %c0_i32_1 = arith.constant 0 : i32
    return %c0_i32, %c0_i32_0 : i32, i32
  }
  func.func @transform_21(%arg0: i32) -> (i32, i32) {
    %c0_i32 = arith.constant 0 : i32
    %c0_i32_0 = arith.constant 0 : i32
    %c0_i32_1 = arith.constant 0 : i32
    return %c0_i32, %c0_i32_0 : i32, i32
  }
  func.func @transform_22(%arg0: i32) -> (i32, i32) {
    %c0_i32 = arith.constant 0 : i32
    %c0_i32_0 = arith.constant 0 : i32
    %c0_i32_1 = arith.constant 0 : i32
    return %c0_i32, %c0_i32_0 : i32, i32
  }
  func.func @transform_23(%arg0: i32) -> (i32, i32) {
    %c0_i32 = arith.constant 0 : i32
    %c0_i32_0 = arith.constant 0 : i32
    %c0_i32_1 = arith.constant 0 : i32
    return %c0_i32, %c0_i32_0 : i32, i32
  }
  func.func @transform_24(%arg0: i32) -> (i32, i32) {
    %c0_i32 = arith.constant 0 : i32
    %c0_i32_0 = arith.constant 0 : i32
    %c0_i32_1 = arith.constant 0 : i32
    return %c0_i32, %c0_i32_0 : i32, i32
  }
  func.func @transform_25(%arg0: i32) -> (i32, i32) {
    %c0_i32 = arith.constant 0 : i32
    %c0_i32_0 = arith.constant 0 : i32
    %c0_i32_1 = arith.constant 0 : i32
    return %c0_i32, %c0_i32_0 : i32, i32
  }
  func.func @transform_26(%arg0: i32) -> (i32, i32) {
    %c0_i32 = arith.constant 0 : i32
    %c0_i32_0 = arith.constant 0 : i32
    %c0_i32_1 = arith.constant 0 : i32
    return %c0_i32, %c0_i32_0 : i32, i32
  }
  func.func @transform_27(%arg0: i32) -> (i32, i32, i32) {
    %c0_i32 = arith.constant 0 : i32
    %c0_i32_0 = arith.constant 0 : i32
    %c0_i32_1 = arith.constant 0 : i32
    %c0_i32_2 = arith.constant 0 : i32
    return %c0_i32, %c0_i32_0, %c0_i32_1 : i32, i32, i32
  }
  func.func @transform_28(%arg0: i32) -> (i32, i32) {
    %c0_i32 = arith.constant 0 : i32
    %c0_i32_0 = arith.constant 0 : i32
    %c0_i32_1 = arith.constant 0 : i32
    return %c0_i32, %c0_i32_0 : i32, i32
  }
  func.func @transform_29(%arg0: i32) -> (i32, i32) {
    %c0_i32 = arith.constant 0 : i32
    %c0_i32_0 = arith.constant 0 : i32
    %c0_i32_1 = arith.constant 0 : i32
    return %c0_i32, %c0_i32_0 : i32, i32
  }
  func.func @transform_30(%arg0: i32) -> (i32, i32) {
    %c0_i32 = arith.constant 0 : i32
    %c0_i32_0 = arith.constant 0 : i32
    %c0_i32_1 = arith.constant 0 : i32
    return %c0_i32, %c0_i32_0 : i32, i32
  }
  func.func @transform_31(%arg0: i32) -> (i32, i32) {
    %c0_i32 = arith.constant 0 : i32
    %c0_i32_0 = arith.constant 0 : i32
    %c0_i32_1 = arith.constant 0 : i32
    return %c0_i32, %c0_i32_0 : i32, i32
  }
  func.func @transform_32(%arg0: i32) -> (i32, i32) {
    %c0_i32 = arith.constant 0 : i32
    %c0_i32_0 = arith.constant 0 : i32
    %c0_i32_1 = arith.constant 0 : i32
    return %c0_i32, %c0_i32_0 : i32, i32
  }
  func.func @transform_33(%arg0: i32) -> (i32, i32, i32) {
    %c0_i32 = arith.constant 0 : i32
    %c0_i32_0 = arith.constant 0 : i32
    %c0_i32_1 = arith.constant 0 : i32
    %c0_i32_2 = arith.constant 0 : i32
    return %c0_i32, %c0_i32_0, %c0_i32_1 : i32, i32, i32
  }
}

module attributes {stable_mosaic.version = 11 : i64} {
  func.func @kernel(%arg0: i32, %arg1: memref<10x2xf32, #tpu.memory_space<vmem>>, %arg2: memref<10x2xf32, #tpu.memory_space<vmem>>, %arg3: memref<10x2xf32, #tpu.memory_space<vmem>>, %arg4: memref<10x16xf32, #tpu.memory_space<vmem>>, %arg5: memref<10x32xf32, #tpu.memory_space<vmem>>, %arg6: memref<10x32xf32, #tpu.memory_space<vmem>>, %arg7: memref<10x48xf32, #tpu.memory_space<vmem>>, %arg8: memref<4x8x16xf32, #tpu.memory_space<vmem>>, %arg9: memref<10x4xf32, #tpu.memory_space<vmem>>, %arg10: memref<10x2xf32, #tpu.memory_space<vmem>>, %arg11: memref<10x10xf32, #tpu.memory_space<vmem>>, %arg12: memref<2x16xf32, #tpu.memory_space<vmem>>, %arg13: memref<2x16xf32, #tpu.memory_space<vmem>>, %arg14: memref<1x16xf32, #tpu.memory_space<vmem>>, %arg15: memref<16x32xf32, #tpu.memory_space<vmem>>, %arg16: memref<1x32xf32, #tpu.memory_space<vmem>>, %arg17: memref<32x192xf32, #tpu.memory_space<vmem>>, %arg18: memref<16x192xf32, #tpu.memory_space<vmem>>, %arg19: memref<1x192xf32, #tpu.memory_space<vmem>>, %arg20: memref<32x96xf32, #tpu.memory_space<vmem>>, %arg21: memref<1x96xf32, #tpu.memory_space<vmem>>, %arg22: memref<32x96xf32, #tpu.memory_space<vmem>>, %arg23: memref<1x96xf32, #tpu.memory_space<vmem>>, %arg24: memref<32x144xf32, #tpu.memory_space<vmem>>, %arg25: memref<16x144xf32, #tpu.memory_space<vmem>>, %arg26: memref<1x144xf32, #tpu.memory_space<vmem>>, %arg27: memref<48x144xf32, #tpu.memory_space<vmem>>, %arg28: memref<1x144xf32, #tpu.memory_space<vmem>>, %arg29: memref<48x2xf32, #tpu.memory_space<vmem>>, %arg30: memref<1x2xf32, #tpu.memory_space<vmem>>, %arg31: memref<2x32x66xf32, #tpu.memory_space<vmem>>, %arg32: memref<2x66xf32, #tpu.memory_space<vmem>>, %arg33: memref<1x10x2xf32, #tpu.memory_space<vmem>>, %arg34: memref<10x16xf32, #tpu.memory_space<vmem>>, %arg35: memref<10x32xf32, #tpu.memory_space<vmem>>, %arg36: memref<10x32xf32, #tpu.memory_space<vmem>>, %arg37: memref<10x48xf32, #tpu.memory_space<vmem>>, %arg38: memref<4x8x16xf32, #tpu.memory_space<vmem>>, %arg39: memref<10x2xf32, #tpu.memory_space<vmem>>, %arg40: memref<10x2xf32, #tpu.memory_space<vmem>>, %arg41: memref<10x2xf32, #tpu.memory_space<vmem>>) attributes {dimension_semantics = [#tpu.dimension_semantics<arbitrary>], iteration_bounds = array<i64: 4>, scalar_prefetch = 0 : i64, scratch_operands = 8 : i64, tpu.core_type = #tpu.core_type<tc>, window_params = [{pipeline_mode = #tpu.pipeline_mode<synchronous>, transform_indices = @transform_0, window_bounds = array<i64: 10, 2>}, {pipeline_mode = #tpu.pipeline_mode<synchronous>, transform_indices = @transform_1, window_bounds = array<i64: 10, 2>}, {pipeline_mode = #tpu.pipeline_mode<synchronous>, transform_indices = @transform_2, window_bounds = array<i64: 10, 2>}, {pipeline_mode = #tpu.pipeline_mode<synchronous>, transform_indices = @transform_3, window_bounds = array<i64: 10, 16>}, {pipeline_mode = #tpu.pipeline_mode<synchronous>, transform_indices = @transform_4, window_bounds = array<i64: 10, 32>}, {pipeline_mode = #tpu.pipeline_mode<synchronous>, transform_indices = @transform_5, window_bounds = array<i64: 10, 32>}, {pipeline_mode = #tpu.pipeline_mode<synchronous>, transform_indices = @transform_6, window_bounds = array<i64: 10, 48>}, {pipeline_mode = #tpu.pipeline_mode<synchronous>, transform_indices = @transform_7, window_bounds = array<i64: 4, 8, 16>}, {pipeline_mode = #tpu.pipeline_mode<synchronous>, transform_indices = @transform_8, window_bounds = array<i64: 10, 4>}, {pipeline_mode = #tpu.pipeline_mode<synchronous>, transform_indices = @transform_9, window_bounds = array<i64: 10, 2>}, {pipeline_mode = #tpu.pipeline_mode<synchronous>, transform_indices = @transform_10, window_bounds = array<i64: 10, 10>}, {pipeline_mode = #tpu.pipeline_mode<synchronous>, transform_indices = @transform_11, window_bounds = array<i64: 2, 16>}, {pipeline_mode = #tpu.pipeline_mode<synchronous>, transform_indices = @transform_12, window_bounds = array<i64: 2, 16>}, {pipeline_mode = #tpu.pipeline_mode<synchronous>, transform_indices = @transform_13, window_bounds = array<i64: 1, 16>}, {pipeline_mode = #tpu.pipeline_mode<synchronous>, transform_indices = @transform_14, window_bounds = array<i64: 16, 32>}, {pipeline_mode = #tpu.pipeline_mode<synchronous>, transform_indices = @transform_15, window_bounds = array<i64: 1, 32>}, {pipeline_mode = #tpu.pipeline_mode<synchronous>, transform_indices = @transform_16, window_bounds = array<i64: 32, 192>}, {pipeline_mode = #tpu.pipeline_mode<synchronous>, transform_indices = @transform_17, window_bounds = array<i64: 16, 192>}, {pipeline_mode = #tpu.pipeline_mode<synchronous>, transform_indices = @transform_18, window_bounds = array<i64: 1, 192>}, {pipeline_mode = #tpu.pipeline_mode<synchronous>, transform_indices = @transform_19, window_bounds = array<i64: 32, 96>}, {pipeline_mode = #tpu.pipeline_mode<synchronous>, transform_indices = @transform_20, window_bounds = array<i64: 1, 96>}, {pipeline_mode = #tpu.pipeline_mode<synchronous>, transform_indices = @transform_21, window_bounds = array<i64: 32, 96>}, {pipeline_mode = #tpu.pipeline_mode<synchronous>, transform_indices = @transform_22, window_bounds = array<i64: 1, 96>}, {pipeline_mode = #tpu.pipeline_mode<synchronous>, transform_indices = @transform_23, window_bounds = array<i64: 32, 144>}, {pipeline_mode = #tpu.pipeline_mode<synchronous>, transform_indices = @transform_24, window_bounds = array<i64: 16, 144>}, {pipeline_mode = #tpu.pipeline_mode<synchronous>, transform_indices = @transform_25, window_bounds = array<i64: 1, 144>}, {pipeline_mode = #tpu.pipeline_mode<synchronous>, transform_indices = @transform_26, window_bounds = array<i64: 48, 144>}, {pipeline_mode = #tpu.pipeline_mode<synchronous>, transform_indices = @transform_27, window_bounds = array<i64: 1, 144>}, {pipeline_mode = #tpu.pipeline_mode<synchronous>, transform_indices = @transform_28, window_bounds = array<i64: 48, 2>}, {pipeline_mode = #tpu.pipeline_mode<synchronous>, transform_indices = @transform_29, window_bounds = array<i64: 1, 2>}, {pipeline_mode = #tpu.pipeline_mode<synchronous>, transform_indices = @transform_30, window_bounds = array<i64: 2, 32, 66>}, {pipeline_mode = #tpu.pipeline_mode<synchronous>, transform_indices = @transform_31, window_bounds = array<i64: 2, 66>}, {transform_indices = @transform_32, window_bounds = array<i64: 1, 10, 2>}]} {
    %c0_i32 = arith.constant 0 : i32
    %0 = arith.cmpi eq, %arg0, %c0_i32 : i32
    %1 = arith.extui %0 : i1 to i32
    %c0_i32_0 = arith.constant 0 : i32
    %2 = arith.cmpi ne, %1, %c0_i32_0 : i32
    scf.if %2 {
      %c0_180 = arith.constant 0 : index
      %c0_181 = arith.constant 0 : index
      %438 = vector.load %arg4[%c0_180, %c0_181] : memref<10x16xf32, #tpu.memory_space<vmem>>, vector<10x16xf32>
      %c0_182 = arith.constant 0 : index
      %c0_183 = arith.constant 0 : index
      %439 = vector.load %arg34[%c0_182, %c0_183] : memref<10x16xf32, #tpu.memory_space<vmem>>, vector<10x16xf32>
      tpu.vector_store %arg34[%c0_182, %c0_183], %438 {strides = array<i32>} : memref<10x16xf32, #tpu.memory_space<vmem>>, vector<10x16xf32>,
      %c0_184 = arith.constant 0 : index
      %c0_185 = arith.constant 0 : index
      %440 = vector.load %arg5[%c0_184, %c0_185] : memref<10x32xf32, #tpu.memory_space<vmem>>, vector<10x32xf32>
      %c0_186 = arith.constant 0 : index
      %c0_187 = arith.constant 0 : index
      %441 = vector.load %arg35[%c0_186, %c0_187] : memref<10x32xf32, #tpu.memory_space<vmem>>, vector<10x32xf32>
      tpu.vector_store %arg35[%c0_186, %c0_187], %440 {strides = array<i32>} : memref<10x32xf32, #tpu.memory_space<vmem>>, vector<10x32xf32>,
      %c0_188 = arith.constant 0 : index
      %c0_189 = arith.constant 0 : index
      %442 = vector.load %arg6[%c0_188, %c0_189] : memref<10x32xf32, #tpu.memory_space<vmem>>, vector<10x32xf32>
      %c0_190 = arith.constant 0 : index
      %c0_191 = arith.constant 0 : index
      %443 = vector.load %arg36[%c0_190, %c0_191] : memref<10x32xf32, #tpu.memory_space<vmem>>, vector<10x32xf32>
      tpu.vector_store %arg36[%c0_190, %c0_191], %442 {strides = array<i32>} : memref<10x32xf32, #tpu.memory_space<vmem>>, vector<10x32xf32>,
      %c0_192 = arith.constant 0 : index
      %c0_193 = arith.constant 0 : index
      %444 = vector.load %arg7[%c0_192, %c0_193] : memref<10x48xf32, #tpu.memory_space<vmem>>, vector<10x48xf32>
      %c0_194 = arith.constant 0 : index
      %c0_195 = arith.constant 0 : index
      %445 = vector.load %arg37[%c0_194, %c0_195] : memref<10x48xf32, #tpu.memory_space<vmem>>, vector<10x48xf32>
      tpu.vector_store %arg37[%c0_194, %c0_195], %444 {strides = array<i32>} : memref<10x48xf32, #tpu.memory_space<vmem>>, vector<10x48xf32>,
      %c0_196 = arith.constant 0 : index
      %c0_197 = arith.constant 0 : index
      %c0_198 = arith.constant 0 : index
      %446 = vector.load %arg8[%c0_196, %c0_197, %c0_198] : memref<4x8x16xf32, #tpu.memory_space<vmem>>, vector<4x8x16xf32>
      %c0_199 = arith.constant 0 : index
      %c0_200 = arith.constant 0 : index
      %c0_201 = arith.constant 0 : index
      %447 = vector.load %arg38[%c0_199, %c0_200, %c0_201] : memref<4x8x16xf32, #tpu.memory_space<vmem>>, vector<4x8x16xf32>
      tpu.vector_store %arg38[%c0_199, %c0_200, %c0_201], %446 {strides = array<i32>} : memref<4x8x16xf32, #tpu.memory_space<vmem>>, vector<4x8x16xf32>,
      %c0_202 = arith.constant 0 : index
      %c0_203 = arith.constant 0 : index
      %448 = vector.load %arg1[%c0_202, %c0_203] : memref<10x2xf32, #tpu.memory_space<vmem>>, vector<10x2xf32>
      %c0_204 = arith.constant 0 : index
      %c0_205 = arith.constant 0 : index
      %449 = vector.load %arg39[%c0_204, %c0_205] : memref<10x2xf32, #tpu.memory_space<vmem>>, vector<10x2xf32>
      tpu.vector_store %arg39[%c0_204, %c0_205], %448 {strides = array<i32>} : memref<10x2xf32, #tpu.memory_space<vmem>>, vector<10x2xf32>,
      %c0_206 = arith.constant 0 : index
      %c0_207 = arith.constant 0 : index
      %450 = vector.load %arg2[%c0_206, %c0_207] : memref<10x2xf32, #tpu.memory_space<vmem>>, vector<10x2xf32>
      %c0_208 = arith.constant 0 : index
      %c0_209 = arith.constant 0 : index
      %451 = vector.load %arg40[%c0_208, %c0_209] : memref<10x2xf32, #tpu.memory_space<vmem>>, vector<10x2xf32>
      tpu.vector_store %arg40[%c0_208, %c0_209], %450 {strides = array<i32>} : memref<10x2xf32, #tpu.memory_space<vmem>>, vector<10x2xf32>,
      %cst_210 = arith.constant 0.000000e+00 : f32
      %452 = vector.broadcast %cst_210 : f32 to vector<10x2xf32>
      %c0_211 = arith.constant 0 : index
      %c0_212 = arith.constant 0 : index
      %453 = vector.load %arg41[%c0_211, %c0_212] : memref<10x2xf32, #tpu.memory_space<vmem>>, vector<10x2xf32>
      tpu.vector_store %arg41[%c0_211, %c0_212], %452 {strides = array<i32>} : memref<10x2xf32, #tpu.memory_space<vmem>>, vector<10x2xf32>,
    } else {
    }
    %c0 = arith.constant 0 : index
    %c0_1 = arith.constant 0 : index
    %3 = vector.load %arg9[%c0, %c0_1] : memref<10x4xf32, #tpu.memory_space<vmem>>, vector<10x4xf32>
    %c0_2 = arith.constant 0 : index
    %c0_3 = arith.constant 0 : index
    %4 = vector.load %arg10[%c0_2, %c0_3] : memref<10x2xf32, #tpu.memory_space<vmem>>, vector<10x2xf32>
    %c0_4 = arith.constant 0 : index
    %c0_5 = arith.constant 0 : index
    %5 = vector.load %arg39[%c0_4, %c0_5] : memref<10x2xf32, #tpu.memory_space<vmem>>, vector<10x2xf32>
    %c0_6 = arith.constant 0 : index
    %c0_7 = arith.constant 0 : index
    %6 = vector.load %arg40[%c0_6, %c0_7] : memref<10x2xf32, #tpu.memory_space<vmem>>, vector<10x2xf32>
    %c0_8 = arith.constant 0 : index
    %c0_9 = arith.constant 0 : index
    %7 = vector.load %arg34[%c0_8, %c0_9] : memref<10x16xf32, #tpu.memory_space<vmem>>, vector<10x16xf32>
    %c0_10 = arith.constant 0 : index
    %c0_11 = arith.constant 0 : index
    %8 = vector.load %arg35[%c0_10, %c0_11] : memref<10x32xf32, #tpu.memory_space<vmem>>, vector<10x32xf32>
    %c0_12 = arith.constant 0 : index
    %c0_13 = arith.constant 0 : index
    %9 = vector.load %arg36[%c0_12, %c0_13] : memref<10x32xf32, #tpu.memory_space<vmem>>, vector<10x32xf32>
    %c0_14 = arith.constant 0 : index
    %c0_15 = arith.constant 0 : index
    %10 = vector.load %arg37[%c0_14, %c0_15] : memref<10x48xf32, #tpu.memory_space<vmem>>, vector<10x48xf32>
    %c0_16 = arith.constant 0 : index
    %c0_17 = arith.constant 0 : index
    %c0_18 = arith.constant 0 : index
    %11 = vector.load %arg38[%c0_16, %c0_17, %c0_18] : memref<4x8x16xf32, #tpu.memory_space<vmem>>, vector<4x8x16xf32>
    %c0_19 = arith.constant 0 : index
    %c0_20 = arith.constant 0 : index
    %12 = vector.load %arg12[%c0_19, %c0_20] : memref<2x16xf32, #tpu.memory_space<vmem>>, vector<2x16xf32>
    %cst = arith.constant dense<0.000000e+00> : vector<10x16xf32>
    %13 = tpu.matmul %5, %12, %cst {dimension_numbers = #tpu.dot_dimension_numbers<[1], [0], [0], [1], [0, 0, 1, 1], [], []>} : vector<10x2xf32>, vector<2x16xf32>, vector<10x16xf32> -> vector<10x16xf32>
    %c0_21 = arith.constant 0 : index
    %c0_22 = arith.constant 0 : index
    %14 = vector.load %arg13[%c0_21, %c0_22] : memref<2x16xf32, #tpu.memory_space<vmem>>, vector<2x16xf32>
    %cst_23 = arith.constant dense<0.000000e+00> : vector<10x16xf32>
    %15 = tpu.matmul %6, %14, %cst_23 {dimension_numbers = #tpu.dot_dimension_numbers<[1], [0], [0], [1], [0, 0, 1, 1], [], []>} : vector<10x2xf32>, vector<2x16xf32>, vector<10x16xf32> -> vector<10x16xf32>
    %16 = arith.addf %13, %15 : vector<10x16xf32>
    %c0_24 = arith.constant 0 : index
    %c0_25 = arith.constant 0 : index
    %17 = vector.load %arg14[%c0_24, %c0_25] : memref<1x16xf32, #tpu.memory_space<vmem>>, vector<1x16xf32>
    %18 = vector.broadcast %17 : vector<1x16xf32> to vector<10x16xf32>
    %19 = arith.addf %16, %18 : vector<10x16xf32>
    %cst_26 = arith.constant 0.000000e+00 : f32
    %20 = vector.broadcast %cst_26 : f32 to vector<10x16xf32>
    %21 = arith.maximumf %19, %20 : vector<10x16xf32>
    %c0_27 = arith.constant 0 : index
    %c0_28 = arith.constant 0 : index
    %22 = vector.load %arg15[%c0_27, %c0_28] : memref<16x32xf32, #tpu.memory_space<vmem>>, vector<16x32xf32>
    %cst_29 = arith.constant dense<0.000000e+00> : vector<10x32xf32>
    %23 = tpu.matmul %21, %22, %cst_29 {dimension_numbers = #tpu.dot_dimension_numbers<[1], [0], [0], [1], [0, 0, 1, 1], [], []>} : vector<10x16xf32>, vector<16x32xf32>, vector<10x32xf32> -> vector<10x32xf32>
    %c0_30 = arith.constant 0 : index
    %c0_31 = arith.constant 0 : index
    %24 = vector.load %arg16[%c0_30, %c0_31] : memref<1x32xf32, #tpu.memory_space<vmem>>, vector<1x32xf32>
    %25 = vector.broadcast %24 : vector<1x32xf32> to vector<10x32xf32>
    %26 = arith.addf %23, %25 : vector<10x32xf32>
    %c0_32 = arith.constant 0 : index
    %c0_33 = arith.constant 0 : index
    %27 = vector.load %arg17[%c0_32, %c0_33] : memref<32x192xf32, #tpu.memory_space<vmem>>, vector<32x192xf32>
    %cst_34 = arith.constant dense<0.000000e+00> : vector<10x192xf32>
    %28 = tpu.matmul %26, %27, %cst_34 {dimension_numbers = #tpu.dot_dimension_numbers<[1], [0], [0], [1], [0, 0, 1, 1], [], []>} : vector<10x32xf32>, vector<32x192xf32>, vector<10x192xf32> -> vector<10x192xf32>
    %c0_35 = arith.constant 0 : index
    %c0_36 = arith.constant 0 : index
    %29 = vector.load %arg18[%c0_35, %c0_36] : memref<16x192xf32, #tpu.memory_space<vmem>>, vector<16x192xf32>
    %cst_37 = arith.constant dense<0.000000e+00> : vector<10x192xf32>
    %30 = tpu.matmul %7, %29, %cst_37 {dimension_numbers = #tpu.dot_dimension_numbers<[1], [0], [0], [1], [0, 0, 1, 1], [], []>} : vector<10x16xf32>, vector<16x192xf32>, vector<10x192xf32> -> vector<10x192xf32>
    %31 = arith.addf %28, %30 : vector<10x192xf32>
    %c0_38 = arith.constant 0 : index
    %c0_39 = arith.constant 0 : index
    %32 = vector.load %arg19[%c0_38, %c0_39] : memref<1x192xf32, #tpu.memory_space<vmem>>, vector<1x192xf32>
    %33 = vector.broadcast %32 : vector<1x192xf32> to vector<10x192xf32>
    %34 = arith.addf %31, %33 : vector<10x192xf32>
    %c0_40 = arith.constant 0 : index
    %c0_41 = arith.constant 0 : index
    %35 = vector.load %arg20[%c0_40, %c0_41] : memref<32x96xf32, #tpu.memory_space<vmem>>, vector<32x96xf32>
    %cst_42 = arith.constant dense<0.000000e+00> : vector<10x96xf32>
    %36 = tpu.matmul %8, %35, %cst_42 {dimension_numbers = #tpu.dot_dimension_numbers<[1], [0], [0], [1], [0, 0, 1, 1], [], []>} : vector<10x32xf32>, vector<32x96xf32>, vector<10x96xf32> -> vector<10x96xf32>
    %c0_43 = arith.constant 0 : index
    %c0_44 = arith.constant 0 : index
    %37 = vector.load %arg21[%c0_43, %c0_44] : memref<1x96xf32, #tpu.memory_space<vmem>>, vector<1x96xf32>
    %38 = vector.broadcast %37 : vector<1x96xf32> to vector<10x96xf32>
    %39 = arith.addf %36, %38 : vector<10x96xf32>
    %c0_45 = arith.constant 0 : index
    %c0_46 = arith.constant 0 : index
    %40 = vector.load %arg22[%c0_45, %c0_46] : memref<32x96xf32, #tpu.memory_space<vmem>>, vector<32x96xf32>
    %cst_47 = arith.constant dense<0.000000e+00> : vector<10x96xf32>
    %41 = tpu.matmul %9, %40, %cst_47 {dimension_numbers = #tpu.dot_dimension_numbers<[1], [0], [0], [1], [0, 0, 1, 1], [], []>} : vector<10x32xf32>, vector<32x96xf32>, vector<10x96xf32> -> vector<10x96xf32>
    %c0_48 = arith.constant 0 : index
    %c0_49 = arith.constant 0 : index
    %42 = vector.load %arg23[%c0_48, %c0_49] : memref<1x96xf32, #tpu.memory_space<vmem>>, vector<1x96xf32>
    %43 = vector.broadcast %42 : vector<1x96xf32> to vector<10x96xf32>
    %44 = arith.addf %41, %43 : vector<10x96xf32>
    %45 = vector.extract_strided_slice %34 {offsets = [0, 0], sizes = [10, 96], strides = [1, 1]} : vector<10x192xf32> to vector<10x96xf32>
    %46 = vector.extract_strided_slice %45 {offsets = [0, 0], sizes = [10, 32], strides = [1, 1]} : vector<10x96xf32> to vector<10x32xf32>
    %47 = vector.extract_strided_slice %39 {offsets = [0, 0], sizes = [10, 32], strides = [1, 1]} : vector<10x96xf32> to vector<10x32xf32>
    %48 = arith.addf %46, %47 : vector<10x32xf32>
    %49 = arith.negf %48 : vector<10x32xf32>
    %50 = math.exp %49 : vector<10x32xf32>
    %cst_50 = arith.constant 1.000000e+00 : f32
    %51 = vector.broadcast %cst_50 : f32 to vector<10x32xf32>
    %52 = arith.addf %51, %50 : vector<10x32xf32>
    %53 = arith.divf %51, %52 : vector<10x32xf32>
    %54 = vector.extract_strided_slice %45 {offsets = [0, 32], sizes = [10, 32], strides = [1, 1]} : vector<10x96xf32> to vector<10x32xf32>
    %55 = vector.extract_strided_slice %39 {offsets = [0, 32], sizes = [10, 32], strides = [1, 1]} : vector<10x96xf32> to vector<10x32xf32>
    %56 = arith.addf %54, %55 : vector<10x32xf32>
    %57 = arith.negf %56 : vector<10x32xf32>
    %58 = math.exp %57 : vector<10x32xf32>
    %cst_51 = arith.constant 1.000000e+00 : f32
    %59 = vector.broadcast %cst_51 : f32 to vector<10x32xf32>
    %60 = arith.addf %59, %58 : vector<10x32xf32>
    %61 = arith.divf %59, %60 : vector<10x32xf32>
    %62 = vector.extract_strided_slice %45 {offsets = [0, 64], sizes = [10, 32], strides = [1, 1]} : vector<10x96xf32> to vector<10x32xf32>
    %63 = vector.extract_strided_slice %39 {offsets = [0, 64], sizes = [10, 32], strides = [1, 1]} : vector<10x96xf32> to vector<10x32xf32>
    %64 = arith.mulf %53, %63 : vector<10x32xf32>
    %65 = arith.addf %62, %64 : vector<10x32xf32>
    %66 = math.tanh %65 : vector<10x32xf32>
    %cst_52 = arith.constant 1.000000e+00 : f32
    %67 = vector.broadcast %cst_52 : f32 to vector<10x32xf32>
    %68 = arith.subf %67, %61 : vector<10x32xf32>
    %69 = arith.mulf %68, %66 : vector<10x32xf32>
    %70 = arith.mulf %61, %8 : vector<10x32xf32>
    %71 = arith.addf %69, %70 : vector<10x32xf32>
    %72 = vector.extract_strided_slice %34 {offsets = [0, 96], sizes = [10, 96], strides = [1, 1]} : vector<10x192xf32> to vector<10x96xf32>
    %73 = vector.extract_strided_slice %72 {offsets = [0, 0], sizes = [10, 32], strides = [1, 1]} : vector<10x96xf32> to vector<10x32xf32>
    %74 = vector.extract_strided_slice %44 {offsets = [0, 0], sizes = [10, 32], strides = [1, 1]} : vector<10x96xf32> to vector<10x32xf32>
    %75 = arith.addf %73, %74 : vector<10x32xf32>
    %76 = arith.negf %75 : vector<10x32xf32>
    %77 = math.exp %76 : vector<10x32xf32>
    %cst_53 = arith.constant 1.000000e+00 : f32
    %78 = vector.broadcast %cst_53 : f32 to vector<10x32xf32>
    %79 = arith.addf %78, %77 : vector<10x32xf32>
    %80 = arith.divf %78, %79 : vector<10x32xf32>
    %81 = vector.extract_strided_slice %72 {offsets = [0, 32], sizes = [10, 32], strides = [1, 1]} : vector<10x96xf32> to vector<10x32xf32>
    %82 = vector.extract_strided_slice %44 {offsets = [0, 32], sizes = [10, 32], strides = [1, 1]} : vector<10x96xf32> to vector<10x32xf32>
    %83 = arith.addf %81, %82 : vector<10x32xf32>
    %84 = arith.negf %83 : vector<10x32xf32>
    %85 = math.exp %84 : vector<10x32xf32>
    %cst_54 = arith.constant 1.000000e+00 : f32
    %86 = vector.broadcast %cst_54 : f32 to vector<10x32xf32>
    %87 = arith.addf %86, %85 : vector<10x32xf32>
    %88 = arith.divf %86, %87 : vector<10x32xf32>
    %89 = vector.extract_strided_slice %72 {offsets = [0, 64], sizes = [10, 32], strides = [1, 1]} : vector<10x96xf32> to vector<10x32xf32>
    %90 = vector.extract_strided_slice %44 {offsets = [0, 64], sizes = [10, 32], strides = [1, 1]} : vector<10x96xf32> to vector<10x32xf32>
    %91 = arith.mulf %80, %90 : vector<10x32xf32>
    %92 = arith.addf %89, %91 : vector<10x32xf32>
    %93 = math.tanh %92 : vector<10x32xf32>
    %cst_55 = arith.constant 1.000000e+00 : f32
    %94 = vector.broadcast %cst_55 : f32 to vector<10x32xf32>
    %95 = arith.subf %94, %88 : vector<10x32xf32>
    %96 = arith.mulf %95, %93 : vector<10x32xf32>
    %97 = arith.mulf %88, %9 : vector<10x32xf32>
    %98 = arith.addf %96, %97 : vector<10x32xf32>
    %cst_56 = arith.constant 0.000000e+00 : f32
    %99 = vector.broadcast %cst_56 : f32 to vector<10x8x16xf32>
    %100 = vector.extract_strided_slice %3 {offsets = [0, 0], sizes = [10, 1], strides = [1, 1]} : vector<10x4xf32> to vector<10x1xf32>
    %101 = vector.shape_cast %100 : vector<10x1xf32> to vector<10x1x1xf32>
    %102 = vector.extract_strided_slice %11 {offsets = [0, 0, 0], sizes = [1, 8, 16], strides = [1, 1, 1]} : vector<4x8x16xf32> to vector<1x8x16xf32>
    %103 = vector.shape_cast %102 : vector<1x8x16xf32> to vector<8x16xf32>
    %104 = vector.shape_cast %103 : vector<8x16xf32> to vector<1x8x16xf32>
    %105 = vector.broadcast %101 : vector<10x1x1xf32> to vector<10x8x16xf32>
    %106 = vector.broadcast %104 : vector<1x8x16xf32> to vector<10x8x16xf32>
    %107 = arith.mulf %105, %106 : vector<10x8x16xf32>
    %108 = arith.addf %99, %107 : vector<10x8x16xf32>
    %109 = vector.extract_strided_slice %3 {offsets = [0, 1], sizes = [10, 1], strides = [1, 1]} : vector<10x4xf32> to vector<10x1xf32>
    %110 = vector.shape_cast %109 : vector<10x1xf32> to vector<10x1x1xf32>
    %111 = vector.extract_strided_slice %11 {offsets = [1, 0, 0], sizes = [1, 8, 16], strides = [1, 1, 1]} : vector<4x8x16xf32> to vector<1x8x16xf32>
    %112 = vector.shape_cast %111 : vector<1x8x16xf32> to vector<8x16xf32>
    %113 = vector.shape_cast %112 : vector<8x16xf32> to vector<1x8x16xf32>
    %114 = vector.broadcast %110 : vector<10x1x1xf32> to vector<10x8x16xf32>
    %115 = vector.broadcast %113 : vector<1x8x16xf32> to vector<10x8x16xf32>
    %116 = arith.mulf %114, %115 : vector<10x8x16xf32>
    %117 = arith.addf %108, %116 : vector<10x8x16xf32>
    %118 = vector.extract_strided_slice %3 {offsets = [0, 2], sizes = [10, 1], strides = [1, 1]} : vector<10x4xf32> to vector<10x1xf32>
    %119 = vector.shape_cast %118 : vector<10x1xf32> to vector<10x1x1xf32>
    %120 = vector.extract_strided_slice %11 {offsets = [2, 0, 0], sizes = [1, 8, 16], strides = [1, 1, 1]} : vector<4x8x16xf32> to vector<1x8x16xf32>
    %121 = vector.shape_cast %120 : vector<1x8x16xf32> to vector<8x16xf32>
    %122 = vector.shape_cast %121 : vector<8x16xf32> to vector<1x8x16xf32>
    %123 = vector.broadcast %119 : vector<10x1x1xf32> to vector<10x8x16xf32>
    %124 = vector.broadcast %122 : vector<1x8x16xf32> to vector<10x8x16xf32>
    %125 = arith.mulf %123, %124 : vector<10x8x16xf32>
    %126 = arith.addf %117, %125 : vector<10x8x16xf32>
    %127 = vector.extract_strided_slice %3 {offsets = [0, 3], sizes = [10, 1], strides = [1, 1]} : vector<10x4xf32> to vector<10x1xf32>
    %128 = vector.shape_cast %127 : vector<10x1xf32> to vector<10x1x1xf32>
    %129 = vector.extract_strided_slice %11 {offsets = [3, 0, 0], sizes = [1, 8, 16], strides = [1, 1, 1]} : vector<4x8x16xf32> to vector<1x8x16xf32>
    %130 = vector.shape_cast %129 : vector<1x8x16xf32> to vector<8x16xf32>
    %131 = vector.shape_cast %130 : vector<8x16xf32> to vector<1x8x16xf32>
    %132 = vector.broadcast %128 : vector<10x1x1xf32> to vector<10x8x16xf32>
    %133 = vector.broadcast %131 : vector<1x8x16xf32> to vector<10x8x16xf32>
    %134 = arith.mulf %132, %133 : vector<10x8x16xf32>
    %135 = arith.addf %126, %134 : vector<10x8x16xf32>
    %cst_57 = arith.constant 1.000000e-16 : f32
    %136 = vector.broadcast %cst_57 : f32 to vector<10x8x16xf32>
    %137 = arith.addf %135, %136 : vector<10x8x16xf32>
    %138 = arith.mulf %137, %137 : vector<10x8x16xf32>
    %cst_58 = arith.constant dense<0.000000e+00> : vector<10x8xf32>
    %139 = vector.multi_reduction <add>, %138, %cst_58 [2] : vector<10x8x16xf32> to vector<10x8xf32>
    %140 = math.sqrt %139 : vector<10x8xf32>
    %cst_59 = arith.constant 0.000000e+00 : f32
    %141 = vector.broadcast %cst_59 : f32 to vector<10x66xf32>
    %c0_60 = arith.constant 0 : index
    %c0_61 = arith.constant 0 : index
    %c0_62 = arith.constant 0 : index
    %142 = vector.load %arg31[%c0_60, %c0_61, %c0_62] : memref<2x32x66xf32, #tpu.memory_space<vmem>>, vector<1x32x66xf32>
    %143 = vector.shape_cast %142 : vector<1x32x66xf32> to vector<32x66xf32>
    %cst_63 = arith.constant dense<0.000000e+00> : vector<10x66xf32>
    %144 = tpu.matmul %71, %143, %cst_63 {dimension_numbers = #tpu.dot_dimension_numbers<[1], [0], [0], [1], [0, 0, 1, 1], [], []>} : vector<10x32xf32>, vector<32x66xf32>, vector<10x66xf32> -> vector<10x66xf32>
    %c0_64 = arith.constant 0 : index
    %c0_65 = arith.constant 0 : index
    %145 = vector.load %arg32[%c0_64, %c0_65] : memref<2x66xf32, #tpu.memory_space<vmem>>, vector<1x66xf32>
    %146 = vector.broadcast %145 : vector<1x66xf32> to vector<10x66xf32>
    %147 = arith.addf %144, %146 : vector<10x66xf32>
    %148 = vector.extract_strided_slice %4 {offsets = [0, 0], sizes = [10, 1], strides = [1, 1]} : vector<10x2xf32> to vector<10x1xf32>
    %149 = vector.broadcast %148 : vector<10x1xf32> to vector<10x66xf32>
    %150 = arith.mulf %147, %149 : vector<10x66xf32>
    %151 = arith.addf %141, %150 : vector<10x66xf32>
    %c1 = arith.constant 1 : index
    %c0_66 = arith.constant 0 : index
    %c0_67 = arith.constant 0 : index
    %152 = vector.load %arg31[%c1, %c0_66, %c0_67] : memref<2x32x66xf32, #tpu.memory_space<vmem>>, vector<1x32x66xf32>
    %153 = vector.shape_cast %152 : vector<1x32x66xf32> to vector<32x66xf32>
    %cst_68 = arith.constant dense<0.000000e+00> : vector<10x66xf32>
    %154 = tpu.matmul %71, %153, %cst_68 {dimension_numbers = #tpu.dot_dimension_numbers<[1], [0], [0], [1], [0, 0, 1, 1], [], []>} : vector<10x32xf32>, vector<32x66xf32>, vector<10x66xf32> -> vector<10x66xf32>
    %c1_69 = arith.constant 1 : index
    %c0_70 = arith.constant 0 : index
    %155 = vector.load %arg32[%c1_69, %c0_70] : memref<2x66xf32, #tpu.memory_space<vmem>>, vector<1x66xf32>
    %156 = vector.broadcast %155 : vector<1x66xf32> to vector<10x66xf32>
    %157 = arith.addf %154, %156 : vector<10x66xf32>
    %158 = vector.extract_strided_slice %4 {offsets = [0, 1], sizes = [10, 1], strides = [1, 1]} : vector<10x2xf32> to vector<10x1xf32>
    %159 = vector.broadcast %158 : vector<10x1xf32> to vector<10x66xf32>
    %160 = arith.mulf %157, %159 : vector<10x66xf32>
    %161 = arith.addf %151, %160 : vector<10x66xf32>
    %162 = vector.extract_strided_slice %161 {offsets = [0, 0], sizes = [10, 16], strides = [1, 1]} : vector<10x66xf32> to vector<10x16xf32>
    %163 = vector.extract_strided_slice %161 {offsets = [0, 16], sizes = [10, 1], strides = [1, 1]} : vector<10x66xf32> to vector<10x1xf32>
    %cst_71 = arith.constant 0.000000e+00 : f32
    %164 = vector.broadcast %cst_71 : f32 to vector<10x1xf32>
    %165 = arith.maximumf %163, %164 : vector<10x1xf32>
    %166 = vector.broadcast %cst_71 : f32 to vector<10x1xf32>
    %167 = arith.subf %163, %166 : vector<10x1xf32>
    %168 = arith.cmpf one, %167, %167 : vector<10x1xf32>
    %169 = vector.broadcast %cst_71 : f32 to vector<10x1xf32>
    %170 = arith.addf %163, %169 : vector<10x1xf32>
    %171 = math.absf %167 : vector<10x1xf32>
    %cst_72 = arith.constant 0.000000e+00 : f32
    %172 = vector.broadcast %cst_72 : f32 to vector<10x1xf32>
    %173 = arith.subf %172, %171 : vector<10x1xf32>
    %174 = math.exp %173 : vector<10x1xf32>
    %175 = math.log1p %174 : vector<10x1xf32>
    %176 = arith.addf %165, %175 : vector<10x1xf32>
    %177 = arith.select %168, %170, %176 : vector<10x1xi1>, vector<10x1xf32>
    %178 = vector.extract_strided_slice %161 {offsets = [0, 17], sizes = [10, 16], strides = [1, 1]} : vector<10x66xf32> to vector<10x16xf32>
    %179 = vector.extract_strided_slice %161 {offsets = [0, 33], sizes = [10, 1], strides = [1, 1]} : vector<10x66xf32> to vector<10x1xf32>
    %cst_73 = arith.constant 0.000000e+00 : f32
    %180 = vector.broadcast %cst_73 : f32 to vector<10x1xf32>
    %181 = arith.maximumf %179, %180 : vector<10x1xf32>
    %182 = vector.broadcast %cst_73 : f32 to vector<10x1xf32>
    %183 = arith.subf %179, %182 : vector<10x1xf32>
    %184 = arith.cmpf one, %183, %183 : vector<10x1xf32>
    %185 = vector.broadcast %cst_73 : f32 to vector<10x1xf32>
    %186 = arith.addf %179, %185 : vector<10x1xf32>
    %187 = math.absf %183 : vector<10x1xf32>
    %cst_74 = arith.constant 0.000000e+00 : f32
    %188 = vector.broadcast %cst_74 : f32 to vector<10x1xf32>
    %189 = arith.subf %188, %187 : vector<10x1xf32>
    %190 = math.exp %189 : vector<10x1xf32>
    %191 = math.log1p %190 : vector<10x1xf32>
    %192 = arith.addf %181, %191 : vector<10x1xf32>
    %193 = arith.select %184, %186, %192 : vector<10x1xi1>, vector<10x1xf32>
    %194 = vector.extract_strided_slice %161 {offsets = [0, 34], sizes = [10, 16], strides = [1, 1]} : vector<10x66xf32> to vector<10x16xf32>
    %195 = arith.negf %194 : vector<10x16xf32>
    %196 = math.exp %195 : vector<10x16xf32>
    %cst_75 = arith.constant 1.000000e+00 : f32
    %197 = vector.broadcast %cst_75 : f32 to vector<10x16xf32>
    %198 = arith.addf %197, %196 : vector<10x16xf32>
    %199 = arith.divf %197, %198 : vector<10x16xf32>
    %200 = vector.extract_strided_slice %161 {offsets = [0, 50], sizes = [10, 16], strides = [1, 1]} : vector<10x66xf32> to vector<10x16xf32>
    %201 = vector.shape_cast %162 : vector<10x16xf32> to vector<10x1x16xf32>
    %cst_76 = arith.constant 1.000000e-16 : f32
    %202 = vector.broadcast %cst_76 : f32 to vector<10x1x16xf32>
    %203 = arith.addf %201, %202 : vector<10x1x16xf32>
    %204 = vector.broadcast %203 : vector<10x1x16xf32> to vector<10x8x16xf32>
    %205 = arith.mulf %137, %204 : vector<10x8x16xf32>
    %cst_77 = arith.constant dense<0.000000e+00> : vector<10x8xf32>
    %206 = vector.multi_reduction <add>, %205, %cst_77 [2] : vector<10x8x16xf32> to vector<10x8xf32>
    %207 = arith.mulf %203, %203 : vector<10x1x16xf32>
    %cst_78 = arith.constant dense<0.000000e+00> : vector<10x1xf32>
    %208 = vector.multi_reduction <add>, %207, %cst_78 [2] : vector<10x1x16xf32> to vector<10x1xf32>
    %209 = math.sqrt %208 : vector<10x1xf32>
    %210 = vector.broadcast %209 : vector<10x1xf32> to vector<10x8xf32>
    %211 = arith.mulf %140, %210 : vector<10x8xf32>
    %cst_79 = arith.constant 9.99999993E-9 : f32
    %212 = vector.broadcast %cst_79 : f32 to vector<10x8xf32>
    %213 = arith.maximumf %211, %212 : vector<10x8xf32>
    %214 = arith.divf %206, %213 : vector<10x8xf32>
    %215 = vector.broadcast %177 : vector<10x1xf32> to vector<10x8xf32>
    %216 = arith.mulf %215, %214 : vector<10x8xf32>
    %cst_80 = arith.constant dense<0xFF800000> : vector<10xf32>
    %217 = vector.multi_reduction <maximumf>, %216, %cst_80 [1] : vector<10x8xf32> to vector<10xf32>
    %cst_81 = arith.constant 0xFF800000 : f32
    %218 = vector.broadcast %cst_81 : f32 to vector<10xf32>
    %219 = arith.maximumf %218, %217 : vector<10xf32>
    %220 = vector.shape_cast %219 : vector<10xf32> to vector<10x1xf32>
    %221 = vector.broadcast %220 : vector<10x1xf32> to vector<10x8xf32>
    %222 = arith.subf %216, %221 : vector<10x8xf32>
    %223 = math.exp %222 : vector<10x8xf32>
    %cst_82 = arith.constant dense<0.000000e+00> : vector<10xf32>
    %224 = vector.multi_reduction <add>, %223, %cst_82 [1] : vector<10x8xf32> to vector<10xf32>
    %225 = vector.shape_cast %224 : vector<10xf32> to vector<10x1xf32>
    %226 = vector.broadcast %225 : vector<10x1xf32> to vector<10x8xf32>
    %227 = arith.divf %223, %226 : vector<10x8xf32>
    %228 = vector.shape_cast %227 : vector<10x8xf32> to vector<10x8x1xf32>
    %229 = vector.broadcast %228 : vector<10x8x1xf32> to vector<10x8x16xf32>
    %230 = arith.mulf %229, %135 : vector<10x8x16xf32>
    %cst_83 = arith.constant dense<0.000000e+00> : vector<10x16xf32>
    %231 = vector.multi_reduction <add>, %230, %cst_83 [1] : vector<10x8x16xf32> to vector<10x16xf32>
    %c0_84 = arith.constant 0 : index
    %c0_85 = arith.constant 0 : index
    %232 = vector.load %arg24[%c0_84, %c0_85] : memref<32x144xf32, #tpu.memory_space<vmem>>, vector<32x144xf32>
    %cst_86 = arith.constant dense<0.000000e+00> : vector<10x144xf32>
    %233 = tpu.matmul %98, %232, %cst_86 {dimension_numbers = #tpu.dot_dimension_numbers<[1], [0], [0], [1], [0, 0, 1, 1], [], []>} : vector<10x32xf32>, vector<32x144xf32>, vector<10x144xf32> -> vector<10x144xf32>
    %c0_87 = arith.constant 0 : index
    %c0_88 = arith.constant 0 : index
    %234 = vector.load %arg25[%c0_87, %c0_88] : memref<16x144xf32, #tpu.memory_space<vmem>>, vector<16x144xf32>
    %cst_89 = arith.constant dense<0.000000e+00> : vector<10x144xf32>
    %235 = tpu.matmul %231, %234, %cst_89 {dimension_numbers = #tpu.dot_dimension_numbers<[1], [0], [0], [1], [0, 0, 1, 1], [], []>} : vector<10x16xf32>, vector<16x144xf32>, vector<10x144xf32> -> vector<10x144xf32>
    %236 = arith.addf %233, %235 : vector<10x144xf32>
    %c0_90 = arith.constant 0 : index
    %c0_91 = arith.constant 0 : index
    %237 = vector.load %arg26[%c0_90, %c0_91] : memref<1x144xf32, #tpu.memory_space<vmem>>, vector<1x144xf32>
    %238 = vector.broadcast %237 : vector<1x144xf32> to vector<10x144xf32>
    %239 = arith.addf %236, %238 : vector<10x144xf32>
    %c0_92 = arith.constant 0 : index
    %c0_93 = arith.constant 0 : index
    %240 = vector.load %arg27[%c0_92, %c0_93] : memref<48x144xf32, #tpu.memory_space<vmem>>, vector<48x144xf32>
    %cst_94 = arith.constant dense<0.000000e+00> : vector<10x144xf32>
    %241 = tpu.matmul %10, %240, %cst_94 {dimension_numbers = #tpu.dot_dimension_numbers<[1], [0], [0], [1], [0, 0, 1, 1], [], []>} : vector<10x48xf32>, vector<48x144xf32>, vector<10x144xf32> -> vector<10x144xf32>
    %c0_95 = arith.constant 0 : index
    %c0_96 = arith.constant 0 : index
    %242 = vector.load %arg28[%c0_95, %c0_96] : memref<1x144xf32, #tpu.memory_space<vmem>>, vector<1x144xf32>
    %243 = vector.broadcast %242 : vector<1x144xf32> to vector<10x144xf32>
    %244 = arith.addf %241, %243 : vector<10x144xf32>
    %245 = vector.extract_strided_slice %239 {offsets = [0, 0], sizes = [10, 48], strides = [1, 1]} : vector<10x144xf32> to vector<10x48xf32>
    %246 = vector.extract_strided_slice %244 {offsets = [0, 0], sizes = [10, 48], strides = [1, 1]} : vector<10x144xf32> to vector<10x48xf32>
    %247 = arith.addf %245, %246 : vector<10x48xf32>
    %248 = arith.negf %247 : vector<10x48xf32>
    %249 = math.exp %248 : vector<10x48xf32>
    %cst_97 = arith.constant 1.000000e+00 : f32
    %250 = vector.broadcast %cst_97 : f32 to vector<10x48xf32>
    %251 = arith.addf %250, %249 : vector<10x48xf32>
    %252 = arith.divf %250, %251 : vector<10x48xf32>
    %253 = vector.extract_strided_slice %239 {offsets = [0, 48], sizes = [10, 48], strides = [1, 1]} : vector<10x144xf32> to vector<10x48xf32>
    %254 = vector.extract_strided_slice %244 {offsets = [0, 48], sizes = [10, 48], strides = [1, 1]} : vector<10x144xf32> to vector<10x48xf32>
    %255 = arith.addf %253, %254 : vector<10x48xf32>
    %256 = arith.negf %255 : vector<10x48xf32>
    %257 = math.exp %256 : vector<10x48xf32>
    %cst_98 = arith.constant 1.000000e+00 : f32
    %258 = vector.broadcast %cst_98 : f32 to vector<10x48xf32>
    %259 = arith.addf %258, %257 : vector<10x48xf32>
    %260 = arith.divf %258, %259 : vector<10x48xf32>
    %261 = vector.extract_strided_slice %239 {offsets = [0, 96], sizes = [10, 48], strides = [1, 1]} : vector<10x144xf32> to vector<10x48xf32>
    %262 = vector.extract_strided_slice %244 {offsets = [0, 96], sizes = [10, 48], strides = [1, 1]} : vector<10x144xf32> to vector<10x48xf32>
    %263 = arith.mulf %252, %262 : vector<10x48xf32>
    %264 = arith.addf %261, %263 : vector<10x48xf32>
    %265 = math.tanh %264 : vector<10x48xf32>
    %cst_99 = arith.constant 1.000000e+00 : f32
    %266 = vector.broadcast %cst_99 : f32 to vector<10x48xf32>
    %267 = arith.subf %266, %260 : vector<10x48xf32>
    %268 = arith.mulf %267, %265 : vector<10x48xf32>
    %269 = arith.mulf %260, %10 : vector<10x48xf32>
    %270 = arith.addf %268, %269 : vector<10x48xf32>
    %c0_100 = arith.constant 0 : index
    %c0_101 = arith.constant 0 : index
    %271 = vector.load %arg29[%c0_100, %c0_101] : memref<48x2xf32, #tpu.memory_space<vmem>>, vector<48x2xf32>
    %cst_102 = arith.constant dense<0.000000e+00> : vector<10x2xf32>
    %272 = tpu.matmul %270, %271, %cst_102 {dimension_numbers = #tpu.dot_dimension_numbers<[1], [0], [0], [1], [0, 0, 1, 1], [], []>} : vector<10x48xf32>, vector<48x2xf32>, vector<10x2xf32> -> vector<10x2xf32>
    %c0_103 = arith.constant 0 : index
    %c0_104 = arith.constant 0 : index
    %273 = vector.load %arg30[%c0_103, %c0_104] : memref<1x2xf32, #tpu.memory_space<vmem>>, vector<1x2xf32>
    %274 = vector.broadcast %273 : vector<1x2xf32> to vector<10x2xf32>
    %275 = arith.addf %272, %274 : vector<10x2xf32>
    %276 = vector.shape_cast %178 : vector<10x16xf32> to vector<10x1x16xf32>
    %cst_105 = arith.constant 1.000000e-16 : f32
    %277 = vector.broadcast %cst_105 : f32 to vector<10x1x16xf32>
    %278 = arith.addf %276, %277 : vector<10x1x16xf32>
    %279 = vector.broadcast %278 : vector<10x1x16xf32> to vector<10x8x16xf32>
    %280 = arith.mulf %137, %279 : vector<10x8x16xf32>
    %cst_106 = arith.constant dense<0.000000e+00> : vector<10x8xf32>
    %281 = vector.multi_reduction <add>, %280, %cst_106 [2] : vector<10x8x16xf32> to vector<10x8xf32>
    %282 = arith.mulf %278, %278 : vector<10x1x16xf32>
    %cst_107 = arith.constant dense<0.000000e+00> : vector<10x1xf32>
    %283 = vector.multi_reduction <add>, %282, %cst_107 [2] : vector<10x1x16xf32> to vector<10x1xf32>
    %284 = math.sqrt %283 : vector<10x1xf32>
    %285 = vector.broadcast %284 : vector<10x1xf32> to vector<10x8xf32>
    %286 = arith.mulf %140, %285 : vector<10x8xf32>
    %cst_108 = arith.constant 9.99999993E-9 : f32
    %287 = vector.broadcast %cst_108 : f32 to vector<10x8xf32>
    %288 = arith.maximumf %286, %287 : vector<10x8xf32>
    %289 = arith.divf %281, %288 : vector<10x8xf32>
    %290 = vector.broadcast %193 : vector<10x1xf32> to vector<10x8xf32>
    %291 = arith.mulf %290, %289 : vector<10x8xf32>
    %cst_109 = arith.constant dense<0xFF800000> : vector<10xf32>
    %292 = vector.multi_reduction <maximumf>, %291, %cst_109 [1] : vector<10x8xf32> to vector<10xf32>
    %cst_110 = arith.constant 0xFF800000 : f32
    %293 = vector.broadcast %cst_110 : f32 to vector<10xf32>
    %294 = arith.maximumf %293, %292 : vector<10xf32>
    %295 = vector.shape_cast %294 : vector<10xf32> to vector<10x1xf32>
    %296 = vector.broadcast %295 : vector<10x1xf32> to vector<10x8xf32>
    %297 = arith.subf %291, %296 : vector<10x8xf32>
    %298 = math.exp %297 : vector<10x8xf32>
    %cst_111 = arith.constant dense<0.000000e+00> : vector<10xf32>
    %299 = vector.multi_reduction <add>, %298, %cst_111 [1] : vector<10x8xf32> to vector<10xf32>
    %300 = vector.shape_cast %299 : vector<10xf32> to vector<10x1xf32>
    %301 = vector.broadcast %300 : vector<10x1xf32> to vector<10x8xf32>
    %302 = arith.divf %298, %301 : vector<10x8xf32>
    %303 = vector.shape_cast %302 : vector<10x8xf32> to vector<10x8x1xf32>
    %304 = vector.shape_cast %199 : vector<10x16xf32> to vector<10x1x16xf32>
    %305 = vector.broadcast %303 : vector<10x8x1xf32> to vector<10x8x16xf32>
    %306 = vector.broadcast %304 : vector<10x1x16xf32> to vector<10x8x16xf32>
    %307 = arith.mulf %305, %306 : vector<10x8x16xf32>
    %308 = vector.shape_cast %302 : vector<10x8xf32> to vector<10x8x1xf32>
    %309 = vector.shape_cast %200 : vector<10x16xf32> to vector<10x1x16xf32>
    %310 = vector.broadcast %308 : vector<10x8x1xf32> to vector<10x8x16xf32>
    %311 = vector.broadcast %309 : vector<10x1x16xf32> to vector<10x8x16xf32>
    %312 = arith.mulf %310, %311 : vector<10x8x16xf32>
    %313 = vector.extract_strided_slice %3 {offsets = [0, 0], sizes = [10, 1], strides = [1, 1]} : vector<10x4xf32> to vector<10x1xf32>
    %314 = vector.shape_cast %313 : vector<10x1xf32> to vector<10x1x1xf32>
    %cst_112 = arith.constant 5.000000e-01 : f32
    %315 = vector.broadcast %cst_112 : f32 to vector<10x1x1xf32>
    %316 = arith.cmpf ogt, %314, %315 : vector<10x1x1xf32>
    %cst_113 = arith.constant -1.000000e+30 : f32
    %317 = vector.shape_cast %316 : vector<10x1x1xi1> to vector<10x1x1xi1>
    %318 = vector.broadcast %317 : vector<10x1x1xi1> to vector<10x8x16xi1>
    %319 = vector.broadcast %cst_113 : f32 to vector<10x8x16xf32>
    %320 = arith.select %318, %307, %319 : vector<10x8x16xi1>, vector<10x8x16xf32>
    %cst_114 = arith.constant dense<0xFF800000> : vector<8x16xf32>
    %321 = vector.multi_reduction <maximumf>, %320, %cst_114 [0] : vector<10x8x16xf32> to vector<8x16xf32>
    %cst_115 = arith.constant 0.000000e+00 : f32
    %322 = vector.broadcast %cst_115 : f32 to vector<8x16xf32>
    %323 = arith.maximumf %321, %322 : vector<8x16xf32>
    %cst_116 = arith.constant -1.000000e+30 : f32
    %324 = vector.shape_cast %316 : vector<10x1x1xi1> to vector<10x1x1xi1>
    %325 = vector.broadcast %324 : vector<10x1x1xi1> to vector<10x8x16xi1>
    %326 = vector.broadcast %cst_116 : f32 to vector<10x8x16xf32>
    %327 = arith.select %325, %312, %326 : vector<10x8x16xi1>, vector<10x8x16xf32>
    %cst_117 = arith.constant dense<0xFF800000> : vector<8x16xf32>
    %328 = vector.multi_reduction <maximumf>, %327, %cst_117 [0] : vector<10x8x16xf32> to vector<8x16xf32>
    %cst_118 = arith.constant 0.000000e+00 : f32
    %329 = vector.broadcast %cst_118 : f32 to vector<8x16xf32>
    %330 = arith.maximumf %328, %329 : vector<8x16xf32>
    %cst_119 = arith.constant 1.000000e+00 : f32
    %331 = vector.broadcast %cst_119 : f32 to vector<8x16xf32>
    %332 = arith.subf %331, %323 : vector<8x16xf32>
    %333 = vector.extract_strided_slice %11 {offsets = [0, 0, 0], sizes = [1, 8, 16], strides = [1, 1, 1]} : vector<4x8x16xf32> to vector<1x8x16xf32>
    %334 = vector.shape_cast %333 : vector<1x8x16xf32> to vector<8x16xf32>
    %335 = arith.mulf %332, %334 : vector<8x16xf32>
    %336 = arith.addf %335, %330 : vector<8x16xf32>
    %337 = vector.extract_strided_slice %3 {offsets = [0, 1], sizes = [10, 1], strides = [1, 1]} : vector<10x4xf32> to vector<10x1xf32>
    %338 = vector.shape_cast %337 : vector<10x1xf32> to vector<10x1x1xf32>
    %cst_120 = arith.constant 5.000000e-01 : f32
    %339 = vector.broadcast %cst_120 : f32 to vector<10x1x1xf32>
    %340 = arith.cmpf ogt, %338, %339 : vector<10x1x1xf32>
    %cst_121 = arith.constant -1.000000e+30 : f32
    %341 = vector.shape_cast %340 : vector<10x1x1xi1> to vector<10x1x1xi1>
    %342 = vector.broadcast %341 : vector<10x1x1xi1> to vector<10x8x16xi1>
    %343 = vector.broadcast %cst_121 : f32 to vector<10x8x16xf32>
    %344 = arith.select %342, %307, %343 : vector<10x8x16xi1>, vector<10x8x16xf32>
    %cst_122 = arith.constant dense<0xFF800000> : vector<8x16xf32>
    %345 = vector.multi_reduction <maximumf>, %344, %cst_122 [0] : vector<10x8x16xf32> to vector<8x16xf32>
    %cst_123 = arith.constant 0.000000e+00 : f32
    %346 = vector.broadcast %cst_123 : f32 to vector<8x16xf32>
    %347 = arith.maximumf %345, %346 : vector<8x16xf32>
    %cst_124 = arith.constant -1.000000e+30 : f32
    %348 = vector.shape_cast %340 : vector<10x1x1xi1> to vector<10x1x1xi1>
    %349 = vector.broadcast %348 : vector<10x1x1xi1> to vector<10x8x16xi1>
    %350 = vector.broadcast %cst_124 : f32 to vector<10x8x16xf32>
    %351 = arith.select %349, %312, %350 : vector<10x8x16xi1>, vector<10x8x16xf32>
    %cst_125 = arith.constant dense<0xFF800000> : vector<8x16xf32>
    %352 = vector.multi_reduction <maximumf>, %351, %cst_125 [0] : vector<10x8x16xf32> to vector<8x16xf32>
    %cst_126 = arith.constant 0.000000e+00 : f32
    %353 = vector.broadcast %cst_126 : f32 to vector<8x16xf32>
    %354 = arith.maximumf %352, %353 : vector<8x16xf32>
    %cst_127 = arith.constant 1.000000e+00 : f32
    %355 = vector.broadcast %cst_127 : f32 to vector<8x16xf32>
    %356 = arith.subf %355, %347 : vector<8x16xf32>
    %357 = vector.extract_strided_slice %11 {offsets = [1, 0, 0], sizes = [1, 8, 16], strides = [1, 1, 1]} : vector<4x8x16xf32> to vector<1x8x16xf32>
    %358 = vector.shape_cast %357 : vector<1x8x16xf32> to vector<8x16xf32>
    %359 = arith.mulf %356, %358 : vector<8x16xf32>
    %360 = arith.addf %359, %354 : vector<8x16xf32>
    %361 = vector.extract_strided_slice %3 {offsets = [0, 2], sizes = [10, 1], strides = [1, 1]} : vector<10x4xf32> to vector<10x1xf32>
    %362 = vector.shape_cast %361 : vector<10x1xf32> to vector<10x1x1xf32>
    %cst_128 = arith.constant 5.000000e-01 : f32
    %363 = vector.broadcast %cst_128 : f32 to vector<10x1x1xf32>
    %364 = arith.cmpf ogt, %362, %363 : vector<10x1x1xf32>
    %cst_129 = arith.constant -1.000000e+30 : f32
    %365 = vector.shape_cast %364 : vector<10x1x1xi1> to vector<10x1x1xi1>
    %366 = vector.broadcast %365 : vector<10x1x1xi1> to vector<10x8x16xi1>
    %367 = vector.broadcast %cst_129 : f32 to vector<10x8x16xf32>
    %368 = arith.select %366, %307, %367 : vector<10x8x16xi1>, vector<10x8x16xf32>
    %cst_130 = arith.constant dense<0xFF800000> : vector<8x16xf32>
    %369 = vector.multi_reduction <maximumf>, %368, %cst_130 [0] : vector<10x8x16xf32> to vector<8x16xf32>
    %cst_131 = arith.constant 0.000000e+00 : f32
    %370 = vector.broadcast %cst_131 : f32 to vector<8x16xf32>
    %371 = arith.maximumf %369, %370 : vector<8x16xf32>
    %cst_132 = arith.constant -1.000000e+30 : f32
    %372 = vector.shape_cast %364 : vector<10x1x1xi1> to vector<10x1x1xi1>
    %373 = vector.broadcast %372 : vector<10x1x1xi1> to vector<10x8x16xi1>
    %374 = vector.broadcast %cst_132 : f32 to vector<10x8x16xf32>
    %375 = arith.select %373, %312, %374 : vector<10x8x16xi1>, vector<10x8x16xf32>
    %cst_133 = arith.constant dense<0xFF800000> : vector<8x16xf32>
    %376 = vector.multi_reduction <maximumf>, %375, %cst_133 [0] : vector<10x8x16xf32> to vector<8x16xf32>
    %cst_134 = arith.constant 0.000000e+00 : f32
    %377 = vector.broadcast %cst_134 : f32 to vector<8x16xf32>
    %378 = arith.maximumf %376, %377 : vector<8x16xf32>
    %cst_135 = arith.constant 1.000000e+00 : f32
    %379 = vector.broadcast %cst_135 : f32 to vector<8x16xf32>
    %380 = arith.subf %379, %371 : vector<8x16xf32>
    %381 = vector.extract_strided_slice %11 {offsets = [2, 0, 0], sizes = [1, 8, 16], strides = [1, 1, 1]} : vector<4x8x16xf32> to vector<1x8x16xf32>
    %382 = vector.shape_cast %381 : vector<1x8x16xf32> to vector<8x16xf32>
    %383 = arith.mulf %380, %382 : vector<8x16xf32>
    %384 = arith.addf %383, %378 : vector<8x16xf32>
    %385 = vector.extract_strided_slice %3 {offsets = [0, 3], sizes = [10, 1], strides = [1, 1]} : vector<10x4xf32> to vector<10x1xf32>
    %386 = vector.shape_cast %385 : vector<10x1xf32> to vector<10x1x1xf32>
    %cst_136 = arith.constant 5.000000e-01 : f32
    %387 = vector.broadcast %cst_136 : f32 to vector<10x1x1xf32>
    %388 = arith.cmpf ogt, %386, %387 : vector<10x1x1xf32>
    %cst_137 = arith.constant -1.000000e+30 : f32
    %389 = vector.shape_cast %388 : vector<10x1x1xi1> to vector<10x1x1xi1>
    %390 = vector.broadcast %389 : vector<10x1x1xi1> to vector<10x8x16xi1>
    %391 = vector.broadcast %cst_137 : f32 to vector<10x8x16xf32>
    %392 = arith.select %390, %307, %391 : vector<10x8x16xi1>, vector<10x8x16xf32>
    %cst_138 = arith.constant dense<0xFF800000> : vector<8x16xf32>
    %393 = vector.multi_reduction <maximumf>, %392, %cst_138 [0] : vector<10x8x16xf32> to vector<8x16xf32>
    %cst_139 = arith.constant 0.000000e+00 : f32
    %394 = vector.broadcast %cst_139 : f32 to vector<8x16xf32>
    %395 = arith.maximumf %393, %394 : vector<8x16xf32>
    %cst_140 = arith.constant -1.000000e+30 : f32
    %396 = vector.shape_cast %388 : vector<10x1x1xi1> to vector<10x1x1xi1>
    %397 = vector.broadcast %396 : vector<10x1x1xi1> to vector<10x8x16xi1>
    %398 = vector.broadcast %cst_140 : f32 to vector<10x8x16xf32>
    %399 = arith.select %397, %312, %398 : vector<10x8x16xi1>, vector<10x8x16xf32>
    %cst_141 = arith.constant dense<0xFF800000> : vector<8x16xf32>
    %400 = vector.multi_reduction <maximumf>, %399, %cst_141 [0] : vector<10x8x16xf32> to vector<8x16xf32>
    %cst_142 = arith.constant 0.000000e+00 : f32
    %401 = vector.broadcast %cst_142 : f32 to vector<8x16xf32>
    %402 = arith.maximumf %400, %401 : vector<8x16xf32>
    %cst_143 = arith.constant 1.000000e+00 : f32
    %403 = vector.broadcast %cst_143 : f32 to vector<8x16xf32>
    %404 = arith.subf %403, %395 : vector<8x16xf32>
    %405 = vector.extract_strided_slice %11 {offsets = [3, 0, 0], sizes = [1, 8, 16], strides = [1, 1, 1]} : vector<4x8x16xf32> to vector<1x8x16xf32>
    %406 = vector.shape_cast %405 : vector<1x8x16xf32> to vector<8x16xf32>
    %407 = arith.mulf %404, %406 : vector<8x16xf32>
    %408 = arith.addf %407, %402 : vector<8x16xf32>
    %c0_144 = arith.constant 0 : index
    %c0_145 = arith.constant 0 : index
    %c0_146 = arith.constant 0 : index
    %409 = vector.load %arg33[%c0_144, %c0_145, %c0_146] : memref<1x10x2xf32, #tpu.memory_space<vmem>>, vector<1x10x2xf32>
    %410 = vector.shape_cast %409 : vector<1x10x2xf32> to vector<10x2xf32>
    %411 = vector.shape_cast %275 : vector<10x2xf32> to vector<1x10x2xf32>
    tpu.vector_store %arg33[%c0_144, %c0_145, %c0_146], %411 {strides = array<i32>} : memref<1x10x2xf32, #tpu.memory_space<vmem>>, vector<1x10x2xf32>,
    %c0_147 = arith.constant 0 : index
    %c0_148 = arith.constant 0 : index
    %412 = vector.load %arg34[%c0_147, %c0_148] : memref<10x16xf32, #tpu.memory_space<vmem>>, vector<10x16xf32>
    tpu.vector_store %arg34[%c0_147, %c0_148], %231 {strides = array<i32>} : memref<10x16xf32, #tpu.memory_space<vmem>>, vector<10x16xf32>,
    %c0_149 = arith.constant 0 : index
    %c0_150 = arith.constant 0 : index
    %413 = vector.load %arg35[%c0_149, %c0_150] : memref<10x32xf32, #tpu.memory_space<vmem>>, vector<10x32xf32>
    tpu.vector_store %arg35[%c0_149, %c0_150], %71 {strides = array<i32>} : memref<10x32xf32, #tpu.memory_space<vmem>>, vector<10x32xf32>,
    %c0_151 = arith.constant 0 : index
    %c0_152 = arith.constant 0 : index
    %414 = vector.load %arg36[%c0_151, %c0_152] : memref<10x32xf32, #tpu.memory_space<vmem>>, vector<10x32xf32>
    tpu.vector_store %arg36[%c0_151, %c0_152], %98 {strides = array<i32>} : memref<10x32xf32, #tpu.memory_space<vmem>>, vector<10x32xf32>,
    %c0_153 = arith.constant 0 : index
    %c0_154 = arith.constant 0 : index
    %415 = vector.load %arg37[%c0_153, %c0_154] : memref<10x48xf32, #tpu.memory_space<vmem>>, vector<10x48xf32>
    tpu.vector_store %arg37[%c0_153, %c0_154], %270 {strides = array<i32>} : memref<10x48xf32, #tpu.memory_space<vmem>>, vector<10x48xf32>,
    %c0_155 = arith.constant 0 : index
    %c0_156 = arith.constant 0 : index
    %c0_157 = arith.constant 0 : index
    %416 = vector.load %arg38[%c0_155, %c0_156, %c0_157] : memref<4x8x16xf32, #tpu.memory_space<vmem>>, vector<1x8x16xf32>
    %417 = vector.shape_cast %416 : vector<1x8x16xf32> to vector<8x16xf32>
    %418 = vector.shape_cast %336 : vector<8x16xf32> to vector<1x8x16xf32>
    tpu.vector_store %arg38[%c0_155, %c0_156, %c0_157], %418 {strides = array<i32>} : memref<4x8x16xf32, #tpu.memory_space<vmem>>, vector<1x8x16xf32>,
    %c1_158 = arith.constant 1 : index
    %c0_159 = arith.constant 0 : index
    %c0_160 = arith.constant 0 : index
    %419 = vector.load %arg38[%c1_158, %c0_159, %c0_160] : memref<4x8x16xf32, #tpu.memory_space<vmem>>, vector<1x8x16xf32>
    %420 = vector.shape_cast %419 : vector<1x8x16xf32> to vector<8x16xf32>
    %421 = vector.shape_cast %360 : vector<8x16xf32> to vector<1x8x16xf32>
    tpu.vector_store %arg38[%c1_158, %c0_159, %c0_160], %421 {strides = array<i32>} : memref<4x8x16xf32, #tpu.memory_space<vmem>>, vector<1x8x16xf32>,
    %c2 = arith.constant 2 : index
    %c0_161 = arith.constant 0 : index
    %c0_162 = arith.constant 0 : index
    %422 = vector.load %arg38[%c2, %c0_161, %c0_162] : memref<4x8x16xf32, #tpu.memory_space<vmem>>, vector<1x8x16xf32>
    %423 = vector.shape_cast %422 : vector<1x8x16xf32> to vector<8x16xf32>
    %424 = vector.shape_cast %384 : vector<8x16xf32> to vector<1x8x16xf32>
    tpu.vector_store %arg38[%c2, %c0_161, %c0_162], %424 {strides = array<i32>} : memref<4x8x16xf32, #tpu.memory_space<vmem>>, vector<1x8x16xf32>,
    %c3 = arith.constant 3 : index
    %c0_163 = arith.constant 0 : index
    %c0_164 = arith.constant 0 : index
    %425 = vector.load %arg38[%c3, %c0_163, %c0_164] : memref<4x8x16xf32, #tpu.memory_space<vmem>>, vector<1x8x16xf32>
    %426 = vector.shape_cast %425 : vector<1x8x16xf32> to vector<8x16xf32>
    %427 = vector.shape_cast %408 : vector<8x16xf32> to vector<1x8x16xf32>
    tpu.vector_store %arg38[%c3, %c0_163, %c0_164], %427 {strides = array<i32>} : memref<4x8x16xf32, #tpu.memory_space<vmem>>, vector<1x8x16xf32>,
    %c0_165 = arith.constant 0 : index
    %c0_166 = arith.constant 0 : index
    %428 = vector.load %arg11[%c0_165, %c0_166] : memref<10x10xf32, #tpu.memory_space<vmem>>, vector<10x10xf32>
    %cst_167 = arith.constant dense<0.000000e+00> : vector<10x2xf32>
    %429 = tpu.matmul %428, %275, %cst_167 {dimension_numbers = #tpu.dot_dimension_numbers<[1], [0], [0], [1], [0, 0, 1, 1], [], []>} : vector<10x10xf32>, vector<10x2xf32>, vector<10x2xf32> -> vector<10x2xf32>
    %c0_168 = arith.constant 0 : index
    %c0_169 = arith.constant 0 : index
    %430 = vector.load %arg41[%c0_168, %c0_169] : memref<10x2xf32, #tpu.memory_space<vmem>>, vector<10x2xf32>
    %431 = arith.addf %430, %429 : vector<10x2xf32>
    %c0_170 = arith.constant 0 : index
    %c0_171 = arith.constant 0 : index
    %432 = vector.load %arg41[%c0_170, %c0_171] : memref<10x2xf32, #tpu.memory_space<vmem>>, vector<10x2xf32>
    tpu.vector_store %arg41[%c0_170, %c0_171], %431 {strides = array<i32>} : memref<10x2xf32, #tpu.memory_space<vmem>>, vector<10x2xf32>,
    %c0_172 = arith.constant 0 : index
    %c0_173 = arith.constant 0 : index
    %433 = vector.load %arg3[%c0_172, %c0_173] : memref<10x2xf32, #tpu.memory_space<vmem>>, vector<10x2xf32>
    %c0_174 = arith.constant 0 : index
    %c0_175 = arith.constant 0 : index
    %434 = vector.load %arg41[%c0_174, %c0_175] : memref<10x2xf32, #tpu.memory_space<vmem>>, vector<10x2xf32>
    %435 = arith.addf %433, %434 : vector<10x2xf32>
    %c0_176 = arith.constant 0 : index
    %c0_177 = arith.constant 0 : index
    %436 = vector.load %arg39[%c0_176, %c0_177] : memref<10x2xf32, #tpu.memory_space<vmem>>, vector<10x2xf32>
    tpu.vector_store %arg39[%c0_176, %c0_177], %435 {strides = array<i32>} : memref<10x2xf32, #tpu.memory_space<vmem>>, vector<10x2xf32>,
    %c0_178 = arith.constant 0 : index
    %c0_179 = arith.constant 0 : index
    %437 = vector.load %arg40[%c0_178, %c0_179] : memref<10x2xf32, #tpu.memory_space<vmem>>, vector<10x2xf32>
    tpu.vector_store %arg40[%c0_178, %c0_179], %429 {strides = array<i32>} : memref<10x2xf32, #tpu.memory_space<vmem>>, vector<10x2xf32>,
    return
  }
  func.func @transform_0(%arg0: i32) -> (i32, i32) {
    %c0_i32 = arith.constant 0 : i32
    %c0_i32_0 = arith.constant 0 : i32
    %c0_i32_1 = arith.constant 0 : i32
    return %c0_i32, %c0_i32_0 : i32, i32
  }
  func.func @transform_1(%arg0: i32) -> (i32, i32) {
    %c0_i32 = arith.constant 0 : i32
    %c0_i32_0 = arith.constant 0 : i32
    %c0_i32_1 = arith.constant 0 : i32
    return %c0_i32, %c0_i32_0 : i32, i32
  }
  func.func @transform_2(%arg0: i32) -> (i32, i32) {
    %c0_i32 = arith.constant 0 : i32
    %c0_i32_0 = arith.constant 0 : i32
    %c0_i32_1 = arith.constant 0 : i32
    return %c0_i32, %c0_i32_0 : i32, i32
  }
  func.func @transform_3(%arg0: i32) -> (i32, i32) {
    %c0_i32 = arith.constant 0 : i32
    %c0_i32_0 = arith.constant 0 : i32
    %c0_i32_1 = arith.constant 0 : i32
    return %c0_i32, %c0_i32_0 : i32, i32
  }
  func.func @transform_4(%arg0: i32) -> (i32, i32) {
    %c0_i32 = arith.constant 0 : i32
    %c0_i32_0 = arith.constant 0 : i32
    %c0_i32_1 = arith.constant 0 : i32
    return %c0_i32, %c0_i32_0 : i32, i32
  }
  func.func @transform_5(%arg0: i32) -> (i32, i32) {
    %c0_i32 = arith.constant 0 : i32
    %c0_i32_0 = arith.constant 0 : i32
    %c0_i32_1 = arith.constant 0 : i32
    return %c0_i32, %c0_i32_0 : i32, i32
  }
  func.func @transform_6(%arg0: i32) -> (i32, i32) {
    %c0_i32 = arith.constant 0 : i32
    %c0_i32_0 = arith.constant 0 : i32
    %c0_i32_1 = arith.constant 0 : i32
    return %c0_i32, %c0_i32_0 : i32, i32
  }
  func.func @transform_7(%arg0: i32) -> (i32, i32, i32) {
    %c0_i32 = arith.constant 0 : i32
    %c0_i32_0 = arith.constant 0 : i32
    %c0_i32_1 = arith.constant 0 : i32
    %c0_i32_2 = arith.constant 0 : i32
    return %c0_i32, %c0_i32_0, %c0_i32_1 : i32, i32, i32
  }
  func.func @transform_8(%arg0: i32) -> (i32, i32) {
    %c0_i32 = arith.constant 0 : i32
    %c0_i32_0 = arith.constant 0 : i32
    %c0_i32_1 = arith.constant 0 : i32
    return %c0_i32, %c0_i32_0 : i32, i32
  }
  func.func @transform_9(%arg0: i32) -> (i32, i32) {
    %c0_i32 = arith.constant 0 : i32
    %c0_i32_0 = arith.constant 0 : i32
    %c0_i32_1 = arith.constant 0 : i32
    return %c0_i32, %c0_i32_0 : i32, i32
  }
  func.func @transform_10(%arg0: i32) -> (i32, i32) {
    %c0_i32 = arith.constant 0 : i32
    %c0_i32_0 = arith.constant 0 : i32
    %c0_i32_1 = arith.constant 0 : i32
    return %c0_i32, %c0_i32_0 : i32, i32
  }
  func.func @transform_11(%arg0: i32) -> (i32, i32) {
    %c0_i32 = arith.constant 0 : i32
    %c0_i32_0 = arith.constant 0 : i32
    %c0_i32_1 = arith.constant 0 : i32
    return %c0_i32, %c0_i32_0 : i32, i32
  }
  func.func @transform_12(%arg0: i32) -> (i32, i32) {
    %c0_i32 = arith.constant 0 : i32
    %c0_i32_0 = arith.constant 0 : i32
    %c0_i32_1 = arith.constant 0 : i32
    return %c0_i32, %c0_i32_0 : i32, i32
  }
  func.func @transform_13(%arg0: i32) -> (i32, i32) {
    %c0_i32 = arith.constant 0 : i32
    %c0_i32_0 = arith.constant 0 : i32
    %c0_i32_1 = arith.constant 0 : i32
    return %c0_i32, %c0_i32_0 : i32, i32
  }
  func.func @transform_14(%arg0: i32) -> (i32, i32) {
    %c0_i32 = arith.constant 0 : i32
    %c0_i32_0 = arith.constant 0 : i32
    %c0_i32_1 = arith.constant 0 : i32
    return %c0_i32, %c0_i32_0 : i32, i32
  }
  func.func @transform_15(%arg0: i32) -> (i32, i32) {
    %c0_i32 = arith.constant 0 : i32
    %c0_i32_0 = arith.constant 0 : i32
    %c0_i32_1 = arith.constant 0 : i32
    return %c0_i32, %c0_i32_0 : i32, i32
  }
  func.func @transform_16(%arg0: i32) -> (i32, i32) {
    %c0_i32 = arith.constant 0 : i32
    %c0_i32_0 = arith.constant 0 : i32
    %c0_i32_1 = arith.constant 0 : i32
    return %c0_i32, %c0_i32_0 : i32, i32
  }
  func.func @transform_17(%arg0: i32) -> (i32, i32) {
    %c0_i32 = arith.constant 0 : i32
    %c0_i32_0 = arith.constant 0 : i32
    %c0_i32_1 = arith.constant 0 : i32
    return %c0_i32, %c0_i32_0 : i32, i32
  }
  func.func @transform_18(%arg0: i32) -> (i32, i32) {
    %c0_i32 = arith.constant 0 : i32
    %c0_i32_0 = arith.constant 0 : i32
    %c0_i32_1 = arith.constant 0 : i32
    return %c0_i32, %c0_i32_0 : i32, i32
  }
  func.func @transform_19(%arg0: i32) -> (i32, i32) {
    %c0_i32 = arith.constant 0 : i32
    %c0_i32_0 = arith.constant 0 : i32
    %c0_i32_1 = arith.constant 0 : i32
    return %c0_i32, %c0_i32_0 : i32, i32
  }
  func.func @transform_20(%arg0: i32) -> (i32, i32) {
    %c0_i32 = arith.constant 0 : i32
    %c0_i32_0 = arith.constant 0 : i32
    %c0_i32_1 = arith.constant 0 : i32
    return %c0_i32, %c0_i32_0 : i32, i32
  }
  func.func @transform_21(%arg0: i32) -> (i32, i32) {
    %c0_i32 = arith.constant 0 : i32
    %c0_i32_0 = arith.constant 0 : i32
    %c0_i32_1 = arith.constant 0 : i32
    return %c0_i32, %c0_i32_0 : i32, i32
  }
  func.func @transform_22(%arg0: i32) -> (i32, i32) {
    %c0_i32 = arith.constant 0 : i32
    %c0_i32_0 = arith.constant 0 : i32
    %c0_i32_1 = arith.constant 0 : i32
    return %c0_i32, %c0_i32_0 : i32, i32
  }
  func.func @transform_23(%arg0: i32) -> (i32, i32) {
    %c0_i32 = arith.constant 0 : i32
    %c0_i32_0 = arith.constant 0 : i32
    %c0_i32_1 = arith.constant 0 : i32
    return %c0_i32, %c0_i32_0 : i32, i32
  }
  func.func @transform_24(%arg0: i32) -> (i32, i32) {
    %c0_i32 = arith.constant 0 : i32
    %c0_i32_0 = arith.constant 0 : i32
    %c0_i32_1 = arith.constant 0 : i32
    return %c0_i32, %c0_i32_0 : i32, i32
  }
  func.func @transform_25(%arg0: i32) -> (i32, i32) {
    %c0_i32 = arith.constant 0 : i32
    %c0_i32_0 = arith.constant 0 : i32
    %c0_i32_1 = arith.constant 0 : i32
    return %c0_i32, %c0_i32_0 : i32, i32
  }
  func.func @transform_26(%arg0: i32) -> (i32, i32) {
    %c0_i32 = arith.constant 0 : i32
    %c0_i32_0 = arith.constant 0 : i32
    %c0_i32_1 = arith.constant 0 : i32
    return %c0_i32, %c0_i32_0 : i32, i32
  }
  func.func @transform_27(%arg0: i32) -> (i32, i32) {
    %c0_i32 = arith.constant 0 : i32
    %c0_i32_0 = arith.constant 0 : i32
    %c0_i32_1 = arith.constant 0 : i32
    return %c0_i32, %c0_i32_0 : i32, i32
  }
  func.func @transform_28(%arg0: i32) -> (i32, i32) {
    %c0_i32 = arith.constant 0 : i32
    %c0_i32_0 = arith.constant 0 : i32
    %c0_i32_1 = arith.constant 0 : i32
    return %c0_i32, %c0_i32_0 : i32, i32
  }
  func.func @transform_29(%arg0: i32) -> (i32, i32) {
    %c0_i32 = arith.constant 0 : i32
    %c0_i32_0 = arith.constant 0 : i32
    %c0_i32_1 = arith.constant 0 : i32
    return %c0_i32, %c0_i32_0 : i32, i32
  }
  func.func @transform_30(%arg0: i32) -> (i32, i32, i32) {
    %c0_i32 = arith.constant 0 : i32
    %c0_i32_0 = arith.constant 0 : i32
    %c0_i32_1 = arith.constant 0 : i32
    %c0_i32_2 = arith.constant 0 : i32
    return %c0_i32, %c0_i32_0, %c0_i32_1 : i32, i32, i32
  }
  func.func @transform_31(%arg0: i32) -> (i32, i32) {
    %c0_i32 = arith.constant 0 : i32
    %c0_i32_0 = arith.constant 0 : i32
    %c0_i32_1 = arith.constant 0 : i32
    return %c0_i32, %c0_i32_0 : i32, i32
  }
  func.func @transform_32(%arg0: i32) -> (i32, i32, i32) {
    %c0_i32 = arith.constant 0 : i32
    %c0_i32_0 = arith.constant 0 : i32
    %c0_i32_1 = arith.constant 0 : i32
    return %arg0, %c0_i32, %c0_i32_0 : i32, i32, i32
  }
}

</mosaic_0001>

<bundles_post_ra>
// kernel: tile.100
= control target key start
LH: loop header
LB: loop body
LE: loop exit
PB: predicated region body
PF: predicated region fallthrough
CT: control target
= control target key end

     0   :  { %vm3_vm0 = vcmask 392192   ;;  %s34_s0 = inlined_call_operand.vmem [shape: f32[2,5,48], index: 0, kind: input, shape index: {}]   ;;  %s35_s1 = inlined_call_operand.vmem [shape: f32[10,48], index: 1, kind: output, shape index: {}]  }
   0x1   :  { %v2_v0 = vld [vmem:[%s34_s0] sm:$0x1f]   ;;  %v10_v1 = vld [vmem:[%s34_s0 + $0x8] sm:$0x1f]  }
   0x2   :  { %4 = vst.msk [vmem:[%s35_s1] sm:$0x1f] %vm3_vm0, %v2_v0  }
   0x3   :  { %11 = vst.msk [vmem:[%s35_s1 + $0x5] sm:$0x1f] %vm3_vm0, %v10_v1  }

// kernel: tile.85
= control target key start
LH: loop header
LB: loop body
LE: loop exit
PB: predicated region body
PF: predicated region fallthrough
CT: control target
= control target key end

     0   :  { %vm3_vm0 = vcmask 130048   ;;  %s34_s0 = inlined_call_operand.vmem [shape: f32[2,5,16], index: 0, kind: input, shape index: {}]   ;;  %s35_s1 = inlined_call_operand.vmem [shape: f32[10,16], index: 1, kind: output, shape index: {}]  }
   0x1   :  { %v2_v0 = vld [vmem:[%s34_s0] sm:$0x1f]   ;;  %v10_v1 = vld [vmem:[%s34_s0 + $0x8] sm:$0x1f]  }
   0x2   :  { %4 = vst.msk [vmem:[%s35_s1] sm:$0x1f] %vm3_vm0, %v2_v0  }
   0x3   :  { %11 = vst.msk [vmem:[%s35_s1 + $0x5] sm:$0x1f] %vm3_vm0, %v10_v1  }

// kernel: tile.90
= control target key start
LH: loop header
LB: loop body
LE: loop exit
PB: predicated region body
PF: predicated region fallthrough
CT: control target
= control target key end

     0   :  { %vm3_vm0 = vcmask 261120   ;;  %s34_s0 = inlined_call_operand.vmem [shape: f32[2,5,32], index: 0, kind: input, shape index: {}]   ;;  %s35_s1 = inlined_call_operand.vmem [shape: f32[10,32], index: 1, kind: output, shape index: {}]  }
   0x1   :  { %v2_v0 = vld [vmem:[%s34_s0] sm:$0x1f]   ;;  %v10_v1 = vld [vmem:[%s34_s0 + $0x8] sm:$0x1f]  }
   0x2   :  { %4 = vst.msk [vmem:[%s35_s1] sm:$0x1f] %vm3_vm0, %v2_v0  }
   0x3   :  { %11 = vst.msk [vmem:[%s35_s1 + $0x5] sm:$0x1f] %vm3_vm0, %v10_v1  }

// kernel: tile.76
= control target key start
LH: loop header
LB: loop body
LE: loop exit
PB: predicated region body
PF: predicated region fallthrough
CT: control target
= control target key end

     0   :  { %s10_s10 = smov 3  ;;  %vm12_vm0 = vcmask 39936   ;;  %s29_s11 = smov 5   ;;  %vm19_vm1 = vcmask 80936   ;;  %s49_s0 = inlined_call_operand.vmem [shape: f32[2,5,2], index: 0, kind: input, shape index: {}]   ;;  %s50_s1 = inlined_call_operand.vmem [shape: f32[10,2], index: 1, kind: output, shape index: {}]  }
   0x1   :  { %v27_v0 = vld [vmem:[%s49_s0 + $0x2] sm:$0x3]  ;;  %v8_v1 = vld [vmem:[%s49_s0] sm:$0x3]  ;;  %s15_s0 = smov 3 }
   0x2   :  { %7 = vst [vmem:[#allocation1 + $0x8] sm:$0x3] %v27_v0 }
   0x3   :  { %9 = vst [vmem:[#allocation1] sm:$0x3] %v8_v1 }
   0xa   :  { %v16_v2 = vld [vmem:[#allocation1 + $0x1] ss:$8 sm:%s15_s0]   ;;  %v11_v3 = vld [vmem:[#allocation1] ss:$8 sm:%s10_s10]  }
   0xb   :  { %17 = vrot.lane.b32.xlu0 %v16_v2, %s29_s11  ;;  %13 = vst.msk [vmem:[#allocation0] sm:$0x3] %vm12_vm0, %v11_v3  }
  0x7d   :  { %v18_v4 = vpop.permute.xlu0 %17  }
  0x7e   :  { %20 = vst.msk [vmem:[#allocation0] sm:$0x3] %vm19_vm1, %v18_v4  }
  0x85   :  { %v23_v5 = vld [vmem:[#allocation0] sm:$0x3] }
  0x86   :  { %26 = vst [vmem:[%s50_s1] sm:$0x3] %v23_v5 }

// kernel: fwd.2
= control target key start
LH: loop header
LB: loop body
LE: loop exit
PB: predicated region body
PF: predicated region fallthrough
CT: control target
= control target key end

     0   :  { %s3593_s6 = smov 1   ;;  %s3594_s10 = smov 2   ;;  %s4772_s0 = inlined_call_operand.smem [shape: u32[34], index: -1, kind: input, shape index: {}] }
   0x1   :  { %s3658_s5 = sld [smem:[%s4772_s0]]   ;;  %s3595_s14 = smov 3  }
   0x2   :  { %s3663_s9 = sld [smem:[%s4772_s0 + %s3593_s6]]   ;;  %s3596_s18 = smov 4  }
   0x3   :  { %s3668_s13 = sld [smem:[%s4772_s0 + %s3594_s10]]   ;;  %s3597_s22 = smov 5  }
   0x4   :  { %s3673_s17 = sld [smem:[%s4772_s0 + %s3595_s14]]   ;;  %s3598_s26 = smov 6  }
   0x5   :  { %s3678_s21 = sld [smem:[%s4772_s0 + %s3596_s18]]   ;;  %s3599_s30 = smov 7  }
   0x6   :  { %s3683_s25 = sld [smem:[%s4772_s0 + %s3597_s22]]   ;;  %s3600_s4 = smov 8  }
   0x7   :  { %s3688_s29 = sld [smem:[%s4772_s0 + %s3598_s26]]   ;;  %s3601_s10 = smov 9  }
   0x8   :  { %s3693_s3 = sld [smem:[%s4772_s0 + %s3599_s30]]   ;;  %s3602_s15 = smov 10  }
   0x9   :  { %s3698_s8 = sld [smem:[%s4772_s0 + %s3600_s4]]   ;;  %s3603_s20 = smov 11  }
   0xa   :  { %s3703_s14 = sld [smem:[%s4772_s0 + %s3601_s10]]   ;;  %s3604_s26 = smov 12  }
   0xb   :  { %s3708_s19 = sld [smem:[%s4772_s0 + %s3602_s15]]   ;;  %s3605_s1 = smov 13  }
   0xc   :  { %4803 = sst [smem:[#allocation20_spill]] %s3683_s25  ;;  %s3606_s7 = smov 14  }
   0xd   :  { %4804 = sst [smem:[#allocation21_spill]] %s3688_s29  ;;  %s3607_s15 = smov 15  }
   0xe   :  { %4805 = sst [smem:[#allocation22_spill]] %s3693_s3  ;;  %s3608_s22 = smov 16  }
   0xf   :  { %4806 = sst [smem:[#allocation23_spill]] %s3698_s8  ;;  %s3609_s28 = smov 17  }
  0x10   :  { %4807 = sst [smem:[#allocation24_spill]] %s3703_s14 }
  0x11   :  { %4808 = sst [smem:[#allocation25_spill]] %s3708_s19 }
  0x12   :  { %s3713_s24 = sld [smem:[%s4772_s0 + %s3603_s20]]  }
  0x13   :  { %s3718_s30 = sld [smem:[%s4772_s0 + %s3604_s26]]  }
  0x14   :  { %s3723_s6 = sld [smem:[%s4772_s0 + %s3605_s1]]  }
  0x15   :  { %s3728_s12 = sld [smem:[%s4772_s0 + %s3606_s7]]   ;;  %s3610_s7 = smov 18  }
  0x16   :  { %s3733_s20 = sld [smem:[%s4772_s0 + %s3607_s15]]   ;;  %s3611_s15 = smov 19  }
  0x17   :  { %s3738_s27 = sld [smem:[%s4772_s0 + %s3608_s22]]   ;;  %s3612_s22 = smov 20  }
  0x18   :  { %4809 = sst [smem:[#allocation26_spill]] %s3713_s24 }
  0x19   :  { %4810 = sst [smem:[#allocation27_spill]] %s3718_s30 }
  0x1a   :  { %s3743_s4 = sld [smem:[%s4772_s0 + %s3609_s28]]   ;;  %s3613_s28 = smov 21  }
  0x1b   :  { %4811 = sst [smem:[#allocation28_spill]] %s3728_s12 }
  0x1c   :  { %4812 = sst [smem:[#allocation29_spill]] %s3733_s20 }
  0x1d   :  { %s3748_s3 = sld [smem:[%s4772_s0 + %s3610_s7]]   ;;  %s3614_s7 = smov 22  }
  0x1e   :  { %s3753_s20 = sld [smem:[%s4772_s0 + %s3611_s15]]   ;;  %s3615_s15 = smov 23  }
  0x1f   :  { %s3758_s30 = sld [smem:[%s4772_s0 + %s3612_s22]]   ;;  %s3616_s22 = smov 24  }
  0x20   :  { %4813 = sst [smem:[#allocation30_spill]] %s3743_s4 }
  0x21   :  { %s3763_s4 = sld [smem:[%s4772_s0 + %s3613_s28]]   ;;  %s3617_s28 = smov 25  }
  0x22   :  { %s3768_s19 = sld [smem:[%s4772_s0 + %s3614_s7]]   ;;  %s3618_s7 = smov 27  }
  0x23   :  { %4814 = sst [smem:[#allocation31_spill]] %s3748_s3 }
  0x24   :  { %4815 = sst [smem:[#allocation32_spill]] %s3753_s20 }
  0x25   :  { %s3773_s20 = sld [smem:[%s4772_s0 + %s3615_s15]]   ;;  %s3619_s15 = smov 28  }
  0x26   :  { %s3778_s24 = sld [smem:[%s4772_s0 + %s3616_s22]]   ;;  %s3620_s22 = smov 29  }
  0x27   :  { %4816 = sst [smem:[#allocation33_spill]] %s3763_s4 }
  0x28   :  { %4817 = sst [smem:[#allocation34_spill]] %s3768_s19 }
  0x29   :  { %s3783_s8 = sld [smem:[%s4772_s0 + %s3617_s28]]   ;;  %s3621_s28 = smov 30  }
  0x2a   :  { %s3788_s19 = sld [smem:[%s4772_s0 + %s3618_s7]]   ;;  %s3622_s7 = smov 31  }
  0x2b   :  { %4818 = sst [smem:[#allocation35_spill]] %s3773_s20 }
  0x2c   :  { %4819 = sst [smem:[#allocation36_spill]] %s3778_s24 }
  0x2d   :  { %s3793_s20 = sld [smem:[%s4772_s0 + %s3619_s15]]   ;;  %s3623_s15 = smov 32  }
  0x2e   :  { %s3798_s24 = sld [smem:[%s4772_s0 + %s3620_s22]]   ;;  %s3624_s22 = smov 33  }
  0x2f   :  { %s3803_s14 = sld [smem:[%s4772_s0 + %s3621_s28]]  }
  0x30   :  { %s3808_s29 = sld [smem:[%s4772_s0 + %s3622_s7]]  }
  0x31   :  { %s3818_s25 = sld [smem:[%s4772_s0 + %s3624_s22]]  }
  0x33   :  { %4820 = sst [smem:[#allocation37_spill]] %s3793_s20 }
  0x34   :  { %s3813_s20 = sld [smem:[%s4772_s0 + %s3623_s15]]  }
  0x37   :  { %4821 = sst [smem:[#allocation38_spill]] %s3818_s25 }
  0x38   :  { %73 = vsyncpa [#allocation3], 0 }
  0x39   :  { %74 = vsyncpa [#allocation5], 0 }
  0x3a   :  { %75 = vsyncpa [#allocation8], 0 }
  0x3b   :  { %76 = vsyncpa [#allocation11], 0 }
  0x3c   :  { %77 = vsyncpa [#allocation14], 0  ;;  %s3820_s28 = smov 0  }
  0x3d LB: > { %s4822_s4 = sld [smem:[#allocation33_spill]]  ;;  %s3826_s1 = sadd.s32 4294967295, %s3591_s28   ;;  %s3591_s28 = sphi %s3820_s28, %s83_s28  }
  0x3e   : > { %s4823_s3 = sld [smem:[#allocation31_spill]]  ;;  %p3013_p0 = scmp.ge.s32.totalorder %s3591_s28, 1 }
  0x3f   : > { %s4824_s12 = sld [smem:[#allocation28_spill]]  ;;  %p812_p1 = scmp.lt.s32.totalorder %s3591_s28, 6 }
  0x40   : > { %4825 = sst [smem:[#allocation39_spill]] %s3591_s28  ;;  %p3014_p2 = scmp.ne.s32.totalorder %s3826_s1, 0 }
  0x41   : > { %p3118_p3 = scmp.eq.s32.totalorder %s3826_s1, 0  ;;  %p3833_p4 = pnand %p3013_p0, %p812_p1 }
  0x42   : > { %s3625_s7 = smov [#allocation4]   ;;  %s3626_s16 = smov [#allocation7]  }
  0x43   : > { %p3093_p5 = pneg %p3833_p4  ;;  %s872_s10 = sshll.u32 %s3625_s7, 4  ;;  %s873_s10 = int_to_ptr.vmem [resolvable:$true] %s872_s10 }
  0x44   : > { %s904_s15 = sshll.u32 %s4823_s3, 4  ;;  %s3848_s18 = sshll.u32 %s3626_s16, 4  ;;  %s3846_s15 = int_to_ptr.hbm [resolvable:$true] %s904_s15  ;;  %s907_s18 = int_to_ptr.vmem [resolvable:$true] %s3848_s18 }
  0x45   : > { %s870_s0 = sshll.u32 %s4824_s12, 4  ;;  %p3841_p6 = pnand %p3118_p3, %p3093_p5  ;;  %s871_s0 = int_to_ptr.hbm [resolvable:$true] %s870_s0 }
  0x46   : > { %s3325_s22 = sshra.s32 %s871_s0, 4  ;;  %s3332_s7 = scalar_lea.hbm %s4824_s12, 32  ;;  %s3326_s22 = int_to_ptr.hbm [resolvable:$true] %s3325_s22 }
  0x47   : > { %s3327_s23 = scalar_lea.hbm %s3326_s22, 32  ;;  %p3852_p8 = pneg %p3841_p6 }
  0x48   : > { %p3328_p7 = scmp.ne.s32.totalorder %s3326_s22, %s3327_s23  ;;  %p3333_p11 = scmp.lt.s32.totalorder %s3326_s22, %s4824_s12 }
  0x49   : > { %p3334_p12 = scmp.lt.s32.totalorder %s3332_s7, %s3327_s23 }
  0x4a   : > { %p3330_p9 = pnand %p3852_p8, %p3328_p7 }
  0x4b   : > { %p3335_p13 = por %p3334_p12, %p3333_p11 }
  0x4c   : > { %p3331_p10 = pneg %p3330_p9 }
  0x4e   : > { %p3336_p0 = pnand %p3335_p13, %p3331_p10 }
  0x50   : > { %3339 = shalt.err (!%p3336_p0)
}
  0x51   : > { %s4782_s16 = smov 256   ;;  %s4784_s28 = smov 16  }
  0x52   : > { %3099 = dma.hbm_to_vmem [thread:$0]  (!%p3841_p6), %s871_s0, 512, %s873_s10, [#allocation5], %s4782_s16, %s4782_s16, %s4784_s28  }
  0x53   : > { %s935_s22 = sshll.u32 %s4822_s4, 4  ;;  %s3355_s23 = sshra.s32 %s3846_s15, 4  ;;  %s3356_s23 = int_to_ptr.hbm [resolvable:$true] %s3355_s23  ;;  %s936_s22 = int_to_ptr.hbm [resolvable:$true] %s935_s22 }
  0x54   : > { %s3357_s7 = scalar_lea.hbm %s3356_s23, 32  ;;  %s3362_s12 = scalar_lea.hbm %s4823_s3, 32 }
  0x55   : > { %p3358_p1 = scmp.ne.s32.totalorder %s3356_s23, %s3357_s7  ;;  %p3363_p9 = scmp.lt.s32.totalorder %s3356_s23, %s4823_s3 }
  0x56   : > { %p3364_p10 = scmp.lt.s32.totalorder %s3362_s12, %s3357_s7 }
  0x57   : > { %p3360_p5 = pnand %p3358_p1, %p3852_p8 }
  0x58   : > { %p3365_p11 = por %p3364_p10, %p3363_p9 }
  0x59   : > { %p3361_p7 = pneg %p3360_p5 }
  0x5b   : > { %p3366_p12 = pnand %p3365_p11, %p3361_p7 }
  0x5d   : > { %3369 = shalt.err (!%p3366_p12)
}
  0x5e   : > { %s4786_s25 = smov 128   ;;  %s4788_s0 = smov 8  }
  0x5f   : > { %3105 = dma.hbm_to_vmem [thread:$0]  (!%p3841_p6), %s3846_s15, 512, %s907_s18, [#allocation8], %s4786_s25, %s4786_s25, %s4788_s0  }
  0x60   : > { %s3631_s10 = smov [#allocation10]   ;;  %s856_s12 = sshll.u32 %s3723_s6, 4  ;;  %s3879_s12 = int_to_ptr.hbm [resolvable:$true] %s856_s12 }
  0x61   : > { %s937_s23 = sshll.u32 %s3631_s10, 4  ;;  %s3385_s7 = sshra.s32 %s936_s22, 4  ;;  %s938_s23 = int_to_ptr.vmem [resolvable:$true] %s937_s23  ;;  %s3386_s7 = int_to_ptr.hbm [resolvable:$true] %s3385_s7 }
  0x62   : > { %s3387_s16 = scalar_lea.hbm %s3386_s7, 32  ;;  %s3392_s28 = scalar_lea.hbm %s4822_s4, 32 }
  0x63   : > { %p3388_p13 = scmp.ne.s32.totalorder %s3386_s7, %s3387_s16  ;;  %p3393_p5 = scmp.lt.s32.totalorder %s3386_s7, %s4822_s4 }
  0x64   : > { %p3394_p7 = scmp.lt.s32.totalorder %s3392_s28, %s3387_s16 }
  0x65   : > { %p3390_p0 = pnand %p3388_p13, %p3852_p8 }
  0x66   : > { %p3395_p9 = por %p3394_p7, %p3393_p5 }
  0x67   : > { %p3391_p1 = pneg %p3390_p0 }
  0x69   : > { %p3396_p10 = pnand %p3395_p9, %p3391_p1 }
  0x6b   : > { %3399 = shalt.err (!%p3396_p10)
}
  0x6c   : > { %s4829_s15 = smov 16   ;;  %s4830_s18 = smov 256  }
  0x6d   : > { %3111 = dma.hbm_to_vmem [thread:$0]  (!%p3841_p6), %s936_s22, 512, %s938_s23, [#allocation11], %s4830_s18, %s4830_s18, %s4829_s15  }
  0x6e   : > { %s887_s10 = sshll.u32 %s3738_s27, 4  ;;  %s3632_s25 = smov [#allocation2]   ;;  %s3891_s10 = int_to_ptr.hbm [resolvable:$true] %s887_s10 }
  0x6f   : > { %s858_s0 = sshll.u32 %s3632_s25, 4  ;;  %s3415_s28 = sshra.s32 %s3879_s12, 4  ;;  %s859_s0 = int_to_ptr.vmem [resolvable:$true] %s858_s0  ;;  %s3416_s28 = int_to_ptr.hbm [resolvable:$true] %s3415_s28 }
  0x70   : > { %s3417_s16 = scalar_lea.hbm %s3416_s28, 64  ;;  %s3422_s7 = scalar_lea.hbm %s3723_s6, 64 }
  0x71   : > { %p3418_p11 = scmp.ne.s32.totalorder %s3416_s28, %s3417_s16  ;;  %p3423_p0 = scmp.lt.s32.totalorder %s3416_s28, %s3723_s6 }
  0x72   : > { %p3424_p1 = scmp.lt.s32.totalorder %s3422_s7, %s3417_s16 }
  0x73   : > { %p3420_p12 = pnand %p3418_p11, %p3852_p8 }
  0x74   : > { %p3425_p5 = por %p3424_p1, %p3423_p0 }
  0x75   : > { %p3421_p13 = pneg %p3420_p12 }
  0x77   : > { %p3426_p7 = pnand %p3425_p5, %p3421_p13 }
  0x79   : > { %3429 = shalt.err (!%p3426_p7)
}
  0x7a   : > { %3096 = dma.hbm_to_vmem [thread:$0]  (!%p3841_p6), %s3879_s12, 1024, %s859_s0, [#allocation3], %s4830_s18, %s4830_s18, %s4829_s15  }
  0x7b   : > { %s3633_s25 = smov [#allocation6]   ;;  %s921_s23 = sshll.u32 %s3758_s30, 4  ;;  %s3905_s23 = int_to_ptr.hbm [resolvable:$true] %s921_s23 }
  0x7c   : > { %s889_s22 = sshll.u32 %s3633_s25, 4  ;;  %s3445_s28 = sshra.s32 %s3891_s10, 4  ;;  %s890_s22 = int_to_ptr.vmem [resolvable:$true] %s889_s22  ;;  %s3446_s28 = int_to_ptr.hbm [resolvable:$true] %s3445_s28 }
  0x7d   : > { %s3447_s16 = scalar_lea.hbm %s3446_s28, 32  ;;  %s3452_s7 = scalar_lea.hbm %s3738_s27, 32 }
  0x7e   : > { %p3448_p9 = scmp.ne.s32.totalorder %s3446_s28, %s3447_s16  ;;  %p3453_p12 = scmp.lt.s32.totalorder %s3446_s28, %s3738_s27 }
  0x7f   : > { %p3454_p13 = scmp.lt.s32.totalorder %s3452_s7, %s3447_s16 }
  0x80   : > { %p3450_p10 = pnand %p3448_p9, %p3852_p8 }
  0x81   : > { %p3455_p0 = por %p3454_p13, %p3453_p12 }
  0x82   : > { %p3451_p11 = pneg %p3450_p10 }
  0x84   : > { %p3456_p1 = pnand %p3455_p0, %p3451_p11 }
  0x86   : > { %3459 = shalt.err (!%p3456_p1)
}
  0x87   : > { %s4831_s0 = smov 8   ;;  %s4832_s12 = smov 128  }
  0x88   : > { %3102 = dma.hbm_to_vmem [thread:$0]  (!%p3841_p6), %s3891_s10, 512, %s890_s22, [#allocation5], %s4832_s12, %s4832_s12, %s4831_s0  }
  0x89   : > { %s958_s25 = sshll.u32 %s3783_s8, 4  ;;  %s3634_s3 = smov [#allocation9]   ;;  %s3919_s25 = int_to_ptr.hbm [resolvable:$true] %s958_s25 }
  0x8a   : > { %s923_s4 = sshll.u32 %s3634_s3, 4  ;;  %s3475_s28 = sshra.s32 %s3905_s23, 4  ;;  %s924_s4 = int_to_ptr.vmem [resolvable:$true] %s923_s4  ;;  %s3476_s28 = int_to_ptr.hbm [resolvable:$true] %s3475_s28 }
  0x8b   : > { %s3477_s16 = scalar_lea.hbm %s3476_s28, 64  ;;  %s3482_s7 = scalar_lea.hbm %s3758_s30, 64 }
  0x8c   : > { %p3478_p5 = scmp.ne.s32.totalorder %s3476_s28, %s3477_s16  ;;  %p3483_p10 = scmp.lt.s32.totalorder %s3476_s28, %s3758_s30 }
  0x8d   : > { %p3484_p11 = scmp.lt.s32.totalorder %s3482_s7, %s3477_s16 }
  0x8e   : > { %p3480_p7 = pnand %p3478_p5, %p3852_p8 }
  0x8f   : > { %p3485_p12 = por %p3484_p11, %p3483_p10 }
  0x90   : > { %p3481_p9 = pneg %p3480_p7 }
  0x92   : > { %p3486_p13 = pnand %p3485_p12, %p3481_p9 }
  0x94   : > { %3489 = shalt.err (!%p3486_p13)
}
  0x95   : > { %3108 = dma.hbm_to_vmem [thread:$0]  (!%p3841_p6), %s3905_s23, 1024, %s924_s4, [#allocation8], %s4830_s18, %s4830_s18, %s4829_s15  }
  0x96   : > { %s3635_s3 = smov [#allocation12]   ;;  %s975_s22 = sshll.u32 %s3788_s19, 4  ;;  %s976_s22 = int_to_ptr.hbm [resolvable:$true] %s975_s22 }
  0x97   : > { %s960_s10 = sshll.u32 %s3635_s3, 4  ;;  %s3505_s28 = sshra.s32 %s3919_s25, 4  ;;  %s961_s10 = int_to_ptr.vmem [resolvable:$true] %s960_s10  ;;  %s3506_s28 = int_to_ptr.hbm [resolvable:$true] %s3505_s28 }
  0x98   : > { %s3507_s16 = scalar_lea.hbm %s3506_s28, 48  ;;  %s3512_s7 = scalar_lea.hbm %s3783_s8, 48 }
  0x99   : > { %p3508_p0 = scmp.ne.s32.totalorder %s3506_s28, %s3507_s16  ;;  %p3513_p7 = scmp.lt.s32.totalorder %s3506_s28, %s3783_s8 }
  0x9a   : > { %p3514_p9 = scmp.lt.s32.totalorder %s3512_s7, %s3507_s16 }
  0x9b   : > { %p3510_p1 = pnand %p3508_p0, %p3852_p8 }
  0x9c   : > { %p3515_p10 = por %p3514_p9, %p3513_p7 }
  0x9d   : > { %p3511_p5 = pneg %p3510_p1 }
  0x9f   : > { %p3516_p11 = pnand %p3515_p10, %p3511_p5 }
  0xa1   : > { %3519 = shalt.err (!%p3516_p11)
}
  0xa2   : > { %3114 = dma.hbm_to_vmem [thread:$0]  (!%p3841_p6), %s3919_s25, 768, %s961_s10, [#allocation11], %s4832_s12, %s4832_s12, %s4831_s0  }
  0xa3   : > { %s3636_s4 = smov [#allocation13]   ;;  %s3535_s18 = sshra.s32 %s976_s22, 4  ;;  %s3536_s18 = int_to_ptr.hbm [resolvable:$true] %s3535_s18 }
  0xa4   : > { %s977_s15 = sshll.u32 %s3636_s4, 4  ;;  %s3537_s23 = scalar_lea.hbm %s3536_s18, 32  ;;  %s978_s15 = int_to_ptr.vmem [resolvable:$true] %s977_s15 }
  0xa5   : > { %p3538_p12 = scmp.ne.s32.totalorder %s3536_s18, %s3537_s23  ;;  %s3542_s3 = scalar_lea.hbm %s3788_s19, 32 }
  0xa6   : > { %p3543_p1 = scmp.lt.s32.totalorder %s3536_s18, %s3788_s19  ;;  %p3544_p5 = scmp.lt.s32.totalorder %s3542_s3, %s3537_s23 }
  0xa7   : > { %p3540_p13 = pnand %p3538_p12, %p3852_p8 }
  0xa8   : > { %p3545_p7 = por %p3544_p5, %p3543_p1 }
  0xa9   : > { %p3541_p0 = pneg %p3540_p13 }
  0xab   : > { %p3546_p9 = pnand %p3545_p7, %p3541_p0 }
  0xad   : > { %3549 = shalt.err (!%p3546_p9)
}
  0xae   : > { %3117 = dma.hbm_to_vmem [thread:$0]  (!%p3841_p6), %s976_s22, 512, %s978_s15, [#allocation14], %s4832_s12, %s4832_s12, %s4831_s0  }
  0xaf   : > { %1010 = sbr.rel (%p3833_p4) target bundleno = 2544 (0x9f0), region = 136 }
  0xb4   : > { %3570 = dma.done.wait (%p3118_p3), [#allocation3], 1024  }
  0xb5   : > { %3572 = vsyncadd (%p3118_p3), [#allocation3], 4294966272 }
  0xb6   : > { %3574 = dma.done.wait (%p3118_p3), [#allocation5], 1024  }
  0xb7   : > { %3576 = vsyncadd (%p3118_p3), [#allocation5], 4294966272 }
  0xb8   : > { %3578 = dma.done.wait (%p3118_p3), [#allocation8], 1536  }
  0xb9   : > { %3580 = vsyncadd (%p3118_p3), [#allocation8], 4294965760 }
  0xba   : > { %3582 = dma.done.wait (%p3118_p3), [#allocation11], 1280  }
  0xbb   : > { %3584 = vsyncadd (%p3118_p3), [#allocation11], 4294966016 }
  0xbc   : > { %3586 = dma.done.wait (%p3118_p3), [#allocation14], 512  }
  0xbd   : > { %3588 = vsyncadd (%p3118_p3), [#allocation14], 4294966784  ;;  %p1128_p4 = scmp.lt.s32.totalorder %s3826_s1, 4  ;;  %s4833_s12 = sld [smem:[#allocation20_spill]] (!%p3014_p2) }
  0xbe   : > { %1139 = sbr.rel (%p3014_p2) target bundleno = 202 (0xca), region = 172  ;;  %s4834_s25 = sld [smem:[#allocation21_spill]] (!%p3014_p2) }
  0xbf   : > { %s1129_s2 = scalar_select %p1128_p4, %s3826_s1, 4 }
  0xc0   : > { %s4835_s10 = sld [smem:[#allocation38_spill]] (!%p3014_p2) }
  0xc1   : > { %s3032_s11 = sshll.u32 %s1129_s2, 3 }
  0xc2   : > { %s1131_s26 = scalar_lea.vmem %s3658_s5, %s3032_s11  ;;  %s1135_s0 = scalar_lea.vmem %s3663_s9, %s3032_s11 }
  0xc3   : > { %v1140_v0 = vld [vmem:[%s3668_s13] sm:$0x1f]  ;;  %vm1141_vm0 = vcmask 126976   ;;  %vm1144_vm1 = vcmask 258048   ;;  %vm1149_vm2 = vcmask 389120   ;;  %vm1153_vm3 = vcmask 130048  }
  0xc4   : > { %v1143_v1 = vld [vmem:[%s3673_s17] sm:$0x1f]  ;;  %1142 = vst.msk [vmem:[%s3798_s24] sm:$0x1f] %vm1141_vm0, %v1140_v0  ;;  %v1152_v5 = vld [vmem:[%s4834_s25 + $0x8] sm:$0xff] }
  0xc5   : > { %v1146_v2 = vld [vmem:[%s3678_s21] sm:$0x1f]  ;;  %1145 = vst.msk [vmem:[%s3803_s14] sm:$0x1f] %vm1144_vm1, %v1143_v1 }
  0xc6   : > { %v1148_v3 = vld [vmem:[%s4833_s12] sm:$0x1f]  ;;  %1147 = vst.msk [vmem:[%s3808_s29] sm:$0x1f] %vm1144_vm1, %v1146_v2 }
  0xc7   : > { %v1151_v4 = vld [vmem:[%s4834_s25] sm:$0xff]  ;;  %1150 = vst.msk [vmem:[%s3813_s20] sm:$0x1f] %vm1149_vm2, %v1148_v3 }
  0xc8   : > { %1154 = vst.msk [vmem:[%s4835_s10] sm:$0xff] %vm1153_vm3, %v1151_v4 }
  0xc9   : > { %1155 = vst.msk [vmem:[%s4835_s10 + $0x8] sm:$0xff] %vm1153_vm3, %v1152_v5 }
  0xca PF: > { %s4836_s1 = sld [smem:[#allocation24_spill]]  ;;  %vm1171_vm4 = vcmask 1041408   ;;  %vm1167_vm5 = vcmask 15360   ;;  %v1158_v8 = vld [vmem:[%s1135_s0] sm:$0x1f]  ;;  %v1267_v12 = vld [vmem:[#allocation4 + $0x10] sm:$0xff] }
  0xcb   : > { %s4837_s22 = sld [smem:[#allocation23_spill]]  ;;  %v1157_v9 = vld [vmem:[%s1131_s26] sm:$0x1f]  ;;  %1286 = vmatpush.msra.mxu3 %v1267_v12  ;;  %v1367_v15 = vld [vmem:[#allocation6 + $0x18] sm:$0xff]  ;;  %v1263_v16 = vld [vmem:[#allocation2 + $0x30] sm:$0xff]  ;;  %vm4802_vm6 = vcmask 130048  }
  0xcc   : > { %s4838_s28 = sld [smem:[#allocation26_spill]]  ;;  %v1265_v13 = vld [vmem:[#allocation4] sm:$0xff]  ;;  %v1264_v17 = vld [vmem:[#allocation2 + $0x38] sm:$0xff]  ;;  %v1262_v19 = vld [vmem:[#allocation2 + $0x28] sm:$0xff]  ;;  %vm1312_vm7 = vcmask 261120   ;;  %s3637_s23 = smov 64  }
  0xcd   : > { %v1159_v14 = vld [vmem:[%s3798_s24] sm:$0x1f]  ;;  %1287 = vmatpush.msra.mxu3 %v1265_v13  ;;  %s4840_s7 = sld [smem:[#allocation25_spill]]  ;;  %v1366_v20 = vld [vmem:[#allocation6 + $0x10] sm:$0xff]  ;;  %v1365_v22 = vld [vmem:[#allocation6 + $0x8] sm:$0xff]  ;;  %s3638_s2 = smov 96  }
  0xce   : > { %v1261_v18 = vld [vmem:[#allocation2 + $0x20] sm:$0xff]  ;;  %3040 = vmatmul.msk.f32.vlgmr.msra.gmra.mxu3 %vm4802_vm6, %v1159_v14  ;;  %v1259_v21 = vld [vmem:[#allocation2 + $0x10] sm:$0xff]  ;;  %s4841_s4 = sld [smem:[#allocation30_spill]]  ;;  %v1260_v31 = vld [vmem:[#allocation2 + $0x18] sm:$0xff]  ;;  %s3639_s11 = smov 32   ;;  %v4800_v5 = vmov 1  }
  0xcf   : > { %1387 = vmatpush.msrb.mxu3 %v1367_v15  ;;  %v1364_v23 = vld [vmem:[#allocation6] sm:$0xff]  ;;  %s4842_s15 = sld [smem:[#allocation27_spill]]  ;;  %v1258_v33 = vld [vmem:[#allocation2 + $0x8] sm:$0xff]  ;;  %v1268_v34 = vld [vmem:[#allocation4 + $0x18] sm:$0xff]  ;;  %3201 = vset.pattern.permute.xlu1 %v4800_v5  ;;  %vm2817_vm12 = vcmask 258048   ;;  %vm1813_vm13 = vcmask 122880  }
  0xd0   : > { %v1166_v6 = vld [vmem:[%s4836_s1] sm:$0x3]  ;;  %s4843_s18 = sld [smem:[#allocation29_spill]]  ;;  %v1266_v35 = vld [vmem:[#allocation4 + $0x8] sm:$0xff]  ;;  %v1690_v13 = vld [vmem:[#allocation13 + $0x8] sm:$0xff]  ;;  %s3643_s10 = smov 111  }
  0xd1   : > { %v1165_v7 = vld [vmem:[%s4837_s22] sm:$0x3]  ;;  %3035 = vmatpush.msk.msra.mxu0 %vm1171_vm4, %v1166_v6  ;;  %1388 = vmatpush.msrb.mxu3 %v1366_v20  ;;  %s4844_s3 = sld [smem:[#allocation22_spill]]  ;;  %v1692_v4 = vld [vmem:[#allocation13 + $0x18] sm:$0xff]  ;;  %v3641_v6 = vmov 0  }
  0xd2   : > { %s4839_s16 = smov %s4838_s28  ;;  %3037 = vmatpush.msk.msra.mxu1 %vm1171_vm4, %v1165_v7  ;;  %3036 = vmatmul.msk.f32.vlgmr.msra.gmra.mxu0 %vm1167_vm5, %v1158_v8  ;;  %v1228_v10 = vld [vmem:[%s4838_s28 + $0x8] sm:$0xff]  ;;  %v4000_v24 = vld [vmem:[%s3803_s14] sm:$0x1f]  ;;  %s4845_s26 = sld [smem:[#allocation38_spill]] }
  0xd3   : > { %3038 = vmatmul.msk.f32.vlgmr.msra.gmra.mxu1 %vm1167_vm5, %v1157_v9  ;;  %1251 = vmatpush.msra.mxu2 %v1228_v10  ;;  %v1227_v11 = vld [vmem:[%s4839_s16] sm:$0xff]  ;;  %s4846_s0 = sld [smem:[#allocation37_spill]] }
  0xd4   : > { %1328 = vmatpush.msrb.mxu1 %v1263_v16  ;;  %1389 = vmatpush.msrb.mxu3 %v1365_v22  ;;  %v3225_v25 = vld [vmem:[%s4840_s7] ss:$0 sm:$0xff]  ;;  %s4847_s12 = sld [smem:[#allocation32_spill]]  ;;  %s3645_s7 = smov 48  }
  0xd5   : > { %1252 = vmatpush.msra.mxu2 %v1227_v11  ;;  %v1257_v32 = vld [vmem:[#allocation2] sm:$0xff]  ;;  %1306 = vmatpush.msrb.mxu0 %v1268_v34  ;;  %s4854_s1 = sld [smem:[#allocation35_spill]] }
  0xd6   : > { %1329 = vmatpush.msrb.mxu1 %v1261_v18  ;;  %1390 = vmatpush.msrb.mxu3 %v1364_v23  ;;  %v3227_v37 = vld [vmem:[%s4841_s4] ss:$0 sm:$0xff]  ;;  %v1398_v23 = vld [vmem:[#allocation7 + $0x18] sm:$0xff]  ;;  %s4863_s22 = sld [smem:[#allocation36_spill]]  ;;  %s3646_s4 = smov 34  }
  0xd7   : > { %1348 = vmatpush.msrb.mxu2 %v1264_v17  ;;  %3044 = vmatmul.msk.f32.vlgmr.msrb.gmra.mxu3 %vm1312_vm7, %v4000_v24  ;;  %v3226_v40 = vld [vmem:[%s4842_s15] ss:$0 sm:$0xff]  ;;  %s4864_s28 = sld [smem:[#allocation34_spill]]  ;;  %s3647_s15 = smov 80  }
  0xd8   : > { %1330 = vmatpush.msrb.mxu1 %v1259_v21  ;;  %1307 = vmatpush.msrb.mxu0 %v1266_v35  ;;  %v1356_v43 = vld [vmem:[%s4843_s18] sm:$0x3] }
  0xd9   : > { %1349 = vmatpush.msrb.mxu2 %v1262_v19  ;;  %v1358_v44 = vperm.slane %v1356_v43, 0  ;;  %v4022_v3 = vld [vmem:[%s4844_s3] sm:$0x1f]  ;;  %3200 = vset.pattern.permute.xlu0 %v3641_v6 }
  0xda   : > { %1331 = vmatpush.msrb.mxu1 %v1257_v32  ;;  %3041 = vmatmul.msk.f32.vlgmr.msrb.gmra.mxu0 %vm4802_vm6, %v1159_v14  ;;  %v1539_v7 = vperm.slane %v4022_v3, 0  ;;  %v4797_v8 = vrot.slane %v4022_v3, 1  ;;  %v4799_v10 = vrot.slane %v4022_v3, 2  ;;  %v1691_v12 = vld [vmem:[#allocation13 + $0x10] sm:$0xff]  ;;  %v1689_v14 = vld [vmem:[#allocation13] sm:$0xff]  ;;  %v4796_v21 = vrot.slane %v4022_v3, 3 }
  0xdb   : > { %1350 = vmatpush.msrb.mxu2 %v1260_v31  ;;  %3199 = vset.pattern.permute.xlu2 %v3641_v6  ;;  %v4798_v22 = vrot.slane %v4022_v3, 4  ;;  %v1164_v31 = vld [vmem:[%s4845_s26 + $0x8] sm:$0xff] }
  0xdc   : > { %1714 = vmatpush.msra.mxu1 %v1692_v4  ;;  %v1540_v9 = vperm.slane %v4797_v8, 0  ;;  %v1541_v11 = vperm.slane %v4799_v10, 0  ;;  %1418 = vmatpush.msra.mxu0 %v1398_v23 }
  0xdd   : > { %1351 = vmatpush.msrb.mxu2 %v1258_v33  ;;  %v1163_v33 = vld [vmem:[%s4845_s26] sm:$0xff] }
  0xde   : > { %1715 = vmatpush.msra.mxu1 %v1691_v12 }
  0xe0   : > { %1716 = vmatpush.msra.mxu1 %v1690_v13 }
  0xe2   : > { %1717 = vmatpush.msra.mxu1 %v1689_v14 }
 0x14f   : > { %v1192_v26 = vpop.f32.mrf.mxu0 }
 0x150   : > { %v1218_v27 = vpop.f32.mrf.mxu1 }
 0x151   : > { %v1219_v28 = vadd.f32 %v1218_v27, %v1192_v26  ;;  %v1289_v36 = vpop.f32.mrf.mxu3  ;;  %v1396_v26 = vld [vmem:[#allocation7 + $0x8] sm:$0xff]  ;;  %v1543_v27 = vperm.slane %v4798_v22, 0 }
 0x153   : > { %v1225_v29 = vadd.f32 %v3225_v25, %v1219_v28  ;;  %v1542_v25 = vperm.slane %v4796_v21, 0  ;;  %v1395_v28 = vld [vmem:[#allocation7] sm:$0xff] }
 0x155   : > { %v1226_v30 = vmax.f32 %v1225_v29, 0.0  ;;  %v1161_v29 = vld [vmem:[%s3808_s29] sm:$0x1f] }
 0x157   : > { %3039 = vmatmul.msk.f32.vlgmr.msra.gmra.mxu2 %vm4802_vm6, %v1226_v30 }
 0x15a   : > { %v1392_v38 = vpop.f32.mrf.mxu3 }
 0x15b   : > { %v1393_v39 = vadd.f32 %v3227_v37, %v1392_v38 }
 0x15d   : > { %1447 = vrot.lane.b32.xlu0 %v1393_v39, %s3637_s23 }
 0x1cf   : > { %v1448_v59 = vpop.permute.xlu0 %1447 }
 0x1da   : > { %v1254_v41 = vpop.f32.mrf.mxu2 }
 0x1db   : > { %v1255_v42 = vadd.f32 %v3226_v40, %v1254_v41 }
 0x1dd   : > { %3042 = vmatmul.msk.f32.vlgmr.msrb.gmra.mxu1 %vm1312_vm7, %v1255_v42  ;;  %3043 = vmatmul.msk.f32.vlgmr.msrb.gmra.mxu2 %vm1312_vm7, %v1255_v42 }
 0x25a   : > { %v1333_v45 = vpop.f32.mrf.mxu1 }
 0x25b   : > { %v1334_v46 = vadd.f32 %v1333_v45, %v1289_v36 }
 0x25d   : > { %v4013_v47 = vadd.f32 %v1358_v44, %v1334_v46 }
 0x25f   : > { %v1426_v48 = vadd.f32 %v1393_v39, %v4013_v47 }
 0x261   : > { %v3046_v49 = vmul.f32 -1.442695, %v1426_v48 }
 0x263   : > { %3230 = vpow2.f32 %v3046_v49 }
 0x269   : > { %v3231_v50 = vpop.eup %3230 }
 0x26a   : > { %v1430_v51 = vadd.f32 1.0, %v3231_v50 }
 0x26c   : > { %3232 = vrcp.f32 %v1430_v51  ;;  %v1442_v55 = vand.u32 2147483648, %v1430_v51  ;;  %v1440_v57 = vand.u32 2147483647, %v1430_v51  ;;  %vm1436_vm9 = vweird.f32 %v1430_v51 }
 0x26e   : > { %v1443_v60 = vor.u32 1.1754944e-38, %v1442_v55  ;;  %vm1441_vm11 = vcmp.eq.f32.partialorder %v1440_v57, 8.507059e+37 }
 0x272   : > { %v3233_v52 = vpop.eup %3232 }
 0x273   : > { %v1432_v53 = vmul.f32 %v3233_v52, %v1430_v51  ;;  %vm1437_vm8 = vweird.f32 %v3233_v52 }
 0x274   : > { %vm1438_vm10 = vmor %vm1436_vm9, %vm1437_vm8 }
 0x275   : > { %v1433_v54 = vsub.f32 1.0, %v1432_v53 }
 0x277   : > { %v1434_v56 = vmul.f32 %v3233_v52, %v1433_v54 }
 0x279   : > { %v1435_v58 = vadd.f32 %v3233_v52, %v1434_v56 }
 0x27b   : > { %v1439_v61 = vsel %vm1438_vm10, %v3233_v52, %v1435_v58 }
 0x27c   : > { %v1444_v62 = vsel %vm1441_vm11, %v1443_v60, %v1439_v61 }
 0x27d   : > { %v1450_v63 = vmul.f32 %v1448_v59, %v1444_v62  ;;  %v1457_v16 = vsub.f32 1.0, %v1444_v62 }
 0x27f   : > { %1452 = vrot.lane.b32.xlu0 %v1450_v63, %s3637_s23 }
 0x287   : > { %1549 = vperm.xlu0 %3200, %v1540_v9  }
 0x28f   : > { %1557 = vperm.xlu0 %3200, %v1542_v25  }
 0x297   : > { %3206 = vset.pattern.permute.xlu0 %v4800_v5 }
 0x298   : > { %1591 = vperm.xlu0 %3206, %v1543_v27  }
 0x2f1   : > { %v1453_v0 = vpop.permute.xlu0 %1452 }
 0x2f2   : > { %v1455_v1 = vadd.f32 %v1453_v0, %v4013_v47 }
 0x2f4   : > { %3234 = vtanh.f32 %v1455_v1 }
 0x2f9   : > { %v1550_v39 = vpop.permute.xlu0 %1549 }
 0x2fa   : > { %v3235_v2 = vpop.eup %3234  ;;  %v1565_v41 = vmul.f32 %v1550_v39, %v1163_v33 }
 0x2fb   : > { %1459 = vrot.lane.b32.xlu1 %v3235_v2, %s3638_s2 }
 0x301   : > { %v1558_v58 = vpop.permute.xlu0 %1557 }
 0x302   : > { %v1567_v2 = vmul.f32 %v1558_v58, %v1163_v33 }
 0x303   : > { %1463 = vrot.lane.b32.xlu1 %v4000_v24, %s3639_s11  ;;  %v1397_v24 = vld [vmem:[#allocation7 + $0x10] sm:$0xff] }
 0x304   : > { %1419 = vmatpush.msra.mxu0 %v1397_v24 }
 0x306   : > { %1420 = vmatpush.msra.mxu0 %v1396_v26 }
 0x308   : > { %1421 = vmatpush.msra.mxu0 %v1395_v28 }
 0x309   : > { %3045 = vmatmul.msk.f32.vlgmr.msra.gmra.mxu0 %vm1312_vm7, %v1161_v29 }
 0x30a   : > { %v1592_v60 = vpop.permute.xlu0 %1591 }
 0x30b   : > { %1575 = vperm.xlu1 %3201, %v1539_v7   ;;  %v1598_v0 = vmul.f32 %v1592_v60, %v1164_v31 }
 0x313   : > { %3203 = vset.pattern.permute.xlu1 %v3641_v6 }
 0x314   : > { %1553 = vperm.xlu1 %3203, %v1541_v11  }
 0x31c   : > { %3204 = vset.pattern.permute.xlu1 %v4800_v5 }
 0x31d   : > { %1587 = vperm.xlu1 %3204, %v1542_v25  }
 0x36d   : > { %v1460_v15 = vpop.permute.xlu1 %1459 }
 0x36e   : > { %v1462_v18 = vmul.f32 %v1460_v15, %v1457_v16 }
 0x375   : > { %v1464_v17 = vpop.permute.xlu1 %1463 }
 0x376   : > { %v1466_v19 = vmul.f32 %v1464_v17, %v1444_v62  ;;  %v3228_v62 = vld [vmem:[%s4846_s0] ss:$0 sm:$0xff] }
 0x378   : > { %v1467_v20 = vadd.f32 %v1466_v19, %v1462_v18 }
 0x37a   : > { %1698 = vrot.lane.b32.xlu2 %v1467_v20, %s3638_s2 }
 0x37d   : > { %v1576_v32 = vpop.permute.xlu1 %1575 }
 0x37e   : > { %v1594_v34 = vmul.f32 %v1576_v32, %v1164_v31 }
 0x382   : > { %1545 = vperm.xlu2 %3199, %v1539_v7  }
 0x386   : > { %v1554_v46 = vpop.permute.xlu1 %1553 }
 0x387   : > { %v1566_v49 = vmul.f32 %v1554_v46, %v1163_v33 }
 0x38a   : > { %3202 = vset.pattern.permute.xlu2 %v4800_v5 }
 0x38b   : > { %1579 = vperm.xlu2 %3202, %v1540_v9  }
 0x38f   : > { %v1588_v61 = vpop.permute.xlu1 %1587 }
 0x390   : > { %v1597_v1 = vmul.f32 %v1588_v61, %v1164_v31 }
 0x392   : > { %v4087_v14 = vadd.f32 %v1597_v1, %v1567_v2 }
 0x393   : > { %1583 = vperm.xlu2 %3202, %v1541_v11  }
 0x39b   : > { %3205 = vset.pattern.permute.xlu2 %v3641_v6 }
 0x39c   : > { %1561 = vperm.xlu2 %3205, %v1543_v27   ;;  %v4117_v27 = vadd.f32 1e-16, %v4087_v14 }
 0x3d4   : > { %v1699_v30 = vpop.permute.xlu2 %1698 }
 0x3d5   : > { %2818 = vst.msk [vmem:[%s3803_s14] sm:$0x1f] %vm2817_vm12, %v1699_v30  ;;  %3049 = vmatmul.msk.f32.vlgmr.msra.gmra.mxu1 %vm1312_vm7, %v1699_v30 }
 0x3dc   : > { %v1546_v35 = vpop.permute.xlu2 %1545 }
 0x3dd   : > { %v1564_v36 = vmul.f32 %v1546_v35, %v1163_v33 }
 0x3df   : > { %v4053_v37 = vadd.f32 %v1594_v34, %v1564_v36  ;;  %v1612_v36 = vmul.f32 %v4117_v27, %v4117_v27 }
 0x3e1   : > { %v4056_v38 = vadd.f32 1e-16, %v4053_v37 }
 0x3e3   : > { %v1609_v40 = vmul.f32 %v4056_v38, %v4056_v38 }
 0x3e5   : > { %v1580_v42 = vpop.permute.xlu2 %1579  ;;  %v1614_v43 = vsel %vm4802_vm6, %v1609_v40, 0.0 }
 0x3e6   : > { %v1595_v44 = vmul.f32 %v1580_v42, %v1164_v31  ;;  %1615 = vadd.xlane.f32.xlu2 %v1614_v43  ;;  %v1623_v42 = vsel %vm4802_vm6, %v1612_v36, 0.0  ;;  %v3229_v36 = vld [vmem:[%s4847_s12] ss:$0 sm:$0xff] }
 0x3e8   : > { %v4061_v45 = vadd.f32 %v1595_v44, %v1565_v41 }
 0x3ea   : > { %v4064_v48 = vadd.f32 1e-16, %v4061_v45 }
 0x3ec   : > { %v1610_v50 = vmul.f32 %v4064_v48, %v4064_v48 }
 0x3ed   : > { %v1584_v51 = vpop.permute.xlu2 %1583 }
 0x3ee   : > { %v1596_v52 = vmul.f32 %v1584_v51, %v1164_v31  ;;  %v1617_v53 = vsel %vm4802_vm6, %v1610_v50, 0.0 }
 0x3ef   : > { %1618 = vadd.xlane.f32.xlu1 %v1617_v53 }
 0x3f0   : > { %v4069_v54 = vadd.f32 %v1596_v52, %v1566_v49 }
 0x3f2   : > { %v4072_v55 = vadd.f32 1e-16, %v4069_v54 }
 0x3f4   : > { %v1611_v56 = vmul.f32 %v4072_v55, %v4072_v55 }
 0x3f6   : > { %v1620_v57 = vsel %vm4802_vm6, %v1611_v56, 0.0  ;;  %v1562_v59 = vpop.permute.xlu2 %1561 }
 0x3f7   : > { %1621 = vadd.xlane.f32.xlu1 %v1620_v57  ;;  %v1568_v63 = vmul.f32 %v1562_v59, %v1163_v33  ;;  %v3642_v33 = vmov 16  }
 0x3f8   : > { %3207 = vset.pattern.permute.xlu1 %v3642_v33 }
 0x3f9   : > { %v4080_v9 = vadd.f32 %v1598_v0, %v1568_v63 }
 0x3fb   : > { %v4104_v20 = vadd.f32 1e-16, %v4080_v9 }
 0x3fd   : > { %v1613_v30 = vmul.f32 %v4104_v20, %v4104_v20 }
 0x3ff   : > { %v1626_v34 = vsel %vm4802_vm6, %v1613_v30, 0.0 }
 0x452   : > { %v1719_v4 = vpop.f32.mrf.mxu1 }
 0x453   : > { %v4078_v7 = vadd.f32 %v3228_v62, %v1719_v4 }
 0x455   : > { %v4083_v11 = vadd.f32 1e-16, %v4078_v7  ;;  %v4793_v12 = vrot.slane %v4078_v7, 1  ;;  %v4794_v13 = vrot.slane %v4078_v7, 2  ;;  %v1725_v15 = vand.u32 2147483647, %v4078_v7 }
 0x456   : > { %v4792_v19 = vrot.slane %v4078_v7, 3  ;;  %v4795_v39 = vrot.slane %v4078_v7, 4  ;;  %v1722_v33 = vmax.f32 %v4078_v7, 0.0  ;;  %vm1723_vm15 = vcmp.ne.f32.partialorder %v4078_v7, %v4078_v7 }
 0x457   : > { %v4092_v16 = vmul.f32 %v4083_v11, %v4083_v11  ;;  %v4096_v17 = vadd.f32 1e-16, %v4793_v12  ;;  %v4100_v18 = vadd.f32 1e-16, %v4794_v13  ;;  %v1726_v26 = vsub.f32 0.0, %v1725_v15 }
 0x458   : > { %v4127_v31 = vadd.f32 1e-16, %v4792_v19  ;;  %v4143_v43 = vadd.f32 1e-16, %v4795_v39  ;;  %v1778_v58 = vperm.slane %v4083_v11, 0 }
 0x459   : > { %v1814_v23 = vsel %vm1813_vm13, %v4092_v16, 0.0  ;;  %v4110_v24 = vmul.f32 %v4096_v17, %v4096_v17  ;;  %v4114_v25 = vmul.f32 %v4100_v18, %v4100_v18  ;;  %v1727_v32 = vmul.f32 1.442695, %v1726_v26 }
 0x45a   : > { %1815 = vadd.xlane.f32.xlu1 %v1814_v23  ;;  %v4132_v35 = vmul.f32 %v4127_v31, %v4127_v31  ;;  %v1780_v40 = vperm.slane %v4100_v18, 0  ;;  %v1779_v44 = vperm.slane %v4096_v17, 0  ;;  %v1812_v50 = vmul.f32 %v4143_v43, %v4143_v43 }
 0x45b   : > { %v1817_v28 = vsel %vm1813_vm13, %v4110_v24, 0.0  ;;  %v1820_v29 = vsel %vm1813_vm13, %v4114_v25, 0.0  ;;  %3236 = vpow2.f32 %v1727_v32  ;;  %v1782_v59 = vperm.slane %v4143_v43, 0  ;;  %v2115_v43 = vld [vmem:[#allocation10 + $0x8] sm:$0xff] }
 0x45c   : > { %1818 = vadd.xlane.f32.xlu2 %v1817_v28  ;;  %1821 = vadd.xlane.f32.xlu0 %v1820_v29  ;;  %v1823_v41 = vsel %vm1813_vm13, %v4132_v35, 0.0  ;;  %v1790_v46 = vmul.f32 %v1780_v40, %v4072_v55  ;;  %v1789_v51 = vmul.f32 %v1779_v44, %v4064_v48  ;;  %v1826_v56 = vsel %vm1813_vm13, %v1812_v50, 0.0  ;;  %v4171_v28 = vpop.f32.mrf.mxu0 }
 0x45d   : > { %v1788_v60 = vmul.f32 %v1778_v58, %v4056_v38  ;;  %v1792_v61 = vmul.f32 %v1782_v59, %v4104_v20  ;;  %v1781_v1 = vperm.slane %v4127_v31, 0 }
 0x45e   : > { %v1799_v52 = vsel %vm4802_vm6, %v1790_v46, 0.0  ;;  %v1796_v57 = vsel %vm4802_vm6, %v1789_v51, 0.0  ;;  %v2377_v51 = vperm.slane %v4114_v25, 0 }
 0x45f   : > { %v1793_v63 = vsel %vm4802_vm6, %v1788_v60, 0.0  ;;  %v1805_v0 = vsel %vm4802_vm6, %v1792_v61, 0.0  ;;  %v1791_v23 = vmul.f32 %v1781_v1, %v4117_v27 }
 0x461   : > { %v3237_v49 = vpop.eup %3236  ;;  %v1802_v30 = vsel %vm4802_vm6, %v1791_v23, 0.0 }
 0x462   : > { %1627 = vadd.xlane.f32.xlu1 %v1626_v34  ;;  %v1729_v53 = vadd.f32 1.0, %v3237_v49  ;;  %v1732_v62 = vmul.f32 -0.5, %v3237_v49  ;;  %v1735_v15 = vand.u32 2147483647, %v3237_v49 }
 0x464   : > { %1824 = vadd.xlane.f32.xlu2 %v1823_v41  ;;  %1624 = vadd.xlane.f32.xlu0 %v1623_v42  ;;  %3238 = vlog2.f32 %v1729_v53  ;;  %v1733_v4 = vadd.f32 1.0, %v1732_v62  ;;  %vm1736_vm14 = vcmp.lt.f32.partialorder %v1735_v15, 0.0004427343  ;;  %v1423_v41 = vpop.f32.mrf.mxu0  ;;  %v4191_v53 = vpop.xlane.xlu1 %1618 }
 0x465   : > { %v4182_v46 = vadd.f32 %v3229_v36, %v1423_v41  ;;  %vm1648_vm2 = vcmp.eq.f32.partialorder %v4191_v53, inf  ;;  %vm1650_vm3 = vcmp.eq.f32.partialorder %v4191_v53, 0.0 }
 0x466   : > { %v1734_v29 = vmul.f32 %v3237_v49, %v1733_v4  ;;  %v2375_v49 = vperm.slane %v4092_v16, 0 }
 0x46a   : > { %1800 = vadd.xlane.f32.xlu1 %v1799_v52  ;;  %v3239_v2 = vpop.eup %3238  ;;  %v2379_v52 = vperm.slane %v1812_v50, 0 }
 0x46b   : > { %v1731_v26 = vmul.f32 0.6931472, %v3239_v2 }
 0x46c   : > { %1827 = vadd.xlane.f32.xlu2 %v1826_v56  ;;  %1797 = vadd.xlane.f32.xlu0 %v1796_v57  ;;  %v1616_v56 = vpop.xlane.xlu2 %1615  ;;  %v4194_v57 = vpop.xlane.xlu1 %1621 }
 0x46d   : > { %v1737_v32 = vsel %vm1736_vm14, %v1734_v29, %v1731_v26  ;;  %3240 = vrsqrt.f32 %v1616_v56  ;;  %vm1636_vm0 = vcmp.eq.f32.partialorder %v1616_v56, inf  ;;  %vm1638_vm1 = vcmp.eq.f32.partialorder %v1616_v56, 0.0 }
 0x46e   : > { %v1738_v34 = vadd.f32 %v1737_v32, %v1722_v33  ;;  %3242 = vrsqrt.f32 %v4191_v53  ;;  %vm1660_vm4 = vcmp.eq.f32.partialorder %v4194_v57, inf  ;;  %vm1662_vm5 = vcmp.eq.f32.partialorder %v4194_v57, 0.0 }
 0x46f   : > { %3244 = vrsqrt.f32 %v4194_v57 }
 0x470   : > { %v4179_v42 = vsel %vm1723_vm15, %v4078_v7, %v1738_v34 }
 0x473   : > { %v3241_v16 = vpop.eup %3240 }
 0x474   : > { %1794 = vadd.xlane.f32.xlu2 %v1793_v63  ;;  %1806 = vadd.xlane.f32.xlu0 %v1805_v0  ;;  %v3243_v60 = vpop.eup %3242  ;;  %v1630_v61 = vmul.f32 %v3241_v16, %v1616_v56 }
 0x475   : > { %v3245_v62 = vpop.eup %3244  ;;  %v1642_v25 = vmul.f32 %v3243_v60, %v4191_v53 }
 0x476   : > { %v1631_v63 = vmul.f32 %v3241_v16, %v1630_v61  ;;  %v1654_v50 = vmul.f32 %v3245_v62, %v4194_v57 }
 0x477   : > { %v1643_v0 = vmul.f32 %v3243_v60, %v1642_v25 }
 0x478   : > { %v1632_v2 = vmul.f32 0.5, %v1631_v63  ;;  %v1655_v4 = vmul.f32 %v3245_v62, %v1654_v50 }
 0x479   : > { %v1644_v15 = vmul.f32 0.5, %v1643_v0  ;;  %v1639_v0 = vand.u32 2147483648, %v1616_v56 }
 0x47a   : > { %v1633_v23 = vsub.f32 1.5, %v1632_v2  ;;  %v1656_v26 = vmul.f32 0.5, %v1655_v4 }
 0x47b   : > { %v1645_v29 = vsub.f32 1.5, %v1644_v15 }
 0x47c   : > { %1803 = vadd.xlane.f32.xlu2 %v1802_v30  ;;  %v1634_v34 = vmul.f32 %v3241_v16, %v1633_v23  ;;  %v1657_v36 = vsub.f32 1.5, %v1656_v26 }
 0x47d   : > { %v1646_v41 = vmul.f32 %v3243_v60, %v1645_v29  ;;  %v1651_v60 = vand.u32 2147483648, %v4191_v53 }
 0x47f   : > { %v1647_v61 = vmul.f32 %v1646_v41, %v4191_v53 }
 0x483   : > { %1981 = vperm.xlu1 %3207, %v4179_v42  }
 0x488   : > { %1469 = vrot.lane.b32.xlu0 %v4182_v46, %s3638_s2 }
 0x490   : > { %2380 = vrot.lane.b32.xlu0 %v2375_v49, %s3643_s10 }
 0x498   : > { %2384 = vrot.lane.b32.xlu0 %v2377_v51, %s3643_s10  ;;  %v1635_v51 = vmul.f32 %v1634_v34, %v1616_v56  ;;  %v1649_v34 = vsel %vm1648_vm2, %v4191_v53, %v1647_v61 }
 0x499   : > { %v4237_v39 = vsel %vm1650_vm3, %v1651_v60, %v1649_v34 }
 0x49a   : > { %v1637_v23 = vsel %vm1636_vm0, %v1616_v56, %v1635_v51  ;;  %v1663_v51 = vand.u32 2147483648, %v4194_v57 }
 0x49b   : > { %v4230_v19 = vsel %vm1638_vm1, %v1639_v0, %v1637_v23 }
 0x4a0   : > { %2388 = vrot.lane.b32.xlu0 %v2379_v52, %s3643_s10  ;;  %v1658_v52 = vmul.f32 %v3245_v62, %v1657_v36 }
 0x4a2   : > { %v1659_v26 = vmul.f32 %v1658_v52, %v4194_v57 }
 0x4a4   : > { %v1661_v61 = vsel %vm1660_vm4, %v4194_v57, %v1659_v26 }
 0x4cd   : > { %v4199_v30 = vpop.xlane.xlu1 %1815 }
 0x4ce   : > { %3246 = vrsqrt.f32 %v4199_v30  ;;  %vm1836_vm8 = vcmp.eq.f32.partialorder %v4199_v30, inf  ;;  %vm1838_vm9 = vcmp.eq.f32.partialorder %v4199_v30, 0.0 }
 0x4cf   : > { %v4202_v32 = vpop.xlane.xlu2 %1818  ;;  %v4204_v33 = vpop.xlane.xlu0 %1821 }
 0x4d0   : > { %3248 = vrsqrt.f32 %v4202_v32  ;;  %vm1848_vm10 = vcmp.eq.f32.partialorder %v4202_v32, inf  ;;  %vm1850_vm11 = vcmp.eq.f32.partialorder %v4202_v32, 0.0  ;;  %vm1860_vm14 = vcmp.eq.f32.partialorder %v4204_v33, inf }
 0x4d1   : > { %3250 = vrsqrt.f32 %v4204_v33  ;;  %vm1862_vm15 = vcmp.eq.f32.partialorder %v4204_v33, 0.0 }
 0x4d4   : > { %v3247_v49 = vpop.eup %3246 }
 0x4d5   : > { %v1830_v25 = vmul.f32 %v3247_v49, %v4199_v30  ;;  %v4210_v63 = vpop.xlane.xlu1 %1627 }
 0x4d6   : > { %v3249_v50 = vpop.eup %3248  ;;  %3252 = vrsqrt.f32 %v4210_v63  ;;  %vm1684_vm4 = vcmp.eq.f32.partialorder %v4210_v63, inf }
 0x4d7   : > { %v3251_v16 = vpop.eup %3250  ;;  %v1831_v62 = vmul.f32 %v3247_v49, %v1830_v25  ;;  %v1842_v2 = vmul.f32 %v3249_v50, %v4202_v32  ;;  %v4218_v4 = vpop.xlane.xlu2 %1824 }
 0x4d8   : > { %v4220_v15 = vpop.xlane.xlu0 %1624  ;;  %v1854_v29 = vmul.f32 %v3251_v16, %v4204_v33  ;;  %3254 = vrsqrt.f32 %v4218_v4  ;;  %vm1872_vm0 = vcmp.eq.f32.partialorder %v4218_v4, inf  ;;  %vm1874_vm1 = vcmp.eq.f32.partialorder %v4218_v4, 0.0 }
 0x4d9   : > { %v1832_v36 = vmul.f32 0.5, %v1831_v62  ;;  %v1843_v41 = vmul.f32 %v3249_v50, %v1842_v2  ;;  %3256 = vrsqrt.f32 %v4220_v15  ;;  %vm1672_vm2 = vcmp.eq.f32.partialorder %v4220_v15, inf }
 0x4da   : > { %v1855_v25 = vmul.f32 %v3251_v16, %v1854_v29  ;;  %v1839_v29 = vand.u32 2147483648, %v4199_v30  ;;  %vm1674_vm3 = vcmp.eq.f32.partialorder %v4220_v15, 0.0 }
 0x4db   : > { %v1833_v12 = vsub.f32 1.5, %v1832_v36  ;;  %v1844_v52 = vmul.f32 0.5, %v1843_v41  ;;  %v1851_v41 = vand.u32 2147483648, %v4202_v32 }
 0x4dc   : > { %v4233_v13 = vpop.eup %3252  ;;  %v1856_v62 = vmul.f32 0.5, %v1855_v25 }
 0x4dd   : > { %v1834_v56 = vmul.f32 %v3247_v49, %v1833_v12  ;;  %v1845_v0 = vsub.f32 1.5, %v1844_v52  ;;  %v1678_v2 = vmul.f32 %v4233_v13, %v4210_v63 }
 0x4de   : > { %v3255_v23 = vpop.eup %3254  ;;  %v1857_v53 = vsub.f32 1.5, %v1856_v62 }
 0x4df   : > { %v3257_v60 = vpop.eup %3256  ;;  %v1835_v26 = vmul.f32 %v1834_v56, %v4199_v30  ;;  %v1846_v34 = vmul.f32 %v3249_v50, %v1845_v0  ;;  %v1679_v12 = vmul.f32 %v4233_v13, %v1678_v2  ;;  %v1866_v49 = vmul.f32 %v3255_v23, %v4218_v4  ;;  %v4252_v36 = vpop.xlane.xlu2 %1827 }
 0x4e0   : > { %v1858_v25 = vmul.f32 %v3251_v16, %v1857_v53  ;;  %v1666_v52 = vmul.f32 %v3257_v60, %v4220_v15  ;;  %3258 = vrsqrt.f32 %v4252_v36  ;;  %v1863_v16 = vand.u32 2147483648, %v4204_v33 }
 0x4e1   : > { %v1837_v62 = vsel %vm1836_vm8, %v4199_v30, %v1835_v26  ;;  %v1847_v56 = vmul.f32 %v1846_v34, %v4202_v32  ;;  %v1867_v50 = vmul.f32 %v3255_v23, %v1866_v49  ;;  %v1680_v22 = vmul.f32 0.5, %v1679_v12 }
 0x4e2   : > { %v1840_v0 = vsel %vm1838_vm9, %v1839_v29, %v1837_v62  ;;  %v1859_v2 = vmul.f32 %v1858_v25, %v4204_v33  ;;  %v1667_v53 = vmul.f32 %v3257_v60, %v1666_v52  ;;  %v4275_v29 = vsel %vm1662_vm5, %v1663_v51, %v1661_v61 }
 0x4e3   : > { %v1889_v21 = vperm.slane %v1840_v0, 0  ;;  %v1849_v8 = vsel %vm1848_vm10, %v4202_v32, %v1847_v56  ;;  %v1868_v26 = vmul.f32 0.5, %v1867_v50  ;;  %vm1884_vm5 = vcmp.eq.f32.partialorder %v4252_v36, inf }
 0x4e4   : > { %v1852_v34 = vsel %vm1850_vm11, %v1851_v41, %v1849_v8  ;;  %v1861_v49 = vsel %vm1860_vm14, %v4204_v33, %v1859_v2  ;;  %v1668_v30 = vmul.f32 0.5, %v1667_v53  ;;  %v1681_v8 = vsub.f32 1.5, %v1680_v22 }
 0x4e5   : > { %v1890_v25 = vperm.slane %v1852_v34, 0  ;;  %v1864_v52 = vsel %vm1862_vm15, %v1863_v16, %v1861_v49  ;;  %v1869_v62 = vsub.f32 1.5, %v1868_v26  ;;  %v1894_v32 = vmul.f32 %v1889_v21, %v4230_v19 }
 0x4e6   : > { %v3259_v0 = vpop.eup %3258  ;;  %v1891_v10 = vperm.slane %v1864_v52, 0  ;;  %v1669_v12 = vsub.f32 1.5, %v1668_v30  ;;  %v1875_v2 = vand.u32 2147483648, %v4218_v4  ;;  %v1675_v30 = vand.u32 2147483648, %v4220_v15 }
 0x4e7   : > { %v1870_v41 = vmul.f32 %v3255_v23, %v1869_v62  ;;  %v1878_v56 = vmul.f32 %v3259_v0, %v4252_v36  ;;  %v1895_v33 = vmul.f32 %v1890_v25, %v4237_v39  ;;  %v4283_v61 = vmax.f32 %v1894_v32, 1e-08 }
 0x4e8   : > { %v1670_v57 = vmul.f32 %v3257_v60, %v1669_v12  ;;  %v1896_v51 = vmul.f32 %v1891_v10, %v4275_v29  ;;  %v1682_v23 = vmul.f32 %v4233_v13, %v1681_v8  ;;  %vm1886_vm8 = vcmp.eq.f32.partialorder %v4252_v36, 0.0 }
 0x4e9   : > { %v1871_v50 = vmul.f32 %v1870_v41, %v4218_v4  ;;  %v1879_v16 = vmul.f32 %v3259_v0, %v1878_v56  ;;  %v4287_v53 = vmax.f32 %v1895_v33, 1e-08  ;;  %3260 = vrcp.f32 %v4283_v61 }
 0x4ea   : > { %v1671_v21 = vmul.f32 %v1670_v57, %v4220_v15  ;;  %v4291_v22 = vmax.f32 %v1896_v51, 1e-08  ;;  %v1683_v25 = vmul.f32 %v1682_v23, %v4210_v63  ;;  %v1887_v51 = vand.u32 2147483648, %v4252_v36 }
 0x4eb   : > { %v1873_v10 = vsel %vm1872_vm0, %v4218_v4, %v1871_v50  ;;  %v1880_v60 = vmul.f32 0.5, %v1879_v16  ;;  %3262 = vrcp.f32 %v4287_v53  ;;  %vm1686_vm9 = vcmp.eq.f32.partialorder %v4210_v63, 0.0 }
 0x4ec   : > { %v1876_v26 = vsel %vm1874_vm1, %v1875_v2, %v1873_v10  ;;  %v1673_v34 = vsel %vm1672_vm2, %v4220_v15, %v1671_v21  ;;  %3264 = vrcp.f32 %v4291_v22  ;;  %v1687_v21 = vand.u32 2147483648, %v4210_v63 }
 0x4ed   : > { %v1892_v49 = vperm.slane %v1876_v26, 0  ;;  %v1881_v13 = vsub.f32 1.5, %v1880_v60  ;;  %v4306_v52 = vsel %vm1674_vm3, %v1675_v30, %v1673_v34  ;;  %vm1924_vm11 = vweird.f32 %v4287_v53 }
 0x4ee   : > { %vm1939_vm14 = vweird.f32 %v4291_v22  ;;  %vm1909_vm2 = vweird.f32 %v4283_v61 }
 0x4ef   : > { %v4308_v62 = vpop.eup %3260  ;;  %v1882_v12 = vmul.f32 %v3259_v0, %v1881_v13  ;;  %v1897_v4 = vmul.f32 %v1892_v49, %v4306_v52  ;;  %v1685_v0 = vsel %vm1684_vm4, %v4210_v63, %v1683_v25  ;;  %v1930_v63 = vand.u32 2147483648, %v4287_v53 }
 0x4f0   : > { %v1905_v8 = vmul.f32 %v4308_v62, %v4283_v61  ;;  %v4330_v34 = vsel %vm1686_vm9, %v1687_v21, %v1685_v0  ;;  %vm1910_vm15 = vweird.f32 %v4308_v62  ;;  %v1945_v0 = vand.u32 2147483648, %v4291_v22 }
 0x4f1   : > { %v3263_v32 = vpop.eup %3262  ;;  %v1883_v15 = vmul.f32 %v1882_v12, %v4252_v36  ;;  %v4319_v33 = vmax.f32 %v1897_v4, 1e-08  ;;  %v1928_v4 = vand.u32 2147483647, %v4287_v53  ;;  %v1943_v21 = vand.u32 2147483647, %v4291_v22  ;;  %vm4360_vm4 = vmor %vm1909_vm2, %vm1910_vm15 }
 0x4f2   : > { %v4314_v41 = vpop.eup %3264  ;;  %v1920_v56 = vmul.f32 %v3263_v32, %v4287_v53  ;;  %v1906_v16 = vsub.f32 1.0, %v1905_v8  ;;  %vm1925_vm10 = vweird.f32 %v3263_v32  ;;  %v1795_v53 = vpop.xlane.xlu2 %1794 }
 0x4f3   : > { %v1935_v57 = vmul.f32 %v4314_v41, %v4291_v22  ;;  %v1885_v50 = vsel %vm1884_vm5, %v4252_v36, %v1883_v15  ;;  %3266 = vrcp.f32 %v4319_v33  ;;  %vm1940_vm0 = vweird.f32 %v4314_v41  ;;  %vm4348_vm1 = vmor %vm1924_vm11, %vm1925_vm10 }
 0x4f4   : > { %v1921_v2 = vsub.f32 1.0, %v1920_v56  ;;  %v1888_v10 = vsel %vm1886_vm8, %v1887_v51, %v1885_v50  ;;  %v1907_v49 = vmul.f32 %v4308_v62, %v1906_v16  ;;  %v1915_v51 = vand.u32 2147483648, %v4283_v61  ;;  %vm4367_vm5 = vmor %vm1939_vm14, %vm1940_vm0 }
 0x4f5   : > { %v1936_v23 = vsub.f32 1.0, %v1935_v57  ;;  %v1893_v60 = vperm.slane %v1888_v10, 0  ;;  %vm1929_vm3 = vcmp.eq.f32.partialorder %v1928_v4, 8.507059e+37  ;;  %vm1954_vm10 = vweird.f32 %v4319_v33 }
 0x4f6   : > { %v1922_v26 = vmul.f32 %v3263_v32, %v1921_v2  ;;  %v1908_v15 = vadd.f32 %v4308_v62, %v1907_v49  ;;  %v1913_v2 = vand.u32 2147483647, %v4283_v61  ;;  %v1958_v49 = vand.u32 2147483647, %v4319_v33 }
 0x4f7   : > { %v1898_v30 = vmul.f32 %v1893_v60, %v4330_v34  ;;  %v1937_v36 = vmul.f32 %v4314_v41, %v1936_v23  ;;  %v1931_v23 = vor.u32 1.1754944e-38, %v1930_v63  ;;  %v1960_v60 = vand.u32 2147483648, %v4319_v33 }
 0x4f8   : > { %v1923_v25 = vadd.f32 %v3263_v32, %v1922_v26  ;;  %v1912_v61 = vsel %vm4360_vm4, %v4308_v62, %v1908_v15  ;;  %v1916_v4 = vor.u32 1.1754944e-38, %v1915_v51  ;;  %v1946_v63 = vor.u32 1.1754944e-38, %v1945_v0  ;;  %v1801_v51 = vpop.xlane.xlu1 %1800 }
 0x4f9   : > { %v3267_v13 = vpop.eup %3266  ;;  %v4335_v12 = vmax.f32 %v1898_v30, 1e-08  ;;  %v1938_v56 = vadd.f32 %v4314_v41, %v1937_v36  ;;  %v1989_v30 = vlaneseq  ;;  %vm1914_vm9 = vcmp.eq.f32.partialorder %v1913_v2, 8.507059e+37 }
 0x4fa   : > { %v1950_v8 = vmul.f32 %v3267_v13, %v4319_v33  ;;  %v1927_v50 = vsel %vm4348_vm1, %v3263_v32, %v1923_v25  ;;  %vm1955_vm8 = vweird.f32 %v3267_v13  ;;  %vm1944_vm11 = vcmp.eq.f32.partialorder %v1943_v21, 8.507059e+37 }
 0x4fb   : > { %3268 = vrcp.f32 %v4335_v12  ;;  %v1942_v36 = vsel %vm4367_vm5, %v4314_v41, %v1938_v56  ;;  %v1932_v25 = vsel %vm1929_vm3, %v1931_v23, %v1927_v50  ;;  %v1917_v62 = vsel %vm1914_vm9, %v1916_v4, %v1912_v61  ;;  %vm1956_vm14 = vmor %vm1954_vm10, %vm1955_vm8  ;;  %v1804_v61 = vpop.xlane.xlu2 %1803 }
 0x4fc   : > { %v1951_v16 = vsub.f32 1.0, %v1950_v8  ;;  %v1798_v8 = vpop.xlane.xlu0 %1797  ;;  %v1947_v10 = vsel %vm1944_vm11, %v1946_v63, %v1942_v36  ;;  %vm1959_vm15 = vcmp.eq.f32.partialorder %v1958_v49, 8.507059e+37  ;;  %v4382_v0 = vand.u32 127, %v1989_v30 }
 0x4fd   : > { %v1933_v5 = vmul.f32 %v1932_v25, %v1798_v8  ;;  %v1918_v50 = vmul.f32 %v1917_v62, %v1795_v53  ;;  %v1975_v33 = vand.u32 2147483648, %v4335_v12  ;;  %v1948_v2 = vmul.f32 %v1947_v10, %v1801_v51 }
 0x4fe   : > { %v1952_v26 = vmul.f32 %v3267_v13, %v1951_v16  ;;  %v1961_v16 = vor.u32 1.1754944e-38, %v1960_v60  ;;  %v1973_v23 = vand.u32 2147483647, %v4335_v12  ;;  %vm1996_vm1 = vcmask 1041409  }
 0x4ff   : > { %v1992_v60 = vperm.slane %v1933_v5, %v4382_v0  ;;  %vm1969_vm2 = vweird.f32 %v4335_v12  ;;  %v1991_v49 = vperm.slane %v1918_v50, %v4382_v0  ;;  %v1976_v36 = vor.u32 1.1754944e-38, %v1975_v33 }
 0x500   : > { %v1953_v57 = vadd.f32 %v3267_v13, %v1952_v26  ;;  %v1993_v53 = vperm.slane %v1948_v2, %v4382_v0  ;;  %vm1974_vm4 = vcmp.eq.f32.partialorder %v1973_v23, 8.507059e+37  ;;  %vm1998_vm5 = vcmask 1042434  }
 0x501   : > { %v3269_v22 = vpop.eup %3268  ;;  %v1997_v4 = vsel %vm1996_vm1, %v1992_v60, %v1991_v49  ;;  %vm2000_vm8 = vcmask 1043459   ;;  %vm2002_vm9 = vcmask 1044484   ;;  %vm2006_vm10 = vcmask 61440  }
 0x502   : > { %v1965_v15 = vmul.f32 %v3269_v22, %v4335_v12  ;;  %v1957_v32 = vsel %vm1956_vm14, %v3267_v13, %v1953_v57  ;;  %vm1970_vm0 = vweird.f32 %v3269_v22  ;;  %v1999_v62 = vsel %vm1998_vm5, %v1993_v53, %v1997_v4 }
 0x503   : > { %v1962_v56 = vsel %vm1959_vm15, %v1961_v16, %v1957_v32  ;;  %vm1971_vm3 = vmor %vm1969_vm2, %vm1970_vm0  ;;  %v1982_v16 = vpop.permute.xlu1 %1981 }
 0x504   : > { %v1966_v41 = vsub.f32 1.0, %v1965_v15  ;;  %v1963_v26 = vmul.f32 %v1962_v56, %v1804_v61  ;;  %v1807_v8 = vpop.xlane.xlu0 %1806 }
 0x506   : > { %v1967_v21 = vmul.f32 %v3269_v22, %v1966_v41  ;;  %v1994_v57 = vperm.slane %v1963_v26, %v4382_v0 }
 0x508   : > { %v1968_v13 = vadd.f32 %v3269_v22, %v1967_v21  ;;  %v2001_v15 = vsel %vm2000_vm8, %v1994_v57, %v1999_v62  ;;  %v4410_v62 = vshrl.u32 %v1989_v30, 7 }
 0x50a   : > { %v1972_v25 = vsel %vm1971_vm3, %v3269_v22, %v1968_v13  ;;  %3208 = vset.pattern.permute.xlu2 %v4410_v62  ;;  %3210 = vset.pattern.permute.xlu0 %v4410_v62 }
 0x50b   : > { %v1977_v63 = vsel %vm1974_vm4, %v1976_v36, %v1972_v25  ;;  %3209 = vset.pattern.permute.xlu1 %v4410_v62 }
 0x50c   : > { %v1978_v5 = vmul.f32 %v1977_v63, %v1807_v8  ;;  %v4399_v41 = vpop.permute.xlu0 %1469 }
 0x50d   : > { %v1472_v56 = vadd.f32 %v4399_v41, %v4013_v47 }
 0x50e   : > { %v1995_v12 = vperm.slane %v1978_v5, %v4382_v0  ;;  %v2376_v5 = vperm.slane %v4110_v24, 0 }
 0x50f   : > { %v3047_v51 = vmul.f32 -1.442695, %v1472_v56 }
 0x510   : > { %v2003_v22 = vsel %vm2002_vm9, %v1995_v12, %v2001_v15  ;;  %v2378_v12 = vperm.slane %v4132_v35, 0 }
 0x511   : > { %v2005_v10 = vmul.f32 %v2003_v22, %v1982_v16  ;;  %3270 = vpow2.f32 %v3047_v51 }
 0x513   : > { %v2007_v32 = vsel %vm2006_vm10, %v2005_v10, -inf }
 0x514   : > { %2008 = vmax.xlane.f32.xlu2 %v2007_v32 }
 0x517   : > { %v3271_v50 = vpop.eup %3270 }
 0x518   : > { %v1476_v33 = vadd.f32 1.0, %v3271_v50 }
 0x51a   : > { %3272 = vrcp.f32 %v1476_v33  ;;  %v1488_v49 = vand.u32 2147483648, %v1476_v33  ;;  %vm1482_vm14 = vweird.f32 %v1476_v33  ;;  %v1486_v36 = vand.u32 2147483647, %v1476_v33 }
 0x51c   : > { %v1489_v53 = vor.u32 1.1754944e-38, %v1488_v49  ;;  %vm1487_vm0 = vcmp.eq.f32.partialorder %v1486_v36, 8.507059e+37 }
 0x520   : > { %v3273_v2 = vpop.eup %3272 }
 0x521   : > { %v1478_v21 = vmul.f32 %v3273_v2, %v1476_v33  ;;  %vm1483_vm11 = vweird.f32 %v3273_v2 }
 0x522   : > { %vm1484_vm15 = vmor %vm1482_vm14, %vm1483_vm11  ;;  %vm2238_vm14 = vcmask 392192  }
 0x523   : > { %v1479_v23 = vsub.f32 1.0, %v1478_v21 }
 0x525   : > { %v1480_v61 = vmul.f32 %v3273_v2, %v1479_v23 }
 0x527   : > { %v1481_v13 = vadd.f32 %v3273_v2, %v1480_v61 }
 0x529   : > { %v1485_v47 = vsel %vm1484_vm15, %v3273_v2, %v1481_v13  ;;  %v2381_v13 = vpop.permute.xlu0 %2380 }
 0x52a   : > { %v1490_v4 = vsel %vm1487_vm0, %v1489_v53, %v1485_v47  ;;  %v2395_v53 = vsel %vm1813_vm13, %v2381_v13, 0.0 }
 0x52c   : > { %1512 = vrot.lane.b32.xlu2 %v4182_v46, %s3639_s11 }
 0x587   : > { %v2009_v60 = vpop.xlane.xlu2 %2008 }
 0x588   : > { %v2010_v26 = vsub.f32 %v2005_v10, %v2009_v60 }
 0x58a   : > { %v2011_v46 = vmul.f32 1.442695, %v2010_v26 }
 0x58c   : > { %3274 = vpow2.f32 %v2011_v46  ;;  %v2385_v46 = vpop.permute.xlu0 %2384 }
 0x58d   : > { %v2401_v36 = vsel %vm1813_vm13, %v2385_v46, 0.0 }
 0x58f   : > { %v1513_v25 = vpop.permute.xlu2 %1512 }
 0x590   : > { %v1515_v63 = vmul.f32 %v1513_v25, %v1490_v4  ;;  %v1353_v4 = vpop.f32.mrf.mxu2 }
 0x592   : > { %v3275_v8 = vpop.eup %3274  ;;  %1517 = vrot.lane.b32.xlu1 %v1515_v63, %s3637_s23  ;;  %s3648_s23 = smov 112  }
 0x593   : > { %v2013_v57 = vsel %vm2006_vm10, %v3275_v8, 0.0 }
 0x594   : > { %2014 = vadd.xlane.f32.xlu2 %v2013_v57  ;;  %v3320_v57 = vld [vmem:[%s4843_s18] sm:$0x3]  ;;  %v2389_v17 = vpop.permute.xlu0 %2388 }
 0x59a   : > { %2382 = vrot.lane.b32.xlu1 %v2376_v5, %s3643_s10  ;;  %v1359_v5 = vperm.slane %v3320_v57, 1 }
 0x5a2   : > { %2386 = vrot.lane.b32.xlu1 %v2378_v12, %s3643_s10 }
 0x604   : > { %v1518_v26 = vpop.permute.xlu1 %1517 }
 0x607   : > { %v2015_v15 = vpop.xlane.xlu2 %2014 }
 0x608   : > { %3276 = vrcp.f32 %v2015_v15  ;;  %v2027_v10 = vand.u32 2147483648, %v2015_v15  ;;  %v2025_v35 = vand.u32 2147483647, %v2015_v15  ;;  %vm2021_vm3 = vweird.f32 %v2015_v15 }
 0x60a   : > { %v2028_v30 = vor.u32 1.1754944e-38, %v2027_v10  ;;  %vm2026_vm11 = vcmp.eq.f32.partialorder %v2025_v35, 8.507059e+37 }
 0x60c   : > { %v2383_v49 = vpop.permute.xlu1 %2382 }
 0x60d   : > { %v2398_v63 = vsel %vm1813_vm13, %v2383_v49, 0.0 }
 0x60e   : > { %v3277_v16 = vpop.eup %3276 }
 0x60f   : > { %v2017_v22 = vmul.f32 %v3277_v16, %v2015_v15  ;;  %vm2022_vm2 = vweird.f32 %v3277_v16 }
 0x610   : > { %vm2023_vm4 = vmor %vm2021_vm3, %vm2022_vm2 }
 0x611   : > { %v2018_v24 = vsub.f32 1.0, %v2017_v22  ;;  %v2117_v22 = vld [vmem:[#allocation10 + $0x18] sm:$0xff] }
 0x612   : > { %2163 = vmatpush.msra.mxu3 %v2117_v22 }
 0x613   : > { %v2019_v32 = vmul.f32 %v3277_v16, %v2018_v24  ;;  %v2114_v24 = vld [vmem:[#allocation10] sm:$0xff] }
 0x614   : > { %v2387_v47 = vpop.permute.xlu1 %2386  ;;  %2164 = vmatpush.msra.mxu3 %v2115_v43 }
 0x615   : > { %v2020_v56 = vadd.f32 %v3277_v16, %v2019_v32  ;;  %v2404_v25 = vsel %vm1813_vm13, %v2387_v47, 0.0 }
 0x617   : > { %v2024_v51 = vsel %vm2023_vm4, %v3277_v16, %v2020_v56 }
 0x618   : > { %v2029_v50 = vsel %vm2026_vm11, %v2028_v30, %v2024_v51  ;;  %v2407_v51 = vsel %vm1813_vm13, %v2389_v17, 0.0  ;;  %vm2814_vm13 = vcmask 126976  }
 0x619   : > { %v2030_v33 = vmul.f32 %v3275_v8, %v2029_v50  ;;  %v1354_v8 = vadd.f32 %v1353_v4, %v4171_v28 }
 0x61b   : > { %v2045_v2 = vperm.slane %v2030_v33, 2  ;;  %v2031_v21 = vperm.slane %v2030_v33, 0  ;;  %v2038_v23 = vperm.slane %v2030_v33, 1  ;;  %v2052_v61 = vperm.slane %v2030_v33, 3 }
 0x61c   : > { %v2059_v60 = vperm.slane %v2030_v33, 4  ;;  %v1363_v12 = vadd.f32 %v1359_v5, %v1354_v8 }
 0x61d   : > { %2050 = vperm.xlu0 %3210, %v2045_v2   ;;  %2036 = vperm.xlu2 %3208, %v2031_v21  }
 0x61e   : > { %2043 = vperm.xlu1 %3209, %v2038_v23   ;;  %v1520_v15 = vadd.f32 %v1518_v26, %v1363_v12 }
 0x620   : > { %3278 = vtanh.f32 %v1520_v15 }
 0x625   : > { %2057 = vperm.xlu2 %3208, %v2052_v61  }
 0x626   : > { %2064 = vperm.xlu1 %3209, %v2059_v60   ;;  %v3279_v16 = vpop.eup %3278 }
 0x62e   : > { %3213 = vset.pattern.permute.xlu1 %v3641_v6 }
 0x647   : > { %2402 = vadd.xlane.f32.xlu0 %v2401_v36 }
 0x64e   : > { %2396 = vadd.xlane.f32.xlu2 %v2395_v53 }
 0x64f   : > { %2405 = vadd.xlane.f32.xlu0 %v2404_v25 }
 0x650   : > { %2399 = vadd.xlane.f32.xlu1 %v2398_v63 }
 0x663   : > { %1524 = vrot.lane.b32.xlu0 %v3279_v16, %s3638_s2  ;;  %v1492_v16 = vadd.f32 %v4399_v41, %v1363_v12 }
 0x666   : > { %2335 = vrot.lane.b32.xlu2 %v1778_v58, %s3643_s10  ;;  %v2116_v58 = vld [vmem:[#allocation10 + $0x10] sm:$0xff] }
 0x667   : > { %2143 = vmatpush.msra.mxu2 %v2116_v58 }
 0x669   : > { %2337 = vrot.lane.b32.xlu1 %v1779_v44, %s3643_s10  ;;  %2144 = vmatpush.msra.mxu2 %v2114_v24  ;;  %v3048_v24 = vmul.f32 -1.442695, %v1492_v16 }
 0x66b   : > { %2343 = vrot.lane.b32.xlu0 %v1782_v59, %s3643_s10  ;;  %3280 = vpow2.f32 %v3048_v24 }
 0x66e   : > { %2339 = vrot.lane.b32.xlu2 %v1780_v40, %s3643_s10 }
 0x676   : > { %2341 = vrot.lane.b32.xlu2 %v1781_v1, %s3643_s10 }
 0x677   : > { %v2037_v28 = vpop.permute.xlu2 %2036 }
 0x678   : > { %v2066_v11 = vmul.f32 %v2037_v28, %v4053_v37 }
 0x67a   : > { %v2071_v59 = vsel %vm4802_vm6, %v2066_v11, 0.0 }
 0x67b   : > { %v2072_v40 = vrot.slane %v2071_v59, 4 }
 0x67d   : > { %v2073_v1 = vadd.f32 %v2072_v40, %v2071_v59  ;;  %v2230_v40 = vld [vmem:[%s4854_s1 + $0x50] sm:$0xff] }
 0x67e   : > { %2252 = vmatpush.msrb.mxu2 %v2230_v40 }
 0x67f   : > { %v2058_v44 = vpop.permute.xlu2 %2057  ;;  %v2074_v50 = vrot.slane %v2073_v1, 2 }
 0x680   : > { %v2069_v18 = vmul.f32 %v2058_v44, %v4087_v14 }
 0x681   : > { %v2075_v60 = vadd.f32 %v2074_v50, %v2073_v1  ;;  %v2228_v1 = vld [vmem:[%s4854_s1 + $0x40] sm:$0xff] }
 0x682   : > { %v2092_v31 = vsel %vm4802_vm6, %v2069_v18, 0.0  ;;  %v3281_v18 = vpop.eup %3280  ;;  %2253 = vmatpush.msrb.mxu2 %v2228_v1  ;;  %v2220_v50 = vld [vmem:[%s4854_s1] sm:$0xff] }
 0x683   : > { %v2093_v35 = vrot.slane %v2092_v31, 4  ;;  %v2076_v47 = vrot.slane %v2075_v60, 1 }
 0x685   : > { %v2094_v21 = vadd.f32 %v2093_v35, %v2092_v31  ;;  %v2077_v15 = vadd.f32 %v2076_v47, %v2075_v60  ;;  %v1496_v31 = vadd.f32 1.0, %v3281_v18  ;;  %v2113_v35 = vld [vmem:[#allocation9 + $0x38] sm:$0xff] }
 0x686   : > { %2204 = vmatpush.msrb.mxu1 %v2113_v35 }
 0x687   : > { %v2095_v49 = vrot.slane %v2094_v21, 2  ;;  %3282 = vrcp.f32 %v1496_v31  ;;  %vm1502_vm0 = vweird.f32 %v1496_v31 }
 0x689   : > { %v2096_v8 = vadd.f32 %v2095_v49, %v2094_v21 }
 0x68b   : > { %v2097_v58 = vrot.slane %v2096_v8, 1 }
 0x68d   : > { %v2098_v43 = vadd.f32 %v2097_v58, %v2096_v8  ;;  %v3283_v21 = vpop.eup %3282 }
 0x68e   : > { %v1498_v60 = vmul.f32 %v3283_v21, %v1496_v31  ;;  %vm1503_vm15 = vweird.f32 %v3283_v21 }
 0x68f   : > { %v2051_v10 = vpop.permute.xlu0 %2050  ;;  %vm1504_vm2 = vmor %vm1502_vm0, %vm1503_vm15 }
 0x690   : > { %v2044_v37 = vpop.permute.xlu1 %2043  ;;  %v2068_v32 = vmul.f32 %v2051_v10, %v4069_v54  ;;  %v2226_v10 = vld [vmem:[%s4854_s1 + $0x30] sm:$0xff] }
 0x691   : > { %v2067_v56 = vmul.f32 %v2044_v37, %v4061_v45  ;;  %2254 = vmatpush.msrb.mxu2 %v2226_v10  ;;  %v2224_v37 = vld [vmem:[%s4854_s1 + $0x20] sm:$0xff] }
 0x692   : > { %v2085_v30 = vsel %vm4802_vm6, %v2068_v32, 0.0  ;;  %v2112_v32 = vld [vmem:[#allocation9 + $0x30] sm:$0xff] }
 0x693   : > { %v2078_v33 = vsel %vm4802_vm6, %v2067_v56, 0.0  ;;  %v2086_v2 = vrot.slane %v2085_v30, 4  ;;  %2408 = vadd.xlane.f32.xlu1 %v2407_v51  ;;  %2255 = vmatpush.msrb.mxu2 %v2224_v37  ;;  %v2222_v56 = vld [vmem:[%s4854_s1 + $0x10] sm:$0xff]  ;;  %v2111_v51 = vld [vmem:[#allocation9 + $0x28] sm:$0xff] }
 0x694   : > { %v2079_v14 = vrot.slane %v2078_v33, 4  ;;  %2184 = vmatpush.msrb.mxu0 %v2112_v32  ;;  %2205 = vmatpush.msrb.mxu1 %v2111_v51 }
 0x695   : > { %v2087_v23 = vadd.f32 %v2086_v2, %v2085_v30  ;;  %2256 = vmatpush.msrb.mxu2 %v2222_v56  ;;  %v2110_v30 = vld [vmem:[#allocation9 + $0x20] sm:$0xff]  ;;  %v2108_v2 = vld [vmem:[#allocation9 + $0x10] sm:$0xff] }
 0x696   : > { %v2080_v61 = vadd.f32 %v2079_v14, %v2078_v33  ;;  %2185 = vmatpush.msrb.mxu0 %v2110_v30  ;;  %v4464_v33 = vld [vmem:[%s3813_s20] sm:$0x1f]  ;;  %v2109_v14 = vld [vmem:[#allocation9 + $0x18] sm:$0xff] }
 0x697   : > { %v2088_v26 = vrot.slane %v2087_v23, 2  ;;  %2257 = vmatpush.msrb.mxu2 %v2220_v50  ;;  %2206 = vmatpush.msrb.mxu1 %v2109_v14 }
 0x698   : > { %v2081_v13 = vrot.slane %v2080_v61, 2  ;;  %v2065_v54 = vpop.permute.xlu1 %2064  ;;  %2186 = vmatpush.msrb.mxu0 %v2108_v2 }
 0x699   : > { %v2089_v46 = vadd.f32 %v2088_v26, %v2087_v23  ;;  %v2070_v45 = vmul.f32 %v2065_v54, %v4080_v9  ;;  %v2106_v23 = vld [vmem:[#allocation9] sm:$0xff]  ;;  %v3644_v54 = vmov 33  }
 0x69a   : > { %v2082_v36 = vadd.f32 %v2081_v13, %v2080_v61  ;;  %v2107_v61 = vld [vmem:[#allocation9 + $0x8] sm:$0xff]  ;;  %2187 = vmatpush.msrb.mxu0 %v2106_v23  ;;  %v1499_v13 = vsub.f32 1.0, %v1498_v60  ;;  %3211 = vset.pattern.permute.xlu0 %v3644_v54 }
 0x69b   : > { %v2099_v53 = vsel %vm4802_vm6, %v2070_v45, 0.0  ;;  %v2090_v4 = vrot.slane %v2089_v46, 1  ;;  %2207 = vmatpush.msrb.mxu1 %v2107_v61 }
 0x69c   : > { %v2083_v25 = vrot.slane %v2082_v36, 1  ;;  %v2100_v63 = vrot.slane %v2099_v53, 4 }
 0x69d   : > { %v2091_v28 = vadd.f32 %v2090_v4, %v2089_v46  ;;  %v1500_v46 = vmul.f32 %v3283_v21, %v1499_v13  ;;  %v1506_v4 = vand.u32 2147483647, %v1496_v31 }
 0x69e   : > { %v2084_v57 = vadd.f32 %v2083_v25, %v2082_v36  ;;  %v2101_v5 = vadd.f32 %v2100_v63, %v2099_v53  ;;  %v1508_v53 = vand.u32 2147483648, %v1496_v31 }
 0x69f   : > { %v1501_v47 = vadd.f32 %v3283_v21, %v1500_v46  ;;  %vm1507_vm3 = vcmp.eq.f32.partialorder %v1506_v4, 8.507059e+37 }
 0x6a0   : > { %v2102_v11 = vrot.slane %v2101_v5, 2  ;;  %v2123_v9 = vsel %vm1996_vm1, %v2084_v57, %v2077_v15  ;;  %v1509_v57 = vor.u32 1.1754944e-38, %v1508_v53 }
 0x6a1   : > { %v2124_v44 = vsel %vm1998_vm5, %v2091_v28, %v2123_v9  ;;  %v1505_v8 = vsel %vm1504_vm2, %v3283_v21, %v1501_v47  ;;  %v3321_v9 = vld [vmem:[%s3808_s29] sm:$0x1f] }
 0x6a2   : > { %v2103_v22 = vadd.f32 %v2102_v11, %v2101_v5  ;;  %v2125_v41 = vsel %vm2000_vm8, %v2098_v43, %v2124_v44  ;;  %v1510_v15 = vsel %vm1507_vm3, %v1509_v57, %v1505_v8 }
 0x6a3   : > { %v1522_v11 = vsub.f32 1.0, %v1510_v15 }
 0x6a4   : > { %v2104_v17 = vrot.slane %v2103_v22, 1 }
 0x6a6   : > { %v2105_v59 = vadd.f32 %v2104_v17, %v2103_v22  ;;  %v1528_v22 = vmul.f32 %v3321_v9, %v1510_v15 }
 0x6a8   : > { %v2126_v12 = vsel %vm2002_vm9, %v2105_v59, %v2125_v41 }
 0x6a9   : > { %3051 = vmatmul.msk.f32.vlgmr.msra.gmra.mxu2 %vm4802_vm6, %v2126_v12  ;;  %2815 = vst.msk [vmem:[%s3798_s24] sm:$0x1f] %vm2814_vm13, %v2126_v12  ;;  %3052 = vmatmul.msk.f32.vlgmr.msra.gmra.mxu3 %vm4802_vm6, %v2126_v12 }
 0x6b1   : > { %3055 = vmatmul.msk.f32.vlgmr.msrb.gmra.mxu2 %vm2238_vm14, %v4464_v33 }
 0x6ba   : > { %v4470_v49 = vpop.xlane.xlu0 %2402 }
 0x6bb   : > { %3284 = vrsqrt.f32 %v4470_v49  ;;  %vm2443_vm13 = vcmp.eq.f32.partialorder %v4470_v49, 0.0 }
 0x6c1   : > { %v4468_v26 = vpop.xlane.xlu2 %2396 }
 0x6c2   : > { %v4474_v63 = vpop.xlane.xlu0 %2405  ;;  %3286 = vrsqrt.f32 %v4468_v26  ;;  %vm2417_vm4 = vcmp.eq.f32.partialorder %v4468_v26, inf  ;;  %vm2419_vm0 = vcmp.eq.f32.partialorder %v4468_v26, 0.0 }
 0x6c3   : > { %v4477_v16 = vpop.xlane.xlu1 %2399  ;;  %3288 = vrsqrt.f32 %v4474_v63  ;;  %vm2453_vm11 = vcmp.eq.f32.partialorder %v4474_v63, inf  ;;  %vm2455_vm2 = vcmp.eq.f32.partialorder %v4474_v63, 0.0 }
 0x6c4   : > { %3290 = vrsqrt.f32 %v4477_v16  ;;  %vm2429_vm15 = vcmp.eq.f32.partialorder %v4477_v16, inf  ;;  %vm2431_vm3 = vcmp.eq.f32.partialorder %v4477_v16, 0.0 }
 0x6c9   : > { %v2336_v45 = vpop.permute.xlu2 %2335 }
 0x6ca   : > { %v2350_v36 = vmul.f32 %v2336_v45, %v4056_v38 }
 0x6cc   : > { %v2355_v25 = vsel %vm4802_vm6, %v2350_v36, 0.0 }
 0x6cd   : > { %2356 = vadd.xlane.f32.xlu2 %v2355_v25 }
 0x6d1   : > { %v2340_v5 = vpop.permute.xlu2 %2339 }
 0x6d2   : > { %v2352_v38 = vmul.f32 %v2340_v5, %v4072_v55 }
 0x6d4   : > { %v2361_v28 = vsel %vm4802_vm6, %v2352_v38, 0.0 }
 0x6d5   : > { %2362 = vadd.xlane.f32.xlu1 %v2361_v28  ;;  %v1525_v58 = vpop.permute.xlu0 %1524 }
 0x6d6   : > { %v1527_v24 = vmul.f32 %v1525_v58, %v1522_v11  ;;  %v2444_v11 = vand.u32 2147483648, %v4470_v49 }
 0x6d8   : > { %v1529_v17 = vadd.f32 %v1528_v22, %v1527_v24  ;;  %v2420_v22 = vand.u32 2147483648, %v4468_v26 }
 0x6d9   : > { %v2342_v44 = vpop.permute.xlu2 %2341 }
 0x6da   : > { %2819 = vst.msk [vmem:[%s3808_s29] sm:$0x1f] %vm2817_vm12, %v1529_v17  ;;  %v2353_v43 = vmul.f32 %v2342_v44, %v4117_v27  ;;  %3053 = vmatmul.msk.f32.vlgmr.msrb.gmra.mxu0 %vm1312_vm7, %v1529_v17  ;;  %3054 = vmatmul.msk.f32.vlgmr.msrb.gmra.mxu1 %vm1312_vm7, %v1529_v17  ;;  %vm2441_vm12 = vcmp.eq.f32.partialorder %v4470_v49, inf }
 0x6db   : > { %v2338_v55 = vpop.permute.xlu1 %2337 }
 0x6dc   : > { %v2351_v59 = vmul.f32 %v2338_v55, %v4064_v48  ;;  %v2364_v41 = vsel %vm4802_vm6, %v2353_v43, 0.0  ;;  %v3285_v48 = vpop.eup %3284  ;;  %v2456_v43 = vand.u32 2147483648, %v4474_v63 }
 0x6dd   : > { %2365 = vadd.xlane.f32.xlu1 %v2364_v41  ;;  %v2344_v12 = vpop.permute.xlu0 %2343  ;;  %v2435_v10 = vmul.f32 %v3285_v48, %v4470_v49 }
 0x6de   : > { %v2354_v18 = vmul.f32 %v2344_v12, %v4104_v20  ;;  %v2358_v40 = vsel %vm4802_vm6, %v2351_v59, 0.0  ;;  %v3287_v20 = vpop.eup %3286  ;;  %v2432_v59 = vand.u32 2147483648, %v4477_v16 }
 0x6df   : > { %2359 = vadd.xlane.f32.xlu0 %v2358_v40  ;;  %v3289_v27 = vpop.eup %3288  ;;  %v2411_v37 = vmul.f32 %v3287_v20, %v4468_v26  ;;  %v2436_v56 = vmul.f32 %v3285_v48, %v2435_v10 }
 0x6e0   : > { %v2367_v31 = vsel %vm4802_vm6, %v2354_v18, 0.0  ;;  %v3291_v1 = vpop.eup %3290 }
 0x6e1   : > { %2368 = vadd.xlane.f32.xlu2 %v2367_v31  ;;  %v2423_v35 = vmul.f32 %v3291_v1, %v4477_v16  ;;  %v2412_v30 = vmul.f32 %v3287_v20, %v2411_v37  ;;  %v2437_v2 = vmul.f32 0.5, %v2436_v56 }
 0x6e3   : > { %v2424_v50 = vmul.f32 %v3291_v1, %v2423_v35  ;;  %v2413_v14 = vmul.f32 0.5, %v2412_v30  ;;  %v2438_v60 = vsub.f32 1.5, %v2437_v2 }
 0x6e5   : > { %v2425_v61 = vmul.f32 0.5, %v2424_v50  ;;  %v2414_v13 = vsub.f32 1.5, %v2413_v14  ;;  %v2439_v36 = vmul.f32 %v3285_v48, %v2438_v60 }
 0x6e7   : > { %v2426_v45 = vsub.f32 1.5, %v2425_v61  ;;  %v2415_v47 = vmul.f32 %v3287_v20, %v2414_v13  ;;  %v2440_v8 = vmul.f32 %v2439_v36, %v4470_v49 }
 0x6e9   : > { %v2427_v4 = vmul.f32 %v3291_v1, %v2426_v45  ;;  %v2416_v57 = vmul.f32 %v2415_v47, %v4468_v26  ;;  %v2442_v28 = vsel %vm2441_vm12, %v4470_v49, %v2440_v8 }
 0x6ea   : > { %v2445_v17 = vsel %vm2443_vm13, %v2444_v11, %v2442_v28 }
 0x6eb   : > { %v2428_v38 = vmul.f32 %v2427_v4, %v4477_v16  ;;  %v2418_v58 = vsel %vm2417_vm4, %v4468_v26, %v2416_v57  ;;  %v2472_v12 = vperm.slane %v2445_v17, 0 }
 0x6ec   : > { %v2421_v55 = vsel %vm2419_vm0, %v2420_v22, %v2418_v58 }
 0x6ed   : > { %v2430_v44 = vsel %vm2429_vm15, %v4477_v16, %v2428_v38  ;;  %v2470_v40 = vperm.slane %v2421_v55, 0  ;;  %v2477_v20 = vmul.f32 %v2472_v12, %v4275_v29 }
 0x6ee   : > { %v2433_v18 = vsel %vm2431_vm3, %v2432_v59, %v2430_v44 }
 0x6ef   : > { %v2471_v48 = vperm.slane %v2433_v18, 0  ;;  %v4533_v37 = vmax.f32 %v2477_v20, 1e-08  ;;  %v2225_v18 = vld [vmem:[%s4854_s1 + $0x28] sm:$0xff] }
 0x6f1   : > { %v2476_v16 = vmul.f32 %v2471_v48, %v4237_v39  ;;  %v2526_v8 = vand.u32 2147483648, %v4533_v37 }
 0x6f3   : > { %2561 = vperm.xlu0 %3211, %v4179_v42   ;;  %v2447_v42 = vmul.f32 %v3289_v27, %v4474_v63  ;;  %v2527_v20 = vor.u32 1.1754944e-38, %v2526_v8 }
 0x6f5   : > { %v2448_v51 = vmul.f32 %v3289_v27, %v2447_v42 }
 0x6f7   : > { %v2449_v23 = vmul.f32 0.5, %v2448_v51 }
 0x6f9   : > { %v2450_v46 = vsub.f32 1.5, %v2449_v23 }
 0x6fb   : > { %3212 = vset.pattern.permute.xlu0 %v4410_v62  ;;  %v2451_v25 = vmul.f32 %v3289_v27, %v2450_v46  ;;  %v2475_v27 = vmul.f32 %v2470_v40, %v4230_v19  ;;  %v4540_v19 = vmax.f32 %v2476_v16, 1e-08 }
 0x6fd   : > { %v2452_v15 = vmul.f32 %v2451_v25, %v4474_v63  ;;  %v4536_v42 = vmax.f32 %v2475_v27, 1e-08  ;;  %v2524_v25 = vand.u32 2147483647, %v4533_v37  ;;  %v2511_v55 = vand.u32 2147483648, %v4540_v19 }
 0x6ff   : > { %v2454_v24 = vsel %vm2453_vm11, %v4474_v63, %v2452_v15  ;;  %vm2520_vm11 = vweird.f32 %v4533_v37  ;;  %v2229_v15 = vld [vmem:[%s4854_s1 + $0x48] sm:$0xff]  ;;  %vm2490_vm0 = vweird.f32 %v4536_v42  ;;  %v2496_v38 = vand.u32 2147483648, %v4536_v42 }
 0x700   : > { %v2457_v49 = vsel %vm2455_vm2, %v2456_v43, %v2454_v24  ;;  %v2494_v11 = vand.u32 2147483647, %v4536_v42  ;;  %v2227_v24 = vld [vmem:[%s4854_s1 + $0x38] sm:$0xff] }
 0x701   : > { %v2473_v31 = vperm.slane %v2457_v49, 0  ;;  %v2497_v40 = vor.u32 1.1754944e-38, %v2496_v38  ;;  %v4865_v49 = vmov 1  }
 0x703   : > { %v2478_v1 = vmul.f32 %v2473_v31, %v4306_v52 }
 0x705   : > { %v4538_v29 = vmax.f32 %v2478_v1, 1e-08 }
 0x706   : > { %v4499_v32 = vpop.xlane.xlu1 %2408 }
 0x707   : > { %3292 = vrsqrt.f32 %v4499_v32  ;;  %vm2465_vm12 = vcmp.eq.f32.partialorder %v4499_v32, inf  ;;  %v2468_v10 = vand.u32 2147483648, %v4499_v32  ;;  %vm2467_vm4 = vcmp.eq.f32.partialorder %v4499_v32, 0.0 }
 0x708   : > { %3294 = vrcp.f32 %v4533_v37  ;;  %vm2535_vm6 = vweird.f32 %v4538_v29  ;;  %v2539_v44 = vand.u32 2147483647, %v4538_v29  ;;  %v2541_v43 = vand.u32 2147483648, %v4538_v29 }
 0x709   : > { %3296 = vrcp.f32 %v4536_v42 }
 0x70a   : > { %3298 = vrcp.f32 %v4538_v29 }
 0x70b   : > { %3300 = vrcp.f32 %v4540_v19 }
 0x70d   : > { %v3293_v21 = vpop.eup %3292 }
 0x70e   : > { %v2459_v54 = vmul.f32 %v3293_v21, %v4499_v32  ;;  %v4547_v56 = vpop.eup %3294 }
 0x70f   : > { %v2516_v14 = vmul.f32 %v4547_v56, %v4533_v37  ;;  %vm2521_vm13 = vweird.f32 %v4547_v56  ;;  %v2542_v37 = vor.u32 1.1754944e-38, %v2541_v43 }
 0x710   : > { %v2460_v53 = vmul.f32 %v3293_v21, %v2459_v54  ;;  %vm4589_vm3 = vmor %vm2520_vm11, %vm2521_vm13  ;;  %vm2505_vm13 = vweird.f32 %v4540_v19 }
 0x711   : > { %v2517_v61 = vsub.f32 1.0, %v2516_v14 }
 0x712   : > { %v2461_v5 = vmul.f32 0.5, %v2460_v53 }
 0x713   : > { %v2518_v45 = vmul.f32 %v4547_v56, %v2517_v61 }
 0x714   : > { %v2462_v9 = vsub.f32 1.5, %v2461_v5  ;;  %v2231_v5 = vld [vmem:[%s4854_s1 + $0x58] sm:$0xff] }
 0x715   : > { %v2519_v28 = vadd.f32 %v4547_v56, %v2518_v45  ;;  %2272 = vmatpush.msrb.mxu3 %v2231_v5 }
 0x716   : > { %v2463_v41 = vmul.f32 %v3293_v21, %v2462_v9 }
 0x717   : > { %2273 = vmatpush.msrb.mxu3 %v2229_v15  ;;  %v2523_v48 = vsel %vm4589_vm3, %v4547_v56, %v2519_v28 }
 0x718   : > { %v2464_v26 = vmul.f32 %v2463_v41, %v4499_v32  ;;  %v2509_v41 = vand.u32 2147483647, %v4540_v19 }
 0x719   : > { %2274 = vmatpush.msrb.mxu3 %v2227_v24 }
 0x71a   : > { %v2466_v63 = vsel %vm2465_vm12, %v4499_v32, %v2464_v26  ;;  %v4549_v32 = vpop.eup %3296  ;;  %vm2510_vm3 = vcmp.eq.f32.partialorder %v2509_v41, 8.507059e+37 }
 0x71b   : > { %v2469_v35 = vsel %vm2467_vm4, %v2468_v10, %v2466_v63  ;;  %v4551_v30 = vpop.eup %3298  ;;  %v2486_v2 = vmul.f32 %v4549_v32, %v4536_v42  ;;  %vm2491_vm15 = vweird.f32 %v4549_v32  ;;  %v2223_v63 = vld [vmem:[%s4854_s1 + $0x18] sm:$0xff]  ;;  %v2512_v42 = vor.u32 1.1754944e-38, %v2511_v55  ;;  %2275 = vmatpush.msrb.mxu3 %v2225_v18 }
 0x71c   : > { %v2474_v52 = vperm.slane %v2469_v35, 0  ;;  %v4553_v51 = vpop.eup %3300  ;;  %v2531_v21 = vmul.f32 %v4551_v30, %v4538_v29  ;;  %vm2536_vm2 = vweird.f32 %v4551_v30  ;;  %vm4599_vm4 = vmor %vm2490_vm0, %vm2491_vm15  ;;  %vm2525_vm15 = vcmp.eq.f32.partialorder %v2524_v25, 8.507059e+37 }
 0x71d   : > { %v2487_v23 = vsub.f32 1.0, %v2486_v2  ;;  %vm2506_vm12 = vweird.f32 %v4553_v51  ;;  %vm4612_vm11 = vmor %vm2535_vm6, %vm2536_vm2  ;;  %vm2495_vm6 = vcmp.eq.f32.partialorder %v2494_v11, 8.507059e+37  ;;  %vm2540_vm2 = vcmp.eq.f32.partialorder %v2539_v44, 8.507059e+37  ;;  %2276 = vmatpush.msrb.mxu3 %v2223_v63  ;;  %v2232_v11 = vld [vmem:[%s4863_s22] sm:$0x3] }
 0x71e   : > { %v2479_v39 = vmul.f32 %v2474_v52, %v4330_v34  ;;  %v2501_v34 = vmul.f32 %v4553_v51, %v4540_v19  ;;  %v2532_v60 = vsub.f32 1.0, %v2531_v21  ;;  %vm4624_vm0 = vmor %vm2505_vm13, %vm2506_vm12  ;;  %v2528_v29 = vsel %vm2525_vm15, %v2527_v20, %v2523_v48  ;;  %v2221_v52 = vld [vmem:[%s4854_s1 + $0x8] sm:$0xff]  ;;  %v4666_v48 = vld [vmem:[%s4864_s28] sm:$0x3] }
 0x71f   : > { %v2488_v54 = vmul.f32 %v4549_v32, %v2487_v23  ;;  %2277 = vmatpush.msrb.mxu3 %v2221_v52  ;;  %v2214_v20 = vperm.slane %v4666_v48, 0 }
 0x720   : > { %v4555_v50 = vmax.f32 %v2479_v39, 1e-08  ;;  %v2502_v13 = vsub.f32 1.0, %v2501_v34  ;;  %v2533_v36 = vmul.f32 %v4551_v30, %v2532_v60  ;;  %3056 = vmatmul.msk.f32.vlgmr.msrb.gmra.mxu3 %vm2238_vm14, %v4464_v33 }
 0x721   : > { %v2489_v4 = vadd.f32 %v4549_v32, %v2488_v54 }
 0x722   : > { %3302 = vrcp.f32 %v4555_v50  ;;  %v2503_v47 = vmul.f32 %v4553_v51, %v2502_v13  ;;  %v2534_v9 = vadd.f32 %v4551_v30, %v2533_v36  ;;  %v2556_v61 = vand.u32 2147483648, %v4555_v50 }
 0x723   : > { %v2493_v59 = vsel %vm4599_vm4, %v4549_v32, %v2489_v4  ;;  %vm2550_vm4 = vweird.f32 %v4555_v50  ;;  %v2554_v54 = vand.u32 2147483647, %v4555_v50 }
 0x724   : > { %v2504_v22 = vadd.f32 %v4553_v51, %v2503_v47  ;;  %v2538_v27 = vsel %vm4612_vm11, %v4551_v30, %v2534_v9  ;;  %v2498_v16 = vsel %vm2495_vm6, %v2497_v40, %v2493_v59 }
 0x725   : > { %v2543_v56 = vsel %vm2540_vm2, %v2542_v37, %v2538_v27  ;;  %vm2555_vm14 = vcmp.eq.f32.partialorder %v2554_v54, 8.507059e+37  ;;  %v4867_v54 = vrot.slane %v4022_v3, 4 }
 0x726   : > { %v2508_v1 = vsel %vm4624_vm0, %v4553_v51, %v2504_v22 }
 0x727   : > { %v2513_v32 = vsel %vm2510_vm3, %v2512_v42, %v2508_v1  ;;  %vm2678_vm15 = vcmp.gt.f32.partialorder %v4867_v54, 0.5 }
 0x728   : > { %v4567_v46 = vpop.eup %3302 }
 0x729   : > { %v2546_v57 = vmul.f32 %v4567_v46, %v4555_v50  ;;  %vm2551_vm12 = vweird.f32 %v4567_v46 }
 0x72a   : > { %vm2552_vm11 = vmor %vm2550_vm4, %vm2551_vm12 }
 0x72b   : > { %v2547_v12 = vsub.f32 1.0, %v2546_v57 }
 0x72c   : > { %v2146_v28 = vpop.f32.mrf.mxu2  ;;  %v4661_v41 = vpop.f32.mrf.mxu3 }
 0x72d   : > { %v2548_v19 = vmul.f32 %v4567_v46, %v2547_v12  ;;  %v2235_v12 = vperm.slane %v2232_v11, 1 }
 0x72f   : > { %v2549_v34 = vadd.f32 %v4567_v46, %v2548_v19 }
 0x731   : > { %v2553_v36 = vsel %vm2552_vm11, %v4567_v46, %v2549_v34  ;;  %v2234_v46 = vperm.slane %v2232_v11, 0 }
 0x734   : > { %v2259_v58 = vpop.f32.mrf.mxu2 }
 0x735   : > { %v2260_v9 = vadd.f32 %v2259_v58, %v2234_v46 }
 0x740   : > { %v2357_v31 = vpop.xlane.xlu2 %2356 }
 0x741   : > { %v2499_v35 = vmul.f32 %v2498_v16, %v2357_v31 }
 0x743   : > { %v2569_v14 = vperm.slane %v2499_v35, %v4382_v0 }
 0x748   : > { %v2363_v53 = vpop.xlane.xlu1 %2362 }
 0x749   : > { %v2529_v39 = vmul.f32 %v2528_v29, %v2363_v53  ;;  %v2557_v53 = vor.u32 1.1754944e-38, %v2556_v61 }
 0x74b   : > { %v2571_v23 = vperm.slane %v2529_v39, %v4382_v0  ;;  %v2558_v4 = vsel %vm2555_vm14, %v2557_v53, %v2553_v36 }
 0x750   : > { %v2366_v10 = vpop.xlane.xlu1 %2365 }
 0x751   : > { %v2544_v2 = vmul.f32 %v2543_v56, %v2366_v10 }
 0x752   : > { %v2360_v30 = vpop.xlane.xlu0 %2359 }
 0x753   : > { %v2514_v51 = vmul.f32 %v2513_v32, %v2360_v30  ;;  %v2572_v60 = vperm.slane %v2544_v2, %v4382_v0 }
 0x754   : > { %v2369_v25 = vpop.xlane.xlu2 %2368 }
 0x755   : > { %v2570_v21 = vperm.slane %v2514_v51, %v4382_v0  ;;  %v2559_v8 = vmul.f32 %v2558_v4, %v2369_v25 }
 0x757   : > { %v2574_v13 = vsel %vm1996_vm1, %v2570_v21, %v2569_v14  ;;  %v2573_v57 = vperm.slane %v2559_v8, %v4382_v0  ;;  %v3322_v0 = vld [vmem:[%s4844_s3] sm:$0x1f]  ;;  %v2189_v31 = vpop.f32.mrf.mxu0 }
 0x758   : > { %v2575_v45 = vsel %vm1998_vm5, %v2571_v23, %v2574_v13  ;;  %vm2674_vm1 = vcmp.gt.f32.partialorder %v3322_v0, 0.5  ;;  %v2190_v26 = vadd.f32 %v2189_v31, %v2146_v28  ;;  %v4866_v13 = vrot.slane %v4022_v3, 2 }
 0x759   : > { %v2576_v47 = vsel %vm2000_vm8, %v2572_v60, %v2575_v45  ;;  %v2679_v44 = vsel %vm2674_vm1, 1, %v3641_v6 }
 0x75a   : > { %v2577_v5 = vsel %vm2002_vm9, %v2573_v57, %v2576_v47  ;;  %v2684_v43 = vperm.slane %v2679_v44, 0  ;;  %v4669_v27 = vadd.f32 %v2214_v20, %v2190_v26  ;;  %vm2676_vm13 = vcmp.gt.f32.partialorder %v4866_v13, 0.5 }
 0x75b   : > { %v2681_v45 = vsel %vm2676_vm13, 1, %v3641_v6  ;;  %v2683_v47 = vsel %vm2678_vm15, 1, %v3641_v6  ;;  %v4868_v57 = vrot.slane %v4022_v3, 1 }
 0x75c   : > { %v2282_v1 = vadd.f32 %v2260_v9, %v4669_v27  ;;  %v2686_v53 = vperm.slane %v2681_v45, 0  ;;  %v2688_v4 = vperm.slane %v2683_v47, 0 }
 0x75d   : > { %vm2675_vm6 = vcmp.gt.f32.partialorder %v4868_v57, 0.5 }
 0x75e   : > { %v3057_v63 = vmul.f32 -1.442695, %v2282_v1  ;;  %v2680_v28 = vsel %vm2675_vm6, 1, %v3641_v6 }
 0x765   : > { %v2562_v15 = vpop.permute.xlu0 %2561 }
 0x766   : > { %v2579_v50 = vmul.f32 %v2577_v5, %v2562_v15 }
 0x768   : > { %v2580_v38 = vsel %vm2006_vm10, %v2579_v50, -inf }
 0x769   : > { %2581 = vmax.xlane.f32.xlu1 %v2580_v38 }
 0x782   : > { %2304 = vrot.lane.b32.xlu1 %v2260_v9, %s3639_s11  ;;  %v2685_v9 = vperm.slane %v2680_v28, 0 }
 0x78a   : > { %2690 = vperm.xlu1 %3213, %v2684_v43  }
 0x792   : > { %3215 = vset.pattern.permute.xlu1 %v4865_v49 }
 0x793   : > { %2753 = vperm.xlu1 %3215, %v2684_v43   ;;  %v3323_v43 = vld [vmem:[%s4845_s26 + $0x8] sm:$0xff] }
 0x79b   : > { %3217 = vset.pattern.permute.xlu1 %v4410_v62 }
 0x7a3   : > { %v2279_v18 = vpop.f32.mrf.mxu3 }
 0x7a4   : > { %v2280_v40 = vadd.f32 %v2279_v18, %v2235_v12  ;;  %v3324_v12 = vld [vmem:[%s4845_s26] sm:$0xff] }
 0x7dc   : > { %v2582_v22 = vpop.xlane.xlu1 %2581 }
 0x7dd   : > { %v2583_v24 = vsub.f32 %v2579_v50, %v2582_v22 }
 0x7df   : > { %v2584_v17 = vmul.f32 1.442695, %v2583_v24 }
 0x7e1   : > { %3304 = vpow2.f32 %v2584_v17  ;;  %v4869_v17 = vrot.slane %v4022_v3, 3 }
 0x7e2   : > { %3306 = vpow2.f32 %v3057_v63 }
 0x7e3   : > { %vm2677_vm4 = vcmp.gt.f32.partialorder %v4869_v17, 0.5 }
 0x7e4   : > { %v2682_v0 = vsel %vm2677_vm4, 1, %v3641_v6 }
 0x7e5   : > { %v2687_v44 = vperm.slane %v2682_v0, 0 }
 0x7e7   : > { %v3305_v55 = vpop.eup %3304 }
 0x7e8   : > { %v2586_v59 = vsel %vm2006_vm10, %v3305_v55, 0.0  ;;  %v3307_v10 = vpop.eup %3306 }
 0x7e9   : > { %2587 = vadd.xlane.f32.xlu2 %v2586_v59  ;;  %v2286_v37 = vadd.f32 1.0, %v3307_v10 }
 0x7eb   : > { %v2298_v5 = vand.u32 2147483648, %v2286_v37  ;;  %vm2292_vm2 = vweird.f32 %v2286_v37  ;;  %v2296_v50 = vand.u32 2147483647, %v2286_v37 }
 0x7ed   : > { %v2299_v46 = vor.u32 1.1754944e-38, %v2298_v5  ;;  %vm2297_vm12 = vcmp.eq.f32.partialorder %v2296_v50, 8.507059e+37 }
 0x7f4   : > { %v2305_v38 = vpop.permute.xlu1 %2304 }
 0x7fc   : > { %v2691_v26 = vpop.permute.xlu1 %2690 }
 0x801   : > { %2306 = vrot.lane.b32.xlu2 %v2280_v40, %s3639_s11 }
 0x805   : > { %v2754_v10 = vpop.permute.xlu1 %2753 }
 0x85c   : > { %v2588_v16 = vpop.xlane.xlu2 %2587 }
 0x85d   : > { %3308 = vrcp.f32 %v2588_v16  ;;  %v2600_v19 = vand.u32 2147483648, %v2588_v16  ;;  %v2598_v39 = vand.u32 2147483647, %v2588_v16  ;;  %vm2594_vm8 = vweird.f32 %v2588_v16 }
 0x85e   : > { %3310 = vrcp.f32 %v2286_v37 }
 0x85f   : > { %v2601_v30 = vor.u32 1.1754944e-38, %v2600_v19  ;;  %vm2599_vm10 = vcmp.eq.f32.partialorder %v2598_v39, 8.507059e+37  ;;  %v2659_v39 = vperm.slane %v4078_v7, 0 }
 0x863   : > { %v3309_v42 = vpop.eup %3308 }
 0x864   : > { %v2590_v35 = vmul.f32 %v3309_v42, %v2588_v16  ;;  %vm2595_vm5 = vweird.f32 %v3309_v42  ;;  %v3311_v56 = vpop.eup %3310  ;;  %v2307_v15 = vpop.permute.xlu2 %2306 }
 0x865   : > { %vm2596_vm9 = vmor %vm2594_vm8, %vm2595_vm5  ;;  %v2288_v14 = vmul.f32 %v3311_v56, %v2286_v37  ;;  %vm2293_vm0 = vweird.f32 %v3311_v56  ;;  %v2308_v58 = vsel %vm1312_vm7, %v2305_v38, %v2307_v15  ;;  %vm2767_vm5 = vcmp.eq.s32.totalorder %v2754_v10, 1 }
 0x866   : > { %v2591_v29 = vsub.f32 1.0, %v2590_v35  ;;  %vm2294_vm3 = vmor %vm2292_vm2, %vm2293_vm0  ;;  %vm2704_vm8 = vcmp.eq.s32.totalorder %v2691_v26, 1  ;;  %v4871_v26 = vrot.slane %v4078_v7, 2 }
 0x867   : > { %v2289_v60 = vsub.f32 1.0, %v2288_v14  ;;  %v4870_v14 = vrot.slane %v4078_v7, 4 }
 0x868   : > { %v2592_v52 = vmul.f32 %v3309_v42, %v2591_v29 }
 0x869   : > { %v2290_v36 = vmul.f32 %v3311_v56, %v2289_v60 }
 0x86a   : > { %v2593_v32 = vadd.f32 %v3309_v42, %v2592_v52 }
 0x86b   : > { %v2291_v8 = vadd.f32 %v3311_v56, %v2290_v36 }
 0x86c   : > { %v2597_v2 = vsel %vm2596_vm9, %v3309_v42, %v2593_v32  ;;  %vm2714_vm9 = vcmask 408848  }
 0x86d   : > { %v2602_v51 = vsel %vm2599_vm10, %v2601_v30, %v2597_v2  ;;  %v2295_v11 = vsel %vm2294_vm3, %v3311_v56, %v2291_v8  ;;  %vm2730_vm10 = vcmask 540048  }
 0x86e   : > { %v2603_v21 = vmul.f32 %v3305_v55, %v2602_v51  ;;  %v4684_v22 = vsel %vm2297_vm12, %v2299_v46, %v2295_v11  ;;  %v3050_v55 = vmul.f32 -1.442695, %v4078_v7 }
 0x86f   : > { %v2310_v24 = vmul.f32 %v2308_v58, %v4684_v22 }
 0x870   : > { %v2632_v34 = vperm.slane %v2603_v21, 4  ;;  %v2618_v23 = vperm.slane %v2603_v21, 2  ;;  %v2604_v61 = vperm.slane %v2603_v21, 0  ;;  %v2611_v25 = vperm.slane %v2603_v21, 1 }
 0x871   : > { %v2625_v3 = vperm.slane %v2603_v21, 3  ;;  %3312 = vpow2.f32 %v3050_v55  ;;  %v2663_v21 = vperm.slane %v4870_v14, 0 }
 0x872   : > { %2637 = vperm.xlu0 %3212, %v2632_v34   ;;  %2623 = vperm.xlu1 %3217, %v2618_v23  }
 0x873   : > { %2609 = vperm.xlu2 %3208, %v2604_v61  }
 0x877   : > { %v3313_v59 = vpop.eup %3312 }
 0x87a   : > { %3220 = vset.pattern.permute.xlu1 %v3641_v6  ;;  %2616 = vperm.xlu0 %3212, %v2611_v25  }
 0x87b   : > { %3214 = vset.pattern.permute.xlu2 %v3641_v6  ;;  %2696 = vperm.xlu1 %3220, %v2686_v53  }
 0x87c   : > { %2702 = vperm.xlu2 %3214, %v2688_v4  }
 0x882   : > { %3219 = vset.pattern.permute.xlu0 %v3641_v6 }
 0x883   : > { %2693 = vperm.xlu0 %3219, %v2685_v9   ;;  %2312 = vrot.lane.b32.xlu1 %v2310_v24, %s3638_s2  ;;  %s3649_s2 = smov 94  }
 0x884   : > { %3216 = vset.pattern.permute.xlu2 %v4865_v49  ;;  %3222 = vset.pattern.permute.xlu1 %v4865_v49 }
 0x885   : > { %2765 = vperm.xlu2 %3216, %v2688_v4  }
 0x88b   : > { %3224 = vset.pattern.permute.xlu0 %v4865_v49  ;;  %2756 = vperm.xlu1 %3222, %v2685_v9  }
 0x88c   : > { %2762 = vperm.xlu0 %3224, %v2687_v44  }
 0x88d   : > { %3218 = vset.pattern.permute.xlu2 %v4410_v62  ;;  %v1743_v62 = vadd.f32 1.0, %v3313_v59 }
 0x88f   : > { %3314 = vrcp.f32 %v1743_v62  ;;  %v1755_v1 = vand.u32 2147483648, %v1743_v62  ;;  %vm1749_vm11 = vweird.f32 %v1743_v62 }
 0x891   : > { %v1756_v16 = vor.u32 1.1754944e-38, %v1755_v1  ;;  %v4872_v1 = vrot.slane %v4078_v7, 1 }
 0x893   : > { %2330 = vrot.lane.b32.xlu1 %v4464_v33, %s3645_s7 }
 0x894   : > { %2804 = vrot.lane.b32.xlu0 %v3323_v43, %s3646_s4  ;;  %v2209_v43 = vpop.f32.mrf.mxu1 }
 0x895   : > { %2630 = vperm.xlu2 %3218, %v2625_v3   ;;  %v3315_v33 = vpop.eup %3314 }
 0x896   : > { %v1745_v18 = vmul.f32 %v3315_v33, %v1743_v62  ;;  %vm1750_vm7 = vweird.f32 %v3315_v33 }
 0x897   : > { %vm1751_vm14 = vmor %vm1749_vm11, %vm1750_vm7  ;;  %vm2326_vm7 = vcmask 654336   ;;  %vm4874_vm11 = vcmask 130048  }
 0x898   : > { %v1746_v40 = vsub.f32 1.0, %v1745_v18  ;;  %v2210_v18 = vadd.f32 %v2209_v43, %v4661_v41 }
 0x89a   : > { %v1747_v31 = vmul.f32 %v3315_v33, %v1746_v40  ;;  %v2215_v40 = vperm.slane %v4666_v48, 1 }
 0x89c   : > { %v1748_v20 = vadd.f32 %v3315_v33, %v1747_v31 }
 0x89d   : > { %3221 = vset.pattern.permute.xlu2 %v3641_v6  ;;  %v1753_v6 = vand.u32 2147483647, %v1743_v62 }
 0x89e   : > { %2699 = vperm.xlu2 %3221, %v2687_v44   ;;  %v1752_v63 = vsel %vm1751_vm14, %v3315_v33, %v1748_v20  ;;  %v2661_v20 = vperm.slane %v4871_v26, 0  ;;  %vm2824_vm14 = vcmask 389120  }
 0x89f   : > { %vm1754_vm1 = vcmp.eq.f32.partialorder %v1753_v6, 8.507059e+37  ;;  %v2660_v6 = vperm.slane %v4872_v1, 0 }
 0x8a6   : > { %3223 = vset.pattern.permute.xlu2 %v4865_v49  ;;  %v1757_v49 = vsel %vm1754_vm1, %v1756_v16, %v1752_v63  ;;  %v2219_v63 = vadd.f32 %v2215_v40, %v2210_v18  ;;  %vm4875_vm1 = vmmov %vm4874_vm11 }
 0x8a7   : > { %2759 = vperm.xlu2 %3223, %v2686_v53   ;;  %v2644_v37 = vperm.slane %v1757_v49, 0  ;;  %v2643_v56 = vrot.slane %v1757_v49, 4  ;;  %v2641_v30 = vrot.slane %v1757_v49, 2  ;;  %v2640_v54 = vrot.slane %v1757_v49, 1 }
 0x8a8   : > { %v2642_v0 = vrot.slane %v1757_v49, 3 }
 0x8a9   : > { %v2648_v51 = vperm.slane %v2643_v56, 0  ;;  %v2646_v61 = vperm.slane %v2641_v30, 0  ;;  %v2645_v44 = vperm.slane %v2640_v54, 0 }
 0x8aa   : > { %v2647_v62 = vperm.slane %v2642_v0, 0 }
 0x8af   : > { %2743 = vrot.lane.b32.xlu2 %v3324_v12, %s3646_s4 }
 0x8cd   : > { %v2610_v42 = vpop.permute.xlu2 %2609 }
 0x8ce   : > { %v2654_v35 = vmul.f32 %v2644_v37, %v2610_v42  ;;  %v2669_v32 = vmul.f32 %v2659_v39, %v2610_v42  ;;  %v4873_v42 = vrot.slane %v4078_v7, 3 }
 0x8d0   : > { %v2709_v29 = vsel %vm2704_vm8, %v2654_v35, -1e+30  ;;  %v2772_v19 = vsel %vm2767_vm5, %v2654_v35, -1e+30  ;;  %v2725_v34 = vsel %vm2704_vm8, %v2669_v32, -1e+30 }
 0x8d1   : > { %v2787_v23 = vsel %vm2767_vm5, %v2669_v32, -1e+30  ;;  %v2715_v45 = vsel %vm2714_vm9, %v2709_v29, -inf  ;;  %v2731_v25 = vsel %vm2730_vm10, %v2725_v34, -inf  ;;  %v4712_v4 = vsel %vm2714_vm9, %v2772_v19, -inf }
 0x8d2   : > { %v4715_v8 = vsel %vm2730_vm10, %v2787_v23, -inf  ;;  %v2662_v35 = vperm.slane %v4873_v42, 0 }
 0x8d6   : > { %v2703_v52 = vpop.permute.xlu2 %2702 }
 0x8d7   : > { %vm2708_vm15 = vcmp.eq.s32.totalorder %v2703_v52, 1 }
 0x8df   : > { %v2766_v2 = vpop.permute.xlu2 %2765 }
 0x8e0   : > { %vm2771_vm13 = vcmp.eq.s32.totalorder %v2766_v2, 1 }
 0x8e4   : > { %v2638_v60 = vpop.permute.xlu0 %2637  ;;  %v2624_v13 = vpop.permute.xlu1 %2623 }
 0x8e5   : > { %v2658_v36 = vmul.f32 %v2648_v51, %v2638_v60  ;;  %v2673_v47 = vmul.f32 %v2663_v21, %v2638_v60  ;;  %v4708_v53 = vmul.f32 %v2646_v61, %v2624_v13  ;;  %v2671_v16 = vmul.f32 %v2661_v20, %v2624_v13 }
 0x8e7   : > { %v2713_v57 = vsel %vm2708_vm15, %v2658_v36, -1e+30  ;;  %v2729_v5 = vsel %vm2708_vm15, %v2673_v47, -1e+30  ;;  %v2776_v15 = vsel %vm2771_vm13, %v2658_v36, -1e+30 }
 0x8e8   : > { %v2719_v50 = vsel %vm2714_vm9, %v2713_v57, -inf  ;;  %v2735_v38 = vsel %vm2730_vm10, %v2729_v5, -inf  ;;  %v4721_v28 = vsel %vm2714_vm9, %v2776_v15, -inf  ;;  %v2791_v11 = vsel %vm2771_vm13, %v2673_v47, -1e+30 }
 0x8e9   : > { %v2782_v46 = vmax.f32 %v4712_v4, %v4721_v28  ;;  %v4727_v58 = vsel %vm2730_vm10, %v2791_v11, -inf  ;;  %v2720_v9 = vmax.f32 %v2715_v45, %v2719_v50  ;;  %v2736_v24 = vmax.f32 %v2731_v25, %v2735_v38 }
 0x8ea   : > { %v2797_v17 = vmax.f32 %v4715_v8, %v4727_v58 }
 0x8ec   : > { %v2617_v3 = vpop.permute.xlu0 %2616 }
 0x8ed   : > { %v2655_v55 = vmul.f32 %v2645_v44, %v2617_v3  ;;  %v2697_v59 = vpop.permute.xlu1 %2696  ;;  %v2670_v49 = vmul.f32 %v2660_v6, %v2617_v3  ;;  %v2319_v6 = vsub.f32 1.0, %v4684_v22 }
 0x8ee   : > { %vm2706_vm0 = vcmp.eq.s32.totalorder %v2697_v59, 1 }
 0x8ef   : > { %v2711_v12 = vsel %vm2706_vm0, %v4708_v53, -1e+30  ;;  %v2631_v33 = vpop.permute.xlu2 %2630  ;;  %v2727_v48 = vsel %vm2706_vm0, %v2671_v16, -1e+30 }
 0x8f0   : > { %v2657_v31 = vmul.f32 %v2647_v62, %v2631_v33  ;;  %v2672_v39 = vmul.f32 %v2662_v35, %v2631_v33  ;;  %v2733_v21 = vsel %vm2730_vm10, %v2727_v48, -inf }
 0x8f5   : > { %v2694_v10 = vpop.permute.xlu0 %2693  ;;  %v2313_v37 = vpop.permute.xlu1 %2312 }
 0x8f6   : > { %vm2705_vm6 = vcmp.eq.s32.totalorder %v2694_v10, 1  ;;  %v2315_v41 = vadd.f32 %v2313_v37, %v4669_v27  ;;  %v2316_v29 = vadd.f32 %v2313_v37, %v2219_v63  ;;  %v2717_v27 = vsel %vm2714_vm9, %v2711_v12, -inf }
 0x8f7   : > { %v2710_v19 = vsel %vm2705_vm6, %v2655_v55, -1e+30  ;;  %v2726_v52 = vsel %vm2705_vm6, %v2670_v49, -1e+30 }
 0x8f8   : > { %v2716_v56 = vsel %vm2714_vm9, %v2710_v19, -inf  ;;  %v2732_v32 = vsel %vm2730_vm10, %v2726_v52, -inf  ;;  %3316 = vtanh.f32 %v2315_v41  ;;  %v2700_v30 = vpop.permute.xlu2 %2699 }
 0x8f9   : > { %v2721_v2 = vmax.f32 %v2720_v9, %v2716_v56  ;;  %v2737_v51 = vmax.f32 %v2736_v24, %v2732_v32  ;;  %3318 = vtanh.f32 %v2316_v29  ;;  %vm2707_vm2 = vcmp.eq.s32.totalorder %v2700_v30, 1 }
 0x8fa   : > { %v2712_v7 = vsel %vm2707_vm2, %v2657_v31, -1e+30  ;;  %v2728_v14 = vsel %vm2707_vm2, %v2672_v39, -1e+30 }
 0x8fb   : > { %v2718_v34 = vsel %vm2714_vm9, %v2712_v7, -inf  ;;  %v2734_v23 = vsel %vm2730_vm10, %v2728_v14, -inf }
 0x8fc   : > { %v2722_v61 = vmax.f32 %v2717_v27, %v2718_v34  ;;  %v2738_v60 = vmax.f32 %v2733_v21, %v2734_v23 }
 0x8fd   : > { %v2757_v13 = vpop.permute.xlu1 %2756 }
 0x8fe   : > { %v3317_v54 = vpop.eup %3316  ;;  %vm2768_vm3 = vcmp.eq.s32.totalorder %v2757_v13, 1  ;;  %v2763_v45 = vpop.permute.xlu0 %2762  ;;  %v2739_v36 = vmax.f32 %v2737_v51, %v2738_v60  ;;  %v2723_v47 = vmax.f32 %v2721_v2, %v2722_v61 }
 0x8ff   : > { %v3319_v25 = vpop.eup %3318  ;;  %v2773_v8 = vsel %vm2768_vm3, %v2655_v55, -1e+30  ;;  %v2788_v57 = vsel %vm2768_vm3, %v2670_v49, -1e+30  ;;  %vm2770_vm12 = vcmp.eq.s32.totalorder %v2763_v45, 1  ;;  %2322 = vrot.lane.b32.xlu1 %v3317_v54, %s3647_s15 }
 0x900   : > { %v2778_v5 = vsel %vm2714_vm9, %v2773_v8, -inf  ;;  %v2793_v15 = vsel %vm2730_vm10, %v2788_v57, -inf  ;;  %v2775_v50 = vsel %vm2770_vm12, %v2657_v31, -1e+30  ;;  %2324 = vrot.lane.b32.xlu2 %v3319_v25, %s3647_s15  ;;  %v2790_v58 = vsel %vm2770_vm12, %v2672_v39, -1e+30 }
 0x901   : > { %v2783_v38 = vmax.f32 %v2782_v46, %v2778_v5  ;;  %v2798_v11 = vmax.f32 %v2797_v17, %v2793_v15  ;;  %v2760_v9 = vpop.permute.xlu2 %2759  ;;  %v2780_v44 = vsel %vm2714_vm9, %v2775_v50, -inf  ;;  %v2795_v3 = vsel %vm2730_vm10, %v2790_v58, -inf }
 0x902   : > { %vm2769_vm4 = vcmp.eq.s32.totalorder %v2760_v9, 1  ;;  %v2740_v12 = vmax.f32 %v2739_v36, 0.0 }
 0x903   : > { %v2774_v24 = vsel %vm2769_vm4, %v4708_v53, -1e+30  ;;  %v2789_v0 = vsel %vm2769_vm4, %v2671_v16, -1e+30  ;;  %v2724_v16 = vmax.f32 %v2723_v47, 0.0 }
 0x904   : > { %v2779_v43 = vsel %vm2714_vm9, %v2774_v24, -inf  ;;  %v2794_v55 = vsel %vm2730_vm10, %v2789_v0, -inf }
 0x905   : > { %v2784_v59 = vmax.f32 %v2779_v43, %v2780_v44  ;;  %v2799_v62 = vmax.f32 %v2794_v55, %v2795_v3  ;;  %v2331_v1 = vpop.permute.xlu1 %2330  ;;  %v2741_v35 = vsub.f32 1.0, %v2724_v16 }
 0x906   : > { %v2805_v40 = vpop.permute.xlu0 %2804  ;;  %v2333_v10 = vmul.f32 %v2331_v1, %v4684_v22 }
 0x907   : > { %2748 = vrot.lane.b32.xlu1 %v2740_v12, %s3648_s23  ;;  %v2800_v4 = vmax.f32 %v2798_v11, %v2799_v62  ;;  %v2785_v28 = vmax.f32 %v2783_v38, %v2784_v59 }
 0x909   : > { %v2801_v46 = vmax.f32 %v2800_v4, 0.0  ;;  %v2744_v17 = vpop.permute.xlu2 %2743  ;;  %v2786_v53 = vmax.f32 %v2785_v28, 0.0 }
 0x90a   : > { %v2746_v41 = vmul.f32 %v2744_v17, %v2741_v35 }
 0x90b   : > { %2809 = vrot.lane.b32.xlu2 %v2801_v46, %s3648_s23  ;;  %v2802_v18 = vsub.f32 1.0, %v2786_v53 }
 0x90d   : > { %v2807_v31 = vmul.f32 %v2805_v40, %v2802_v18 }
 0x95a   : > { %v2325_v33 = vpop.permute.xlu2 %2324 }
 0x965   : > { %v2810_v26 = vpop.permute.xlu2 %2809 }
 0x966   : > { %v2812_v20 = vadd.f32 %v2810_v26, %v2807_v31 }
 0x968   : > { %2832 = vrot.lane.b32.xlu2 %v2812_v20, %s3649_s2 }
 0x971   : > { %v2323_v63 = vpop.permute.xlu1 %2322 }
 0x972   : > { %v2327_v49 = vsel %vm2326_vm7, %v2323_v63, %v2325_v33 }
 0x973   : > { %v2329_v37 = vmul.f32 %v2327_v49, %v2319_v6 }
 0x975   : > { %v2334_v42 = vadd.f32 %v2333_v10, %v2329_v37 }
 0x977   : > { %2821 = vrot.lane.b32.xlu0 %v2334_v42, %s3647_s15 }
 0x979   : > { %v2749_v29 = vpop.permute.xlu1 %2748 }
 0x97a   : > { %v2751_v48 = vadd.f32 %v2749_v29, %v2746_v41 }
 0x97c   : > { %2827 = vrot.lane.b32.xlu1 %v2751_v48, %s3649_s2 }
 0x9c2   : > { %v2833_v19 = vpop.permute.xlu2 %2832 }
 0x9c3   : > { %3058 = vst.msk [vmem:[%s4845_s26 + $0x8] sm:$0xff] %vm4874_vm11, %v2833_v19 }
 0x9e9   : > { %v2822_v52 = vpop.permute.xlu0 %2821 }
 0x9ea   : > { %2825 = vst.msk [vmem:[%s3813_s20] sm:$0x1f] %vm2824_vm14, %v2822_v52 }
 0x9ee   : > { %v2828_v39 = vpop.permute.xlu1 %2827 }
 0x9ef   : > { %2830 = vst.msk [vmem:[%s4845_s26] sm:$0xff] %vm4875_vm1, %v2828_v39 }
 0x9f0 PF: > { %s4876_s11 = sld [smem:[#allocation39_spill]] }
 0x9f6   : > { %s83_s28 = sadd.s32 1, %s4876_s11  }
 0x9f7   : > { %p80_p2 = scmp.ge.s32.totalorder %s83_s28, 7  }
 0x9f9   :  { %82 = sbr.rel (!%p80_p2) target bundleno = 61 (0x3d), region = 268 }
 0x9fe   :  { %2872 = vsyncpa [#allocation3], 1 }
 0x9ff   :  { %2874 = vsyncpa [#allocation3 + $0x1], 1 }
 0xa00   :  { %2875 = vsyncpa [#allocation5], 1 }
 0xa01   :  { %2876 = vsyncpa [#allocation8], 1 }
 0xa02   :  { %2877 = vsyncpa [#allocation11], 1 }
 0xa03   :  { %2878 = vsyncpa [#allocation14], 1 }

// kernel: fwd.3
= control target key start
LH: loop header
LB: loop body
LE: loop exit
PB: predicated region body
PF: predicated region fallthrough
CT: control target
= control target key end

     0   :  { %s4905_s6 = smov 1   ;;  %s4906_s10 = smov 2   ;;  %s7278_s0 = inlined_call_operand.smem [shape: u32[33], index: -1, kind: input, shape index: {}] }
   0x1   :  { %s4961_s5 = sld [smem:[%s7278_s0]]   ;;  %s4907_s14 = smov 3  }
   0x2   :  { %s4966_s9 = sld [smem:[%s7278_s0 + %s4905_s6]]   ;;  %s4908_s18 = smov 4  }
   0x3   :  { %s4971_s13 = sld [smem:[%s7278_s0 + %s4906_s10]]   ;;  %s4909_s22 = smov 5  }
   0x4   :  { %s4976_s17 = sld [smem:[%s7278_s0 + %s4907_s14]]   ;;  %s4910_s26 = smov 6  }
   0x5   :  { %s4981_s21 = sld [smem:[%s7278_s0 + %s4908_s18]]   ;;  %s4911_s30 = smov 7  }
   0x6   :  { %s4986_s25 = sld [smem:[%s7278_s0 + %s4909_s22]]   ;;  %s4912_s4 = smov 8  }
   0x7   :  { %s4991_s29 = sld [smem:[%s7278_s0 + %s4910_s26]]   ;;  %s4913_s10 = smov 9  }
   0x8   :  { %s4996_s3 = sld [smem:[%s7278_s0 + %s4911_s30]]   ;;  %s4914_s15 = smov 10  }
   0x9   :  { %7365 = sst [smem:[#allocation10_spill]] %s4971_s13  ;;  %s4915_s20 = smov 11  }
   0xa   :  { %s5001_s8 = sld [smem:[%s7278_s0 + %s4912_s4]]   ;;  %s4916_s26 = smov 12  }
   0xb   :  { %s5006_s14 = sld [smem:[%s7278_s0 + %s4913_s10]]   ;;  %s4917_s1 = smov 13  }
   0xc   :  { %s5011_s19 = sld [smem:[%s7278_s0 + %s4914_s15]]   ;;  %s4918_s7 = smov 14  }
   0xd   :  { %s5016_s24 = sld [smem:[%s7278_s0 + %s4915_s20]]   ;;  %s4919_s15 = smov 15  }
   0xe   :  { %s5021_s30 = sld [smem:[%s7278_s0 + %s4916_s26]]   ;;  %s4920_s22 = smov 16  }
   0xf   :  { %s5026_s6 = sld [smem:[%s7278_s0 + %s4917_s1]]   ;;  %s4921_s28 = smov 17  }
  0x10   :  { %7366 = sst [smem:[#allocation11_spill]] %s5001_s8 }
  0x11   :  { %7367 = sst [smem:[#allocation12_spill]] %s5006_s14 }
  0x12   :  { %7368 = sst [smem:[#allocation13_spill]] %s5011_s19 }
  0x13   :  { %s5031_s12 = sld [smem:[%s7278_s0 + %s4918_s7]]   ;;  %s4922_s7 = smov 18  }
  0x14   :  { %s5036_s20 = sld [smem:[%s7278_s0 + %s4919_s15]]   ;;  %s4923_s15 = smov 19  }
  0x15   :  { %s5041_s27 = sld [smem:[%s7278_s0 + %s4920_s22]]   ;;  %s4924_s22 = smov 20  }
  0x16   :  { %s5046_s4 = sld [smem:[%s7278_s0 + %s4921_s28]]   ;;  %s4925_s28 = smov 21  }
  0x17   :  { %s5051_s13 = sld [smem:[%s7278_s0 + %s4922_s7]]   ;;  %s4926_s7 = smov 22  }
  0x18   :  { %s5056_s19 = sld [smem:[%s7278_s0 + %s4923_s15]]   ;;  %s4927_s15 = smov 23  }
  0x19   :  { %s5061_s14 = sld [smem:[%s7278_s0 + %s4924_s22]]   ;;  %s4928_s22 = smov 24  }
  0x1a   :  { %7369 = sst [smem:[#allocation14_spill]] %s5036_s20 }
  0x1b   :  { %7370 = sst [smem:[#allocation15_spill]] %s5041_s27 }
  0x1c   :  { %s5066_s8 = sld [smem:[%s7278_s0 + %s4925_s28]]   ;;  %s4929_s28 = smov 25  }
  0x1d   :  { %7371 = sst [smem:[#allocation16_spill]] %s5051_s13 }
  0x1e   :  { %s5071_s13 = sld [smem:[%s7278_s0 + %s4926_s7]]   ;;  %s4930_s7 = smov 26  }
  0x1f   :  { %7372 = sst [smem:[#allocation17_spill]] %s5061_s14 }
  0x20   :  { %s5076_s20 = sld [smem:[%s7278_s0 + %s4927_s15]]   ;;  %s4931_s15 = smov 27  }
  0x21   :  { %s5081_s14 = sld [smem:[%s7278_s0 + %s4928_s22]]   ;;  %s4932_s22 = smov 28  }
  0x22   :  { %s5086_s27 = sld [smem:[%s7278_s0 + %s4929_s28]]   ;;  %s4933_s28 = smov 29  }
  0x24   :  { %7373 = sst [smem:[#allocation18_spill]] %s5071_s13 }
  0x25   :  { %s5091_s13 = sld [smem:[%s7278_s0 + %s4930_s7]]   ;;  %s4934_s7 = smov 30  }
  0x26   :  { %7374 = sst [smem:[#allocation19_spill]] %s5076_s20 }
  0x27   :  { %7375 = sst [smem:[#allocation20_spill]] %s5081_s14 }
  0x28   :  { %7376 = sst [smem:[#allocation21_spill]] %s5086_s27 }
  0x29   :  { %s5096_s20 = sld [smem:[%s7278_s0 + %s4931_s15]]   ;;  %s4935_s15 = smov 31  }
  0x2a   :  { %s5101_s14 = sld [smem:[%s7278_s0 + %s4932_s22]]   ;;  %s4936_s22 = smov 32  }
  0x2b   :  { %7377 = sst [smem:[#allocation22_spill]] %s5091_s13 }
  0x2c   :  { %s5106_s27 = sld [smem:[%s7278_s0 + %s4933_s28]]   ;;  %s5123_s28 = smov 0  }
  0x2d   :  { %s5111_s13 = sld [smem:[%s7278_s0 + %s4934_s7]]  }
  0x2f   :  { %7378 = sst [smem:[#allocation23_spill]] %s5096_s20 }
  0x30   :  { %7379 = sst [smem:[#allocation24_spill]] %s5101_s14 }
  0x31   :  { %s5116_s20 = sld [smem:[%s7278_s0 + %s4935_s15]]  }
  0x32   :  { %s5121_s14 = sld [smem:[%s7278_s0 + %s4936_s22]]  }
  0x33 LB: > { %s4535_s1 = sadd.s32 4294967295, %s4903_s28   ;;  %p4538_p0 = scmp.ge.s32.totalorder %s4903_s28, 1  ;;  %s4903_s28 = sphi %s5123_s28, %s75_s28  }
  0x34   : > { %p885_p1 = scmp.lt.s32.totalorder %s4903_s28, 5 }
  0x36   : > { %p886_p2 = pnand %p4538_p0, %p885_p1 }
  0x38   : > { %889 = sbr.rel (%p886_p2) target bundleno = 3405 (0xd4d), region = 148 }
  0x3d   : > { %p962_p3 = scmp.lt.s32.totalorder %s4535_s1, 3  ;;  %p4541_p4 = scmp.ne.s32.totalorder %s4535_s1, 0 }
  0x3f   : > { %s963_s2 = scalar_select %p962_p3, %s4535_s1, 3 }
  0x40   : > { %970 = sbr.rel (%p4541_p4) target bundleno = 88 (0x58), region = 152 }
  0x41   : > { %s4599_s0 = sshll.u32 %s963_s2, 4 }
  0x42   : > { %s5132_s7 = scalar_lea.vmem %s5121_s14, %s4599_s0 }
  0x45   : > { %v971_v0 = vld [vmem:[%s4976_s17] sm:$0xff]  ;;  %vm973_vm0 = vcmask 130048   ;;  %v972_v1 = vld [vmem:[%s4976_s17 + $0x8] sm:$0x3]  ;;  %vm975_vm1 = vcmask 123904   ;;  %vm979_vm2 = vcmask 261120  }
  0x46   : > { %v977_v2 = vld [vmem:[%s4981_s21] sm:$0xff]  ;;  %974 = vst.msk [vmem:[#allocation2] sm:$0xff] %vm973_vm0, %v971_v0  ;;  %v978_v3 = vld [vmem:[%s4981_s21 + $0x8] sm:$0x3]  ;;  %vm981_vm3 = vcmask 254976   ;;  %vm989_vm4 = vcmask 392192  }
  0x47   : > { %976 = vst.msk [vmem:[#allocation2 + $0x8] sm:$0x3] %vm975_vm1, %v972_v1  ;;  %v983_v4 = vld [vmem:[%s4986_s25] sm:$0xff]  ;;  %v984_v5 = vld [vmem:[%s4986_s25 + $0x8] sm:$0x3]  ;;  %vm991_vm5 = vcmask 386048  }
  0x48   : > { %980 = vst.msk [vmem:[#allocation3] sm:$0xff] %vm979_vm2, %v977_v2  ;;  %v987_v6 = vld [vmem:[%s4991_s29] sm:$0xff]  ;;  %v988_v7 = vld [vmem:[%s4991_s29 + $0x8] sm:$0x3]  ;;  %v995_v10 = vld [vmem:[%s4996_s3 + $0x10] sm:$0xff]  ;;  %vm1003_vm6 = vcmask 15360  }
  0x49   : > { %982 = vst.msk [vmem:[#allocation3 + $0x8] sm:$0x3] %vm981_vm3, %v978_v3  ;;  %v993_v8 = vld [vmem:[%s4996_s3] sm:$0xff]  ;;  %v994_v9 = vld [vmem:[%s4996_s3 + $0x8] sm:$0xff]  ;;  %v996_v11 = vld [vmem:[%s4996_s3 + $0x18] sm:$0xff]  ;;  %vm1005_vm7 = vcmask 9216  }
  0x4a   : > { %985 = vst.msk [vmem:[#allocation4] sm:$0xff] %vm979_vm2, %v983_v4  ;;  %v1001_v12 = vld [vmem:[%s4961_s5] sm:$0xff]  ;;  %v1002_v13 = vld [vmem:[%s4961_s5 + $0x8] sm:$0x3]  ;;  %v4937_v16 = vmov 0.0  }
  0x4b   : > { %986 = vst.msk [vmem:[#allocation4 + $0x8] sm:$0x3] %vm981_vm3, %v984_v5  ;;  %v1007_v14 = vld [vmem:[%s4966_s9] sm:$0xff]  ;;  %v1008_v15 = vld [vmem:[%s4966_s9 + $0x8] sm:$0x3] }
  0x4c   : > { %990 = vst.msk [vmem:[#allocation5] sm:$0xff] %vm989_vm4, %v987_v6 }
  0x4d   : > { %992 = vst.msk [vmem:[#allocation5 + $0x8] sm:$0x3] %vm991_vm5, %v988_v7 }
  0x4e   : > { %997 = vst.msk [vmem:[#allocation6] sm:$0xff] %vm973_vm0, %v993_v8 }
  0x4f   : > { %998 = vst.msk [vmem:[#allocation6 + $0x8] sm:$0xff] %vm973_vm0, %v994_v9 }
  0x50   : > { %999 = vst.msk [vmem:[#allocation6 + $0x10] sm:$0xff] %vm973_vm0, %v995_v10 }
  0x51   : > { %1000 = vst.msk [vmem:[#allocation6 + $0x18] sm:$0xff] %vm973_vm0, %v996_v11 }
  0x52   : > { %1004 = vst.msk [vmem:[#allocation7] sm:$0xff] %vm1003_vm6, %v1001_v12 }
  0x53   : > { %1006 = vst.msk [vmem:[#allocation7 + $0x8] sm:$0x3] %vm1005_vm7, %v1002_v13 }
  0x54   : > { %1009 = vst.msk [vmem:[#allocation8] sm:$0xff] %vm1003_vm6, %v1007_v14 }
  0x55   : > { %1010 = vst.msk [vmem:[#allocation8 + $0x8] sm:$0x3] %vm1005_vm7, %v1008_v15 }
  0x56   : > { %1011 = vst.msk [vmem:[#allocation9] sm:$0xff] %vm1003_vm6, %v4937_v16 }
  0x57   : > { %1012 = vst.msk [vmem:[#allocation9 + $0x8] sm:$0x3] %vm1005_vm7, %v4937_v16 }
  0x58 PF: > { %v1034_v17 = vld [vmem:[%s5021_s30] sm:$0x3]  ;;  %vm7358_vm8 = vcmask 1041408   ;;  %vm7359_vm9 = vcmask 15360   ;;  %v1110_v23 = vld [vmem:[%s5031_s12 + $0x8] sm:$0xff]  ;;  %v1155_v25 = vld [vmem:[%s5046_s4 + $0x10] sm:$0xff] }
  0x59   : > { %v1033_v18 = vld [vmem:[%s5016_s24] sm:$0x3]  ;;  %4542 = vmatpush.msk.msra.mxu0 %vm7358_vm8, %v1034_v17  ;;  %1136 = vmatpush.msra.mxu2 %v1110_v23  ;;  %v1156_v28 = vld [vmem:[%s5046_s4 + $0x18] sm:$0xff]  ;;  %v1154_v31 = vld [vmem:[%s5046_s4 + $0x8] sm:$0xff]  ;;  %vm7363_vm10 = vcmask 130048   ;;  %s7380_s10 = sld [smem:[#allocation15_spill]] }
  0x5a   : > { %4545 = vmatpush.msk.msra.mxu1 %vm7358_vm8, %v1033_v18  ;;  %v1017_v20 = vld [vmem:[#allocation7] sm:$0xff]  ;;  %v1018_v22 = vld [vmem:[#allocation7 + $0x8] sm:$0x3]  ;;  %4600 = vmatpush.msra.mxu3 %v1110_v23  ;;  %v1312_v36 = vld [vmem:[%s5066_s8 + $0x18] sm:$0xff]  ;;  %vm7360_vm11 = vcmask 261120   ;;  %s7381_s11 = sld [smem:[#allocation14_spill]] }
  0x5b   : > { %v1019_v19 = vld [vmem:[#allocation8] sm:$0xff]  ;;  %4546 = vmatmul.msk.f32.vlgmr.msra.gmra.mxu1 %vm7359_vm9, %v1017_v20  ;;  %v1109_v24 = vld [vmem:[%s5031_s12] sm:$0xff]  ;;  %1200 = vmatpush.msrb.mxu0 %v1156_v28  ;;  %v1022_v40 = vld [vmem:[#allocation2 + $0x8] sm:$0x3]  ;;  %s7382_s15 = sld [smem:[#allocation18_spill]]  ;;  %s4938_s16 = smov 32  }
  0x5c   : > { %4543 = vmatmul.msk.f32.vlgmr.msra.gmra.mxu0 %vm7359_vm9, %v1019_v19  ;;  %v1020_v21 = vld [vmem:[#allocation8 + $0x8] sm:$0x3]  ;;  %1137 = vmatpush.msra.mxu2 %v1109_v24  ;;  %v1153_v26 = vld [vmem:[%s5046_s4] sm:$0xff]  ;;  %v1311_v44 = vld [vmem:[%s5066_s8 + $0x10] sm:$0xff]  ;;  %s7383_s18 = sld [smem:[#allocation17_spill]]  ;;  %s4939_s22 = smov 96  }
  0x5d   : > { %4601 = vmatpush.msra.mxu3 %v1109_v24  ;;  %v4704_v27 = vld [vmem:[%s5026_s6] ss:$0 sm:$0xff]  ;;  %1201 = vmatpush.msrb.mxu0 %v1154_v31  ;;  %v1275_v43 = vld [vmem:[%s5056_s19 + $0x18] sm:$0xff]  ;;  %v1274_v45 = vld [vmem:[%s5056_s19 + $0x10] sm:$0xff]  ;;  %s7384_s23 = sld [smem:[#allocation16_spill]]  ;;  %s4940_s26 = smov 64  }
  0x5e   : > { %v1021_v33 = vld [vmem:[#allocation2] sm:$0xff]  ;;  %v1310_v46 = vld [vmem:[%s5066_s8 + $0x8] sm:$0xff]  ;;  %v1023_v58 = vld [vmem:[#allocation3] sm:$0xff]  ;;  %s7385_s1 = sld [smem:[#allocation11_spill]] }
  0x5f   : > { %1177 = vmatpush.msrb.mxu3 %v1155_v25  ;;  %1335 = vmatpush.msra.mxu0 %v1312_v36  ;;  %v1309_v47 = vld [vmem:[%s5066_s8] sm:$0xff]  ;;  %v1151_v48 = vld [vmem:[%s7380_s10 + $0x30] sm:$0xff]  ;;  %v1273_v50 = vld [vmem:[%s5056_s19 + $0x8] sm:$0xff]  ;;  %s7388_s2 = sld [smem:[#allocation12_spill]] }
  0x60   : > { %v1149_v49 = vld [vmem:[%s7380_s10 + $0x20] sm:$0xff]  ;;  %1228 = vmatpush.msrb.mxu1 %v1151_v48  ;;  %v1152_v52 = vld [vmem:[%s7380_s10 + $0x38] sm:$0xff]  ;;  %v1147_v53 = vld [vmem:[%s7380_s10 + $0x10] sm:$0xff]  ;;  %1420 = vrot.lane.b32.xlu2 %v1023_v58, %s4938_s16  ;;  %s7389_s0 = sld [smem:[#allocation19_spill]] }
  0x61   : > { %1178 = vmatpush.msrb.mxu3 %v1153_v26  ;;  %1336 = vmatpush.msra.mxu0 %v1311_v44  ;;  %v5183_v51 = vld [vmem:[#allocation4] sm:$0xff]  ;;  %v1150_v54 = vld [vmem:[%s7380_s10 + $0x28] sm:$0xff]  ;;  %v5199_v59 = vld [vmem:[#allocation3 + $0x8] sm:$0x3] }
  0x62   : > { %1251 = vmatpush.msrb.mxu2 %v1152_v52  ;;  %v1272_v55 = vld [vmem:[%s5056_s19] sm:$0xff]  ;;  %1229 = vmatpush.msrb.mxu1 %v1149_v49  ;;  %v5193_v57 = vld [vmem:[#allocation4 + $0x8] sm:$0x3]  ;;  %v1148_v60 = vld [vmem:[%s7380_s10 + $0x18] sm:$0xff] }
  0x63   : > { %4547 = vmatmul.msk.f32.gmra.mxu1 %vm7359_vm9, %v1018_v22  ;;  %1337 = vmatpush.msra.mxu0 %v1310_v46  ;;  %v1145_v56 = vld [vmem:[%s7380_s10] sm:$0xff]  ;;  %v1146_v61 = vld [vmem:[%s7380_s10 + $0x8] sm:$0xff] }
  0x64   : > { %4544 = vmatmul.msk.f32.gmra.mxu0 %vm7359_vm9, %v1020_v21  ;;  %1230 = vmatpush.msrb.mxu1 %v1147_v53  ;;  %v4705_v63 = vld [vmem:[%s7381_s11] ss:$0 sm:$0xff]  ;;  %s4946_s11 = smov 48  }
  0x65   : > { %1338 = vmatpush.msra.mxu0 %v1309_v47  ;;  %1252 = vmatpush.msrb.mxu2 %v1150_v54  ;;  %v4707_v3 = vld [vmem:[%s7382_s15] ss:$0 sm:$0xff]  ;;  %s4947_s15 = smov 111  }
  0x66   : > { %1231 = vmatpush.msrb.mxu1 %v1145_v56  ;;  %v4706_v10 = vld [vmem:[%s7383_s18] ss:$0 sm:$0xff]  ;;  %s7461_s18 = sld [smem:[#allocation20_spill]] }
  0x67   : > { %1253 = vmatpush.msrb.mxu2 %v1148_v60  ;;  %v5228_v17 = vld [vmem:[%s7384_s23] sm:$0x3]  ;;  %s7462_s23 = sld [smem:[#allocation22_spill]] }
  0x68   : > { %v1264_v18 = vperm.slane %v5228_v17, 0 }
  0x69   : > { %1254 = vmatpush.msrb.mxu2 %v1146_v61 }
  0x6c   : > { %4552 = vmatmul.msk.f32.vlgmr.msrb.gmra.mxu0 %vm7363_vm10, %v1021_v33 }
  0x74   : > { %4553 = vmatmul.msk.f32.gmra.mxu0 %vm7363_vm10, %v1022_v40 }
  0x7c   : > { %4560 = vmatmul.msk.f32.vlgmr.msra.gmra.mxu0 %vm7360_vm11, %v5183_v51 }
  0x84   : > { %4561 = vmatmul.msk.f32.gmra.mxu0 %vm7360_vm11, %v5193_v57 }
  0xba   : > { %v5246_v60 = vpop.permute.xlu2 %1420 }
  0xd8   : > { %v1095_v30 = vpop.f32.mrf.mxu1 }
  0xd9   : > { %v1063_v29 = vpop.f32.mrf.mxu0 }
  0xda   : > { %v1096_v32 = vadd.f32 %v1095_v30, %v1063_v29 }
  0xdc   : > { %v1105_v34 = vadd.f32 %v4704_v27, %v1096_v32 }
  0xde   : > { %v1107_v35 = vmax.f32 %v1105_v34, 0.0 }
  0xe0   : > { %4548 = vmatmul.msk.f32.vlgmr.msra.gmra.mxu2 %vm7363_vm10, %v1107_v35  ;;  %v1098_v38 = vpop.f32.mrf.mxu1 }
  0xe1   : > { %v1066_v37 = vpop.f32.mrf.mxu0 }
  0xe2   : > { %v1099_v39 = vadd.f32 %v1098_v38, %v1066_v37 }
  0xe4   : > { %v1106_v41 = vadd.f32 %v4704_v27, %v1099_v39 }
  0xe6   : > { %v1108_v42 = vmax.f32 %v1106_v41, 0.0 }
  0xe8   : > { %4549 = vmatmul.msk.f32.vlgmr.msra.gmra.mxu3 %vm7363_vm10, %v1108_v42 }
  0xe9   : > { %1298 = vmatpush.msra.mxu3 %v1275_v43  ;;  %v5206_v62 = vpop.f32.mrf.mxu0 }
  0xeb   : > { %1299 = vmatpush.msra.mxu3 %v1274_v45 }
  0xed   : > { %1300 = vmatpush.msra.mxu3 %v1273_v50 }
  0xef   : > { %1301 = vmatpush.msra.mxu3 %v1272_v55 }
  0xf0   : > { %4550 = vmatmul.msk.f32.vlgmr.msrb.gmra.mxu3 %vm7363_vm10, %v1021_v33 }
  0xf1   : > { %v5209_v0 = vpop.f32.mrf.mxu0 }
  0xf8   : > { %4551 = vmatmul.msk.f32.gmra.mxu3 %vm7363_vm10, %v1022_v40 }
  0xf9   : > { %v1340_v4 = vpop.f32.mrf.mxu0 }
  0xfa   : > { %v5214_v6 = vadd.f32 %v4707_v3, %v1340_v4 }
  0xfc   : > { %1432 = vrot.lane.b32.xlu2 %v5214_v6, %s4939_s22 }
 0x100   : > { %4558 = vmatmul.msk.f32.vlgmr.msra.gmra.mxu3 %vm7360_vm11, %v1023_v58 }
 0x101   : > { %v1343_v15 = vpop.f32.mrf.mxu0 }
 0x102   : > { %v5223_v16 = vadd.f32 %v4707_v3, %v1343_v15 }
 0x108   : > { %4559 = vmatmul.msk.f32.gmra.mxu3 %vm7360_vm11, %v5199_v59 }
 0x156   : > { %v5248_v61 = vpop.permute.xlu2 %1432 }
 0x163   : > { %v1139_v1 = vpop.f32.mrf.mxu2 }
 0x164   : > { %v1140_v2 = vadd.f32 %v4705_v63, %v1139_v1 }
 0x166   : > { %4554 = vmatmul.msk.f32.vlgmr.msrb.gmra.mxu1 %vm7360_vm11, %v1140_v2  ;;  %4556 = vmatmul.msk.f32.vlgmr.msrb.gmra.mxu2 %vm7360_vm11, %v1140_v2 }
 0x16b   : > { %v1142_v5 = vpop.f32.mrf.mxu3 }
 0x16c   : > { %v1143_v7 = vadd.f32 %v4705_v63, %v1142_v5 }
 0x16e   : > { %4555 = vmatmul.msk.f32.gmra.mxu1 %vm7360_vm11, %v1143_v7  ;;  %4557 = vmatmul.msk.f32.gmra.mxu2 %vm7360_vm11, %v1143_v7 }
 0x173   : > { %v1180_v8 = vpop.f32.mrf.mxu3 }
 0x17b   : > { %v1183_v9 = vpop.f32.mrf.mxu3 }
 0x183   : > { %v1303_v11 = vpop.f32.mrf.mxu3 }
 0x184   : > { %v1304_v12 = vadd.f32 %v4706_v10, %v1303_v11 }
 0x186   : > { %1388 = vrot.lane.b32.xlu0 %v1304_v12, %s4940_s26 }
 0x18b   : > { %v1306_v13 = vpop.f32.mrf.mxu3 }
 0x18c   : > { %v1307_v14 = vadd.f32 %v4706_v10, %v1306_v13 }
 0x18e   : > { %1390 = vrot.lane.b32.xlu0 %v1307_v14, %s4940_s26 }
 0x196   : > { %1434 = vrot.lane.b32.xlu0 %v5223_v16, %s4939_s22 }
 0x1e3   : > { %v1233_v19 = vpop.f32.mrf.mxu1 }
 0x1e4   : > { %v1234_v20 = vadd.f32 %v1233_v19, %v1180_v8 }
 0x1e6   : > { %v1268_v21 = vadd.f32 %v1264_v18, %v1234_v20 }
 0x1e8   : > { %v1346_v22 = vadd.f32 %v1304_v12, %v1268_v21  ;;  %v1438_v63 = vadd.f32 %v5248_v61, %v1268_v21 }
 0x1ea   : > { %v4562_v23 = vmul.f32 -1.442695, %v1346_v22  ;;  %v4564_v1 = vmul.f32 -1.442695, %v1438_v63 }
 0x1eb   : > { %v1236_v24 = vpop.f32.mrf.mxu1 }
 0x1ec   : > { %4711 = vpow2.f32 %v4562_v23  ;;  %v1237_v25 = vadd.f32 %v1236_v24, %v1183_v9 }
 0x1ee   : > { %v5231_v26 = vadd.f32 %v1264_v18, %v1237_v25 }
 0x1f0   : > { %v1347_v27 = vadd.f32 %v1307_v14, %v5231_v26 }
 0x1f2   : > { %v4712_v28 = vpop.eup %4711  ;;  %v4563_v29 = vmul.f32 -1.442695, %v1347_v27 }
 0x1f3   : > { %v1354_v30 = vadd.f32 1.0, %v4712_v28 }
 0x1f4   : > { %4713 = vpow2.f32 %v4563_v29  ;;  %v7309_v29 = vmov 0  }
 0x1f5   : > { %4715 = vrcp.f32 %v1354_v30  ;;  %v1367_v36 = vand.u32 2147483648, %v1354_v30  ;;  %v1365_v38 = vand.u32 2147483647, %v1354_v30  ;;  %vm1361_vm13 = vweird.f32 %v1354_v30  ;;  %4658 = vset.pattern.permute.xlu1 %v7309_v29  ;;  %4659 = vset.pattern.permute.xlu2 %v7309_v29 }
 0x1f7   : > { %v1368_v42 = vor.u32 1.1754944e-38, %v1367_v36  ;;  %vm1366_vm15 = vcmp.eq.f32.partialorder %v1365_v38, 8.507059e+37 }
 0x1f8   : > { %v1389_v41 = vpop.permute.xlu0 %1388 }
 0x1fa   : > { %v4714_v31 = vpop.eup %4713 }
 0x1fb   : > { %v4716_v32 = vpop.eup %4715  ;;  %v1355_v33 = vadd.f32 1.0, %v4714_v31 }
 0x1fc   : > { %v1357_v34 = vmul.f32 %v4716_v32, %v1354_v30  ;;  %vm1362_vm12 = vweird.f32 %v4716_v32 }
 0x1fd   : > { %4717 = vrcp.f32 %v1355_v33  ;;  %vm1363_vm14 = vmor %vm1361_vm13, %vm1362_vm12  ;;  %v1382_v48 = vand.u32 2147483648, %v1355_v33  ;;  %v1380_v50 = vand.u32 2147483647, %v1355_v33  ;;  %vm1376_vm1 = vweird.f32 %v1355_v33 }
 0x1fe   : > { %v1358_v35 = vsub.f32 1.0, %v1357_v34  ;;  %4719 = vpow2.f32 %v4564_v1 }
 0x1ff   : > { %v1383_v53 = vor.u32 1.1754944e-38, %v1382_v48  ;;  %vm1381_vm3 = vcmp.eq.f32.partialorder %v1380_v50, 8.507059e+37  ;;  %v1256_v50 = vpop.f32.mrf.mxu2 }
 0x200   : > { %v1359_v37 = vmul.f32 %v4716_v32, %v1358_v35  ;;  %v1391_v55 = vpop.permute.xlu0 %1390 }
 0x202   : > { %v1360_v39 = vadd.f32 %v4716_v32, %v1359_v37 }
 0x203   : > { %v4718_v40 = vpop.eup %4717 }
 0x204   : > { %v1372_v43 = vmul.f32 %v4718_v40, %v1355_v33  ;;  %v1364_v44 = vsel %vm1363_vm14, %v4716_v32, %v1360_v39  ;;  %vm1377_vm0 = vweird.f32 %v4718_v40  ;;  %v4720_v2 = vpop.eup %4719 }
 0x205   : > { %v5234_v45 = vsel %vm1366_vm15, %v1368_v42, %v1364_v44  ;;  %vm1378_vm2 = vmor %vm1376_vm1, %vm1377_vm0  ;;  %v1446_v3 = vadd.f32 1.0, %v4720_v2  ;;  %v5265_v42 = vld [vmem:[%s7385_s1] sm:$0xff] }
 0x206   : > { %v1373_v46 = vsub.f32 1.0, %v1372_v43  ;;  %v1394_v47 = vmul.f32 %v1389_v41, %v5234_v45  ;;  %7386 = vst [vmem:[#allocation25_spill] sm:$0xff] %v5265_v42  ;;  %v5268_v43 = vperm.slane %v5265_v42, 0  ;;  %v7311_v44 = vrot.slane %v5265_v42, 2 }
 0x207   : > { %4721 = vrcp.f32 %v1446_v3  ;;  %v1459_v15 = vand.u32 2147483648, %v1446_v3  ;;  %vm1453_vm5 = vweird.f32 %v1446_v3  ;;  %v1457_v18 = vand.u32 2147483647, %v1446_v3 }
 0x208   : > { %v1374_v49 = vmul.f32 %v4718_v40, %v1373_v46  ;;  %1398 = vrot.lane.b32.xlu1 %v1394_v47, %s4940_s26  ;;  %v5257_v24 = vpop.permute.xlu0 %1434  ;;  %v5274_v46 = vperm.slane %v7311_v44, 0  ;;  %v7304_v47 = vmov 1   ;;  %v7300_v63 = vrot.slane %v5265_v42, 6 }
 0x209   : > { %v1460_v20 = vor.u32 1.1754944e-38, %v1459_v15  ;;  %vm1458_vm7 = vcmp.eq.f32.partialorder %v1457_v18, 8.507059e+37  ;;  %v1439_v25 = vadd.f32 %v5257_v24, %v5231_v26  ;;  %4661 = vset.pattern.permute.xlu0 %v7304_v47  ;;  %v7296_v18 = vmov 2  }
 0x20a   : > { %v1375_v52 = vadd.f32 %v4718_v40, %v1374_v49 }
 0x20c   : > { %v1379_v54 = vsel %vm1378_vm2, %v4718_v40, %v1375_v52 }
 0x20d   : > { %v5238_v56 = vsel %vm1381_vm3, %v1383_v53, %v1379_v54  ;;  %v4722_v7 = vpop.eup %4721 }
 0x20e   : > { %v1395_v58 = vmul.f32 %v1391_v55, %v5238_v56  ;;  %v1449_v8 = vmul.f32 %v4722_v7, %v1446_v3  ;;  %vm1454_vm4 = vweird.f32 %v4722_v7  ;;  %v1409_v48 = vsub.f32 1.0, %v5238_v56 }
 0x20f   : > { %vm1455_vm6 = vmor %vm1453_vm5, %vm1454_vm4  ;;  %v1257_v55 = vadd.f32 %v1256_v50, %v5206_v62  ;;  %v5288_v3 = vperm.slane %v7300_v63, 0  ;;  %v4570_v50 = vld [vmem:[%s5111_s13 + $0x20] sm:$0xff]  ;;  %vm4377_vm4 = vcmask 254976  }
 0x210   : > { %1400 = vrot.lane.b32.xlu1 %v1395_v58, %s4940_s26  ;;  %v1450_v10 = vsub.f32 1.0, %v1449_v8  ;;  %v1265_v58 = vperm.slane %v5228_v17, 1  ;;  %v7301_v8 = vrot.slane %v5265_v42, 3  ;;  %v4572_v17 = vld [vmem:[%s5111_s13 + $0x30] sm:$0xff] }
 0x212   : > { %v1451_v11 = vmul.f32 %v4722_v7, %v1450_v10  ;;  %v1269_v1 = vadd.f32 %v1265_v58, %v1257_v55  ;;  %v1408_v10 = vsub.f32 1.0, %v5234_v45 }
 0x214   : > { %v1452_v14 = vadd.f32 %v4722_v7, %v1451_v11 }
 0x216   : > { %v1456_v19 = vsel %vm1455_vm6, %v4722_v7, %v1452_v14 }
 0x218   : > { %1422 = vrot.lane.b32.xlu1 %v5199_v59, %s4938_s16 }
 0x220   : > { %1518 = vrot.lane.b32.xlu1 %v5214_v6, %s4938_s16 }
 0x27a   : > { %v1399_v4 = vpop.permute.xlu1 %1398 }
 0x27b   : > { %v1404_v5 = vadd.f32 %v1399_v4, %v1268_v21  ;;  %v1461_v21 = vsel %vm1458_vm7, %v1460_v20, %v1456_v19  ;;  %v1478_v19 = vadd.f32 %v5248_v61, %v1269_v1  ;;  %v7308_v20 = vrot.slane %v5265_v42, 5 }
 0x27d   : > { %4723 = vtanh.f32 %v1404_v5  ;;  %v5338_v61 = vperm.slane %v7308_v20, 0 }
 0x282   : > { %v1401_v59 = vpop.permute.xlu1 %1400 }
 0x283   : > { %v4724_v9 = vpop.eup %4723  ;;  %v1405_v6 = vadd.f32 %v1401_v59, %v5231_v26  ;;  %v5304_v59 = vperm.slane %v7301_v8, 0 }
 0x284   : > { %1412 = vrot.lane.b32.xlu2 %v4724_v9, %s4939_s22  ;;  %v7307_v9 = vrot.slane %v5265_v42, 4 }
 0x285   : > { %4725 = vtanh.f32 %v1405_v6 }
 0x286   : > { %v1576_v6 = vperm.slane %v7307_v9, 0 }
 0x28a   : > { %v1423_v12 = vpop.permute.xlu1 %1422 }
 0x28b   : > { %v4726_v13 = vpop.eup %4725  ;;  %v1427_v52 = vmul.f32 %v1423_v12, %v5238_v56  ;;  %v5291_v56 = vld [vmem:[%s7385_s1 + $0x8] sm:$0x3]  ;;  %v7303_v12 = vrot.slane %v5265_v42, 7 }
 0x28c   : > { %1520 = vrot.lane.b32.xlu2 %v5223_v16, %s4938_s16  ;;  %1414 = vrot.lane.b32.xlu0 %v4726_v13, %s4939_s22  ;;  %v4565_v16 = vmul.f32 -1.442695, %v1439_v25  ;;  %7387 = vst [vmem:[#allocation26_spill] sm:$0xff] %v5291_v56  ;;  %v7298_v62 = vrot.slane %v5291_v56, 1  ;;  %v1426_v13 = vmul.f32 %v5246_v60, %v5234_v45  ;;  %v4566_v45 = vmul.f32 -1.442695, %v1478_v19 }
 0x28d   : > { %v5318_v15 = vperm.slane %v7303_v12, 0  ;;  %v5329_v60 = vld [vmem:[%s7388_s2] sm:$0xff]  ;;  %v1016_v19 = vld [vmem:[%s7388_s2 + $0x8] sm:$0x3] }
 0x28e   : > { %4727 = vpow2.f32 %v4565_v16  ;;  %v5297_v5 = vperm.slane %v7298_v62, 0  ;;  %v1259_v16 = vpop.f32.mrf.mxu2 }
 0x292   : > { %v1519_v22 = vpop.permute.xlu1 %1518 }
 0x293   : > { %v1524_v23 = vmul.f32 %v1519_v22, %v1461_v21 }
 0x294   : > { %v4728_v27 = vpop.eup %4727 }
 0x295   : > { %1528 = vrot.lane.b32.xlu0 %v1524_v23, %s4940_s26  ;;  %v1447_v28 = vadd.f32 1.0, %v4728_v27  ;;  %v5343_v23 = vperm.slane %v5291_v56, 0  ;;  %v7306_v27 = vrot.slane %v5265_v42, 1 }
 0x297   : > { %4729 = vrcp.f32 %v1447_v28  ;;  %v1474_v36 = vand.u32 2147483648, %v1447_v28  ;;  %vm1468_vm13 = vweird.f32 %v1447_v28  ;;  %v1472_v26 = vand.u32 2147483647, %v1447_v28 }
 0x299   : > { %v1475_v38 = vor.u32 1.1754944e-38, %v1474_v36  ;;  %vm1473_vm15 = vcmp.eq.f32.partialorder %v1472_v26, 8.507059e+37  ;;  %v1995_v36 = vld [vmem:[%s5111_s13 + $0x18] sm:$0xff] }
 0x29a   : > { %v4573_v26 = vld [vmem:[%s5111_s13 + $0x38] sm:$0xff]  ;;  %2020 = vmatpush.msra.mxu1 %v1995_v36 }
 0x29b   : > { %2064 = vmatpush.msra.mxu2 %v4573_v26 }
 0x29d   : > { %v4730_v30 = vpop.eup %4729  ;;  %2065 = vmatpush.msra.mxu2 %v4572_v17 }
 0x29e   : > { %v1464_v31 = vmul.f32 %v4730_v30, %v1447_v28  ;;  %vm1469_vm12 = vweird.f32 %v4730_v30 }
 0x29f   : > { %vm1470_vm14 = vmor %vm1468_vm13, %vm1469_vm12  ;;  %vm7361_vm13 = vcmask 122880  }
 0x2a0   : > { %v1465_v32 = vsub.f32 1.0, %v1464_v31  ;;  %v5351_v31 = vperm.slane %v7306_v27, 0 }
 0x2a2   : > { %v1466_v33 = vmul.f32 %v4730_v30, %v1465_v32 }
 0x2a4   : > { %v1467_v35 = vadd.f32 %v4730_v30, %v1466_v33 }
 0x2a6   : > { %v1471_v37 = vsel %vm1470_vm14, %v4730_v30, %v1467_v35  ;;  %v1260_v30 = vadd.f32 %v1259_v16, %v5209_v0  ;;  %v2852_v16 = vld [vmem:[%s7389_s0 + $0x8] sm:$0xff] }
 0x2a7   : > { %v1476_v39 = vsel %vm1473_vm15, %v1475_v38, %v1471_v37  ;;  %v1994_v37 = vld [vmem:[%s5111_s13 + $0x10] sm:$0xff]  ;;  %v1993_v38 = vld [vmem:[%s5111_s13 + $0x8] sm:$0xff] }
 0x2a8   : > { %v5355_v33 = vadd.f32 %v1265_v58, %v1260_v30  ;;  %2021 = vmatpush.msra.mxu1 %v1994_v37 }
 0x2aa   : > { %2022 = vmatpush.msra.mxu1 %v1993_v38 }
 0x2de   : > { %v1413_v34 = vpop.permute.xlu2 %1412 }
 0x2df   : > { %v1418_v11 = vmul.f32 %v1413_v34, %v1408_v10 }
 0x2e1   : > { %v1428_v14 = vadd.f32 %v1426_v13, %v1418_v11  ;;  %v2857_v11 = vld [vmem:[%s7389_s0 + $0x30] sm:$0xff]  ;;  %v2858_v13 = vld [vmem:[%s7389_s0 + $0x38] sm:$0xff] }
 0x2e6   : > { %v1521_v40 = vpop.permute.xlu2 %1520 }
 0x2e7   : > { %v1525_v41 = vmul.f32 %v1521_v40, %v1476_v39  ;;  %v7294_v39 = vmov 3   ;;  %v4571_v40 = vld [vmem:[%s5111_s13 + $0x28] sm:$0xff] }
 0x2e8   : > { %2066 = vmatpush.msra.mxu2 %v4571_v40 }
 0x2e9   : > { %1530 = vrot.lane.b32.xlu1 %v1525_v41, %s4940_s26  ;;  %s7476_s26 = sld [smem:[#allocation21_spill]] }
 0x2ea   : > { %2067 = vmatpush.msra.mxu2 %v4570_v50 }
 0x2ec   : > { %2972 = vmatpush.msrb.mxu2 %v2858_v13 }
 0x2f1   : > { %1583 = vperm.xlu1 %4658, %v5268_v43  }
 0x2f9   : > { %1591 = vperm.xlu1 %4658, %v5274_v46  }
 0x2fe   : > { %v1415_v49 = vpop.permute.xlu0 %1414 }
 0x2ff   : > { %v1419_v53 = vmul.f32 %v1415_v49, %v1409_v48  ;;  %v1992_v48 = vld [vmem:[%s5111_s13] sm:$0xff] }
 0x300   : > { %2023 = vmatpush.msra.mxu1 %v1992_v48  ;;  %v5450_v48 = vld [vmem:[#allocation6 + $0x8] sm:$0xff] }
 0x301   : > { %v1429_v54 = vadd.f32 %v1427_v52, %v1419_v53 }
 0x302   : > { %2949 = vmatpush.msrb.mxu1 %v2857_v11 }
 0x303   : > { %2002 = vrot.lane.b32.xlu1 %v1429_v54, %s4939_s22 }
 0x307   : > { %v1529_v2 = vpop.permute.xlu0 %1528 }
 0x308   : > { %v1534_v4 = vadd.f32 %v1529_v2, %v1269_v1 }
 0x30a   : > { %4731 = vtanh.f32 %v1534_v4 }
 0x30b   : > { %1607 = vperm.xlu1 %4658, %v5288_v3   ;;  %4733 = vpow2.f32 %v4566_v45  ;;  %v2856_v45 = vld [vmem:[%s7389_s0 + $0x28] sm:$0xff] }
 0x30c   : > { %2973 = vmatpush.msrb.mxu2 %v2856_v45 }
 0x310   : > { %v4732_v7 = vpop.eup %4731 }
 0x311   : > { %1542 = vrot.lane.b32.xlu2 %v4732_v7, %s4939_s22  ;;  %v4734_v21 = vpop.eup %4733 }
 0x312   : > { %v1486_v22 = vadd.f32 1.0, %v4734_v21  ;;  %v2853_v21 = vld [vmem:[%s7389_s0 + $0x10] sm:$0xff] }
 0x313   : > { %1619 = vperm.xlu1 %4658, %v5297_v5  }
 0x314   : > { %4735 = vrcp.f32 %v1486_v22  ;;  %v1499_v49 = vand.u32 2147483648, %v1486_v22  ;;  %vm1493_vm1 = vweird.f32 %v1486_v22  ;;  %v1497_v52 = vand.u32 2147483647, %v1486_v22 }
 0x316   : > { %v1500_v58 = vor.u32 1.1754944e-38, %v1499_v49  ;;  %vm1498_vm3 = vcmp.eq.f32.partialorder %v1497_v52, 8.507059e+37 }
 0x319   : > { %1595 = vperm.xlu2 %4659, %v5304_v59  }
 0x31a   : > { %v4736_v25 = vpop.eup %4735 }
 0x31b   : > { %4662 = vset.pattern.permute.xlu1 %v7304_v47  ;;  %v1489_v28 = vmul.f32 %v4736_v25, %v1486_v22  ;;  %vm1494_vm0 = vweird.f32 %v4736_v25  ;;  %v2851_v22 = vld [vmem:[%s7389_s0] sm:$0xff] }
 0x31c   : > { %1651 = vperm.xlu1 %4662, %v5274_v46   ;;  %vm1495_vm2 = vmor %vm1493_vm1, %vm1494_vm0 }
 0x31d   : > { %v1490_v32 = vsub.f32 1.0, %v1489_v28 }
 0x31f   : > { %v1491_v35 = vmul.f32 %v4736_v25, %v1490_v32 }
 0x321   : > { %1599 = vperm.xlu2 %4659, %v1576_v6   ;;  %v1492_v41 = vadd.f32 %v4736_v25, %v1491_v35 }
 0x323   : > { %v1496_v55 = vsel %vm1495_vm2, %v4736_v25, %v1492_v41  ;;  %v5448_v41 = vld [vmem:[#allocation6] sm:$0xff] }
 0x324   : > { %1659 = vperm.xlu1 %4662, %v1576_v6   ;;  %v1501_v1 = vsel %vm1498_vm3, %v1500_v58, %v1496_v55  ;;  %v5459_v58 = vld [vmem:[#allocation6 + $0x18] sm:$0xff] }
 0x325   : > { %v1538_v2 = vsub.f32 1.0, %v1501_v1 }
 0x329   : > { %2000 = vrot.lane.b32.xlu2 %v1428_v14, %s4939_s22 }
 0x32c   : > { %1671 = vperm.xlu1 %4662, %v5318_v15  }
 0x331   : > { %1611 = vperm.xlu2 %4659, %v5318_v15  }
 0x334   : > { %4664 = vset.pattern.permute.xlu1 %v7296_v18 }
 0x335   : > { %1703 = vperm.xlu1 %4664, %v5268_v43  }
 0x339   : > { %4660 = vset.pattern.permute.xlu2 %v7304_v47 }
 0x33a   : > { %1643 = vperm.xlu2 %4660, %v5268_v43  }
 0x33d   : > { %4666 = vset.pattern.permute.xlu1 %v7304_v47 }
 0x33e   : > { %2076 = vperm.xlu1 %4666, %v5329_v60  }
 0x342   : > { %1655 = vperm.xlu2 %4660, %v5304_v59  }
 0x346   : > { %4667 = vset.pattern.permute.xlu1 %v7296_v18 }
 0x347   : > { %1715 = vperm.xlu1 %4667, %v5304_v59  }
 0x34a   : > { %1663 = vperm.xlu2 %4660, %v5338_v61  }
 0x34f   : > { %1719 = vperm.xlu1 %4667, %v1576_v6  }
 0x352   : > { %1675 = vperm.xlu2 %4660, %v5343_v23  }
 0x357   : > { %1723 = vperm.xlu1 %4667, %v5338_v61  }
 0x35a   : > { %4665 = vset.pattern.permute.xlu2 %v7296_v18 }
 0x35b   : > { %v1531_v34 = vpop.permute.xlu1 %1530  ;;  %1707 = vperm.xlu2 %4665, %v5351_v31  }
 0x35c   : > { %v1535_v0 = vadd.f32 %v1531_v34, %v5355_v33 }
 0x35e   : > { %4737 = vtanh.f32 %v1535_v0 }
 0x35f   : > { %4671 = vset.pattern.permute.xlu1 %v7294_v39 }
 0x360   : > { %1779 = vperm.xlu1 %4671, %v1576_v6   ;;  %v1550_v6 = vmul.f32 %v1501_v1, %v5183_v51  ;;  %v2855_v51 = vld [vmem:[%s7389_s0 + $0x20] sm:$0xff] }
 0x361   : > { %2950 = vmatpush.msrb.mxu1 %v2855_v51 }
 0x363   : > { %1711 = vperm.xlu2 %4665, %v5274_v46   ;;  %v5370_v53 = vpop.permute.xlu1 %1583  ;;  %2951 = vmatpush.msrb.mxu1 %v2853_v21 }
 0x364   : > { %v4738_v54 = vpop.eup %4737  ;;  %v1622_v49 = vmul.f32 %v5370_v53, %v5448_v41 }
 0x365   : > { %1544 = vrot.lane.b32.xlu0 %v4738_v54, %s4939_s22  ;;  %2952 = vmatpush.msrb.mxu1 %v2851_v22 }
 0x368   : > { %1783 = vperm.xlu1 %4671, %v5338_v61  }
 0x36b   : > { %v1543_v4 = vpop.permute.xlu2 %1542  ;;  %4668 = vset.pattern.permute.xlu2 %v7294_v39  ;;  %v5375_v7 = vpop.permute.xlu1 %1591 }
 0x36c   : > { %v1548_v10 = vmul.f32 %v1543_v4, %v1538_v2  ;;  %1763 = vperm.xlu2 %4668, %v5268_v43   ;;  %v2854_v43 = vld [vmem:[%s7389_s0 + $0x18] sm:$0xff]  ;;  %v1624_v53 = vmul.f32 %v5375_v7, %v5448_v41 }
 0x36d   : > { %1647 = vperm.xlu0 %4661, %v5351_v31   ;;  %2974 = vmatpush.msrb.mxu2 %v2854_v43 }
 0x36e   : > { %v1552_v14 = vadd.f32 %v1550_v6, %v1548_v10 }
 0x36f   : > { %2975 = vmatpush.msrb.mxu2 %v2852_v16 }
 0x370   : > { %4379 = vst.msk [vmem:[#allocation4] sm:$0xff] %vm7360_vm11, %v1552_v14  ;;  %4674 = vset.pattern.permute.xlu1 %v7309_v29 }
 0x371   : > { %2038 = vperm.xlu1 %4674, %v1016_v19  }
 0x373   : > { %v5390_v25 = vpop.permute.xlu2 %1595 }
 0x374   : > { %1771 = vperm.xlu2 %4668, %v5274_v46  }
 0x375   : > { %v2003_v28 = vpop.permute.xlu1 %2002  ;;  %1667 = vperm.xlu0 %4661, %v5288_v3  }
 0x376   : > { %4378 = vst.msk [vmem:[#allocation3 + $0x8] sm:$0x3] %vm4377_vm4, %v2003_v28 }
 0x379   : > { %4676 = vset.pattern.permute.xlu1 %v7296_v18 }
 0x37a   : > { %1735 = vperm.xlu1 %4676, %v5343_v23  }
 0x37b   : > { %v5398_v30 = vpop.permute.xlu2 %1599 }
 0x37c   : > { %1775 = vperm.xlu2 %4668, %v5304_v59  }
 0x37d   : > { %1679 = vperm.xlu0 %4661, %v5297_v5   ;;  %v5418_v32 = vpop.permute.xlu1 %1607 }
 0x382   : > { %4678 = vset.pattern.permute.xlu1 %v7294_v39 }
 0x383   : > { %v2001_v46 = vpop.permute.xlu2 %2000  ;;  %1799 = vperm.xlu1 %4678, %v5297_v5  }
 0x384   : > { %4376 = vst.msk [vmem:[#allocation3] sm:$0xff] %vm7360_vm11, %v2001_v46  ;;  %4568 = vmatmul.msk.f32.vlgmr.msra.gmra.mxu1 %vm7360_vm11, %v2001_v46  ;;  %4574 = vmatmul.msk.f32.vlgmr.msra.gmra.mxu2 %vm7360_vm11, %v2001_v46 }
 0x385   : > { %4672 = vset.pattern.permute.xlu2 %v7296_v18  ;;  %4663 = vset.pattern.permute.xlu0 %v7309_v29  ;;  %v5424_v0 = vpop.permute.xlu1 %1619 }
 0x386   : > { %1731 = vperm.xlu2 %4672, %v5318_v15   ;;  %1587 = vperm.xlu0 %4663, %v5351_v31  }
 0x38b   : > { %v5411_v59 = vpop.permute.xlu2 %1611 }
 0x38c   : > { %4569 = vmatmul.msk.f32.gmra.mxu1 %vm7360_vm11, %v2003_v28  ;;  %4575 = vmatmul.msk.f32.gmra.mxu2 %vm7360_vm11, %v2003_v28 }
 0x38e   : > { %4673 = vset.pattern.permute.xlu2 %v7294_v39  ;;  %1603 = vperm.xlu0 %4663, %v5338_v61   ;;  %v1479_v61 = vadd.f32 %v5257_v24, %v5355_v33  ;;  %v1652_v36 = vpop.permute.xlu1 %1651 }
 0x38f   : > { %1787 = vperm.xlu2 %4673, %v5288_v3   ;;  %v1684_v11 = vmul.f32 %v1652_v36, %v5450_v48 }
 0x390   : > { %v4567_v37 = vmul.f32 -1.442695, %v1479_v61 }
 0x391   : > { %v1694_v45 = vadd.f32 %v1684_v11, %v1624_v53 }
 0x392   : > { %4739 = vpow2.f32 %v4567_v37 }
 0x394   : > { %v1644_v34 = vpop.permute.xlu2 %1643  ;;  %4582 = vmatmul.msk.f32.vlgmr.msrb.gmra.mxu1 %vm7360_vm11, %v1552_v14  ;;  %4584 = vmatmul.msk.f32.vlgmr.msrb.gmra.mxu2 %vm7360_vm11, %v1552_v14 }
 0x395   : > { %v1682_v50 = vmul.f32 %v1644_v34, %v5450_v48 }
 0x396   : > { %1615 = vperm.xlu0 %4663, %v5343_v23   ;;  %v5439_v38 = vpop.permute.xlu1 %1659 }
 0x397   : > { %4675 = vset.pattern.permute.xlu2 %v7304_v47  ;;  %v1692_v55 = vadd.f32 %v1682_v50, %v1622_v49 }
 0x398   : > { %2080 = vperm.xlu2 %4675, %v1016_v19  }
 0x39c   : > { %v5426_v35 = vpop.permute.xlu2 %1655 }
 0x39d   : > { %v1685_v49 = vmul.f32 %v5426_v35, %v5450_v48 }
 0x39e   : > { %2033 = vperm.xlu0 %4663, %v5329_v60   ;;  %v4740_v60 = vpop.eup %4739  ;;  %v5445_v33 = vpop.permute.xlu1 %1671 }
 0x3a0   : > { %4677 = vset.pattern.permute.xlu2 %v7296_v18 }
 0x3a1   : > { %1739 = vperm.xlu2 %4677, %v5297_v5   ;;  %v1487_v5 = vadd.f32 1.0, %v4740_v60 }
 0x3a3   : > { %4741 = vrcp.f32 %v1487_v5  ;;  %v1514_v43 = vand.u32 2147483648, %v1487_v5  ;;  %vm1508_vm6 = vweird.f32 %v1487_v5  ;;  %v1512_v7 = vand.u32 2147483647, %v1487_v5 }
 0x3a4   : > { %v5433_v26 = vpop.permute.xlu2 %1663 }
 0x3a5   : > { %v1515_v36 = vor.u32 1.1754944e-38, %v1514_v43  ;;  %vm1513_vm12 = vcmp.eq.f32.partialorder %v1512_v7, 8.507059e+37 }
 0x3a6   : > { %4669 = vset.pattern.permute.xlu0 %v7296_v18 }
 0x3a7   : > { %1727 = vperm.xlu0 %4669, %v5288_v3   ;;  %v1704_v52 = vpop.permute.xlu1 %1703 }
 0x3a9   : > { %v4742_v40 = vpop.eup %4741 }
 0x3aa   : > { %v1504_v54 = vmul.f32 %v4742_v40, %v1487_v5  ;;  %vm1509_vm5 = vweird.f32 %v4742_v40  ;;  %v1625_v5 = vmul.f32 %v5390_v25, %v5448_v41 }
 0x3ab   : > { %vm1510_vm7 = vmor %vm1508_vm6, %vm1509_vm5 }
 0x3ac   : > { %v5437_v17 = vpop.permute.xlu2 %1675  ;;  %v1505_v1 = vsub.f32 1.0, %v1504_v54 }
 0x3ae   : > { %v1506_v10 = vmul.f32 %v4742_v40, %v1505_v1 }
 0x3af   : > { %4670 = vset.pattern.permute.xlu0 %v7294_v39 }
 0x3b0   : > { %1767 = vperm.xlu0 %4670, %v5351_v31   ;;  %v5455_v31 = vld [vmem:[#allocation6 + $0x10] sm:$0xff]  ;;  %v1507_v51 = vadd.f32 %v4742_v40, %v1506_v10 }
 0x3b2   : > { %v1511_v34 = vsel %vm1510_vm7, %v4742_v40, %v1507_v51 }
 0x3b3   : > { %v1516_v60 = vsel %vm1513_vm12, %v1515_v36, %v1511_v34 }
 0x3b4   : > { %v1539_v40 = vsub.f32 1.0, %v1516_v60  ;;  %v1551_v1 = vmul.f32 %v1516_v60, %v5193_v57 }
 0x3b5   : > { %v5443_v24 = vpop.permute.xlu2 %1707 }
 0x3b8   : > { %1791 = vperm.xlu0 %4670, %v5318_v15   ;;  %v1742_v15 = vmul.f32 %v1704_v52, %v5455_v31 }
 0x3ba   : > { %v1752_v4 = vadd.f32 %v1742_v15, %v1692_v55 }
 0x3bd   : > { %v1712_v3 = vpop.permute.xlu2 %1711 }
 0x3be   : > { %v1744_v14 = vmul.f32 %v1712_v3, %v5455_v31 }
 0x3c0   : > { %1795 = vperm.xlu0 %4670, %v5343_v23   ;;  %v5467_v23 = vpop.permute.xlu1 %2076  ;;  %v1754_v16 = vadd.f32 %v1744_v14, %v1694_v45 }
 0x3c6   : > { %v1764_v2 = vpop.permute.xlu2 %1763 }
 0x3c7   : > { %v1802_v6 = vmul.f32 %v1764_v2, %v5459_v58 }
 0x3c8   : > { %v1716_v3 = vpop.permute.xlu1 %1715 }
 0x3c9   : > { %v5465_v13 = vadd.f32 %v1802_v6, %v1752_v4  ;;  %v1745_v54 = vmul.f32 %v1716_v3, %v5455_v31  ;;  %v1695_v4 = vadd.f32 %v1685_v49, %v1625_v5 }
 0x3cb   : > { %v5471_v19 = vadd.f32 1e-16, %v5465_v13  ;;  %v1755_v10 = vadd.f32 %v1745_v54, %v1695_v4 }
 0x3cd   : > { %7390 = vst [vmem:[#allocation27_spill] sm:$0xff] %v5471_v19  ;;  %v1832_v21 = vmul.f32 %v5471_v19, %v5471_v19 }
 0x3ce   : > { %v1772_v22 = vpop.permute.xlu2 %1771 }
 0x3cf   : > { %v1804_v28 = vmul.f32 %v1772_v22, %v5459_v58  ;;  %v1842_v46 = vsel %vm7363_vm10, %v1832_v21, 0.0 }
 0x3d0   : > { %1843 = vadd.xlane.f32.xlu2 %v1842_v46  ;;  %v1720_v14 = vpop.permute.xlu1 %1719 }
 0x3d1   : > { %v5477_v61 = vadd.f32 %v1804_v28, %v1754_v16  ;;  %v1687_v28 = vmul.f32 %v5433_v26, %v5450_v48  ;;  %v5521_v26 = vld [vmem:[%s5116_s20] ss:$0 sm:$0xff] }
 0x3d3   : > { %v5480_v37 = vadd.f32 1e-16, %v5477_v61 }
 0x3d5   : > { %v1834_v50 = vmul.f32 %v5480_v37, %v5480_v37 }
 0x3d6   : > { %v1776_v52 = vpop.permute.xlu2 %1775 }
 0x3d7   : > { %v1545_v55 = vpop.permute.xlu0 %1544  ;;  %v1848_v15 = vsel %vm7363_vm10, %v1834_v50, 0.0  ;;  %v1805_v25 = vmul.f32 %v1776_v52, %v5459_v58  ;;  %v5515_v52 = vld [vmem:[%s5116_s20 + $0x1] ss:$0 sm:$0xff] }
 0x3d8   : > { %v1549_v2 = vmul.f32 %v1545_v55, %v1539_v40  ;;  %1849 = vadd.xlane.f32.xlu1 %v1848_v15  ;;  %v1724_v43 = vpop.permute.xlu1 %1723 }
 0x3d9   : > { %v5495_v35 = vadd.f32 %v1805_v25, %v1755_v10  ;;  %v1747_v46 = vmul.f32 %v1724_v43, %v5455_v31 }
 0x3da   : > { %v1553_v6 = vadd.f32 %v1551_v1, %v1549_v2 }
 0x3db   : > { %v5498_v11 = vadd.f32 1e-16, %v5495_v35 }
 0x3dc   : > { %4380 = vst.msk [vmem:[#allocation4 + $0x8] sm:$0x3] %vm4377_vm4, %v1553_v6  ;;  %4583 = vmatmul.msk.f32.gmra.mxu1 %vm7360_vm11, %v1553_v6  ;;  %4585 = vmatmul.msk.f32.gmra.mxu2 %vm7360_vm11, %v1553_v6 }
 0x3dd   : > { %7391 = vst [vmem:[#allocation28_spill] sm:$0xff] %v5498_v11  ;;  %v1835_v57 = vmul.f32 %v5498_v11, %v5498_v11 }
 0x3df   : > { %v1648_v53 = vpop.permute.xlu0 %1647  ;;  %v1851_v45 = vsel %vm7363_vm10, %v1835_v57, 0.0 }
 0x3e0   : > { %v1780_v7 = vpop.permute.xlu1 %1779  ;;  %v1732_v6 = vpop.permute.xlu2 %1731 }
 0x3e7   : > { %v1668_v51 = vpop.permute.xlu0 %1667 }
 0x3e8   : > { %v1784_v36 = vpop.permute.xlu1 %1783 }
 0x3e9   : > { %v1807_v60 = vmul.f32 %v1784_v36, %v5459_v58  ;;  %v1788_v36 = vpop.permute.xlu2 %1787 }
 0x3ea   : > { %1852 = vadd.xlane.f32.xlu0 %v1851_v45 }
 0x3ef   : > { %v5503_v21 = vpop.permute.xlu0 %1679 }
 0x3f8   : > { %v1588_v22 = vpop.permute.xlu0 %1587 }
 0x400   : > { %v1604_v16 = vpop.permute.xlu0 %1603 }
 0x401   : > { %v1627_v34 = vmul.f32 %v1604_v16, %v5448_v41  ;;  %v2025_v15 = vpop.f32.mrf.mxu1  ;;  %v1688_v16 = vmul.f32 %v1668_v51, %v5450_v48 }
 0x402   : > { %v2026_v4 = vadd.f32 %v5521_v26, %v2025_v15 }
 0x403   : > { %v1697_v3 = vadd.f32 %v1687_v28, %v1627_v34  ;;  %v1628_v34 = vmul.f32 %v5418_v32, %v5448_v41 }
 0x405   : > { %v1757_v5 = vadd.f32 %v1747_v46, %v1697_v3  ;;  %v1698_v3 = vadd.f32 %v1688_v16, %v1628_v34  ;;  %v1746_v16 = vmul.f32 %v1720_v14, %v5455_v31 }
 0x407   : > { %v5510_v49 = vadd.f32 %v1807_v60, %v1757_v5  ;;  %v2069_v54 = vpop.f32.mrf.mxu2  ;;  %v1808_v5 = vmul.f32 %v1788_v36, %v5459_v58 }
 0x408   : > { %v5512_v50 = vpop.permute.xlu0 %1615  ;;  %v2070_v1 = vadd.f32 %v5515_v52, %v2069_v54  ;;  %v1623_v54 = vmul.f32 %v1588_v22, %v5448_v41  ;;  %v1743_v22 = vmul.f32 %v5443_v24, %v5455_v31  ;;  %v5574_v24 = vpop.permute.xlu1 %2038 }
 0x409   : > { %v5518_v40 = vadd.f32 1e-16, %v5510_v49 }
 0x40a   : > { %v2083_v10 = vmul.f32 %v5467_v23, %v2070_v1  ;;  %v1683_v1 = vmul.f32 %v1648_v53, %v5450_v48 }
 0x40b   : > { %v1837_v55 = vmul.f32 %v5518_v40, %v5518_v40 }
 0x40d   : > { %v1857_v2 = vsel %vm7363_vm10, %v1837_v55, 0.0 }
 0x40e   : > { %1858 = vadd.xlane.f32.xlu1 %v1857_v2  ;;  %v1626_v2 = vmul.f32 %v5398_v30, %v5448_v41 }
 0x410   : > { %v2034_v25 = vpop.permute.xlu0 %2033 }
 0x411   : > { %v2041_v57 = vmul.f32 %v2034_v25, %v2026_v4  ;;  %v1686_v4 = vmul.f32 %v5439_v38, %v5450_v48  ;;  %v1806_v38 = vmul.f32 %v1780_v7, %v5459_v58  ;;  %v1689_v7 = vmul.f32 %v5445_v33, %v5450_v48 }
 0x413   : > { %v5529_v45 = vadd.f32 %v2083_v10, %v2041_v57  ;;  %v1693_v10 = vadd.f32 %v1683_v1, %v1623_v54  ;;  %v1696_v34 = vadd.f32 %v1686_v4, %v1626_v2  ;;  %v1629_v2 = vmul.f32 %v5411_v59, %v5448_v41 }
 0x414   : > { %v1749_v4 = vmul.f32 %v1732_v6, %v5455_v31  ;;  %v1630_v6 = vmul.f32 %v5512_v50, %v5448_v41 }
 0x415   : > { %7392 = vst [vmem:[#allocation29_spill] sm:$0xff] %v5529_v45  ;;  %v7289_v43 = vrot.slane %v5529_v45, 2  ;;  %v7288_v46 = vrot.slane %v5529_v45, 5  ;;  %v7291_v30 = vrot.slane %v5529_v45, 1  ;;  %v1699_v33 = vadd.f32 %v1689_v7, %v1629_v2  ;;  %v1736_v7 = vpop.permute.xlu1 %1735 }
 0x416   : > { %v2093_v12 = vand.u32 2147483647, %v5529_v45  ;;  %vm2089_vm1 = vcmp.ne.f32.partialorder %v5529_v45, %v5529_v45 }
 0x417   : > { %v5535_v28 = vadd.f32 1e-16, %v7289_v43  ;;  %v5551_v32 = vadd.f32 1e-16, %v7288_v46 }
 0x419   : > { %v1728_v60 = vpop.permute.xlu0 %1727  ;;  %v5542_v23 = vmul.f32 %v5535_v28, %v5535_v28  ;;  %v5564_v57 = vmul.f32 %v5551_v32, %v5551_v32  ;;  %v7321_v63 = vperm.slane %v5535_v28, 0  ;;  %v7320_v47 = vperm.slane %v5551_v32, 0 }
 0x41a   : > { %v1748_v51 = vmul.f32 %v1728_v60, %v5455_v31 }
 0x41b   : > { %7393 = vst [vmem:[#allocation30_spill] sm:$0xff] %v5542_v23  ;;  %v2276_v55 = vsel %vm7361_vm13, %v5542_v23, 0.0  ;;  %v2285_v14 = vsel %vm7361_vm13, %v5564_v57, 0.0 }
 0x41c   : > { %v1758_v15 = vadd.f32 %v1748_v51, %v1698_v3  ;;  %2277 = vadd.xlane.f32.xlu1 %v2276_v55  ;;  %7394 = vst [vmem:[#allocation31_spill] sm:$0xff] %v5564_v57  ;;  %v1753_v3 = vadd.f32 %v1743_v22, %v1693_v10  ;;  %v1756_v51 = vadd.f32 %v1746_v16, %v1696_v34  ;;  %v5582_v55 = vadd.f32 1e-16, %v7291_v30 }
 0x41d   : > { %v7290_v16 = vrot.slane %v5529_v45, 3  ;;  %v7293_v30 = vrot.slane %v5529_v45, 4 }
 0x41e   : > { %v5558_v25 = vadd.f32 %v1808_v5, %v1758_v15  ;;  %v5588_v1 = vadd.f32 %v1806_v38, %v1756_v51  ;;  %v5598_v10 = vmul.f32 %v5582_v55, %v5582_v55 }
 0x41f   : > { %v5614_v51 = vadd.f32 1e-16, %v7290_v16 }
 0x420   : > { %v5568_v53 = vadd.f32 1e-16, %v5558_v25  ;;  %7397 = vst [vmem:[#allocation34_spill] sm:$0xff] %v5598_v10  ;;  %v5604_v38 = vadd.f32 1e-16, %v5588_v1 }
 0x422   : > { %7395 = vst [vmem:[#allocation32_spill] sm:$0xff] %v5568_v53  ;;  %v1768_v36 = vpop.permute.xlu0 %1767  ;;  %v1838_v60 = vmul.f32 %v5568_v53, %v5568_v53  ;;  %v1836_v50 = vmul.f32 %v5604_v38, %v5604_v38 }
 0x423   : > { %v1803_v5 = vmul.f32 %v1768_v36, %v5459_v58  ;;  %7398 = vst [vmem:[#allocation35_spill] sm:$0xff] %v5604_v38  ;;  %v2081_v36 = vpop.permute.xlu2 %2080 }
 0x424   : > { %2286 = vadd.xlane.f32.xlu1 %v2285_v14  ;;  %v1860_v54 = vsel %vm7363_vm10, %v1838_v60, 0.0  ;;  %v1759_v60 = vadd.f32 %v1749_v4, %v1699_v33  ;;  %v2273_v14 = vsel %vm7361_vm13, %v5598_v10, 0.0  ;;  %v1750_v4 = vmul.f32 %v1736_v7, %v5455_v31 }
 0x425   : > { %v5586_v15 = vadd.f32 %v1803_v5, %v1753_v3  ;;  %1861 = vadd.xlane.f32.xlu0 %v1860_v54  ;;  %v1690_v54 = vmul.f32 %v5437_v17, %v5450_v48 }
 0x427   : > { %v5594_v22 = vadd.f32 1e-16, %v5586_v15  ;;  %v1700_v33 = vadd.f32 %v1690_v54, %v1630_v6  ;;  %v5637_v54 = vadd.f32 1e-16, %v5529_v45 }
 0x429   : > { %7396 = vst [vmem:[#allocation33_spill] sm:$0xff] %v5594_v22  ;;  %v1833_v34 = vmul.f32 %v5594_v22, %v5594_v22 }
 0x42a   : > { %v1792_v59 = vpop.permute.xlu0 %1791 }
 0x42b   : > { %v1809_v3 = vmul.f32 %v1792_v59, %v5459_v58  ;;  %v1845_v5 = vsel %vm7363_vm10, %v1833_v34, 0.0  ;;  %v5628_v59 = vmul.f32 %v5614_v51, %v5614_v51  ;;  %v1740_v7 = vpop.permute.xlu2 %1739 }
 0x42c   : > { %1846 = vadd.xlane.f32.xlu2 %v1845_v5  ;;  %v7292_v5 = vrot.slane %v5529_v45, 6 }
 0x42d   : > { %v5618_v2 = vadd.f32 %v1809_v3, %v1759_v60  ;;  %2274 = vadd.xlane.f32.xlu0 %v2273_v14  ;;  %7401 = vst [vmem:[#allocation38_spill] sm:$0xff] %v5628_v59  ;;  %v1854_v3 = vsel %vm7363_vm10, %v1836_v50, 0.0  ;;  %v1760_v14 = vadd.f32 %v1750_v4, %v1700_v33  ;;  %v2279_v43 = vsel %vm7361_vm13, %v5628_v59, 0.0 }
 0x42e   : > { %v5643_v16 = vadd.f32 1e-16, %v7292_v5  ;;  %v1691_v50 = vmul.f32 %v5503_v21, %v5450_v48  ;;  %v1631_v33 = vmul.f32 %v5424_v0, %v5448_v41  ;;  %v2028_v5 = vpop.f32.mrf.mxu1 }
 0x42f   : > { %7399 = vst [vmem:[#allocation36_spill] sm:$0xff] %v5618_v2  ;;  %v5624_v34 = vadd.f32 1e-16, %v5618_v2 }
 0x430   : > { %v5662_v48 = vmul.f32 %v5643_v16, %v5643_v16  ;;  %v1701_v21 = vadd.f32 %v1691_v50, %v1631_v33  ;;  %v7316_v33 = vperm.slane %v5637_v54, 0  ;;  %v7313_v62 = vperm.slane %v5643_v16, 0 }
 0x431   : > { %7400 = vst [vmem:[#allocation37_spill] sm:$0xff] %v5624_v34  ;;  %v1839_v17 = vmul.f32 %v5624_v34, %v5624_v34 }
 0x432   : > { %v1796_v60 = vpop.permute.xlu0 %1795  ;;  %7404 = vst [vmem:[#allocation41_spill] sm:$0xff] %v5662_v48  ;;  %v2288_v50 = vsel %vm7361_vm13, %v5662_v48, 0.0 }
 0x433   : > { %v1810_v46 = vmul.f32 %v1796_v60, %v5459_v58  ;;  %v1863_v6 = vsel %vm7363_vm10, %v1839_v17, 0.0  ;;  %v1751_v17 = vmul.f32 %v1740_v7, %v5455_v31  ;;  %v1800_v60 = vpop.permute.xlu1 %1799  ;;  %v5672_v7 = vadd.f32 1e-16, %v7293_v30 }
 0x434   : > { %1855 = vadd.xlane.f32.xlu2 %v1854_v3  ;;  %1864 = vadd.xlane.f32.xlu1 %v1863_v6  ;;  %v5657_v6 = vmul.f32 %v5637_v54, %v5637_v54  ;;  %v1811_v41 = vmul.f32 %v1800_v60, %v5459_v58  ;;  %v7318_v58 = vperm.slane %v5582_v55, 0 }
 0x435   : > { %v5647_v4 = vadd.f32 %v1810_v46, %v1760_v14  ;;  %2280 = vadd.xlane.f32.xlu0 %v2279_v43  ;;  %v1761_v31 = vadd.f32 %v1751_v17, %v1701_v21  ;;  %v2072_v43 = vpop.f32.mrf.mxu2  ;;  %v5683_v21 = vmul.f32 %v5672_v7, %v5672_v7 }
 0x436   : > { %7403 = vst [vmem:[#allocation40_spill] sm:$0xff] %v5657_v6  ;;  %v2270_v46 = vsel %vm7361_vm13, %v5657_v6, 0.0  ;;  %v2073_v17 = vadd.f32 %v5515_v52, %v2072_v43 }
 0x437   : > { %7402 = vst [vmem:[#allocation39_spill] sm:$0xff] %v5647_v4  ;;  %v5653_v3 = vadd.f32 1e-16, %v5647_v4  ;;  %v5679_v60 = vadd.f32 %v1811_v41, %v1761_v31  ;;  %v2282_v52 = vsel %vm7361_vm13, %v5683_v21, 0.0  ;;  %v7317_v31 = vperm.slane %v5672_v7, 0 }
 0x438   : > { %7406 = vst [vmem:[#allocation43_spill] sm:$0xff] %v5683_v21 }
 0x439   : > { %v1840_v0 = vmul.f32 %v5653_v3, %v5653_v3  ;;  %7405 = vst [vmem:[#allocation42_spill] sm:$0xff] %v5679_v60  ;;  %v5693_v30 = vadd.f32 1e-16, %v5679_v60 }
 0x43b   : > { %v1866_v14 = vsel %vm7363_vm10, %v1840_v0, 0.0  ;;  %v2220_v0 = vmul.f32 %v7318_v58, %v5594_v22  ;;  %7407 = vst [vmem:[#allocation44_spill] sm:$0xff] %v5693_v30  ;;  %v1841_v39 = vmul.f32 %v5693_v30, %v5693_v30 }
 0x43c   : > { %2271 = vadd.xlane.f32.xlu2 %v2270_v46  ;;  %1867 = vadd.xlane.f32.xlu1 %v1866_v14  ;;  %v2029_v46 = vadd.f32 %v5521_v26, %v2028_v5  ;;  %v2219_v14 = vmul.f32 %v7316_v33, %v5471_v19  ;;  %v7314_v5 = vperm.slane %v5614_v51, 0 }
 0x43d   : > { %2289 = vadd.xlane.f32.xlu0 %v2288_v50  ;;  %v2084_v50 = vmul.f32 %v2081_v36, %v2073_v17  ;;  %v2232_v41 = vsel %vm7363_vm10, %v2220_v0, 0.0  ;;  %v7299_v36 = vrot.slane %v5529_v45, 7  ;;  %v2223_v0 = vmul.f32 %v7317_v31, %v5604_v38 }
 0x43e   : > { %v2042_v43 = vmul.f32 %v5574_v24, %v2029_v46  ;;  %v2229_v26 = vsel %vm7363_vm10, %v2219_v14, 0.0  ;;  %v2222_v24 = vmul.f32 %v7314_v5, %v5498_v11 }
 0x43f   : > { %v5715_v46 = vadd.f32 1e-16, %v7299_v36 }
 0x440   : > { %v5703_v17 = vadd.f32 %v2084_v50, %v2042_v43  ;;  %v1869_v50 = vsel %vm7363_vm10, %v1841_v39, 0.0  ;;  %v2238_v43 = vsel %vm7363_vm10, %v2222_v24, 0.0  ;;  %v2225_v24 = vmul.f32 %v7313_v62, %v5568_v53 }
 0x441   : > { %v5726_v36 = vmul.f32 %v5715_v46, %v5715_v46 }
 0x442   : > { %7408 = vst [vmem:[#allocation45_spill] sm:$0xff] %v5703_v17  ;;  %v2094_v14 = vand.u32 2147483647, %v5703_v17  ;;  %vm2090_vm15 = vcmp.ne.f32.partialorder %v5703_v17, %v5703_v17 }
 0x443   : > { %7409 = vst [vmem:[#allocation46_spill] sm:$0xff] %v5726_v36 }
 0x444   : > { %2283 = vadd.xlane.f32.xlu2 %v2282_v52  ;;  %2233 = vadd.xlane.f32.xlu1 %v2232_v41  ;;  %v2241_v52 = vsel %vm7363_vm10, %v2223_v0, 0.0  ;;  %v7302_v41 = vrot.slane %v5703_v17, 1  ;;  %v2096_v18 = vsub.f32 0.0, %v2094_v14  ;;  %v4945_v14 = vmov 16  }
 0x445   : > { %2230 = vadd.xlane.f32.xlu0 %v2229_v26  ;;  %v7315_v26 = vperm.slane %v5715_v46, 0  ;;  %4679 = vset.pattern.permute.xlu2 %v4945_v14 }
 0x446   : > { %v5733_v0 = vadd.f32 1e-16, %v7302_v41  ;;  %4680 = vset.pattern.permute.xlu0 %v4945_v14  ;;  %v2247_v41 = vsel %vm7363_vm10, %v2225_v24, 0.0  ;;  %v2095_v24 = vsub.f32 0.0, %v2093_v12  ;;  %v2224_v12 = vmul.f32 %v7320_v47, %v5518_v40 }
 0x447   : > { %v2226_v39 = vmul.f32 %v7315_v26, %v5624_v34 }
 0x448   : > { %v7312_v8 = vperm.slane %v5733_v0, 0  ;;  %v2097_v20 = vmul.f32 1.442695, %v2095_v24 }
 0x44a   : > { %v2228_v14 = vmul.f32 %v7312_v8, %v5693_v30 }
 0x44c   : > { %1870 = vadd.xlane.f32.xlu2 %v1869_v50  ;;  %2242 = vadd.xlane.f32.xlu1 %v2241_v52  ;;  %v2099_v50 = vmul.f32 1.442695, %v2096_v18  ;;  %v2291_v52 = vsel %vm7361_vm13, %v5726_v36, 0.0  ;;  %v2221_v18 = vmul.f32 %v7321_v63, %v5480_v37 }
 0x44d   : > { %2239 = vadd.xlane.f32.xlu0 %v2238_v43  ;;  %v2250_v43 = vsel %vm7363_vm10, %v2226_v39, 0.0  ;;  %v5753_v39 = vmul.f32 %v5733_v0, %v5733_v0 }
 0x44e   : > { %4743 = vpow2.f32 %v2099_v50 }
 0x44f   : > { %7410 = vst [vmem:[#allocation47_spill] sm:$0xff] %v5753_v39  ;;  %v2297_v27 = vsel %vm7361_vm13, %v5753_v39, 0.0  ;;  %4745 = vpow2.f32 %v2097_v20 }
 0x454   : > { %2292 = vadd.xlane.f32.xlu2 %v2291_v52  ;;  %2251 = vadd.xlane.f32.xlu1 %v2250_v43  ;;  %v5756_v52 = vadd.f32 1e-16, %v5703_v17  ;;  %v2256_v43 = vsel %vm7363_vm10, %v2228_v14, 0.0  ;;  %v4744_v50 = vpop.eup %4743 }
 0x455   : > { %2248 = vadd.xlane.f32.xlu0 %v2247_v41  ;;  %v2235_v41 = vsel %vm7363_vm10, %v2221_v18, 0.0  ;;  %v2110_v14 = vadd.f32 1.0, %v4744_v50  ;;  %v2113_v24 = vmul.f32 -0.5, %v4744_v50  ;;  %v4746_v29 = vpop.eup %4745  ;;  %v2116_v20 = vand.u32 2147483647, %v4744_v50 }
 0x456   : > { %v7319_v9 = vperm.slane %v5756_v52, 0  ;;  %v2101_v5 = vadd.f32 1.0, %v4746_v29  ;;  %v2107_v58 = vand.u32 2147483647, %v4746_v29 }
 0x457   : > { %4747 = vlog2.f32 %v2110_v14  ;;  %v2114_v62 = vadd.f32 1.0, %v2113_v24  ;;  %vm2117_vm14 = vcmp.lt.f32.partialorder %v2116_v20, 0.0004427343  ;;  %v2088_v14 = vmax.f32 %v5703_v17, 0.0 }
 0x458   : > { %v2227_v18 = vmul.f32 %v7319_v9, %v5653_v3  ;;  %4749 = vlog2.f32 %v2101_v5  ;;  %vm2108_vm0 = vcmp.lt.f32.partialorder %v2107_v58, 0.0004427343  ;;  %v2087_v5 = vmax.f32 %v5529_v45, 0.0 }
 0x45c   : > { %2236 = vadd.xlane.f32.xlu2 %v2235_v41  ;;  %2257 = vadd.xlane.f32.xlu1 %v2256_v43  ;;  %v2244_v41 = vsel %vm7363_vm10, %v2224_v12, 0.0  ;;  %v2253_v43 = vsel %vm7363_vm10, %v2227_v18, 0.0 }
 0x45d   : > { %2298 = vadd.xlane.f32.xlu0 %v2297_v27  ;;  %v5774_v27 = vmul.f32 %v5756_v52, %v5756_v52  ;;  %v4748_v44 = vpop.eup %4747 }
 0x45e   : > { %v2112_v12 = vmul.f32 0.6931472, %v4748_v44  ;;  %v4750_v33 = vpop.eup %4749 }
 0x45f   : > { %7411 = vst [vmem:[#allocation48_spill] sm:$0xff] %v5774_v27  ;;  %v2294_v8 = vsel %vm7361_vm13, %v5774_v27, 0.0 }
 0x464   : > { %2245 = vadd.xlane.f32.xlu2 %v2244_v41  ;;  %v2115_v41 = vmul.f32 %v4744_v50, %v2114_v62  ;;  %v5786_v50 = vpop.xlane.xlu1 %1849 }
 0x465   : > { %2254 = vadd.xlane.f32.xlu0 %v2253_v43  ;;  %v2104_v43 = vmul.f32 -0.5, %v4746_v29  ;;  %vm1903_vm4 = vcmp.eq.f32.partialorder %v5786_v50, inf  ;;  %v1906_v30 = vand.u32 2147483648, %v5786_v50  ;;  %vm1905_vm6 = vcmp.eq.f32.partialorder %v5786_v50, 0.0 }
 0x466   : > { %v2118_v18 = vsel %vm2117_vm14, %v2115_v41, %v2112_v12 }
 0x467   : > { %v2120_v26 = vadd.f32 %v2118_v18, %v2088_v14  ;;  %v2105_v31 = vadd.f32 1.0, %v2104_v43 }
 0x469   : > { %v5782_v24 = vsel %vm2090_vm15, %v5703_v17, %v2120_v26  ;;  %v2106_v44 = vmul.f32 %v4746_v29, %v2105_v31  ;;  %v5794_v26 = vpop.xlane.xlu2 %1843  ;;  %v5798_v29 = vpop.xlane.xlu0 %1852 }
 0x46a   : > { %7412 = vst [vmem:[#allocation49_spill] sm:$0xff] %v5782_v24  ;;  %4751 = vrsqrt.f32 %v5794_v26  ;;  %vm1879_vm2 = vcmp.eq.f32.partialorder %v5794_v26, inf  ;;  %vm1881_vm3 = vcmp.eq.f32.partialorder %v5794_v26, 0.0  ;;  %vm1915_vm5 = vcmp.eq.f32.partialorder %v5798_v29, inf }
 0x46b   : > { %4753 = vrsqrt.f32 %v5786_v50  ;;  %v1918_v34 = vand.u32 2147483648, %v5798_v29  ;;  %vm1917_vm7 = vcmp.eq.f32.partialorder %v5798_v29, 0.0 }
 0x46c   : > { %2295 = vadd.xlane.f32.xlu2 %v2294_v8  ;;  %v2103_v8 = vmul.f32 0.6931472, %v4750_v33  ;;  %4755 = vrsqrt.f32 %v5798_v29 }
 0x46e   : > { %v2109_v62 = vsel %vm2108_vm0, %v2106_v44, %v2103_v8 }
 0x46f   : > { %v2119_v20 = vadd.f32 %v2109_v62, %v2087_v5 }
 0x470   : > { %v4752_v58 = vpop.eup %4751 }
 0x471   : > { %v5791_v12 = vsel %vm2089_vm1, %v5529_v45, %v2119_v20  ;;  %v4754_v41 = vpop.eup %4753  ;;  %v1873_v14 = vmul.f32 %v4752_v58, %v5794_v26 }
 0x472   : > { %7413 = vst [vmem:[#allocation50_spill] sm:$0xff] %v5791_v12  ;;  %v4756_v18 = vpop.eup %4755  ;;  %v1897_v43 = vmul.f32 %v4754_v41, %v5786_v50 }
 0x473   : > { %v1909_v8 = vmul.f32 %v4756_v18, %v5798_v29  ;;  %v1874_v62 = vmul.f32 %v4752_v58, %v1873_v14 }
 0x474   : > { %v1898_v5 = vmul.f32 %v4754_v41, %v1897_v43 }
 0x475   : > { %v1910_v20 = vmul.f32 %v4756_v18, %v1909_v8  ;;  %v1875_v17 = vmul.f32 0.5, %v1874_v62 }
 0x476   : > { %v1899_v56 = vmul.f32 0.5, %v1898_v5 }
 0x477   : > { %v1911_v45 = vmul.f32 0.5, %v1910_v20  ;;  %v1876_v27 = vsub.f32 1.5, %v1875_v17 }
 0x478   : > { %v1900_v57 = vsub.f32 1.5, %v1899_v56 }
 0x479   : > { %2607 = vperm.xlu0 %4680, %v5782_v24   ;;  %v1912_v43 = vsub.f32 1.5, %v1911_v45 }
 0x47a   : > { %v1901_v5 = vmul.f32 %v4754_v41, %v1900_v57  ;;  %v1882_v41 = vand.u32 2147483648, %v5794_v26 }
 0x47b   : > { %v1913_v20 = vmul.f32 %v4756_v18, %v1912_v43 }
 0x47d   : > { %v1914_v18 = vmul.f32 %v1913_v20, %v5798_v29 }
 0x481   : > { %v5796_v33 = vpop.xlane.xlu1 %1858 }
 0x482   : > { %vm1939_vm14 = vcmp.eq.f32.partialorder %v5796_v33, inf }
 0x484   : > { %2602 = vperm.xlu2 %4679, %v5791_v12  }
 0x48f   : > { %v5803_v31 = vpop.xlane.xlu1 %2277 }
 0x490   : > { %4757 = vrsqrt.f32 %v5803_v31  ;;  %vm2331_vm12 = vcmp.eq.f32.partialorder %v5803_v31, inf  ;;  %vm2333_vm15 = vcmp.eq.f32.partialorder %v5803_v31, 0.0 }
 0x491   : > { %4759 = vrsqrt.f32 %v5796_v33 }
 0x496   : > { %v4758_v44 = vpop.eup %4757 }
 0x497   : > { %v2325_v9 = vmul.f32 %v4758_v44, %v5803_v31  ;;  %v4760_v63 = vpop.eup %4759  ;;  %v5813_v12 = vpop.xlane.xlu1 %2286 }
 0x498   : > { %v5811_v47 = vpop.xlane.xlu0 %1861  ;;  %v1933_v24 = vmul.f32 %v4760_v63, %v5796_v33  ;;  %4761 = vrsqrt.f32 %v5813_v12 }
 0x499   : > { %v2326_v42 = vmul.f32 %v4758_v44, %v2325_v9  ;;  %v1877_v9 = vmul.f32 %v4752_v58, %v1876_v27 }
 0x49a   : > { %v1934_v62 = vmul.f32 %v4760_v63, %v1933_v24  ;;  %v1902_v24 = vmul.f32 %v1901_v5, %v5786_v50 }
 0x49b   : > { %v2327_v8 = vmul.f32 0.5, %v2326_v42  ;;  %v1878_v45 = vmul.f32 %v1877_v9, %v5794_v26 }
 0x49c   : > { %v1935_v48 = vmul.f32 0.5, %v1934_v62 }
 0x49d   : > { %v2328_v17 = vsub.f32 1.5, %v2327_v8  ;;  %v1880_v6 = vsel %vm1879_vm2, %v5794_v26, %v1878_v45  ;;  %v2334_v26 = vand.u32 2147483648, %v5803_v31 }
 0x49e   : > { %v5824_v56 = vpop.eup %4761  ;;  %v1936_v9 = vsub.f32 1.5, %v1935_v48 }
 0x49f   : > { %v5817_v14 = vpop.xlane.xlu2 %1846  ;;  %v2329_v43 = vmul.f32 %v4758_v44, %v2328_v17  ;;  %v2361_v59 = vmul.f32 %v5824_v56, %v5813_v12  ;;  %v1904_v44 = vsel %vm1903_vm4, %v5786_v50, %v1902_v24 }
 0x4a0   : > { %4763 = vrsqrt.f32 %v5817_v14  ;;  %v5820_v39 = vpop.xlane.xlu0 %2274  ;;  %vm1891_vm1 = vcmp.eq.f32.partialorder %v5817_v14, inf }
 0x4a1   : > { %4765 = vrsqrt.f32 %v5820_v39  ;;  %v2330_v11 = vmul.f32 %v2329_v43, %v5803_v31  ;;  %v2362_v36 = vmul.f32 %v5824_v56, %v2361_v59  ;;  %v5871_v59 = vsel %vm1905_vm6, %v1906_v30, %v1904_v44 }
 0x4a2   : > { %4767 = vrsqrt.f32 %v5811_v47  ;;  %7416 = vst [vmem:[#allocation53_spill] sm:$0xff] %v5871_v59  ;;  %vm2319_vm0 = vcmp.eq.f32.partialorder %v5820_v39, inf  ;;  %vm2321_vm2 = vcmp.eq.f32.partialorder %v5820_v39, 0.0 }
 0x4a3   : > { %v2332_v50 = vsel %vm2331_vm12, %v5803_v31, %v2330_v11 }
 0x4a6   : > { %v4764_v23 = vpop.eup %4763 }
 0x4a7   : > { %v4766_v42 = vpop.eup %4765  ;;  %v1885_v27 = vmul.f32 %v4764_v23, %v5817_v14  ;;  %v5831_v58 = vpop.xlane.xlu2 %1855 }
 0x4a8   : > { %v5833_v57 = vpop.eup %4767  ;;  %v2313_v8 = vmul.f32 %v4766_v42, %v5820_v39  ;;  %v5838_v62 = vpop.xlane.xlu0 %2280  ;;  %4769 = vrsqrt.f32 %v5831_v58 }
 0x4a9   : > { %v1886_v5 = vmul.f32 %v4764_v23, %v1885_v27  ;;  %v5846_v20 = vpop.xlane.xlu1 %1864  ;;  %v1945_v48 = vmul.f32 %v5833_v57, %v5811_v47  ;;  %v1916_v27 = vsel %vm1915_vm5, %v5798_v29, %v1914_v18  ;;  %4771 = vrsqrt.f32 %v5838_v62 }
 0x4aa   : > { %v2314_v53 = vmul.f32 %v4766_v42, %v2313_v8  ;;  %v1937_v8 = vmul.f32 %v4760_v63, %v1936_v9  ;;  %v5869_v63 = vsel %vm1917_vm7, %v1918_v34, %v1916_v27  ;;  %vm2343_vm4 = vcmp.eq.f32.partialorder %v5838_v62, inf }
 0x4ab   : > { %v1887_v17 = vmul.f32 0.5, %v1886_v5  ;;  %v5861_v5 = vsel %vm1881_vm3, %v1882_v41, %v1880_v6  ;;  %7415 = vst [vmem:[#allocation52_spill] sm:$0xff] %v5869_v63  ;;  %v2363_v41 = vmul.f32 0.5, %v2362_v36  ;;  %vm1893_vm3 = vcmp.eq.f32.partialorder %v5817_v14, 0.0 }
 0x4ac   : > { %v2315_v45 = vmul.f32 0.5, %v2314_v53  ;;  %7414 = vst [vmem:[#allocation51_spill] sm:$0xff] %v5861_v5  ;;  %v1946_v53 = vmul.f32 %v5833_v57, %v1945_v48  ;;  %v1938_v6 = vmul.f32 %v1937_v8, %v5796_v33  ;;  %v2322_v8 = vand.u32 2147483648, %v5820_v39 }
 0x4ad   : > { %v1888_v60 = vsub.f32 1.5, %v1887_v17  ;;  %vm2345_vm5 = vcmp.eq.f32.partialorder %v5838_v62, 0.0  ;;  %vm1927_vm7 = vcmp.eq.f32.partialorder %v5831_v58, inf }
 0x4ae   : > { %v2316_v24 = vsub.f32 1.5, %v2315_v45  ;;  %v5863_v18 = vpop.eup %4769  ;;  %v1947_v36 = vmul.f32 0.5, %v1946_v53  ;;  %v5896_v31 = vsel %vm1939_vm14, %v5796_v33, %v1938_v6  ;;  %v2364_v45 = vsub.f32 1.5, %v2363_v41 }
 0x4af   : > { %v5867_v43 = vpop.xlane.xlu2 %2271  ;;  %v1889_v29 = vmul.f32 %v4764_v23, %v1888_v60  ;;  %v4772_v17 = vpop.eup %4771  ;;  %v1921_v23 = vmul.f32 %v5863_v18, %v5831_v58  ;;  %v2335_v60 = vsel %vm2333_vm15, %v2334_v26, %v2332_v50  ;;  %vm1941_vm14 = vcmp.eq.f32.partialorder %v5796_v33, 0.0 }
 0x4b0   : > { %v2317_v9 = vmul.f32 %v4766_v42, %v2316_v24  ;;  %4773 = vrsqrt.f32 %v5867_v43  ;;  %v5878_v48 = vpop.xlane.xlu0 %2289  ;;  %v2337_v30 = vmul.f32 %v4772_v17, %v5838_v62  ;;  %v2422_v50 = vperm.slane %v2335_v60, 0 }
 0x4b1   : > { %4775 = vrsqrt.f32 %v5846_v20  ;;  %v1890_v42 = vmul.f32 %v1889_v29, %v5817_v14  ;;  %v5890_v27 = vpop.xlane.xlu1 %1867  ;;  %v1922_v53 = vmul.f32 %v5863_v18, %v1921_v23  ;;  %v1948_v34 = vsub.f32 1.5, %v1947_v36 }
 0x4b2   : > { %v2318_v11 = vmul.f32 %v2317_v9, %v5820_v39  ;;  %4777 = vrsqrt.f32 %v5878_v48  ;;  %v2338_v24 = vmul.f32 %v4772_v17, %v2337_v30  ;;  %v1894_v23 = vand.u32 2147483648, %v5817_v14 }
 0x4b3   : > { %4779 = vrsqrt.f32 %v5890_v27  ;;  %v1892_v30 = vsel %vm1891_vm1, %v5817_v14, %v1890_v42  ;;  %v2432_v36 = vmul.f32 %v2422_v50, %v5871_v59  ;;  %v1949_v4 = vmul.f32 %v5833_v57, %v1948_v34 }
 0x4b4   : > { %v2320_v44 = vsel %vm2319_vm0, %v5820_v39, %v2318_v11  ;;  %v2339_v29 = vmul.f32 0.5, %v2338_v24  ;;  %v2365_v39 = vmul.f32 %v5824_v56, %v2364_v45  ;;  %v5916_v10 = vsel %vm1893_vm3, %v1894_v23, %v1892_v30 }
 0x4b5   : > { %v2323_v6 = vsel %vm2321_vm2, %v2322_v8, %v2320_v44  ;;  %v1923_v8 = vmul.f32 0.5, %v1922_v53  ;;  %7417 = vst [vmem:[#allocation54_spill] sm:$0xff] %v5916_v10  ;;  %v2346_v57 = vand.u32 2147483648, %v5838_v62  ;;  %vm2307_vm6 = vcmp.eq.f32.partialorder %v5867_v43, inf }
 0x4b6   : > { %v4774_v9 = vpop.eup %4773  ;;  %v2340_v60 = vsub.f32 1.5, %v2339_v29  ;;  %v2421_v44 = vperm.slane %v2323_v6, 0  ;;  %v5926_v14 = vmul.f32 %v2365_v39, %v5813_v12  ;;  %vm2309_vm12 = vcmp.eq.f32.partialorder %v5867_v43, 0.0 }
 0x4b7   : > { %v2301_v26 = vmul.f32 %v4774_v9, %v5867_v43  ;;  %v5904_v11 = vpop.xlane.xlu2 %2283  ;;  %v5909_v38 = vpop.eup %4775  ;;  %v1924_v30 = vsub.f32 1.5, %v1923_v8  ;;  %vm1951_vm15 = vcmp.eq.f32.partialorder %v5811_v47, inf  ;;  %vm2379_vm0 = vcmp.eq.f32.partialorder %v5878_v48, inf }
 0x4b8   : > { %4781 = vrsqrt.f32 %v5904_v11  ;;  %v4778_v21 = vpop.eup %4777  ;;  %v2341_v42 = vmul.f32 %v4772_v17, %v2340_v60  ;;  %v1957_v56 = vmul.f32 %v5909_v38, %v5846_v20  ;;  %v2431_v29 = vmul.f32 %v2421_v44, %v5916_v10  ;;  %v5939_v19 = vpop.xlane.xlu0 %2230 }
 0x4b9   : > { %v2302_v24 = vmul.f32 %v4774_v9, %v2301_v26  ;;  %v2373_v45 = vmul.f32 %v4778_v21, %v5878_v48  ;;  %v5923_v26 = vpop.eup %4779  ;;  %v5941_v10 = vmax.f32 %v2432_v36, 1e-08  ;;  %vm2367_vm1 = vcmp.eq.f32.partialorder %v5813_v12, inf }
 0x4ba   : > { %v2342_v53 = vmul.f32 %v2341_v42, %v5838_v62  ;;  %v5932_v6 = vmax.f32 %v2431_v29, 1e-08  ;;  %v1958_v44 = vmul.f32 %v5909_v38, %v1957_v56  ;;  %v2310_v29 = vand.u32 2147483648, %v5867_v43 }
 0x4bb   : > { %v2303_v41 = vmul.f32 0.5, %v2302_v24  ;;  %v2374_v34 = vmul.f32 %v4778_v21, %v2373_v45  ;;  %vm2381_vm2 = vcmp.eq.f32.partialorder %v5878_v48, 0.0  ;;  %vm1953_vm3 = vcmp.eq.f32.partialorder %v5811_v47, 0.0 }
 0x4bc   : > { %v2344_v23 = vsel %vm2343_vm4, %v5838_v62, %v2342_v53  ;;  %v1969_v62 = vmul.f32 %v5923_v26, %v5890_v27  ;;  %4783 = vrcp.f32 %v5932_v6  ;;  %v1925_v53 = vmul.f32 %v5863_v18, %v1924_v30 }
 0x4bd   : > { %v2304_v17 = vsub.f32 1.5, %v2303_v41  ;;  %v2347_v42 = vsel %vm2345_vm5, %v2346_v57, %v2344_v23  ;;  %v2375_v41 = vmul.f32 0.5, %v2374_v34  ;;  %v1930_v57 = vand.u32 2147483648, %v5831_v58 }
 0x4be   : > { %v4782_v50 = vpop.eup %4781  ;;  %v2423_v8 = vperm.slane %v2347_v42, 0  ;;  %v1959_v34 = vmul.f32 0.5, %v1958_v44  ;;  %vm2355_vm4 = vcmp.eq.f32.partialorder %v5904_v11, inf  ;;  %vm2357_vm5 = vcmp.eq.f32.partialorder %v5904_v11, 0.0 }
 0x4bf   : > { %v2305_v60 = vmul.f32 %v4774_v9, %v2304_v17  ;;  %v2349_v39 = vmul.f32 %v4782_v50, %v5904_v11  ;;  %v5936_v24 = vpop.xlane.xlu2 %1870  ;;  %v2376_v56 = vsub.f32 1.5, %v2375_v41 }
 0x4c0   : > { %4785 = vrsqrt.f32 %v5936_v24  ;;  %v2433_v44 = vmul.f32 %v2423_v8, %v5869_v63 }
 0x4c1   : > { %v2306_v45 = vmul.f32 %v2305_v60, %v5867_v43  ;;  %v2350_v9 = vmul.f32 %v4782_v50, %v2349_v39  ;;  %v2377_v23 = vmul.f32 %v4778_v21, %v2376_v56  ;;  %v1950_v60 = vmul.f32 %v1949_v4, %v5811_v47 }
 0x4c2   : > { %v1970_v39 = vmul.f32 %v5923_v26, %v1969_v62  ;;  %v1926_v21 = vmul.f32 %v1925_v53, %v5831_v58  ;;  %4787 = vrcp.f32 %v5941_v10  ;;  %v1960_v62 = vsub.f32 1.5, %v1959_v34 }
 0x4c3   : > { %v2308_v36 = vsel %vm2307_vm6, %v5867_v43, %v2306_v45  ;;  %v2351_v17 = vmul.f32 0.5, %v2350_v9  ;;  %v2378_v42 = vmul.f32 %v2377_v23, %v5878_v48  ;;  %v5968_v45 = vpop.eup %4783  ;;  %v2382_v9 = vand.u32 2147483648, %v5878_v48  ;;  %v5987_v23 = vpop.xlane.xlu0 %2239 }
 0x4c4   : > { %v2311_v30 = vsel %vm2309_vm12, %v2310_v29, %v2308_v36  ;;  %v1971_v56 = vmul.f32 0.5, %v1970_v39  ;;  %v5980_v36 = vmax.f32 %v2433_v44, 1e-08  ;;  %v1928_v39 = vsel %vm1927_vm7, %v5831_v58, %v1926_v21 }
 0x4c5   : > { %v2352_v18 = vsub.f32 1.5, %v2351_v17  ;;  %v2420_v41 = vperm.slane %v2311_v30, 0  ;;  %v2358_v17 = vand.u32 2147483648, %v5904_v11  ;;  %v2466_v30 = vmul.f32 %v5968_v45, %v5932_v6 }
 0x4c6   : > { %v5973_v8 = vpop.eup %4785  ;;  %vm1929_vm6 = vcmp.eq.f32.partialorder %v5831_v58, 0.0  ;;  %v1972_v21 = vsub.f32 1.5, %v1971_v56  ;;  %v1952_v59 = vsel %vm1951_vm15, %v5811_v47, %v1950_v60  ;;  %v6023_v60 = vsel %vm2367_vm1, %v5813_v12, %v5926_v14 }
 0x4c7   : > { %v2353_v4 = vmul.f32 %v4782_v50, %v2352_v18  ;;  %v5965_v43 = vpop.xlane.xlu2 %2292  ;;  %v2430_v29 = vmul.f32 %v2420_v41, %v5861_v5  ;;  %v2380_v50 = vsel %vm2379_vm0, %v5878_v48, %v2378_v42  ;;  %v1981_v42 = vmul.f32 %v5973_v8, %v5936_v24 }
 0x4c8   : > { %4789 = vrsqrt.f32 %v5965_v43  ;;  %v1961_v41 = vmul.f32 %v5909_v38, %v1960_v62  ;;  %v2383_v44 = vsel %vm2381_vm2, %v2382_v9, %v2380_v50  ;;  %v7351_v38 = vlaneseq }
 0x4c9   : > { %v2354_v53 = vmul.f32 %v2353_v4, %v5904_v11  ;;  %v5985_v34 = vmax.f32 %v2430_v29, 1e-08  ;;  %v6001_v29 = vpop.eup %4787  ;;  %v6008_v62 = vsel %vm1929_vm6, %v1930_v57, %v1928_v39  ;;  %v7419_v48 = vand.u32 2147483648, %v5796_v33 }
 0x4ca   : > { %7418 = vst [vmem:[#allocation55_spill] sm:$0xff] %v6008_v62  ;;  %v2426_v58 = vperm.slane %v2383_v44, 0  ;;  %v2467_v56 = vsub.f32 1.0, %v2466_v30  ;;  %v1982_v50 = vmul.f32 %v5973_v8, %v1981_v42  ;;  %v1962_v57 = vmul.f32 %v1961_v41, %v5846_v20 }
 0x4cb   : > { %v2356_v18 = vsel %vm2355_vm4, %v5904_v11, %v2354_v53  ;;  %4791 = vrcp.f32 %v5985_v34  ;;  %v6015_v9 = vsel %vm1941_vm14, %v7419_v48, %v5896_v31  ;;  %vm1963_vm7 = vcmp.eq.f32.partialorder %v5846_v20, inf }
 0x4cc   : > { %v2359_v4 = vsel %vm2357_vm5, %v2358_v17, %v2356_v18  ;;  %4793 = vrcp.f32 %v5980_v36  ;;  %vm1965_vm12 = vcmp.eq.f32.partialorder %v5846_v20, 0.0  ;;  %v1966_v31 = vand.u32 2147483648, %v5846_v20 }
 0x4cd   : > { %v2424_v11 = vperm.slane %v2359_v4, 0  ;;  %v1973_v39 = vmul.f32 %v5923_v26, %v1972_v21  ;;  %vm1975_vm14 = vcmp.eq.f32.partialorder %v5890_v27, inf  ;;  %v6037_v14 = vand.u32 127, %v7351_v38 }
 0x4ce   : > { %v4790_v53 = vpop.eup %4789  ;;  %v7420_v41 = vand.u32 2147483648, %v5811_v47  ;;  %v2468_v26 = vmul.f32 %v5968_v45, %v2467_v56  ;;  %v2474_v47 = vand.u32 2147483647, %v5932_v6  ;;  %vm2471_vm15 = vweird.f32 %v5968_v45 }
 0x4cf   : > { %v2434_v17 = vmul.f32 %v2424_v11, %v6008_v62  ;;  %v2385_v33 = vmul.f32 %v4790_v53, %v5965_v43  ;;  %v1983_v11 = vmul.f32 0.5, %v1982_v50  ;;  %v1974_v56 = vmul.f32 %v1973_v39, %v5890_v27 }
 0x4d0   : > { %v6043_v44 = vsel %vm1953_vm3, %v7420_v41, %v1952_v59  ;;  %v6057_v59 = vpop.xlane.xlu0 %2248  ;;  %v2476_v41 = vand.u32 2147483648, %v5932_v6  ;;  %vm2470_vm0 = vweird.f32 %v5932_v6  ;;  %vm6071_vm1 = vcmp.eq.f32.partialorder %v2474_v47, 8.507059e+37  ;;  %v6086_v6 = vpop.xlane.xlu2 %2236 }
 0x4d1   : > { %v6031_v18 = vmax.f32 %v2434_v17, 1e-08  ;;  %v6033_v30 = vpop.eup %4791  ;;  %v2386_v42 = vmul.f32 %v4790_v53, %v2385_v33  ;;  %7421 = vst [vmem:[#allocation56_spill] sm:$0xff] %v6043_v44  ;;  %v2436_v48 = vmul.f32 %v2426_v58, %v6043_v44  ;;  %v1964_v17 = vsel %vm1963_vm7, %v5846_v20, %v1962_v57  ;;  %vm6093_vm3 = vmor %vm2470_vm0, %vm2471_vm15 }
 0x4d2   : > { %v6045_v4 = vpop.eup %4793  ;;  %v2451_v21 = vmul.f32 %v6033_v30, %v5985_v34  ;;  %v2481_v57 = vmul.f32 %v6001_v29, %v5941_v10  ;;  %v2469_v44 = vadd.f32 %v5968_v45, %v2468_v26  ;;  %v1984_v62 = vsub.f32 1.5, %v1983_v11 }
 0x4d3   : > { %4795 = vrcp.f32 %v6031_v18  ;;  %v2387_v50 = vmul.f32 0.5, %v2386_v42  ;;  %v2496_v58 = vmul.f32 %v6045_v4, %v5980_v36  ;;  %v6068_v5 = vmax.f32 %v2436_v48, 1e-08 }
 0x4d4   : > { %v2452_v38 = vsub.f32 1.0, %v2451_v21  ;;  %v6078_v21 = vsel %vm1965_vm12, %v1966_v31, %v1964_v17  ;;  %v6083_v26 = vsel %vm1975_vm14, %v5890_v27, %v1974_v56  ;;  %v2477_v11 = vor.u32 1.1754944e-38, %v2476_v41 }
 0x4d5   : > { %v2388_v63 = vsub.f32 1.5, %v2387_v50  ;;  %vm2369_vm2 = vcmp.eq.f32.partialorder %v5813_v12, 0.0  ;;  %vm1987_vm4 = vcmp.eq.f32.partialorder %v5936_v24, inf  ;;  %v2497_v31 = vsub.f32 1.0, %v2496_v58 }
 0x4d6   : > { %v2453_v42 = vmul.f32 %v6033_v30, %v2452_v38  ;;  %v2459_v38 = vand.u32 2147483647, %v5985_v34  ;;  %v2504_v17 = vand.u32 2147483647, %v5980_v36  ;;  %v2461_v56 = vand.u32 2147483648, %v5985_v34 }
 0x4d7   : > { %v2389_v50 = vmul.f32 %v4790_v53, %v2388_v63  ;;  %v2482_v63 = vsub.f32 1.0, %v2481_v57  ;;  %v2473_v53 = vsel %vm6093_vm3, %v5968_v45, %v2469_v44  ;;  %v1985_v41 = vmul.f32 %v5973_v8, %v1984_v62 }
 0x4d8   : > { %4797 = vrcp.f32 %v6068_v5  ;;  %v2454_v33 = vadd.f32 %v6033_v30, %v2453_v42  ;;  %vm2456_vm5 = vweird.f32 %v6033_v30  ;;  %vm2455_vm6 = vweird.f32 %v5985_v34  ;;  %v6121_v42 = vpop.xlane.xlu0 %2298 }
 0x4d9   : > { %v6088_v47 = vpop.eup %4795  ;;  %v2390_v48 = vmul.f32 %v2389_v50, %v5965_v43  ;;  %v2506_v57 = vand.u32 2147483648, %v5980_v36  ;;  %vm2391_vm7 = vcmp.eq.f32.partialorder %v5965_v43, inf  ;;  %v2394_v45 = vand.u32 2147483648, %v5965_v43  ;;  %vm6123_vm15 = vmor %vm2455_vm6, %vm2456_vm5 }
 0x4da   : > { %v2511_v58 = vmul.f32 %v6088_v47, %v6031_v18  ;;  %v2478_v8 = vsel %vm6071_vm1, %v2477_v11, %v2473_v53  ;;  %vm1989_vm12 = vcmp.eq.f32.partialorder %v5936_v24, 0.0  ;;  %v2498_v62 = vmul.f32 %v6045_v4, %v2497_v31 }
 0x4db   : > { %v2392_v44 = vsel %vm2391_vm7, %v5965_v43, %v2390_v48  ;;  %vm2393_vm14 = vcmp.eq.f32.partialorder %v5965_v43, 0.0  ;;  %vm6127_vm0 = vcmp.eq.f32.partialorder %v2459_v38, 8.507059e+37  ;;  %v1986_v39 = vmul.f32 %v1985_v41, %v5936_v24  ;;  %v2234_v48 = vpop.xlane.xlu1 %2233 }
 0x4dc   : > { %vm2500_vm1 = vweird.f32 %v5980_v36  ;;  %v2395_v11 = vsel %vm2393_vm14, %v2394_v45, %v2392_v44  ;;  %vm2485_vm3 = vweird.f32 %v5941_v10  ;;  %v2458_v43 = vsel %vm6123_vm15, %v6033_v30, %v2454_v33  ;;  %v6145_v44 = vpop.xlane.xlu2 %2245 }
 0x4dd   : > { %v2462_v20 = vor.u32 1.1754944e-38, %v2461_v56  ;;  %v2512_v31 = vsub.f32 1.0, %v2511_v58  ;;  %vm6137_vm5 = vcmp.eq.f32.partialorder %v2504_v17, 8.507059e+37  ;;  %v2427_v38 = vperm.slane %v2395_v11, 0 }
 0x4de   : > { %v6141_v22 = vpop.eup %4797  ;;  %v2479_v41 = vmul.f32 %v2478_v8, %v2234_v48  ;;  %v2507_v2 = vor.u32 1.1754944e-38, %v2506_v57  ;;  %v2483_v45 = vmul.f32 %v6001_v29, %v2482_v63  ;;  %4799 = vrsqrt.f32 %v6121_v42 }
 0x4df   : > { %v2519_v34 = vand.u32 2147483647, %v6031_v18  ;;  %v2499_v30 = vadd.f32 %v6045_v4, %v2498_v62  ;;  %vm2501_vm6 = vweird.f32 %v6045_v4  ;;  %v2437_v33 = vmul.f32 %v2427_v38, %v6078_v21 }
 0x4e0   : > { %v2463_v17 = vsel %vm6127_vm0, %v2462_v20, %v2458_v43  ;;  %vm2632_vm7 = vcmask 1041409   ;;  %v1988_v63 = vsel %vm1987_vm4, %v5936_v24, %v1986_v39  ;;  %v2521_v56 = vand.u32 2147483648, %v6031_v18  ;;  %vm6171_vm14 = vmor %vm2500_vm1, %vm2501_vm6 }
 0x4e1   : > { %v7432_v58 = vand.u32 2147483648, %v5813_v12  ;;  %v2513_v8 = vmul.f32 %v6088_v47, %v2512_v31  ;;  %v6163_v62 = vmax.f32 %v2437_v33, 1e-08  ;;  %v2541_v50 = vmul.f32 %v6141_v22, %v6068_v5 }
 0x4e2   : > { %v2623_v48 = vperm.slane %v2479_v41, %v6037_v14  ;;  %vm2515_vm4 = vweird.f32 %v6031_v18  ;;  %v2484_v12 = vadd.f32 %v6001_v29, %v2483_v45  ;;  %v2503_v43 = vsel %vm6171_vm14, %v6045_v4, %v2499_v30 }
 0x4e3   : > { %v2371_v57 = vsel %vm2369_vm2, %v7432_v58, %v6023_v60  ;;  %vm2486_vm2 = vweird.f32 %v6001_v29  ;;  %v2464_v60 = vmul.f32 %v2463_v17, %v5939_v19  ;;  %4801 = vrcp.f32 %v6163_v62 }
 0x4e4   : > { %v2425_v11 = vperm.slane %v2371_v57, 0  ;;  %v2491_v20 = vand.u32 2147483648, %v5941_v10  ;;  %v4800_v31 = vpop.eup %4799  ;;  %v7435_v36 = vand.u32 2147483648, %v5936_v24  ;;  %vm6189_vm15 = vcmp.eq.f32.partialorder %v2519_v34, 8.507059e+37  ;;  %vm6198_vm1 = vmor %vm2485_vm3, %vm2486_vm2  ;;  %v6211_v58 = vpop.xlane.xlu2 %2295 }
 0x4e5   : > { %v2522_v19 = vor.u32 1.1754944e-38, %v2521_v56  ;;  %v2514_v4 = vadd.f32 %v6088_v47, %v2513_v8  ;;  %vm2516_vm0 = vweird.f32 %v6088_v47  ;;  %v2542_v30 = vsub.f32 1.0, %v2541_v50 }
 0x4e6   : > { %v6187_v38 = vsel %vm1989_vm12, %v7435_v36, %v1988_v63  ;;  %v2435_v45 = vmul.f32 %v2425_v11, %v6015_v9  ;;  %v2409_v24 = vmul.f32 %v4800_v31, %v6121_v42  ;;  %v2508_v34 = vsel %vm6137_vm5, %v2507_v2, %v2503_v43  ;;  %vm6217_vm12 = vmor %vm2515_vm4, %vm2516_vm0 }
 0x4e7   : > { %v2551_v17 = vand.u32 2147483648, %v6068_v5  ;;  %v2488_v63 = vsel %vm6198_vm1, %v6001_v29, %v2484_v12  ;;  %v2622_v57 = vperm.slane %v2464_v60, %v6037_v14  ;;  %v2492_v8 = vor.u32 1.1754944e-38, %v2491_v20 }
 0x4e8   : > { %v6209_v56 = vmax.f32 %v2435_v45, 1e-08  ;;  %v2410_v50 = vmul.f32 %v4800_v31, %v2409_v24  ;;  %4803 = vrsqrt.f32 %v6211_v58  ;;  %vm2545_vm3 = vweird.f32 %v6068_v5 }
 0x4e9   : > { %v2549_v29 = vand.u32 2147483647, %v6068_v5  ;;  %v7442_v53 = vand.u32 2147483647, %v5941_v10  ;;  %v4802_v11 = vpop.eup %4801  ;;  %v2518_v39 = vsel %vm6217_vm12, %v6088_v47, %v2514_v4  ;;  %v2543_v18 = vmul.f32 %v6141_v22, %v2542_v30  ;;  %v2243_v4 = vpop.xlane.xlu1 %2242 }
 0x4ea   : > { %4805 = vrcp.f32 %v6209_v56  ;;  %v2411_v60 = vmul.f32 0.5, %v2410_v50  ;;  %v6231_v43 = vmul.f32 %v2508_v34, %v5987_v23  ;;  %v2556_v20 = vmul.f32 %v4802_v11, %v6163_v62 }
 0x4eb   : > { %vm2490_vm5 = vcmp.eq.f32.partialorder %v7442_v53, 8.507059e+37  ;;  %v2552_v36 = vor.u32 1.1754944e-38, %v2551_v17  ;;  %v2633_v45 = vsel %vm2632_vm7, %v2623_v48, %v2622_v57  ;;  %vm2546_vm6 = vweird.f32 %v6141_v22 }
 0x4ec   : > { %v2493_v12 = vsel %vm2490_vm5, %v2492_v8, %v2488_v63  ;;  %vm2634_vm4 = vcmask 1042434   ;;  %v2412_v33 = vsub.f32 1.5, %v2411_v60  ;;  %v2523_v47 = vsel %vm6189_vm15, %v2522_v19, %v2518_v39  ;;  %vm6262_vm8 = vmor %vm2545_vm3, %vm2546_vm6 }
 0x4ed   : > { %v2494_v10 = vmul.f32 %v2493_v12, %v6086_v6  ;;  %v2557_v30 = vsub.f32 1.0, %v2556_v20  ;;  %v2564_v24 = vand.u32 2147483647, %v6163_v62  ;;  %vm6240_vm14 = vcmp.eq.f32.partialorder %v2549_v29, 8.507059e+37 }
 0x4ee   : > { %vm2415_vm2 = vcmp.eq.f32.partialorder %v6121_v42, inf  ;;  %v4804_v6 = vpop.eup %4803  ;;  %v2566_v48 = vand.u32 2147483648, %v6163_v62  ;;  %v2544_v34 = vadd.f32 %v6141_v22, %v2543_v18  ;;  %vm2636_vm0 = vcmask 1043459  }
 0x4ef   : > { %v2413_v17 = vmul.f32 %v4800_v31, %v2412_v33  ;;  %vm2417_vm1 = vcmp.eq.f32.partialorder %v6121_v42, 0.0  ;;  %v2558_v19 = vmul.f32 %v4802_v11, %v2557_v30  ;;  %vm2561_vm15 = vweird.f32 %v4802_v11 }
 0x4f0   : > { %v4806_v41 = vpop.eup %4805  ;;  %v2624_v63 = vperm.slane %v2494_v10, %v6037_v14  ;;  %v2397_v57 = vmul.f32 %v4804_v6, %v6211_v58  ;;  %v2524_v8 = vmul.f32 %v2523_v47, %v2243_v4  ;;  %v2418_v2 = vand.u32 2147483648, %v6121_v42 }
 0x4f1   : > { %v2414_v50 = vmul.f32 %v2413_v17, %v6121_v42  ;;  %v2526_v29 = vmul.f32 %v4806_v41, %v6209_v56  ;;  %v2559_v53 = vadd.f32 %v4802_v11, %v2558_v19  ;;  %vm2560_vm12 = vweird.f32 %v6163_v62 }
 0x4f2   : > { %vm6254_vm5 = vcmp.eq.f32.partialorder %v2564_v24, 8.507059e+37  ;;  %v2398_v18 = vmul.f32 %v4804_v6, %v2397_v57  ;;  %vm2562_vm9 = vmor %vm2560_vm12, %vm2561_vm15  ;;  %v2567_v12 = vor.u32 1.1754944e-38, %v2566_v48  ;;  %v2548_v60 = vsel %vm6262_vm8, %v6141_v22, %v2544_v34 }
 0x4f3   : > { %v2416_v62 = vsel %vm2415_vm2, %v6121_v42, %v2414_v50  ;;  %v2527_v20 = vsub.f32 1.0, %v2526_v29  ;;  %v2563_v10 = vsel %vm2562_vm9, %v4802_v11, %v2559_v53  ;;  %v2536_v33 = vand.u32 2147483648, %v6209_v56  ;;  %v2252_v50 = vpop.xlane.xlu1 %2251 }
 0x4f4   : > { %v2419_v5 = vsel %vm2417_vm1, %v2418_v2, %v2416_v62  ;;  %v2399_v47 = vmul.f32 0.5, %v2398_v18  ;;  %vm2531_vm3 = vweird.f32 %v4806_v41  ;;  %v2534_v24 = vand.u32 2147483647, %v6209_v56 }
 0x4f5   : > { %v2429_v4 = vperm.slane %v2419_v5, 0  ;;  %v2528_v30 = vmul.f32 %v4806_v41, %v2527_v20  ;;  %v2625_v22 = vperm.slane %v6231_v43, %v6037_v14  ;;  %v2568_v48 = vsel %vm6254_vm5, %v2567_v12, %v2563_v10 }
 0x4f6   : > { %v2635_v34 = vsel %vm2634_vm4, %v2624_v63, %v2633_v45  ;;  %v2400_v11 = vsub.f32 1.5, %v2399_v47  ;;  %v2553_v42 = vsel %vm6240_vm14, %v2552_v36, %v2548_v60  ;;  %vm2530_vm8 = vweird.f32 %v6209_v56 }
 0x4f7   : > { %v2439_v17 = vmul.f32 %v2429_v4, %v6187_v38  ;;  %v2529_v19 = vadd.f32 %v4806_v41, %v2528_v30  ;;  %v2626_v57 = vperm.slane %v2524_v8, %v6037_v14  ;;  %vm2532_vm9 = vmor %vm2530_vm8, %vm2531_vm3  ;;  %v2537_v2 = vor.u32 1.1754944e-38, %v2536_v33  ;;  %v2603_v33 = vpop.permute.xlu2 %2602 }
 0x4f8   : > { %v2401_v43 = vmul.f32 %v4804_v6, %v2400_v11  ;;  %vm2638_vm6 = vcmask 1044484   ;;  %v2569_v29 = vmul.f32 %v2568_v48, %v2252_v50  ;;  %vm2535_vm2 = vcmp.eq.f32.partialorder %v2534_v24, 8.507059e+37 }
 0x4f9   : > { %v2449_v53 = vmax.f32 %v2439_v17, 1e-08  ;;  %v2533_v31 = vsel %vm2532_vm9, %v4806_v41, %v2529_v19  ;;  %v2554_v45 = vmul.f32 %v2553_v42, %v6057_v59  ;;  %v2637_v36 = vsel %vm2636_vm0, %v2625_v22, %v2635_v34 }
 0x4fa   : > { %v2538_v23 = vsel %vm2535_vm2, %v2537_v2, %v2533_v31  ;;  %v2402_v63 = vmul.f32 %v2401_v43, %v6211_v58  ;;  %vm2403_vm14 = vcmp.eq.f32.partialorder %v6211_v58, inf  ;;  %v2406_v8 = vand.u32 2147483648, %v6211_v58 }
 0x4fb   : > { %4807 = vrcp.f32 %v2449_v53  ;;  %v2539_v56 = vmul.f32 %v2538_v23, %v6145_v44  ;;  %vm2405_vm1 = vcmp.eq.f32.partialorder %v6211_v58, 0.0  ;;  %vm2640_vm15 = vcmask 1045509   ;;  %v2258_v23 = vpop.xlane.xlu1 %2257 }
 0x4fc   : > { %v2404_v6 = vsel %vm2403_vm14, %v6211_v58, %v2402_v63  ;;  %v2639_v41 = vsel %vm2638_vm6, %v2626_v57, %v2637_v36  ;;  %v2629_v59 = vperm.slane %v2569_v29, %v6037_v14  ;;  %vm2642_vm12 = vcmask 1046534  }
 0x4fd   : > { %v2627_v39 = vperm.slane %v2539_v56, %v6037_v14  ;;  %v2407_v18 = vsel %vm2405_vm1, %v2406_v8, %v2404_v6  ;;  %vm1977_vm5 = vcmp.eq.f32.partialorder %v5890_v27, 0.0  ;;  %v2628_v44 = vperm.slane %v2554_v45, %v6037_v14  ;;  %v2255_v45 = vpop.xlane.xlu0 %2254 }
 0x4fe   : > { %v2428_v12 = vperm.slane %v2407_v18, 0  ;;  %vm7362_vm3 = vcmask 1047559   ;;  %v7449_v60 = vand.u32 2147483648, %v5890_v27  ;;  %vm2651_vm8 = vcmask 64512  }
 0x4ff   : > { %v2641_v58 = vsel %vm2640_vm15, %v2627_v39, %v2639_v41  ;;  %v2596_v11 = vand.u32 2147483648, %v2449_v53  ;;  %vm2590_vm2 = vweird.f32 %v2449_v53  ;;  %v2594_v17 = vand.u32 2147483647, %v2449_v53 }
 0x500   : > { %v6302_v62 = vsel %vm1977_vm5, %v7449_v60, %v6083_v26  ;;  %v2643_v10 = vsel %vm2642_vm12, %v2628_v44, %v2641_v58 }
 0x501   : > { %v2438_v20 = vmul.f32 %v2428_v12, %v6302_v62  ;;  %v4808_v5 = vpop.eup %4807  ;;  %v2645_v47 = vsel %vm7362_vm3, %v2629_v59, %v2643_v10  ;;  %v2597_v2 = vor.u32 1.1754944e-38, %v2596_v11  ;;  %vm2595_vm5 = vcmp.eq.f32.partialorder %v2594_v17, 8.507059e+37 }
 0x502   : > { %v2649_v30 = vmul.f32 %v2645_v47, %v2603_v33  ;;  %v2586_v24 = vmul.f32 %v4808_v5, %v2449_v53  ;;  %vm2591_vm9 = vweird.f32 %v4808_v5 }
 0x503   : > { %v2448_v4 = vmax.f32 %v2438_v20, 1e-08  ;;  %vm2592_vm14 = vmor %vm2590_vm2, %vm2591_vm9  ;;  %vm7364_vm9 = vcmask 58368  }
 0x504   : > { %v2587_v22 = vsub.f32 1.0, %v2586_v24  ;;  %v2652_v27 = vsel %vm2651_vm8, %v2649_v30, -inf }
 0x505   : > { %4809 = vrcp.f32 %v2448_v4  ;;  %2653 = vmax.xlane.f32.xlu1 %v2652_v27  ;;  %v2581_v50 = vand.u32 2147483648, %v2448_v4  ;;  %v2579_v29 = vand.u32 2147483647, %v2448_v4  ;;  %vm2575_vm11 = vweird.f32 %v2448_v4  ;;  %v2608_v18 = vpop.permute.xlu0 %2607 }
 0x506   : > { %v2588_v26 = vmul.f32 %v4808_v5, %v2587_v22  ;;  %v7450_v27 = vlaneseq }
 0x507   : > { %v2582_v63 = vor.u32 1.1754944e-38, %v2581_v50  ;;  %vm2580_vm3 = vcmp.eq.f32.partialorder %v2579_v29, 8.507059e+37 }
 0x508   : > { %v2589_v48 = vadd.f32 %v4808_v5, %v2588_v26  ;;  %v6316_v26 = vshrl.u32 %v7450_v27, 7  ;;  %v6331_v27 = vld [vmem:[#allocation5 + $0x8] sm:$0x3] }
 0x50a   : > { %v2593_v57 = vsel %vm2592_vm14, %v4808_v5, %v2589_v48  ;;  %4681 = vset.pattern.permute.xlu1 %v6316_v26  ;;  %4683 = vset.pattern.permute.xlu2 %v6316_v26 }
 0x50b   : > { %v4810_v34 = vpop.eup %4809  ;;  %v2598_v31 = vsel %vm2595_vm5, %v2597_v2, %v2593_v57  ;;  %4682 = vset.pattern.permute.xlu0 %v6316_v26 }
 0x50c   : > { %v2571_v42 = vmul.f32 %v4810_v34, %v2448_v4  ;;  %vm2576_vm1 = vweird.f32 %v4810_v34  ;;  %v2599_v8 = vmul.f32 %v2598_v31, %v2258_v23 }
 0x50d   : > { %vm2577_vm13 = vmor %vm2575_vm11, %vm2576_vm1 }
 0x50e   : > { %v2572_v19 = vsub.f32 1.0, %v2571_v42  ;;  %v2631_v59 = vperm.slane %v2599_v8, %v6037_v14 }
 0x510   : > { %v2573_v43 = vmul.f32 %v4810_v34, %v2572_v19 }
 0x512   : > { %v2574_v36 = vadd.f32 %v4810_v34, %v2573_v43 }
 0x514   : > { %v2578_v56 = vsel %vm2577_vm13, %v4810_v34, %v2574_v36 }
 0x515   : > { %v2583_v53 = vsel %vm2580_vm3, %v2582_v63, %v2578_v56  ;;  %v6321_v63 = vld [vmem:[#allocation5] sm:$0xff] }
 0x516   : > { %v2584_v6 = vmul.f32 %v2583_v53, %v2255_v45 }
 0x518   : > { %v2630_v41 = vperm.slane %v2584_v6, %v6037_v14 }
 0x51a   : > { %v2646_v39 = vsel %vm2632_vm7, %v2631_v59, %v2630_v41 }
 0x51b   : > { %v2650_v44 = vmul.f32 %v2646_v39, %v2608_v18 }
 0x51d   : > { %v2656_v12 = vsel %vm7364_vm9, %v2650_v44, -inf }
 0x51e   : > { %2657 = vmax.xlane.f32.xlu1 %v2656_v12 }
 0x578   : > { %v2654_v60 = vpop.xlane.xlu1 %2653 }
 0x579   : > { %v2659_v58 = vsub.f32 %v2649_v30, %v2654_v60 }
 0x57b   : > { %v2661_v20 = vmul.f32 1.442695, %v2659_v58  ;;  %v7451_v58 = vperm.slane %v5535_v28, 0  ;;  %v7453_v28 = vperm.slane %v5756_v52, 0  ;;  %v7457_v52 = vperm.slane %v5715_v46, 0 }
 0x57d   : > { %4811 = vpow2.f32 %v2661_v20 }
 0x583   : > { %v4812_v10 = vpop.eup %4811 }
 0x584   : > { %v2665_v5 = vsel %vm2651_vm8, %v4812_v10, 0.0 }
 0x585   : > { %2666 = vadd.xlane.f32.xlu2 %v2665_v5 }
 0x591   : > { %v2658_v33 = vpop.xlane.xlu1 %2657 }
 0x592   : > { %v2660_v47 = vsub.f32 %v2650_v44, %v2658_v33 }
 0x594   : > { %v2663_v4 = vmul.f32 1.442695, %v2660_v47 }
 0x596   : > { %4813 = vpow2.f32 %v2663_v4 }
 0x59c   : > { %v4814_v24 = vpop.eup %4813 }
 0x59d   : > { %v2668_v22 = vsel %vm7364_vm9, %v4814_v24, 0.0 }
 0x59e   : > { %2669 = vadd.xlane.f32.xlu1 %v2668_v22  ;;  %v7452_v22 = vperm.slane %v5551_v32, 0  ;;  %v7456_v32 = vperm.slane %v5637_v54, 0 }
 0x5f8   : > { %v2667_v30 = vpop.xlane.xlu2 %2666 }
 0x5f9   : > { %4815 = vrcp.f32 %v2667_v30  ;;  %v2682_v42 = vand.u32 2147483648, %v2667_v30  ;;  %v2680_v19 = vand.u32 2147483647, %v2667_v30  ;;  %vm2676_vm13 = vweird.f32 %v2667_v30 }
 0x5fb   : > { %v2683_v50 = vor.u32 1.1754944e-38, %v2682_v42  ;;  %vm2681_vm2 = vcmp.eq.f32.partialorder %v2680_v19, 8.507059e+37 }
 0x5ff   : > { %v4816_v48 = vpop.eup %4815 }
 0x600   : > { %v2672_v34 = vmul.f32 %v4816_v48, %v2667_v30  ;;  %vm2677_vm11 = vweird.f32 %v4816_v48  ;;  %v7454_v30 = vperm.slane %v5582_v55, 0  ;;  %v7458_v55 = vperm.slane %v5614_v51, 0 }
 0x601   : > { %vm2678_vm3 = vmor %vm2676_vm13, %vm2677_vm11  ;;  %vm7467_vm13 = vcmask 1047559  }
 0x602   : > { %v2673_v11 = vsub.f32 1.0, %v2672_v34  ;;  %v7459_v34 = vperm.slane %v5643_v16, 0 }
 0x604   : > { %v2674_v17 = vmul.f32 %v4816_v48, %v2673_v11 }
 0x606   : > { %v2675_v57 = vadd.f32 %v4816_v48, %v2674_v17 }
 0x608   : > { %v2679_v2 = vsel %vm2678_vm3, %v4816_v48, %v2675_v57  ;;  %vm4372_vm3 = vcmask 123904  }
 0x609   : > { %v2684_v43 = vsel %vm2681_vm2, %v2683_v50, %v2679_v2  ;;  %vm3011_vm2 = vcmask 392192  }
 0x60a   : > { %v2685_v29 = vmul.f32 %v4812_v10, %v2684_v43 }
 0x60c   : > { %v2729_v31 = vperm.slane %v2685_v29, 4  ;;  %v2708_v45 = vperm.slane %v2685_v29, 1  ;;  %v2701_v36 = vperm.slane %v2685_v29, 0  ;;  %v2722_v56 = vperm.slane %v2685_v29, 3 }
 0x60d   : > { %v2715_v8 = vperm.slane %v2685_v29, 2  ;;  %v2743_v44 = vperm.slane %v2685_v29, 6  ;;  %v2736_v12 = vperm.slane %v2685_v29, 5  ;;  %v2750_v4 = vperm.slane %v2685_v29, 7 }
 0x60e   : > { %2734 = vperm.xlu2 %4683, %v2729_v31   ;;  %2713 = vperm.xlu0 %4682, %v2708_v45   ;;  %v2861_v45 = vld [vmem:[%s7461_s18 + $0x10] sm:$0xff] }
 0x60f   : > { %2706 = vperm.xlu1 %4681, %v2701_v36   ;;  %v2862_v36 = vld [vmem:[%s7461_s18 + $0x18] sm:$0xff]  ;;  %2899 = vmatpush.msrb.mxu3 %v2861_v45 }
 0x610   : > { %2922 = vmatpush.msrb.mxu0 %v2862_v36 }
 0x611   : > { %v2670_v23 = vpop.xlane.xlu1 %2669 }
 0x612   : > { %4817 = vrcp.f32 %v2670_v23  ;;  %v2697_v59 = vand.u32 2147483648, %v2670_v23  ;;  %v2695_v18 = vand.u32 2147483647, %v2670_v23  ;;  %vm2691_vm1 = vweird.f32 %v2670_v23 }
 0x614   : > { %v2698_v20 = vor.u32 1.1754944e-38, %v2697_v59  ;;  %vm2696_vm11 = vcmp.eq.f32.partialorder %v2695_v18, 8.507059e+37 }
 0x616   : > { %3159 = vrot.lane.b32.xlu2 %v6321_v63, %s4946_s11  ;;  %2727 = vperm.xlu0 %4682, %v2722_v56  }
 0x617   : > { %2720 = vperm.xlu1 %4681, %v2715_v8  }
 0x618   : > { %v4818_v53 = vpop.eup %4817 }
 0x619   : > { %v2687_v6 = vmul.f32 %v4818_v53, %v2670_v23  ;;  %vm2692_vm14 = vweird.f32 %v4818_v53  ;;  %v2859_v23 = vld [vmem:[%s7461_s18] sm:$0xff] }
 0x61a   : > { %vm2693_vm5 = vmor %vm2691_vm1, %vm2692_vm14  ;;  %2900 = vmatpush.msrb.mxu3 %v2859_v23  ;;  %vm7482_vm14 = vcmask 122880  }
 0x61b   : > { %v2688_v41 = vsub.f32 1.0, %v2687_v6  ;;  %vm7483_vm1 = vmmov %vm7482_vm14 }
 0x61d   : > { %v2689_v39 = vmul.f32 %v4818_v53, %v2688_v41 }
 0x61e   : > { %3216 = vrot.lane.b32.xlu2 %v7451_v58, %s4947_s15  ;;  %2748 = vperm.xlu0 %4682, %v2743_v44  }
 0x61f   : > { %v2690_v60 = vadd.f32 %v4818_v53, %v2689_v39  ;;  %2741 = vperm.xlu1 %4681, %v2736_v12  }
 0x621   : > { %v2694_v10 = vsel %vm2693_vm5, %v4818_v53, %v2690_v60  ;;  %vm7488_vm5 = vmmov %vm7483_vm1 }
 0x622   : > { %v2699_v5 = vsel %vm2696_vm11, %v2698_v20, %v2694_v10  ;;  %vm7489_vm11 = vmmov %vm7483_vm1 }
 0x623   : > { %v2700_v33 = vmul.f32 %v4814_v24, %v2699_v5  ;;  %v7455_v24 = vperm.slane %v5672_v7, 0  ;;  %v7460_v7 = vperm.slane %v5733_v0, 0 }
 0x625   : > { %v2757_v47 = vperm.slane %v2700_v33, 0  ;;  %v2764_v48 = vperm.slane %v2700_v33, 1 }
 0x626   : > { %3222 = vrot.lane.b32.xlu2 %v7452_v22, %s4947_s15 }
 0x627   : > { %2762 = vperm.xlu0 %4682, %v2757_v47   ;;  %2755 = vperm.xlu1 %4681, %v2750_v4  }
 0x62e   : > { %3228 = vrot.lane.b32.xlu2 %v7453_v28, %s4947_s15 }
 0x62f   : > { %3214 = vrot.lane.b32.xlu0 %v7454_v30, %s4947_s15  ;;  %3161 = vrot.lane.b32.xlu1 %v6331_v27, %s4946_s11  ;;  %s7481_s11 = sld [smem:[#allocation23_spill]] }
 0x637   : > { %3220 = vrot.lane.b32.xlu0 %v7455_v24, %s4947_s15  ;;  %3212 = vrot.lane.b32.xlu1 %v7456_v32, %s4947_s15 }
 0x63f   : > { %3226 = vrot.lane.b32.xlu0 %v7457_v52, %s4947_s15  ;;  %2769 = vperm.xlu1 %4681, %v2764_v48  }
 0x647   : > { %3218 = vrot.lane.b32.xlu1 %v7458_v55, %s4947_s15 }
 0x64f   : > { %3224 = vrot.lane.b32.xlu1 %v7459_v34, %s4947_s15 }
 0x657   : > { %3230 = vrot.lane.b32.xlu1 %v7460_v7, %s4947_s15 }
 0x668   : > { %v2735_v54 = vpop.permute.xlu2 %2734 }
 0x669   : > { %v2775_v31 = vmul.f32 %v2735_v54, %v5588_v1 }
 0x66b   : > { %v2809_v1 = vsel %vm7363_vm10, %v2775_v31, 0.0  ;;  %v7463_v31 = vld [vmem:[#allocation36_spill] sm:$0xff] }
 0x66c   : > { %v2810_v10 = vrot.slane %v2809_v1, 4 }
 0x670   : > { %v6359_v11 = vpop.permute.xlu2 %3159 }
 0x678   : > { %v3217_v42 = vpop.permute.xlu2 %3216 }
 0x679   : > { %v3244_v46 = vmul.f32 %v3217_v42, %v5480_v37 }
 0x67b   : > { %v3258_v51 = vsel %vm7363_vm10, %v3244_v46, 0.0 }
 0x680   : > { %v3223_v17 = vpop.permute.xlu2 %3222  ;;  %v2714_v19 = vpop.permute.xlu0 %2713 }
 0x681   : > { %3259 = vadd.xlane.f32.xlu1 %v3258_v51  ;;  %v2707_v16 = vpop.permute.xlu1 %2706  ;;  %v2772_v57 = vmul.f32 %v2714_v19, %v5586_v15  ;;  %v3247_v2 = vmul.f32 %v3223_v17, %v5518_v40 }
 0x682   : > { %v2771_v0 = vmul.f32 %v2707_v16, %v5465_v13  ;;  %v2860_v13 = vld [vmem:[%s7461_s18 + $0x8] sm:$0xff] }
 0x683   : > { %v2788_v50 = vsel %vm7363_vm10, %v2772_v57, 0.0  ;;  %v3267_v8 = vsel %vm7363_vm10, %v3247_v2, 0.0  ;;  %2923 = vmatpush.msrb.mxu0 %v2860_v13 }
 0x684   : > { %v2781_v43 = vsel %vm7363_vm10, %v2771_v0, 0.0  ;;  %v2789_v29 = vrot.slane %v2788_v50, 4 }
 0x685   : > { %v2782_v37 = vrot.slane %v2781_v43, 4 }
 0x686   : > { %v2790_v56 = vadd.f32 %v2789_v29, %v2788_v50 }
 0x687   : > { %v2783_v53 = vadd.f32 %v2782_v37, %v2781_v43 }
 0x688   : > { %v2728_v15 = vpop.permute.xlu0 %2727  ;;  %v3229_v6 = vpop.permute.xlu2 %3228  ;;  %v2791_v18 = vrot.slane %v2790_v56, 2 }
 0x689   : > { %3268 = vadd.xlane.f32.xlu1 %v3267_v8  ;;  %v2721_v40 = vpop.permute.xlu1 %2720  ;;  %v2774_v41 = vmul.f32 %v2728_v15, %v5495_v35  ;;  %v3250_v44 = vmul.f32 %v3229_v6, %v5653_v3  ;;  %v2784_v58 = vrot.slane %v2783_v53, 2  ;;  %v2811_v3 = vadd.f32 %v2810_v10, %v2809_v1  ;;  %v3003_v6 = vld [vmem:[%s7462_s23 + $0x50] sm:$0xff] }
 0x68a   : > { %v2773_v59 = vmul.f32 %v2721_v40, %v5477_v61  ;;  %v2792_v35 = vadd.f32 %v2791_v18, %v2790_v56  ;;  %v3001_v40 = vld [vmem:[%s7462_s23 + $0x40] sm:$0xff]  ;;  %3028 = vmatpush.msra.mxu3 %v3003_v6 }
 0x68b   : > { %v2802_v39 = vsel %vm7363_vm10, %v2774_v41, 0.0  ;;  %v3276_v61 = vsel %vm7363_vm10, %v3250_v44, 0.0  ;;  %v2785_v4 = vadd.f32 %v2784_v58, %v2783_v53  ;;  %v2812_v17 = vrot.slane %v2811_v3, 2  ;;  %v3004_v41 = vld [vmem:[%s7462_s23 + $0x58] sm:$0xff]  ;;  %v2999_v44 = vld [vmem:[%s7462_s23 + $0x30] sm:$0xff] }
 0x68c   : > { %v2795_v12 = vsel %vm7363_vm10, %v2773_v59, 0.0  ;;  %v2803_v60 = vrot.slane %v2802_v39, 4  ;;  %v2793_v54 = vrot.slane %v2792_v35, 1  ;;  %3051 = vmatpush.msra.mxu0 %v3004_v41  ;;  %3029 = vmatpush.msra.mxu3 %v3001_v40 }
 0x68d   : > { %v2796_v20 = vrot.slane %v2795_v12, 4  ;;  %v2786_v7 = vrot.slane %v2785_v4, 1  ;;  %v2813_v29 = vadd.f32 %v2812_v17, %v2811_v3  ;;  %v7466_v17 = vld [vmem:[#allocation34_spill] sm:$0xff] }
 0x68e   : > { %v2804_v5 = vadd.f32 %v2803_v60, %v2802_v39  ;;  %v3002_v39 = vld [vmem:[%s7462_s23 + $0x48] sm:$0xff]  ;;  %3030 = vmatpush.msra.mxu3 %v2999_v44 }
 0x68f   : > { %v2797_v33 = vadd.f32 %v2796_v20, %v2795_v12  ;;  %v2814_v59 = vrot.slane %v2813_v29, 1  ;;  %3052 = vmatpush.msra.mxu0 %v3002_v39 }
 0x690   : > { %v2749_v47 = vpop.permute.xlu0 %2748  ;;  %v2805_v28 = vrot.slane %v2804_v5, 2 }
 0x691   : > { %v2798_v22 = vrot.slane %v2797_v33, 2  ;;  %3277 = vadd.xlane.f32.xlu1 %v3276_v61  ;;  %v2742_v30 = vpop.permute.xlu1 %2741  ;;  %v2777_v24 = vmul.f32 %v2749_v47, %v5558_v25  ;;  %v2787_v25 = vadd.f32 %v2786_v7, %v2785_v4  ;;  %v2815_v61 = vadd.f32 %v2814_v59, %v2813_v29  ;;  %v2997_v47 = vld [vmem:[%s7462_s23 + $0x20] sm:$0xff]  ;;  %v3000_v4 = vld [vmem:[%s7462_s23 + $0x38] sm:$0xff] }
 0x692   : > { %v2776_v32 = vmul.f32 %v2742_v30, %v5510_v49  ;;  %v2806_v42 = vadd.f32 %v2805_v28, %v2804_v5  ;;  %v2794_v49 = vadd.f32 %v2793_v54, %v2792_v35  ;;  %3053 = vmatpush.msra.mxu0 %v3000_v4  ;;  %v2995_v30 = vld [vmem:[%s7462_s23 + $0x10] sm:$0xff]  ;;  %3031 = vmatpush.msra.mxu3 %v2997_v47  ;;  %v2996_v7 = vld [vmem:[%s7462_s23 + $0x18] sm:$0xff]  ;;  %v2993_v54 = vld [vmem:[%s7462_s23] sm:$0xff] }
 0x693   : > { %v2799_v48 = vadd.f32 %v2798_v22, %v2797_v33  ;;  %v2823_v52 = vsel %vm7363_vm10, %v2777_v24, 0.0  ;;  %v7464_v33 = vld [vmem:[#allocation33_spill] sm:$0xff]  ;;  %v2998_v24 = vld [vmem:[%s7462_s23 + $0x28] sm:$0xff] }
 0x694   : > { %v2816_v55 = vsel %vm7363_vm10, %v2776_v32, 0.0  ;;  %v2824_v34 = vrot.slane %v2823_v52, 4  ;;  %v2807_v50 = vrot.slane %v2806_v42, 1  ;;  %v2873_v8 = vsel %vm2632_vm7, %v2794_v49, %v2787_v25  ;;  %v7465_v32 = vld [vmem:[#allocation39_spill] sm:$0xff]  ;;  %3054 = vmatpush.msra.mxu0 %v2998_v24  ;;  %3032 = vmatpush.msra.mxu3 %v2995_v30  ;;  %v7475_v24 = vld [vmem:[#allocation32_spill] sm:$0xff] }
 0x695   : > { %v2817_v46 = vrot.slane %v2816_v55, 4  ;;  %v2800_v51 = vrot.slane %v2799_v48, 1  ;;  %v7468_v25 = vld [vmem:[#allocation27_spill] sm:$0xff] }
 0x696   : > { %v2825_v19 = vadd.f32 %v2824_v34, %v2823_v52  ;;  %v2808_v15 = vadd.f32 %v2807_v50, %v2806_v42  ;;  %v2994_v42 = vld [vmem:[%s7462_s23 + $0x8] sm:$0xff]  ;;  %3055 = vmatpush.msra.mxu0 %v2996_v7  ;;  %3033 = vmatpush.msra.mxu3 %v2993_v54 }
 0x697   : > { %v2818_v16 = vadd.f32 %v2817_v46, %v2816_v55  ;;  %v2801_v37 = vadd.f32 %v2800_v51, %v2799_v48  ;;  %v3293_v51 = vperm.slane %v7466_v17, 0  ;;  %v7478_v7 = vld [vmem:[#allocation40_spill] sm:$0xff]  ;;  %v7480_v17 = vld [vmem:[#allocation30_spill] sm:$0xff] }
 0x698   : > { %v2826_v57 = vrot.slane %v2825_v19, 2  ;;  %3056 = vmatpush.msra.mxu0 %v2994_v42  ;;  %v3292_v54 = vperm.slane %v7478_v7, 0  ;;  %v7479_v42 = vld [vmem:[#allocation38_spill] sm:$0xff] }
 0x699   : > { %v2763_v0 = vpop.permute.xlu0 %2762  ;;  %v2819_v2 = vrot.slane %v2818_v16, 2  ;;  %v2756_v43 = vpop.permute.xlu1 %2755  ;;  %v2874_v1 = vsel %vm2634_vm4, %v2801_v37, %v2873_v8  ;;  %v7469_v37 = vld [vmem:[#allocation43_spill] sm:$0xff] }
 0x69a   : > { %v2778_v45 = vmul.f32 %v2756_v43, %v7463_v31  ;;  %v2827_v23 = vadd.f32 %v2826_v57, %v2825_v19  ;;  %v2875_v58 = vsel %vm2636_vm0, %v2808_v15, %v2874_v1  ;;  %v2779_v48 = vmul.f32 %v2763_v0, %v7465_v32  ;;  %v7472_v1 = vld [vmem:[#allocation46_spill] sm:$0xff] }
 0x69b   : > { %v2820_v36 = vadd.f32 %v2819_v2, %v2818_v16  ;;  %v2876_v52 = vsel %vm2638_vm6, %v2815_v61, %v2875_v58  ;;  %v3296_v31 = vperm.slane %v7469_v37, 0  ;;  %v3299_v39 = vperm.slane %v7472_v1, 0  ;;  %v7474_v58 = vld [vmem:[#allocation28_spill] sm:$0xff]  ;;  %v7484_v1 = vld [vmem:[#allocation41_spill] sm:$0xff] }
 0x69c   : > { %v2830_v56 = vsel %vm7363_vm10, %v2778_v45, 0.0  ;;  %v2828_v12 = vrot.slane %v2827_v23, 1  ;;  %v2837_v19 = vsel %vm7363_vm10, %v2779_v48, 0.0  ;;  %v7470_v45 = vld [vmem:[#allocation35_spill] sm:$0xff] }
 0x69d   : > { %v2821_v13 = vrot.slane %v2820_v36, 1  ;;  %v2831_v53 = vrot.slane %v2830_v56, 4  ;;  %v2838_v50 = vrot.slane %v2837_v19, 4 }
 0x69e   : > { %v2829_v3 = vadd.f32 %v2828_v12, %v2827_v23 }
 0x69f   : > { %v2832_v18 = vadd.f32 %v2831_v53, %v2830_v56  ;;  %v2822_v20 = vadd.f32 %v2821_v13, %v2820_v36  ;;  %v2839_v29 = vadd.f32 %v2838_v50, %v2837_v19  ;;  %v7471_v56 = vld [vmem:[#allocation42_spill] sm:$0xff] }
 0x6a1   : > { %v3215_v60 = vpop.permute.xlu0 %3214  ;;  %v2833_v10 = vrot.slane %v2832_v18, 2  ;;  %v6395_v5 = vpop.permute.xlu1 %3161  ;;  %v2877_v34 = vsel %vm2640_vm15, %v2822_v20, %v2876_v52  ;;  %v2840_v15 = vrot.slane %v2839_v29, 2  ;;  %v7477_v52 = vld [vmem:[#allocation44_spill] sm:$0xff] }
 0x6a2   : > { %v3243_v35 = vmul.f32 %v3215_v60, %v7464_v33  ;;  %v2878_v16 = vsel %vm2642_vm12, %v2829_v3, %v2877_v34 }
 0x6a3   : > { %v2834_v22 = vadd.f32 %v2833_v10, %v2832_v18  ;;  %v2841_v41 = vadd.f32 %v2840_v15, %v2839_v29  ;;  %v7473_v18 = vld [vmem:[#allocation37_spill] sm:$0xff] }
 0x6a4   : > { %v3255_v28 = vsel %vm7363_vm10, %v3243_v35, 0.0 }
 0x6a5   : > { %3256 = vadd.xlane.f32.xlu2 %v3255_v28  ;;  %v2835_v55 = vrot.slane %v2834_v22, 1  ;;  %v2842_v10 = vrot.slane %v2841_v41, 1 }
 0x6a7   : > { %v2836_v46 = vadd.f32 %v2835_v55, %v2834_v22  ;;  %v2843_v4 = vadd.f32 %v2842_v10, %v2841_v41 }
 0x6a9   : > { %v3213_v57 = vpop.permute.xlu1 %3212  ;;  %v2879_v0 = vsel %vm7467_vm13, %v2836_v46, %v2878_v16  ;;  %v3221_v2 = vpop.permute.xlu0 %3220  ;;  %v3295_v46 = vperm.slane %v7479_v42, 0  ;;  %vm7490_vm13 = vmmov %vm7483_vm1 }
 0x6aa   : > { %v3242_v49 = vmul.f32 %v3213_v57, %v7468_v25  ;;  %3304 = vrot.lane.b32.xlu1 %v3293_v51, %s4947_s15  ;;  %4578 = vmatmul.msk.f32.vlgmr.msrb.gmra.mxu3 %vm7363_vm10, %v2879_v0  ;;  %4371 = vst.msk [vmem:[#allocation2] sm:$0xff] %vm7363_vm10, %v2879_v0  ;;  %v3246_v36 = vmul.f32 %v3221_v2, %v7470_v45  ;;  %v6453_v51 = vld [vmem:[%s7476_s26] sm:$0x3]  ;;  %v2977_v57 = vpop.f32.mrf.mxu2  ;;  %s4952_s26 = smov 94  }
 0x6ab   : > { %4580 = vmatmul.msk.f32.vlgmr.msrb.gmra.mxu0 %vm7363_vm10, %v2879_v0  ;;  %v2986_v16 = vperm.slane %v6453_v51, 1  ;;  %v2985_v7 = vperm.slane %v6453_v51, 0 }
 0x6ac   : > { %v3252_v43 = vsel %vm7363_vm10, %v3242_v49, 0.0  ;;  %v3264_v53 = vsel %vm7363_vm10, %v3246_v36, 0.0 }
 0x6ad   : > { %3253 = vadd.xlane.f32.xlu0 %v3252_v43 }
 0x6b1   : > { %v2770_v23 = vpop.permute.xlu1 %2769  ;;  %v3227_v40 = vpop.permute.xlu0 %3226 }
 0x6b2   : > { %v2780_v8 = vmul.f32 %v2770_v23, %v7471_v56  ;;  %3310 = vrot.lane.b32.xlu1 %v3296_v31, %s4947_s15  ;;  %v3249_v44 = vmul.f32 %v3227_v40, %v7473_v18  ;;  %v2980_v43 = vpop.f32.mrf.mxu2  ;;  %v3005_v31 = vld [vmem:[%s7481_s11] sm:$0x3]  ;;  %s7546_s11 = sld [smem:[#allocation13_spill]] }
 0x6b3   : > { %v3008_v56 = vperm.slane %v3005_v31, 1 }
 0x6b4   : > { %v2844_v13 = vsel %vm7363_vm10, %v2780_v8, 0.0  ;;  %v3273_v61 = vsel %vm7363_vm10, %v3249_v44, 0.0 }
 0x6b5   : > { %v2845_v6 = vrot.slane %v2844_v13, 4  ;;  %3265 = vadd.xlane.f32.xlu0 %v3264_v53  ;;  %v3007_v53 = vperm.slane %v3005_v31, 0 }
 0x6b7   : > { %v2846_v59 = vadd.f32 %v2845_v6, %v2844_v13 }
 0x6b9   : > { %v2847_v12 = vrot.slane %v2846_v59, 2  ;;  %v3219_v60 = vpop.permute.xlu1 %3218 }
 0x6ba   : > { %v3245_v20 = vmul.f32 %v3219_v60, %v7474_v58  ;;  %3316 = vrot.lane.b32.xlu1 %v3299_v39, %s4947_s15  ;;  %v3298_v39 = vperm.slane %v7484_v1, 0 }
 0x6bb   : > { %v2848_v33 = vadd.f32 %v2847_v12, %v2846_v59  ;;  %v7485_v12 = vld [vmem:[#allocation47_spill] sm:$0xff] }
 0x6bc   : > { %v3261_v35 = vsel %vm7363_vm10, %v3245_v20, 0.0  ;;  %v3301_v60 = vperm.slane %v7485_v12, 0  ;;  %v7486_v20 = vld [vmem:[#allocation31_spill] sm:$0xff] }
 0x6bd   : > { %v2849_v47 = vrot.slane %v2848_v33, 1  ;;  %3262 = vadd.xlane.f32.xlu2 %v3261_v35  ;;  %3274 = vadd.xlane.f32.xlu0 %v3273_v61  ;;  %v3297_v10 = vperm.slane %v7486_v20, 0 }
 0x6bf   : > { %v2850_v22 = vadd.f32 %v2849_v47, %v2848_v33  ;;  %v7487_v47 = vld [vmem:[#allocation48_spill] sm:$0xff] }
 0x6c1   : > { %v3225_v28 = vpop.permute.xlu1 %3224  ;;  %v2880_v30 = vsel %vm2632_vm7, %v2850_v22, %v2843_v4  ;;  %v3300_v4 = vperm.slane %v7487_v47, 0 }
 0x6c2   : > { %v3248_v3 = vmul.f32 %v3225_v28, %v7475_v24  ;;  %4579 = vmatmul.msk.f32.gmra.mxu3 %vm7363_vm10, %v2880_v30  ;;  %4373 = vst.msk [vmem:[#allocation2 + $0x8] sm:$0x3] %vm4372_vm3, %v2880_v30  ;;  %4581 = vmatmul.msk.f32.gmra.mxu0 %vm7363_vm10, %v2880_v30 }
 0x6c4   : > { %v3270_v32 = vsel %vm7363_vm10, %v3248_v3, 0.0 }
 0x6c5   : > { %3271 = vadd.xlane.f32.xlu2 %v3270_v32 }
 0x6c9   : > { %v3231_v48 = vpop.permute.xlu1 %3230 }
 0x6ca   : > { %v3251_v55 = vmul.f32 %v3231_v48, %v7477_v52  ;;  %4586 = vmatmul.msk.f32.vlgmr.msra.gmra.mxu3 %vm3011_vm2, %v6321_v63  ;;  %4588 = vmatmul.msk.f32.vlgmr.msra.gmra.mxu0 %vm3011_vm2, %v6321_v63  ;;  %v3294_v63 = vperm.slane %v7480_v17, 0  ;;  %v2954_v52 = vpop.f32.mrf.mxu1 }
 0x6cc   : > { %v3279_v34 = vsel %vm7363_vm10, %v3251_v55, 0.0 }
 0x6cd   : > { %3280 = vadd.xlane.f32.xlu2 %v3279_v34 }
 0x6d1   : > { %3302 = vrot.lane.b32.xlu0 %v3292_v54, %s4947_s15 }
 0x6d2   : > { %4587 = vmatmul.msk.f32.gmra.mxu3 %vm3011_vm2, %v6331_v27  ;;  %4589 = vmatmul.msk.f32.gmra.mxu0 %vm3011_vm2, %v6331_v27 }
 0x6d9   : > { %3308 = vrot.lane.b32.xlu0 %v3295_v46, %s4947_s15 }
 0x6e5   : > { %3306 = vrot.lane.b32.xlu2 %v3294_v63, %s4947_s15 }
 0x6f4   : > { %v6487_v28 = vpop.xlane.xlu1 %3259 }
 0x6fc   : > { %v6491_v24 = vpop.xlane.xlu1 %3268 }
 0x704   : > { %v6494_v48 = vpop.xlane.xlu1 %3277 }
 0x718   : > { %v6475_v58 = vpop.xlane.xlu2 %3256 }
 0x71c   : > { %v3305_v55 = vpop.permute.xlu1 %3304 }
 0x71d   : > { %v3335_v42 = vsel %vm7489_vm11, %v3305_v55, 0.0  ;;  %vm7491_vm11 = vcmask 261120  }
 0x720   : > { %v6455_v19 = vpop.xlane.xlu0 %3253 }
 0x724   : > { %v3311_v17 = vpop.permute.xlu1 %3310 }
 0x728   : > { %v2925_v0 = vpop.f32.mrf.mxu0  ;;  %v6460_v27 = vpop.xlane.xlu0 %3265 }
 0x729   : > { %v2978_v25 = vadd.f32 %v2977_v57, %v2925_v0  ;;  %v2957_v0 = vpop.f32.mrf.mxu1 }
 0x72b   : > { %v6458_v49 = vadd.f32 %v2986_v16, %v2978_v25 }
 0x72d   : > { %v2902_v2 = vpop.f32.mrf.mxu3 }
 0x72e   : > { %v2955_v34 = vadd.f32 %v2954_v52, %v2902_v2 }
 0x730   : > { %v6462_v50 = vpop.xlane.xlu0 %3274  ;;  %v6480_v33 = vpop.xlane.xlu2 %3262  ;;  %v6497_v54 = vadd.f32 %v2985_v7, %v2955_v34 }
 0x738   : > { %v6485_v22 = vpop.xlane.xlu2 %3271 }
 0x73f   : > { %v2928_v29 = vpop.f32.mrf.mxu0 }
 0x740   : > { %v2981_v37 = vadd.f32 %v2980_v43, %v2928_v29  ;;  %v6489_v30 = vpop.xlane.xlu2 %3280 }
 0x742   : > { %v6465_v45 = vadd.f32 %v2986_v16, %v2981_v37  ;;  %v3344_v16 = vsel %vm7490_vm13, %v3311_v17, 0.0 }
 0x743   : > { %v3303_v36 = vpop.permute.xlu0 %3302 }
 0x744   : > { %v3332_v23 = vsel %vm7482_vm14, %v3303_v36, 0.0 }
 0x745   : > { %v2905_v8 = vpop.f32.mrf.mxu3  ;;  %3333 = vadd.xlane.f32.xlu1 %v3332_v23 }
 0x746   : > { %v2958_v25 = vadd.f32 %v2957_v0, %v2905_v8 }
 0x747   : > { %v3058_v15 = vpop.f32.mrf.mxu0 }
 0x748   : > { %v3059_v13 = vadd.f32 %v3058_v15, %v3008_v56  ;;  %v3307_v3 = vpop.permute.xlu2 %3306  ;;  %v6502_v2 = vadd.f32 %v2985_v7, %v2958_v25 }
 0x749   : > { %v3338_v32 = vsel %vm7488_vm5, %v3307_v3, 0.0 }
 0x74a   : > { %3110 = vrot.lane.b32.xlu2 %v3059_v13, %s4938_s16 }
 0x74b   : > { %v3309_v6 = vpop.permute.xlu0 %3308 }
 0x74c   : > { %v3341_v40 = vsel %vm7483_vm1, %v3309_v6, 0.0  ;;  %v6505_v6 = vpop.permute.xlu1 %3316 }
 0x74d   : > { %v3035_v41 = vpop.f32.mrf.mxu3  ;;  %3342 = vadd.xlane.f32.xlu1 %v3341_v40 }
 0x74e   : > { %v3036_v59 = vadd.f32 %v3035_v41, %v3007_v53 }
 0x74f   : > { %v3061_v18 = vpop.f32.mrf.mxu0 }
 0x750   : > { %3108 = vrot.lane.b32.xlu0 %v3036_v59, %s4938_s16  ;;  %v3062_v44 = vadd.f32 %v3061_v18, %v3008_v56  ;;  %v3064_v46 = vadd.f32 %v3036_v59, %v6497_v54 }
 0x752   : > { %3314 = vrot.lane.b32.xlu2 %v3298_v39, %s4947_s15  ;;  %v4590_v63 = vmul.f32 -1.442695, %v3064_v46 }
 0x754   : > { %4819 = vpow2.f32 %v4590_v63 }
 0x755   : > { %v3038_v35 = vpop.f32.mrf.mxu3 }
 0x756   : > { %v3039_v61 = vadd.f32 %v3038_v35, %v3007_v53 }
 0x758   : > { %3114 = vrot.lane.b32.xlu0 %v3062_v44, %s4938_s16  ;;  %v3065_v51 = vadd.f32 %v3039_v61, %v6502_v2 }
 0x75a   : > { %3320 = vrot.lane.b32.xlu2 %v3301_v60, %s4947_s15  ;;  %v4820_v57 = vpop.eup %4819  ;;  %v4591_v29 = vmul.f32 -1.442695, %v3065_v51 }
 0x75b   : > { %v3072_v43 = vadd.f32 1.0, %v4820_v57 }
 0x75d   : > { %4821 = vrcp.f32 %v3072_v43  ;;  %v3085_v53 = vand.u32 2147483648, %v3072_v43  ;;  %vm3079_vm14 = vweird.f32 %v3072_v43  ;;  %v3083_v8 = vand.u32 2147483647, %v3072_v43 }
 0x75e   : > { %4823 = vpow2.f32 %v4591_v29 }
 0x75f   : > { %v3086_v41 = vor.u32 1.1754944e-38, %v3085_v53  ;;  %vm3084_vm5 = vcmp.eq.f32.partialorder %v3083_v8, 8.507059e+37 }
 0x760   : > { %3312 = vrot.lane.b32.xlu0 %v3297_v10, %s4947_s15 }
 0x763   : > { %v4822_v37 = vpop.eup %4821 }
 0x764   : > { %v3075_v31 = vmul.f32 %v4822_v37, %v3072_v43  ;;  %v4824_v23 = vpop.eup %4823  ;;  %vm3080_vm3 = vweird.f32 %v4822_v37 }
 0x765   : > { %v3073_v15 = vadd.f32 1.0, %v4824_v23  ;;  %vm3081_vm1 = vmor %vm3079_vm14, %vm3080_vm3 }
 0x766   : > { %3112 = vrot.lane.b32.xlu1 %v3039_v61, %s4938_s16  ;;  %v3076_v36 = vsub.f32 1.0, %v3075_v31  ;;  %s4948_s16 = smov 80  }
 0x767   : > { %4825 = vrcp.f32 %v3073_v15  ;;  %vm3094_vm3 = vweird.f32 %v3073_v15  ;;  %v3098_v3 = vand.u32 2147483647, %v3073_v15 }
 0x768   : > { %3318 = vrot.lane.b32.xlu0 %v3300_v4, %s4947_s15  ;;  %v3077_v56 = vmul.f32 %v4822_v37, %v3076_v36  ;;  %v3100_v4 = vand.u32 2147483648, %v3073_v15  ;;  %s4951_s15 = smov 112  }
 0x76a   : > { %v3078_v13 = vadd.f32 %v4822_v37, %v3077_v56  ;;  %v3101_v52 = vor.u32 1.1754944e-38, %v3100_v4 }
 0x76c   : > { %v3082_v40 = vsel %vm3081_vm1, %v4822_v37, %v3078_v13  ;;  %vm3099_vm1 = vcmp.eq.f32.partialorder %v3098_v3, 8.507059e+37 }
 0x76d   : > { %v4826_v39 = vpop.eup %4825  ;;  %v6507_v18 = vsel %vm3084_vm5, %v3086_v41, %v3082_v40  ;;  %vm7492_vm5 = vmmov %vm7491_vm11 }
 0x76e   : > { %v3090_v20 = vmul.f32 %v4826_v39, %v3073_v15  ;;  %vm3095_vm13 = vweird.f32 %v4826_v39 }
 0x76f   : > { %vm3096_vm14 = vmor %vm3094_vm3, %vm3095_vm13 }
 0x770   : > { %v3091_v10 = vsub.f32 1.0, %v3090_v20 }
 0x772   : > { %v3092_v35 = vmul.f32 %v4826_v39, %v3091_v10 }
 0x774   : > { %v3093_v47 = vadd.f32 %v4826_v39, %v3092_v35 }
 0x783   : > { %3339 = vadd.xlane.f32.xlu2 %v3338_v32  ;;  %v3097_v32 = vsel %vm3096_vm14, %v4826_v39, %v3093_v47 }
 0x784   : > { %v6516_v7 = vsel %vm3099_vm1, %v3101_v52, %v3097_v32 }
 0x792   : > { %3336 = vadd.xlane.f32.xlu0 %v3335_v42 }
 0x79a   : > { %3345 = vadd.xlane.f32.xlu0 %v3344_v16 }
 0x7a4   : > { %v3111_v59 = vpop.permute.xlu2 %3110 }
 0x7ac   : > { %v3315_v17 = vpop.permute.xlu2 %3314 }
 0x7b4   : > { %v6523_v16 = vpop.permute.xlu2 %3320 }
 0x7b8   : > { %v6511_v60 = vpop.xlane.xlu1 %3333 }
 0x7b9   : > { %4827 = vrsqrt.f32 %v6511_v60  ;;  %vm3369_vm3 = vcmp.eq.f32.partialorder %v6511_v60, inf  ;;  %v3372_v32 = vand.u32 2147483648, %v6511_v60 }
 0x7bf   : > { %v4828_v0 = vpop.eup %4827 }
 0x7c0   : > { %v6514_v61 = vpop.xlane.xlu1 %3342  ;;  %v3363_v43 = vmul.f32 %v4828_v0, %v6511_v60 }
 0x7c1   : > { %4829 = vrsqrt.f32 %v6514_v61  ;;  %vm3405_vm14 = vcmp.eq.f32.partialorder %v6514_v61, inf }
 0x7c2   : > { %v3109_v1 = vpop.permute.xlu0 %3108  ;;  %v3364_v37 = vmul.f32 %v4828_v0, %v3363_v43 }
 0x7c3   : > { %v3116_v44 = vsel %vm7491_vm11, %v3109_v1, %v3111_v59  ;;  %vm7493_vm11 = vcmask 122880  }
 0x7c4   : > { %v3120_v12 = vmul.f32 %v3116_v44, %v6507_v18  ;;  %v3365_v36 = vmul.f32 0.5, %v3364_v37  ;;  %vm7494_vm13 = vmmov %vm7493_vm11 }
 0x7c5   : > { %v3350_v44 = vsel %vm7494_vm13, %v3315_v17, 0.0 }
 0x7c6   : > { %3124 = vrot.lane.b32.xlu2 %v3120_v12, %s4939_s22  ;;  %v3366_v53 = vsub.f32 1.5, %v3365_v36  ;;  %v7495_v36 = vld [vmem:[#allocation51_spill] sm:$0xff] }
 0x7c7   : > { %v4830_v25 = vpop.eup %4829 }
 0x7c8   : > { %v3399_v51 = vmul.f32 %v4830_v25, %v6514_v61  ;;  %v3367_v59 = vmul.f32 %v4828_v0, %v3366_v53  ;;  %v7497_v53 = vld [vmem:[#allocation53_spill] sm:$0xff] }
 0x7ca   : > { %v3115_v55 = vpop.permute.xlu0 %3114  ;;  %v3400_v31 = vmul.f32 %v4830_v25, %v3399_v51  ;;  %v3368_v10 = vmul.f32 %v3367_v59, %v6511_v60 }
 0x7cc   : > { %v3401_v23 = vmul.f32 0.5, %v3400_v31  ;;  %v3370_v4 = vsel %vm3369_vm3, %v6511_v60, %v3368_v10 }
 0x7ce   : > { %v3402_v8 = vsub.f32 1.5, %v3401_v23 }
 0x7d0   : > { %v3403_v1 = vmul.f32 %v4830_v25, %v3402_v8 }
 0x7d2   : > { %v3313_v63 = vpop.permute.xlu0 %3312  ;;  %v3404_v35 = vmul.f32 %v3403_v1, %v6514_v61 }
 0x7d3   : > { %v3347_v57 = vsel %vm7493_vm11, %v3313_v63, 0.0  ;;  %vm3407_vm11 = vcmp.eq.f32.partialorder %v6514_v61, 0.0 }
 0x7d4   : > { %v3406_v52 = vsel %vm3405_vm14, %v6514_v61, %v3404_v35 }
 0x7d8   : > { %v3113_v34 = vpop.permute.xlu1 %3112 }
 0x7d9   : > { %v3117_v42 = vsel %vm7492_vm5, %v3113_v34, %v3115_v55  ;;  %vm3371_vm5 = vcmp.eq.f32.partialorder %v6511_v60, 0.0  ;;  %v3408_v55 = vand.u32 2147483648, %v6514_v61 }
 0x7da   : > { %v3121_v46 = vmul.f32 %v3117_v42, %v6516_v7  ;;  %v6528_v15 = vpop.permute.xlu0 %3318 }
 0x7db   : > { %v3409_v63 = vsel %vm3407_vm11, %v3408_v55, %v3406_v52 }
 0x7dc   : > { %3126 = vrot.lane.b32.xlu1 %v3121_v46, %s4939_s22  ;;  %v3373_v46 = vsel %vm3371_vm5, %v3372_v32, %v3370_v4  ;;  %v3485_v51 = vperm.slane %v3409_v63, 0  ;;  %s7509_s22 = sld [smem:[#allocation24_spill]] }
 0x7dd   : > { %v3482_v25 = vperm.slane %v3373_v46, 0 }
 0x7df   : > { %v3492_v23 = vmul.f32 %v3482_v25, %v7495_v36 }
 0x7e1   : > { %v3502_v61 = vmax.f32 %v3492_v23, 1e-08 }
 0x7e3   : > { %v3523_v36 = vand.u32 2147483648, %v3502_v61 }
 0x7ef   : > { %3348 = vadd.xlane.f32.xlu2 %v3347_v57 }
 0x7f6   : > { %v3340_v29 = vpop.xlane.xlu2 %3339 }
 0x7f7   : > { %4831 = vrsqrt.f32 %v3340_v29  ;;  %vm3393_vm1 = vcmp.eq.f32.partialorder %v3340_v29, inf  ;;  %v3396_v17 = vand.u32 2147483648, %v3340_v29  ;;  %vm3395_vm13 = vcmp.eq.f32.partialorder %v3340_v29, 0.0 }
 0x7fd   : > { %v4832_v56 = vpop.eup %4831 }
 0x7fe   : > { %v3387_v13 = vmul.f32 %v4832_v56, %v3340_v29 }
 0x800   : > { %v3388_v40 = vmul.f32 %v4832_v56, %v3387_v13 }
 0x802   : > { %v3389_v41 = vmul.f32 0.5, %v3388_v40 }
 0x804   : > { %v3390_v39 = vsub.f32 1.5, %v3389_v41 }
 0x805   : > { %v3337_v12 = vpop.xlane.xlu0 %3336 }
 0x806   : > { %v3391_v20 = vmul.f32 %v4832_v56, %v3390_v39  ;;  %4833 = vrsqrt.f32 %v3337_v12  ;;  %3351 = vadd.xlane.f32.xlu1 %v3350_v44  ;;  %v7496_v56 = vld [vmem:[#allocation52_spill] sm:$0xff]  ;;  %vm3381_vm3 = vcmp.eq.f32.partialorder %v3337_v12, inf  ;;  %v3384_v59 = vand.u32 2147483648, %v3337_v12 }
 0x807   : > { %v3495_v13 = vmul.f32 %v3485_v51, %v7496_v56  ;;  %vm3383_vm14 = vcmp.eq.f32.partialorder %v3337_v12, 0.0  ;;  %4835 = vrcp.f32 %v3502_v61 }
 0x808   : > { %v3392_v47 = vmul.f32 %v3391_v20, %v3340_v29 }
 0x80a   : > { %v3394_v34 = vsel %vm3393_vm1, %v3340_v29, %v3392_v47  ;;  %v6544_v29 = vmax.f32 %v3495_v13, 1e-08  ;;  %v7498_v47 = vld [vmem:[#allocation54_spill] sm:$0xff]  ;;  %vm3517_vm1 = vweird.f32 %v3502_v61 }
 0x80b   : > { %v3397_v0 = vsel %vm3395_vm13, %v3396_v17, %v3394_v34 }
 0x80c   : > { %v4834_v3 = vpop.eup %4833  ;;  %v3484_v37 = vperm.slane %v3397_v0, 0  ;;  %4837 = vrcp.f32 %v6544_v29 }
 0x80d   : > { %v3375_v42 = vmul.f32 %v4834_v3, %v3337_v12 }
 0x80e   : > { %v3494_v8 = vmul.f32 %v3484_v37, %v7497_v53 }
 0x80f   : > { %v3376_v57 = vmul.f32 %v4834_v3, %v3375_v42 }
 0x810   : > { %v6546_v1 = vmax.f32 %v3494_v8, 1e-08 }
 0x811   : > { %v3377_v43 = vmul.f32 0.5, %v3376_v57 }
 0x812   : > { %4839 = vrcp.f32 %v6546_v1  ;;  %v3553_v13 = vand.u32 2147483648, %v6546_v1  ;;  %vm3547_vm10 = vweird.f32 %v6546_v1  ;;  %v3551_v53 = vand.u32 2147483647, %v6546_v1 }
 0x813   : > { %v3378_v31 = vsub.f32 1.5, %v3377_v43 }
 0x815   : > { %v3379_v60 = vmul.f32 %v4834_v3, %v3378_v31  ;;  %v4836_v3 = vpop.eup %4835  ;;  %v3521_v31 = vand.u32 2147483647, %v3502_v61 }
 0x816   : > { %v4838_v32 = vpop.eup %4837  ;;  %v3513_v55 = vmul.f32 %v4836_v3, %v3502_v61  ;;  %vm3518_vm5 = vweird.f32 %v4836_v3 }
 0x817   : > { %v3380_v40 = vmul.f32 %v3379_v60, %v3337_v12  ;;  %v3558_v42 = vmul.f32 %v4838_v32, %v6544_v29  ;;  %vm3563_vm11 = vweird.f32 %v4838_v32 }
 0x819   : > { %v3382_v41 = vsel %vm3381_vm3, %v3337_v12, %v3380_v40  ;;  %v4840_v12 = vpop.eup %4839  ;;  %v3559_v63 = vsub.f32 1.0, %v3558_v42  ;;  %vm6557_vm3 = vmor %vm3517_vm1, %vm3518_vm5  ;;  %v3568_v40 = vand.u32 2147483648, %v6544_v29  ;;  %vm3522_vm1 = vcmp.eq.f32.partialorder %v3521_v31, 8.507059e+37 }
 0x81a   : > { %v3385_v39 = vsel %vm3383_vm14, %v3384_v59, %v3382_v41  ;;  %v3543_v34 = vmul.f32 %v4840_v12, %v6546_v1  ;;  %vm3548_vm13 = vweird.f32 %v4840_v12  ;;  %vm3562_vm14 = vweird.f32 %v6544_v29 }
 0x81b   : > { %v3483_v44 = vperm.slane %v3385_v39, 0  ;;  %v3560_v43 = vmul.f32 %v4838_v32, %v3559_v63  ;;  %vm6565_vm9 = vmor %vm3562_vm14, %vm3563_vm11  ;;  %v3566_v39 = vand.u32 2147483647, %v6544_v29 }
 0x81c   : > { %vm6572_vm5 = vmor %vm3547_vm10, %vm3548_vm13 }
 0x81d   : > { %v3493_v4 = vmul.f32 %v3483_v44, %v7498_v47  ;;  %v3561_v60 = vadd.f32 %v4838_v32, %v3560_v43  ;;  %v3524_v44 = vor.u32 1.1754944e-38, %v3523_v36  ;;  %vm3567_vm13 = vcmp.eq.f32.partialorder %v3566_v39, 8.507059e+37 }
 0x81f   : > { %v3503_v52 = vmax.f32 %v3493_v4, 1e-08  ;;  %v3554_v4 = vor.u32 1.1754944e-38, %v3553_v13 }
 0x820   : > { %v3125_v20 = vpop.permute.xlu2 %3124 }
 0x821   : > { %v3130_v10 = vadd.f32 %v3125_v20, %v6497_v54  ;;  %v3131_v35 = vadd.f32 %v3125_v20, %v6458_v49  ;;  %v3514_v49 = vsub.f32 1.0, %v3513_v55  ;;  %v3544_v54 = vsub.f32 1.0, %v3543_v34 }
 0x822   : > { %v3538_v20 = vand.u32 2147483648, %v3503_v52  ;;  %v3536_v47 = vand.u32 2147483647, %v3503_v52  ;;  %v3569_v55 = vor.u32 1.1754944e-38, %v3568_v40  ;;  %vm3532_vm10 = vweird.f32 %v3503_v52 }
 0x823   : > { %4841 = vtanh.f32 %v3130_v10  ;;  %v3515_v57 = vmul.f32 %v4836_v3, %v3514_v49  ;;  %v3545_v25 = vmul.f32 %v4840_v12, %v3544_v54  ;;  %v3565_v10 = vsel %vm6565_vm9, %v4838_v32, %v3561_v60 }
 0x824   : > { %4843 = vtanh.f32 %v3131_v35  ;;  %v3539_v29 = vor.u32 1.1754944e-38, %v3538_v20  ;;  %vm7505_vm9 = vcmask 122880  }
 0x825   : > { %4845 = vrcp.f32 %v3503_v52  ;;  %v3516_v37 = vadd.f32 %v4836_v3, %v3515_v57  ;;  %v3546_v23 = vadd.f32 %v4840_v12, %v3545_v25  ;;  %v3346_v25 = vpop.xlane.xlu0 %3345  ;;  %v3356_v60 = vsel %vm7505_vm9, %v6528_v15, 0.0 }
 0x826   : > { %4847 = vrsqrt.f32 %v3346_v25  ;;  %v3420_v59 = vand.u32 2147483648, %v3346_v25 }
 0x827   : > { %v3520_v61 = vsel %vm6557_vm3, %v4836_v3, %v3516_v37  ;;  %v3550_v1 = vsel %vm6572_vm5, %v4840_v12, %v3546_v23  ;;  %vm3552_vm3 = vcmp.eq.f32.partialorder %v3551_v53, 8.507059e+37  ;;  %vm3537_vm5 = vcmp.eq.f32.partialorder %v3536_v47, 8.507059e+37  ;;  %v7507_v47 = vld [vmem:[#allocation55_spill] sm:$0xff] }
 0x828   : > { %v3525_v3 = vsel %vm3522_vm1, %v3524_v44, %v3520_v61  ;;  %v3555_v42 = vsel %vm3552_vm3, %v3554_v4, %v3550_v1  ;;  %v4949_v61 = vmov 33   ;;  %vm7508_vm3 = vmmov %vm7505_vm9 }
 0x829   : > { %v4842_v46 = vpop.eup %4841  ;;  %v3556_v32 = vmul.f32 %v3555_v42, %v6487_v28  ;;  %4685 = vset.pattern.permute.xlu2 %v4949_v61  ;;  %4684 = vset.pattern.permute.xlu0 %v4949_v61 }
 0x82a   : > { %v4844_v17 = vpop.eup %4843  ;;  %3144 = vrot.lane.b32.xlu0 %v4842_v46, %s4948_s16  ;;  %v3570_v46 = vsel %vm3567_vm13, %v3569_v55, %v3565_v10  ;;  %v7506_v10 = vld [vmem:[#allocation49_spill] sm:$0xff] }
 0x82b   : > { %3146 = vrot.lane.b32.xlu2 %v4844_v17, %s4948_s16  ;;  %v4846_v0 = vpop.eup %4845  ;;  %v3526_v17 = vmul.f32 %v3525_v3, %v6455_v19  ;;  %v3571_v63 = vmul.f32 %v3570_v46, %v6480_v33  ;;  %v3682_v43 = vperm.slane %v3556_v32, %v6037_v14  ;;  %v3359_v32 = vsel %vm7508_vm3, %v6523_v16, 0.0 }
 0x82c   : > { %v3528_v51 = vmul.f32 %v4846_v0, %v3503_v52  ;;  %vm3533_vm11 = vweird.f32 %v4846_v0 }
 0x82d   : > { %vm3534_vm14 = vmor %vm3532_vm10, %vm3533_vm11  ;;  %v3680_v57 = vperm.slane %v3526_v17, %v6037_v14 }
 0x82e   : > { %v3529_v41 = vsub.f32 1.0, %v3528_v51  ;;  %v3683_v51 = vperm.slane %v3571_v63, %v6037_v14 }
 0x830   : > { %v3530_v35 = vmul.f32 %v4846_v0, %v3529_v41 }
 0x832   : > { %v3531_v34 = vadd.f32 %v4846_v0, %v3530_v35 }
 0x834   : > { %v3535_v12 = vsel %vm3534_vm14, %v4846_v0, %v3531_v34 }
 0x835   : > { %v3540_v49 = vsel %vm3537_vm5, %v3539_v29, %v3535_v12 }
 0x836   : > { %v3541_v54 = vmul.f32 %v3540_v49, %v6475_v58  ;;  %v4848_v58 = vpop.eup %4847 }
 0x837   : > { %v3411_v37 = vmul.f32 %v4848_v58, %v3346_v25 }
 0x838   : > { %v3681_v52 = vperm.slane %v3541_v54, %v6037_v14 }
 0x839   : > { %v3412_v23 = vmul.f32 %v4848_v58, %v3411_v37 }
 0x83a   : > { %v3690_v19 = vsel %vm2632_vm7, %v3681_v52, %v3680_v57 }
 0x83b   : > { %v3691_v0 = vsel %vm2634_vm4, %v3682_v43, %v3690_v19  ;;  %v3413_v56 = vmul.f32 0.5, %v3412_v23  ;;  %vm3417_vm4 = vcmp.eq.f32.partialorder %v3346_v25, inf }
 0x83c   : > { %v6592_v28 = vsel %vm2636_vm0, %v3683_v51, %v3691_v0  ;;  %vm3419_vm0 = vcmp.eq.f32.partialorder %v3346_v25, 0.0 }
 0x83d   : > { %v3414_v8 = vsub.f32 1.5, %v3413_v56 }
 0x83f   : > { %v3415_v40 = vmul.f32 %v4848_v58, %v3414_v8 }
 0x84e   : > { %v3127_v33 = vpop.permute.xlu1 %3126 }
 0x84f   : > { %v3132_v31 = vadd.f32 %v3127_v33, %v6502_v2  ;;  %v3133_v36 = vadd.f32 %v3127_v33, %v6465_v45  ;;  %v3416_v45 = vmul.f32 %v3415_v40, %v3346_v25 }
 0x851   : > { %4849 = vtanh.f32 %v3132_v31  ;;  %v3418_v41 = vsel %vm3417_vm4, %v3346_v25, %v3416_v45  ;;  %v3138_v45 = vsub.f32 1.0, %v6507_v18 }
 0x852   : > { %4851 = vtanh.f32 %v3133_v36  ;;  %v3421_v39 = vsel %vm3419_vm0, %v3420_v59, %v3418_v41 }
 0x853   : > { %v3486_v20 = vperm.slane %v3421_v39, 0 }
 0x854   : > { %3357 = vadd.xlane.f32.xlu2 %v3356_v60 }
 0x855   : > { %v3496_v4 = vmul.f32 %v3486_v20, %v7507_v47  ;;  %v3166_v47 = vmul.f32 %v6395_v5, %v6516_v7 }
 0x857   : > { %v4850_v13 = vpop.eup %4849  ;;  %v3506_v34 = vmax.f32 %v3496_v4, 1e-08 }
 0x858   : > { %v4852_v53 = vpop.eup %4851  ;;  %3148 = vrot.lane.b32.xlu1 %v4850_v13, %s4948_s16 }
 0x859   : > { %3150 = vrot.lane.b32.xlu0 %v4852_v53, %s4948_s16  ;;  %v3583_v51 = vand.u32 2147483648, %v3506_v34  ;;  %vm3577_vm13 = vweird.f32 %v3506_v34  ;;  %v3581_v0 = vand.u32 2147483647, %v3506_v34 }
 0x85b   : > { %v3584_v37 = vor.u32 1.1754944e-38, %v3583_v51  ;;  %vm3582_vm5 = vcmp.eq.f32.partialorder %v3581_v0, 8.507059e+37 }
 0x862   : > { %v3349_v2 = vpop.xlane.xlu2 %3348 }
 0x863   : > { %4853 = vrsqrt.f32 %v3349_v2  ;;  %vm3429_vm1 = vcmp.eq.f32.partialorder %v3349_v2, inf  ;;  %v3432_v46 = vand.u32 2147483648, %v3349_v2  ;;  %vm3431_vm11 = vcmp.eq.f32.partialorder %v3349_v2, 0.0 }
 0x864   : > { %4855 = vrcp.f32 %v3506_v34 }
 0x869   : > { %v4854_v15 = vpop.eup %4853 }
 0x86a   : > { %v3423_v44 = vmul.f32 %v4854_v15, %v3349_v2  ;;  %v4856_v49 = vpop.eup %4855 }
 0x86b   : > { %v3573_v63 = vmul.f32 %v4856_v49, %v3506_v34  ;;  %vm3578_vm10 = vweird.f32 %v4856_v49  ;;  %v3173_v34 = vld [vmem:[%s7509_s22 + $0x20] sm:$0xff] }
 0x86c   : > { %v3424_v1 = vmul.f32 %v4854_v15, %v3423_v44  ;;  %3667 = vperm.xlu2 %4685, %v7506_v10   ;;  %vm3579_vm14 = vmor %vm3577_vm13, %vm3578_vm10 }
 0x86d   : > { %v3574_v52 = vsub.f32 1.0, %v3573_v63 }
 0x86e   : > { %v3425_v35 = vmul.f32 0.5, %v3424_v1 }
 0x86f   : > { %v3575_v25 = vmul.f32 %v4856_v49, %v3574_v52 }
 0x870   : > { %v3426_v3 = vsub.f32 1.5, %v3425_v35 }
 0x871   : > { %v3576_v43 = vadd.f32 %v4856_v49, %v3575_v25 }
 0x872   : > { %v3427_v55 = vmul.f32 %v4854_v15, %v3426_v3 }
 0x873   : > { %v3580_v58 = vsel %vm3579_vm14, %v4856_v49, %v3576_v43 }
 0x874   : > { %v3428_v42 = vmul.f32 %v3427_v55, %v3349_v2  ;;  %4687 = vset.pattern.permute.xlu2 %v6316_v26  ;;  %v3585_v16 = vsel %vm3582_vm5, %v3584_v37, %v3580_v58  ;;  %v7510_v55 = vld [vmem:[#allocation50_spill] sm:$0xff] }
 0x875   : > { %v3586_v60 = vmul.f32 %v3585_v16, %v6460_v27  ;;  %v3165_v27 = vmul.f32 %v6359_v11, %v6507_v18  ;;  %v3353_v11 = vsel %vm7508_vm3, %v6505_v6, 0.0  ;;  %v3139_v18 = vsub.f32 1.0, %v6516_v7  ;;  %v3174_v6 = vld [vmem:[%s7509_s22 + $0x28] sm:$0xff] }
 0x876   : > { %v3430_v29 = vsel %vm3429_vm1, %v3349_v2, %v3428_v42  ;;  %vm3152_vm1 = vcmask 654336   ;;  %3199 = vmatpush.msra.mxu1 %v3174_v6  ;;  %v3172_v42 = vld [vmem:[%s7509_s22 + $0x18] sm:$0xff] }
 0x877   : > { %v3433_v17 = vsel %vm3431_vm11, %v3432_v46, %v3430_v29  ;;  %v3684_v40 = vperm.slane %v3586_v60, %v6037_v14  ;;  %v3171_v29 = vld [vmem:[%s7509_s22 + $0x10] sm:$0xff]  ;;  %v3170_v46 = vld [vmem:[%s7509_s22 + $0x8] sm:$0xff] }
 0x878   : > { %v3487_v12 = vperm.slane %v3433_v17, 0  ;;  %3200 = vmatpush.msra.mxu1 %v3173_v34  ;;  %v3169_v17 = vld [vmem:[%s7509_s22] sm:$0xff] }
 0x879   : > { %v3693_v44 = vsel %vm2638_vm6, %v3684_v40, %v6592_v28  ;;  %vm4384_vm6 = vcmask 386048  }
 0x87a   : > { %v3497_v54 = vmul.f32 %v3487_v12, %v6015_v9  ;;  %3201 = vmatpush.msra.mxu1 %v3172_v42 }
 0x87c   : > { %v3507_v57 = vmax.f32 %v3497_v54, 1e-08  ;;  %3202 = vmatpush.msra.mxu1 %v3171_v29 }
 0x87e   : > { %4857 = vrcp.f32 %v3507_v57  ;;  %v3598_v9 = vand.u32 2147483648, %v3507_v57  ;;  %v3596_v23 = vand.u32 2147483647, %v3507_v57  ;;  %vm3592_vm4 = vweird.f32 %v3507_v57  ;;  %3203 = vmatpush.msra.mxu1 %v3170_v46 }
 0x880   : > { %v3599_v13 = vor.u32 1.1754944e-38, %v3598_v9  ;;  %vm3597_vm11 = vcmp.eq.f32.partialorder %v3596_v23, 8.507059e+37  ;;  %3204 = vmatpush.msra.mxu1 %v3169_v17 }
 0x882   : > { %3360 = vadd.xlane.f32.xlu1 %v3359_v32 }
 0x884   : > { %v4858_v19 = vpop.eup %4857 }
 0x885   : > { %v3588_v33 = vmul.f32 %v4858_v19, %v3507_v57  ;;  %vm3593_vm9 = vweird.f32 %v4858_v19  ;;  %v3147_v61 = vpop.permute.xlu2 %3146 }
 0x886   : > { %vm3594_vm0 = vmor %vm3592_vm4, %vm3593_vm9 }
 0x887   : > { %v3589_v31 = vsub.f32 1.0, %v3588_v33 }
 0x889   : > { %v3590_v36 = vmul.f32 %v4858_v19, %v3589_v31 }
 0x88b   : > { %v3591_v56 = vadd.f32 %v4858_v19, %v3590_v36 }
 0x88d   : > { %v3595_v53 = vsel %vm3594_vm0, %v4858_v19, %v3591_v56 }
 0x88e   : > { %v3600_v8 = vsel %vm3597_vm11, %v3599_v13, %v3595_v53 }
 0x88f   : > { %v3601_v41 = vmul.f32 %v3600_v8, %v6491_v24  ;;  %v6620_v24 = vpop.xlane.xlu1 %3351 }
 0x890   : > { %4859 = vrsqrt.f32 %v6620_v24  ;;  %v3444_v13 = vand.u32 2147483648, %v6620_v24  ;;  %vm3443_vm10 = vcmp.eq.f32.partialorder %v6620_v24, 0.0 }
 0x891   : > { %v3685_v39 = vperm.slane %v3601_v41, %v6037_v14 }
 0x893   : > { %v6617_v1 = vsel %vm2640_vm15, %v3685_v39, %v3693_v44  ;;  %vm3441_vm15 = vcmp.eq.f32.partialorder %v6620_v24, inf }
 0x896   : > { %v4860_v12 = vpop.eup %4859 }
 0x897   : > { %v3435_v49 = vmul.f32 %v4860_v12, %v6620_v24 }
 0x899   : > { %v3436_v54 = vmul.f32 %v4860_v12, %v3435_v49 }
 0x89b   : > { %v3437_v25 = vmul.f32 0.5, %v3436_v54 }
 0x89c   : > { %v3145_v2 = vpop.permute.xlu0 %3144 }
 0x89d   : > { %v3153_v59 = vsel %vm3152_vm1, %v3145_v2, %v3147_v61  ;;  %v3438_v19 = vsub.f32 1.5, %v3437_v25 }
 0x89e   : > { %v3157_v15 = vmul.f32 %v3153_v59, %v3138_v45 }
 0x89f   : > { %v3439_v33 = vmul.f32 %v4860_v12, %v3438_v19 }
 0x8a0   : > { %v3167_v20 = vadd.f32 %v3165_v27, %v3157_v15  ;;  %v7511_v27 = vld [vmem:[#allocation56_spill] sm:$0xff] }
 0x8a1   : > { %v3440_v9 = vmul.f32 %v3439_v33, %v6620_v24 }
 0x8a2   : > { %3181 = vrot.lane.b32.xlu0 %v3167_v20, %s4948_s16 }
 0x8a3   : > { %v3442_v60 = vsel %vm3441_vm15, %v6620_v24, %v3440_v9 }
 0x8a4   : > { %v3445_v8 = vsel %vm3443_vm10, %v3444_v13, %v3442_v60 }
 0x8a5   : > { %v3488_v61 = vperm.slane %v3445_v8, 0 }
 0x8a7   : > { %v3498_v39 = vmul.f32 %v3488_v61, %v7511_v27 }
 0x8a9   : > { %v3508_v24 = vmax.f32 %v3498_v39, 1e-08 }
 0x8c7   : > { %v3358_v7 = vpop.xlane.xlu2 %3357 }
 0x8c8   : > { %vm3465_vm13 = vcmp.eq.f32.partialorder %v3358_v7, inf  ;;  %v3468_v59 = vand.u32 2147483648, %v3358_v7  ;;  %vm3467_vm5 = vcmp.eq.f32.partialorder %v3358_v7, 0.0 }
 0x8ca   : > { %v3149_v10 = vpop.permute.xlu1 %3148 }
 0x8cb   : > { %v3151_v35 = vpop.permute.xlu0 %3150 }
 0x8cc   : > { %v3154_v28 = vsel %vm3152_vm1, %v3149_v10, %v3151_v35  ;;  %3354 = vadd.xlane.f32.xlu0 %v3353_v11  ;;  %vm3607_vm1 = vweird.f32 %v3508_v24 }
 0x8cd   : > { %v3158_v4 = vmul.f32 %v3154_v28, %v3139_v18 }
 0x8cf   : > { %v3168_v3 = vadd.f32 %v3166_v47, %v3158_v4  ;;  %v6641_v57 = vpop.permute.xlu2 %3667 }
 0x8d1   : > { %3183 = vrot.lane.b32.xlu2 %v3168_v3, %s4948_s16  ;;  %s7547_s16 = sld [smem:[#allocation10_spill]] }
 0x8e0   : > { %3663 = vperm.xlu0 %4684, %v7510_v55  }
 0x8e8   : > { %4686 = vset.pattern.permute.xlu0 %v6316_v26 }
 0x8f5   : > { %v3361_v26 = vpop.xlane.xlu1 %3360 }
 0x8f6   : > { %4861 = vrsqrt.f32 %v3361_v26  ;;  %v3480_v2 = vand.u32 2147483648, %v3361_v26  ;;  %vm3479_vm14 = vcmp.eq.f32.partialorder %v3361_v26, 0.0 }
 0x8f7   : > { %4863 = vrsqrt.f32 %v3358_v7 }
 0x8fc   : > { %v4862_v32 = vpop.eup %4861 }
 0x8fd   : > { %v4864_v63 = vpop.eup %4863  ;;  %v3471_v52 = vmul.f32 %v4862_v32, %v3361_v26 }
 0x8fe   : > { %v3459_v43 = vmul.f32 %v4864_v63, %v3358_v7 }
 0x8ff   : > { %v3472_v51 = vmul.f32 %v4862_v32, %v3471_v52 }
 0x900   : > { %v3460_v0 = vmul.f32 %v4864_v63, %v3459_v43 }
 0x901   : > { %v3473_v58 = vmul.f32 0.5, %v3472_v51 }
 0x902   : > { %v3461_v16 = vmul.f32 0.5, %v3460_v0  ;;  %v3613_v0 = vand.u32 2147483648, %v3508_v24 }
 0x903   : > { %v3474_v31 = vsub.f32 1.5, %v3473_v58  ;;  %v3611_v58 = vand.u32 2147483647, %v3508_v24 }
 0x904   : > { %v3462_v36 = vsub.f32 1.5, %v3461_v16  ;;  %v3614_v9 = vor.u32 1.1754944e-38, %v3613_v0 }
 0x905   : > { %v3475_v23 = vmul.f32 %v4862_v32, %v3474_v31  ;;  %vm3612_vm3 = vcmp.eq.f32.partialorder %v3611_v58, 8.507059e+37 }
 0x906   : > { %v3463_v56 = vmul.f32 %v4864_v63, %v3462_v36 }
 0x907   : > { %v3476_v53 = vmul.f32 %v3475_v23, %v3361_v26 }
 0x908   : > { %v3464_v40 = vmul.f32 %v3463_v56, %v3358_v7 }
 0x90a   : > { %v3466_v41 = vsel %vm3465_vm13, %v3358_v7, %v3464_v40 }
 0x90b   : > { %v3469_v20 = vsel %vm3467_vm5, %v3468_v59, %v3466_v41 }
 0x90c   : > { %v3490_v11 = vperm.slane %v3469_v20, 0 }
 0x90e   : > { %v3500_v28 = vmul.f32 %v3490_v11, %v6302_v62 }
 0x910   : > { %v6654_v55 = vmax.f32 %v3500_v28, 1e-08 }
 0x912   : > { %v3641_v40 = vand.u32 2147483647, %v6654_v55  ;;  %v3643_v61 = vand.u32 2147483648, %v6654_v55 }
 0x914   : > { %v3182_v5 = vpop.permute.xlu0 %3181 }
 0x915   : > { %4383 = vst.msk [vmem:[#allocation5] sm:$0xff] %vm3011_vm2, %v3182_v5  ;;  %4592 = vmatmul.msk.f32.vlgmr.msra.gmra.mxu1 %vm3011_vm2, %v3182_v5 }
 0x92b   : > { %v3184_v37 = vpop.permute.xlu2 %3183 }
 0x92c   : > { %4385 = vst.msk [vmem:[#allocation5 + $0x8] sm:$0x3] %vm4384_vm6, %v3184_v37  ;;  %4593 = vmatmul.msk.f32.gmra.mxu1 %vm3011_vm2, %v3184_v37  ;;  %vm3477_vm2 = vcmp.eq.f32.partialorder %v3361_v26, inf }
 0x92d   : > { %v3478_v45 = vsel %vm3477_vm2, %v3361_v26, %v3476_v53  ;;  %vm3637_vm2 = vweird.f32 %v6654_v55 }
 0x92e   : > { %v3481_v15 = vsel %vm3479_vm14, %v3480_v2, %v3478_v45  ;;  %v7521_v45 = vld [vmem:[#allocation25_spill] sm:$0xff] }
 0x92f   : > { %v3491_v10 = vperm.slane %v3481_v15, 0 }
 0x931   : > { %v3501_v18 = vmul.f32 %v3491_v10, %v6187_v38 }
 0x933   : > { %v6652_v4 = vmax.f32 %v3501_v18, 1e-08 }
 0x935   : > { %v3658_v60 = vand.u32 2147483648, %v6652_v4  ;;  %vm3652_vm10 = vweird.f32 %v6652_v4  ;;  %v3656_v53 = vand.u32 2147483647, %v6652_v4 }
 0x937   : > { %v3659_v39 = vor.u32 1.1754944e-38, %v3658_v60 }
 0x93f   : > { %v3355_v44 = vpop.xlane.xlu0 %3354 }
 0x940   : > { %4865 = vrsqrt.f32 %v3355_v44  ;;  %vm3453_vm9 = vcmp.eq.f32.partialorder %v3355_v44, inf  ;;  %v3456_v17 = vand.u32 2147483648, %v3355_v44  ;;  %vm3455_vm4 = vcmp.eq.f32.partialorder %v3355_v44, 0.0 }
 0x941   : > { %4867 = vrcp.f32 %v3508_v24 }
 0x942   : > { %4869 = vrcp.f32 %v6652_v4 }
 0x943   : > { %4871 = vrcp.f32 %v6654_v55 }
 0x946   : > { %v4866_v35 = vpop.eup %4865 }
 0x947   : > { %v3447_v47 = vmul.f32 %v4866_v35, %v3355_v44  ;;  %v4868_v34 = vpop.eup %4867 }
 0x948   : > { %v3603_v46 = vmul.f32 %v4868_v34, %v3508_v24  ;;  %v4870_v5 = vpop.eup %4869  ;;  %vm3608_vm0 = vweird.f32 %v4868_v34  ;;  %v3644_v24 = vor.u32 1.1754944e-38, %v3643_v61 }
 0x949   : > { %v3448_v3 = vmul.f32 %v4866_v35, %v3447_v47  ;;  %v4872_v12 = vpop.eup %4871  ;;  %v3648_v32 = vmul.f32 %v4870_v5, %v6652_v4  ;;  %vm3609_vm11 = vmor %vm3607_vm1, %vm3608_vm0  ;;  %vm3653_vm6 = vweird.f32 %v4870_v5 }
 0x94a   : > { %v3604_v7 = vsub.f32 1.0, %v3603_v46  ;;  %v3633_v52 = vmul.f32 %v4872_v12, %v6654_v55  ;;  %vm3638_vm15 = vweird.f32 %v4872_v12  ;;  %vm6667_vm13 = vmor %vm3652_vm10, %vm3653_vm6  ;;  %vm7517_vm6 = vcmask 58368  }
 0x94b   : > { %v3449_v6 = vmul.f32 0.5, %v3448_v3  ;;  %v3649_v43 = vsub.f32 1.0, %v3648_v32  ;;  %vm6675_vm5 = vmor %vm3637_vm2, %vm3638_vm15  ;;  %vm4367_vm15 = vcmask 9216   ;;  %vm7519_vm10 = vcmask 1041408  }
 0x94c   : > { %v3605_v63 = vmul.f32 %v4868_v34, %v3604_v7  ;;  %v3634_v19 = vsub.f32 1.0, %v3633_v52 }
 0x94d   : > { %v3450_v42 = vsub.f32 1.5, %v3449_v6  ;;  %v3650_v37 = vmul.f32 %v4870_v5, %v3649_v43 }
 0x94e   : > { %v3606_v51 = vadd.f32 %v4868_v34, %v3605_v63  ;;  %v3635_v16 = vmul.f32 %v4872_v12, %v3634_v19 }
 0x94f   : > { %v3451_v29 = vmul.f32 %v4866_v35, %v3450_v42  ;;  %v3651_v36 = vadd.f32 %v4870_v5, %v3650_v37 }
 0x950   : > { %v3610_v33 = vsel %vm3609_vm11, %v4868_v34, %v3606_v51  ;;  %v3636_v13 = vadd.f32 %v4872_v12, %v3635_v16  ;;  %vm3642_vm11 = vcmp.eq.f32.partialorder %v3641_v40, 8.507059e+37 }
 0x951   : > { %v3452_v38 = vmul.f32 %v3451_v29, %v3355_v44  ;;  %v3615_v23 = vsel %vm3612_vm3, %v3614_v9, %v3610_v33  ;;  %v3655_v59 = vsel %vm6667_vm13, %v4870_v5, %v3651_v36  ;;  %vm7516_vm3 = vcmask 1047559  }
 0x952   : > { %v3616_v15 = vmul.f32 %v3615_v23, %v6485_v22  ;;  %v3640_v20 = vsel %vm6675_vm5, %v4872_v12, %v3636_v13  ;;  %v3664_v42 = vpop.permute.xlu0 %3663 }
 0x953   : > { %v3454_v62 = vsel %vm3453_vm9, %v3355_v44, %v3452_v38  ;;  %v3645_v28 = vsel %vm3642_vm11, %v3644_v24, %v3640_v20  ;;  %v7524_v24 = vrot.slane %v7521_v45, 5 }
 0x954   : > { %v3457_v26 = vsel %vm3455_vm4, %v3456_v17, %v3454_v62  ;;  %vm3657_vm4 = vcmp.eq.f32.partialorder %v3656_v53, 8.507059e+37  ;;  %v3686_v35 = vperm.slane %v3616_v15, %v6037_v14  ;;  %v3646_v55 = vmul.f32 %v3645_v28, %v6494_v48 }
 0x955   : > { %v3489_v49 = vperm.slane %v3457_v26, 0  ;;  %v3660_v11 = vsel %vm3657_vm4, %v3659_v39, %v3655_v59  ;;  %vm3895_vm4 = vcmp.gt.f32.partialorder %v7524_v24, 0.5  ;;  %v7536_v24 = vmov 3  }
 0x956   : > { %v3661_v4 = vmul.f32 %v3660_v11, %v6489_v30  ;;  %v3695_v6 = vsel %vm2642_vm12, %v3686_v35, %v6617_v1  ;;  %v4710_v1 = vld [vmem:[%s5106_s27] ss:$0 sm:$0xff]  ;;  %vm7518_vm12 = vcmask 15360  }
 0x957   : > { %v3499_v54 = vmul.f32 %v3489_v49, %v6078_v21 }
 0x958   : > { %v3689_v29 = vperm.slane %v3661_v4, %v6037_v14 }
 0x959   : > { %v3509_v25 = vmax.f32 %v3499_v54, 1e-08 }
 0x95b   : > { %4873 = vrcp.f32 %v3509_v25  ;;  %v3628_v8 = vand.u32 2147483648, %v3509_v25  ;;  %v3626_v41 = vand.u32 2147483647, %v3509_v25  ;;  %vm3622_vm9 = vweird.f32 %v3509_v25 }
 0x95d   : > { %v3629_v10 = vor.u32 1.1754944e-38, %v3628_v8  ;;  %vm3627_vm1 = vcmp.eq.f32.partialorder %v3626_v41, 8.507059e+37  ;;  %v7523_v41 = vmov 0  }
 0x961   : > { %v4874_v31 = vpop.eup %4873 }
 0x962   : > { %v3618_v21 = vmul.f32 %v4874_v31, %v3509_v25  ;;  %vm3623_vm14 = vweird.f32 %v4874_v31 }
 0x963   : > { %vm3624_vm0 = vmor %vm3622_vm9, %vm3623_vm14 }
 0x964   : > { %v3619_v56 = vsub.f32 1.0, %v3618_v21 }
 0x966   : > { %v3620_v2 = vmul.f32 %v4874_v31, %v3619_v56 }
 0x968   : > { %v3621_v44 = vadd.f32 %v4874_v31, %v3620_v2  ;;  %v7522_v2 = vrot.slane %v7521_v45, 2 }
 0x96a   : > { %v3625_v18 = vsel %vm3624_vm0, %v4874_v31, %v3621_v44  ;;  %vm3892_vm5 = vcmp.gt.f32.partialorder %v7522_v2, 0.5  ;;  %v7534_v2 = vmov 2  }
 0x96b   : > { %v3630_v22 = vsel %vm3627_vm1, %v3629_v10, %v3625_v18  ;;  %v3902_v59 = vsel %vm3892_vm5, 1, %v7523_v41  ;;  %v3905_v18 = vsel %vm3895_vm4, 1, %v7523_v41 }
 0x96c   : > { %v3631_v47 = vmul.f32 %v3630_v22, %v6462_v50  ;;  %v3688_v50 = vperm.slane %v3646_v55, %v6037_v14  ;;  %v6706_v27 = vperm.slane %v3902_v59, 0  ;;  %v6713_v28 = vperm.slane %v3905_v18, 0  ;;  %v4891_v55 = vld [vmem:[%s7385_s1 + $0x8] sm:$0x3]  ;;  %v7535_v59 = vld [vmem:[#allocation45_spill] sm:$0xff] }
 0x96e   : > { %v3687_v3 = vperm.slane %v3631_v47, %v6037_v14  ;;  %v3697_v30 = vsel %vm2632_vm7, %v3689_v29, %v3688_v50  ;;  %vm7520_vm7 = vmmov %vm7517_vm6  ;;  %v4892_v50 = vld [vmem:[%s7385_s1] sm:$0xff] }
 0x96f   : > { %v3701_v48 = vmul.f32 %v3697_v30, %v6641_v57 }
 0x970   : > { %v3696_v34 = vsel %vm7516_vm3, %v3687_v3, %v3695_v6  ;;  %vm3898_vm3 = vcmp.gt.f32.partialorder %v4891_v55, 0.5 }
 0x971   : > { %v3700_v46 = vmul.f32 %v3696_v34, %v3664_v42  ;;  %v3705_v17 = vsel %vm7517_vm6, %v3701_v48, -inf  ;;  %v3908_v34 = vsel %vm3898_vm3, 1, %v7523_v41  ;;  %vm3890_vm6 = vcmp.gt.f32.partialorder %v4892_v50, 0.5 }
 0x972   : > { %v6718_v42 = vperm.slane %v3908_v34, 0 }
 0x973   : > { %v3702_v38 = vsel %vm2651_vm8, %v3700_v46, -inf }
 0x974   : > { %3703 = vmax.xlane.f32.xlu1 %v3702_v38  ;;  %v3900_v38 = vsel %vm3890_vm6, 1, %v7523_v41 }
 0x975   : > { %v6723_v30 = vperm.slane %v3900_v38, 0 }
 0x97c   : > { %3706 = vmax.xlane.f32.xlu1 %v3705_v17  ;;  %v7525_v17 = vrot.slane %v7521_v45, 4 }
 0x992   : > { %v3206_v5 = vpop.f32.mrf.mxu1 }
 0x993   : > { %v3207_v62 = vadd.f32 %v4710_v1, %v3206_v5 }
 0x995   : > { %4366 = vst.msk [vmem:[%s5132_s7] sm:$0xff] %vm7518_vm12, %v3207_v62  ;;  %vm3894_vm12 = vcmp.gt.f32.partialorder %v7525_v17, 0.5 }
 0x996   : > { %v3904_v5 = vsel %vm3894_vm12, 1, %v7523_v41 }
 0x9a9   : > { %v3209_v26 = vpop.f32.mrf.mxu1 }
 0x9aa   : > { %v3210_v7 = vadd.f32 %v4710_v1, %v3209_v26  ;;  %v7526_v1 = vrot.slane %v7521_v45, 1 }
 0x9ac   : > { %4368 = vst.msk [vmem:[%s5132_s7 + $0x8] sm:$0x3] %vm4367_vm15, %v3210_v7  ;;  %4594 = vmatpush.msk.msra.mxu2 %vm7519_vm10, %v3210_v7  ;;  %vm3891_vm10 = vcmp.gt.f32.partialorder %v7526_v1, 0.5  ;;  %v6734_v7 = vperm.slane %v3904_v5, 0  ;;  %s4950_s7 = smov 34  }
 0x9ad   : > { %v3901_v26 = vsel %vm3891_vm10, 1, %v7523_v41 }
 0x9ae   : > { %4436 = vmatpush.msra.mxu2 %v3207_v62  ;;  %v7527_v62 = vmov 1  }
 0x9e7   : > { %v3704_v14 = vpop.xlane.xlu1 %3703 }
 0x9e8   : > { %v3708_v12 = vsub.f32 %v3700_v46, %v3704_v14  ;;  %v7528_v14 = vld [vmem:[#allocation29_spill] sm:$0xff] }
 0x9ea   : > { %v3710_v49 = vmul.f32 1.442695, %v3708_v12  ;;  %v4576_v12 = vmul.f32 -1.442695, %v7528_v14 }
 0x9ec   : > { %4875 = vpow2.f32 %v3710_v49  ;;  %v6737_v49 = vperm.slane %v3901_v26, 0 }
 0x9ef   : > { %v3707_v57 = vpop.xlane.xlu1 %3706 }
 0x9f0   : > { %v3709_v32 = vsub.f32 %v3701_v48, %v3707_v57  ;;  %v7529_v57 = vrot.slane %v7521_v45, 7 }
 0x9f2   : > { %v4876_v54 = vpop.eup %4875  ;;  %v3712_v63 = vmul.f32 1.442695, %v3709_v32  ;;  %v7530_v32 = vrot.slane %v7521_v45, 3 }
 0x9f3   : > { %v3714_v52 = vsel %vm2651_vm8, %v4876_v54, 0.0 }
 0x9f4   : > { %4877 = vpow2.f32 %v3712_v63  ;;  %3715 = vadd.xlane.f32.xlu1 %v3714_v52 }
 0x9fa   : > { %v4878_v25 = vpop.eup %4877 }
 0x9fb   : > { %v3717_v43 = vsel %vm7520_vm7, %v4878_v25, 0.0  ;;  %vm3897_vm7 = vcmp.gt.f32.partialorder %v7529_v57, 0.5 }
 0x9fc   : > { %3718 = vadd.xlane.f32.xlu2 %v3717_v43 }
 0xa67   : > { %v3716_v51 = vpop.xlane.xlu1 %3715 }
 0xa68   : > { %4879 = vrcp.f32 %v3716_v51  ;;  %v3731_v33 = vand.u32 2147483648, %v3716_v51  ;;  %v3729_v31 = vand.u32 2147483647, %v3716_v51  ;;  %vm3725_vm13 = vweird.f32 %v3716_v51 }
 0xa6a   : > { %v3732_v36 = vor.u32 1.1754944e-38, %v3731_v33  ;;  %vm3730_vm14 = vcmp.eq.f32.partialorder %v3729_v31, 8.507059e+37 }
 0xa6e   : > { %v4880_v19 = vpop.eup %4879 }
 0xa6f   : > { %v3721_v0 = vmul.f32 %v4880_v19, %v3716_v51  ;;  %v3719_v58 = vpop.xlane.xlu2 %3718  ;;  %vm3726_vm2 = vweird.f32 %v4880_v19  ;;  %v7531_v51 = vrot.slane %v7521_v45, 6 }
 0xa70   : > { %4881 = vrcp.f32 %v3719_v58  ;;  %vm3727_vm8 = vmor %vm3725_vm13, %vm3726_vm2  ;;  %v3746_v10 = vand.u32 2147483648, %v3719_v58  ;;  %vm3740_vm0 = vweird.f32 %v3719_v58  ;;  %v3744_v11 = vand.u32 2147483647, %v3719_v58 }
 0xa71   : > { %v3722_v37 = vsub.f32 1.0, %v3721_v0  ;;  %vm3893_vm2 = vcmp.gt.f32.partialorder %v7530_v32, 0.5  ;;  %4883 = vpow2.f32 %v4576_v12  ;;  %vm3896_vm13 = vcmp.gt.f32.partialorder %v7531_v51, 0.5 }
 0xa72   : > { %v3747_v35 = vor.u32 1.1754944e-38, %v3746_v10  ;;  %vm3745_vm11 = vcmp.eq.f32.partialorder %v3744_v11, 8.507059e+37  ;;  %v3903_v63 = vsel %vm3893_vm2, 1, %v7523_v41  ;;  %v3906_v0 = vsel %vm3896_vm13, 1, %v7523_v41 }
 0xa73   : > { %v3723_v16 = vmul.f32 %v4880_v19, %v3722_v37  ;;  %v7532_v37 = vld [vmem:[#allocation26_spill] sm:$0xff]  ;;  %vm3970_vm2 = vcmask 408848  }
 0xa74   : > { %v7533_v33 = vrot.slane %v7532_v37, 1 }
 0xa75   : > { %v3724_v9 = vadd.f32 %v4880_v19, %v3723_v16  ;;  %v4893_v16 = vld [vmem:[#allocation6] sm:$0xff] }
 0xa76   : > { %v4882_v21 = vpop.eup %4881 }
 0xa77   : > { %v3728_v23 = vsel %vm3727_vm8, %v4880_v19, %v3724_v9  ;;  %v3736_v13 = vmul.f32 %v4882_v21, %v3719_v58  ;;  %vm3741_vm9 = vweird.f32 %v4882_v21  ;;  %v4884_v43 = vpop.eup %4883  ;;  %v6757_v58 = vperm.slane %v3906_v0, 0 }
 0xa78   : > { %v3733_v60 = vsel %vm3730_vm14, %v3732_v36, %v3728_v23  ;;  %vm3742_vm1 = vmor %vm3740_vm0, %vm3741_vm9  ;;  %v2129_v19 = vadd.f32 1.0, %v4884_v43  ;;  %vm3899_vm8 = vcmp.gt.f32.partialorder %v7533_v33, 0.5 }
 0xa79   : > { %v3734_v56 = vmul.f32 %v4876_v54, %v3733_v60  ;;  %v3737_v61 = vsub.f32 1.0, %v3736_v13  ;;  %v3907_v54 = vsel %vm3897_vm7, 1, %v7523_v41  ;;  %v3909_v31 = vsel %vm3899_vm8, 1, %v7523_v41 }
 0xa7a   : > { %v6748_v52 = vperm.slane %v3907_v54, 0  ;;  %4885 = vrcp.f32 %v2129_v19  ;;  %v2142_v13 = vand.u32 2147483648, %v2129_v19  ;;  %vm2136_vm5 = vweird.f32 %v2129_v19 }
 0xa7b   : > { %v3792_v53 = vperm.slane %v3734_v56, 6  ;;  %v3757_v8 = vperm.slane %v3734_v56, 1  ;;  %v3750_v40 = vperm.slane %v3734_v56, 0  ;;  %v3738_v15 = vmul.f32 %v4882_v21, %v3737_v61 }
 0xa7c   : > { %v3771_v39 = vperm.slane %v3734_v56, 3  ;;  %v3764_v44 = vperm.slane %v3734_v56, 2  ;;  %v3785_v47 = vperm.slane %v3734_v56, 5  ;;  %v3778_v4 = vperm.slane %v3734_v56, 4 }
 0xa7d   : > { %3797 = vperm.xlu2 %4687, %v3792_v53   ;;  %3762 = vperm.xlu0 %4686, %v3757_v8   ;;  %v3739_v20 = vadd.f32 %v4882_v21, %v3738_v15  ;;  %v3799_v46 = vperm.slane %v3734_v56, 7  ;;  %v2140_v53 = vand.u32 2147483647, %v2129_v19  ;;  %v4577_v15 = vmul.f32 -1.442695, %v7535_v59 }
 0xa7e   : > { %3755 = vperm.xlu1 %4681, %v3750_v40   ;;  %v2143_v40 = vor.u32 1.1754944e-38, %v2142_v13 }
 0xa7f   : > { %v3743_v22 = vsel %vm3742_vm1, %v4882_v21, %v3739_v20  ;;  %v6765_v21 = vperm.slane %v3909_v31, 0  ;;  %vm2141_vm4 = vcmp.eq.f32.partialorder %v2140_v53, 8.507059e+37  ;;  %4887 = vpow2.f32 %v4577_v15 }
 0xa80   : > { %v3748_v3 = vsel %vm3745_vm11, %v3747_v35, %v3743_v22  ;;  %v4886_v9 = vpop.eup %4885 }
 0xa81   : > { %v3749_v6 = vmul.f32 %v4878_v25, %v3748_v3  ;;  %v6750_v25 = vperm.slane %v3903_v63, 0  ;;  %v2132_v36 = vmul.f32 %v4886_v9, %v2129_v19  ;;  %vm2137_vm14 = vweird.f32 %v4886_v9 }
 0xa82   : > { %vm2138_vm9 = vmor %vm2136_vm5, %vm2137_vm14 }
 0xa83   : > { %v3806_v29 = vperm.slane %v3749_v6, 0  ;;  %v3813_v48 = vperm.slane %v3749_v6, 1  ;;  %v2133_v23 = vsub.f32 1.0, %v2132_v36 }
 0xa85   : > { %3776 = vperm.xlu0 %4686, %v3771_v39   ;;  %4690 = vset.pattern.permute.xlu2 %v7523_v41  ;;  %v2134_v60 = vmul.f32 %v4886_v9, %v2133_v23  ;;  %v4888_v20 = vpop.eup %4887 }
 0xa86   : > { %3769 = vperm.xlu1 %4681, %v3764_v44   ;;  %3927 = vperm.xlu2 %4690, %v6706_v27   ;;  %v2130_v10 = vadd.f32 1.0, %v4888_v20 }
 0xa87   : > { %v2135_v56 = vadd.f32 %v4886_v9, %v2134_v60 }
 0xa88   : > { %4889 = vrcp.f32 %v2130_v10  ;;  %v2157_v54 = vand.u32 2147483648, %v2130_v10  ;;  %vm2151_vm1 = vweird.f32 %v2130_v10  ;;  %v2155_v43 = vand.u32 2147483647, %v2130_v10 }
 0xa89   : > { %v2139_v8 = vsel %vm2138_vm9, %v4886_v9, %v2135_v56  ;;  %vm4001_vm9 = vcmask 540048  }
 0xa8a   : > { %v6773_v61 = vsel %vm2141_vm4, %v2143_v40, %v2139_v8  ;;  %v2158_v9 = vor.u32 1.1754944e-38, %v2157_v54  ;;  %vm2156_vm3 = vcmp.eq.f32.partialorder %v2155_v43, 8.507059e+37 }
 0xa8b   : > { %v3827_v45 = vrot.slane %v6773_v61, 6  ;;  %v3822_v11 = vrot.slane %v6773_v61, 1  ;;  %v3824_v34 = vrot.slane %v6773_v61, 3  ;;  %v3826_v12 = vrot.slane %v6773_v61, 5 }
 0xa8c   : > { %v3825_v57 = vrot.slane %v6773_v61, 4  ;;  %v3828_v23 = vrot.slane %v6773_v61, 7 }
 0xa8d   : > { %3790 = vperm.xlu0 %4686, %v3785_v47   ;;  %v3831_v22 = vperm.slane %v3822_v11, 0  ;;  %v3830_v47 = vperm.slane %v6773_v61, 0  ;;  %v3833_v50 = vperm.slane %v3824_v34, 0  ;;  %v3835_v63 = vperm.slane %v3826_v12, 0 }
 0xa8e   : > { %3783 = vperm.xlu1 %4681, %v3778_v4   ;;  %3936 = vperm.xlu2 %4690, %v6713_v28   ;;  %v4890_v18 = vpop.eup %4889  ;;  %v3834_v19 = vperm.slane %v3825_v57, 0  ;;  %v3837_v13 = vperm.slane %v3828_v23, 0 }
 0xa8f   : > { %v2147_v55 = vmul.f32 %v4890_v18, %v2130_v10  ;;  %vm2152_vm0 = vweird.f32 %v4890_v18 }
 0xa90   : > { %vm2153_vm11 = vmor %vm2151_vm1, %vm2152_vm0 }
 0xa95   : > { %3811 = vperm.xlu0 %4686, %v3806_v29   ;;  %v3823_v29 = vrot.slane %v6773_v61, 2 }
 0xa96   : > { %3804 = vperm.xlu1 %4681, %v3799_v46   ;;  %3945 = vperm.xlu2 %4690, %v6718_v42   ;;  %v2148_v46 = vsub.f32 1.0, %v2147_v55 }
 0xa98   : > { %v2149_v5 = vmul.f32 %v4890_v18, %v2148_v46 }
 0xa9a   : > { %v2150_v32 = vadd.f32 %v4890_v18, %v2149_v5 }
 0xa9d   : > { %4688 = vset.pattern.permute.xlu0 %v7523_v41 }
 0xa9e   : > { %3818 = vperm.xlu1 %4681, %v3813_v48   ;;  %3921 = vperm.xlu0 %4688, %v6723_v30   ;;  %v3832_v48 = vperm.slane %v3823_v29, 0 }
 0xa9f   : > { %4693 = vset.pattern.permute.xlu2 %v7527_v62 }
 0xaa6   : > { %4689 = vset.pattern.permute.xlu1 %v7523_v41  ;;  %3933 = vperm.xlu0 %4688, %v6734_v7   ;;  %v3836_v41 = vperm.slane %v3827_v45, 0 }
 0xaa7   : > { %3924 = vperm.xlu1 %4689, %v6737_v49  }
 0xaae   : > { %3942 = vperm.xlu0 %4688, %v6748_v52  }
 0xaaf   : > { %3930 = vperm.xlu1 %4689, %v6750_v25  }
 0xab6   : > { %4024 = vrot.lane.b32.xlu0 %v4893_v16, %s4950_s7  ;;  %v2154_v16 = vsel %vm2153_vm11, %v4890_v18, %v2150_v32 }
 0xab7   : > { %3939 = vperm.xlu1 %4689, %v6757_v58   ;;  %4692 = vset.pattern.permute.xlu0 %v7527_v62  ;;  %v2159_v36 = vsel %vm2156_vm3, %v2158_v9, %v2154_v16 }
 0xab8   : > { %v3838_v60 = vperm.slane %v2159_v36, 0 }
 0xabe   : > { %4037 = vperm.xlu0 %4692, %v6737_v49  }
 0xabf   : > { %3948 = vperm.xlu1 %4689, %v6765_v21  }
 0xac6   : > { %4052 = vperm.xlu0 %4692, %v6757_v58  }
 0xac7   : > { %4691 = vset.pattern.permute.xlu1 %v7527_v62  ;;  %v4894_v62 = vld [vmem:[#allocation6 + $0x10] sm:$0xff] }
 0xac8   : > { %4034 = vperm.xlu1 %4691, %v6723_v30  }
 0xace   : > { %4061 = vperm.xlu0 %4692, %v6765_v21  }
 0xad0   : > { %4043 = vperm.xlu1 %4691, %v6750_v25  }
 0xad6   : > { %4694 = vset.pattern.permute.xlu0 %v7534_v2 }
 0xad7   : > { %v6779_v39 = vpop.permute.xlu2 %3797  ;;  %4145 = vperm.xlu0 %4694, %v6723_v30  }
 0xad8   : > { %v6783_v44 = vmul.f32 %v3836_v41, %v6779_v39  ;;  %4049 = vperm.xlu1 %4691, %v6713_v28   ;;  %v3829_v41 = vrot.slane %v2159_v36, 1 }
 0xada   : > { %v3839_v15 = vperm.slane %v3829_v41, 0 }
 0xadf   : > { %4163 = vperm.xlu0 %4694, %v6757_v58  }
 0xae0   : > { %4058 = vperm.xlu1 %4691, %v6718_v42   ;;  %v6821_v0 = vpop.permute.xlu2 %3927 }
 0xae1   : > { %vm3952_vm5 = vcmp.eq.s32.totalorder %v6821_v0, 1 }
 0xae7   : > { %4701 = vset.pattern.permute.xlu0 %v7536_v24 }
 0xae8   : > { %4259 = vperm.xlu0 %4701, %v6737_v49   ;;  %4696 = vset.pattern.permute.xlu1 %v7534_v2  ;;  %v6842_v45 = vpop.permute.xlu2 %3936 }
 0xae9   : > { %vm3955_vm12 = vcmp.eq.s32.totalorder %v6842_v45, 1 }
 0xaef   : > { %v6792_v35 = vpop.permute.xlu0 %3762 }
 0xaf0   : > { %v6796_v4 = vmul.f32 %v3831_v22, %v6792_v35  ;;  %v6798_v3 = vpop.permute.xlu1 %3755  ;;  %4265 = vperm.xlu0 %4701, %v6750_v25   ;;  %v6849_v11 = vpop.permute.xlu2 %3945 }
 0xaf1   : > { %v6802_v6 = vmul.f32 %v3830_v47, %v6798_v3  ;;  %vm3958_vm10 = vcmp.eq.s32.totalorder %v6849_v11, 1 }
 0xaf7   : > { %v6806_v38 = vpop.permute.xlu0 %3776 }
 0xaf8   : > { %v6809_v17 = vmul.f32 %v3833_v50, %v6806_v38  ;;  %v6811_v1 = vpop.permute.xlu1 %3769  ;;  %4246 = vrot.lane.b32.xlu0 %v4894_v62, %s4950_s7 }
 0xaf9   : > { %v6815_v26 = vmul.f32 %v3832_v48, %v6811_v1 }
 0xaff   : > { %v6819_v51 = vpop.permute.xlu0 %3790 }
 0xb00   : > { %v6824_v37 = vmul.f32 %v3835_v63, %v6819_v51  ;;  %v6826_v33 = vpop.permute.xlu1 %3783 }
 0xb01   : > { %v6829_v31 = vmul.f32 %v3834_v19, %v6826_v33 }
 0xb02   : > { %v3965_v47 = vsel %vm3955_vm12, %v6824_v37, -1e+30 }
 0xb03   : > { %v6868_v5 = vsel %vm3970_vm2, %v3965_v47, -inf  ;;  %v7539_v47 = vrot.slane %v7528_v14, 3 }
 0xb07   : > { %v6832_v56 = vpop.permute.xlu0 %3811 }
 0xb08   : > { %v6835_v53 = vmul.f32 %v3838_v60, %v6832_v56  ;;  %v6837_v8 = vpop.permute.xlu1 %3804  ;;  %v3860_v60 = vperm.slane %v7528_v14, 0 }
 0xb09   : > { %v6840_v40 = vmul.f32 %v3837_v13, %v6837_v8  ;;  %v7537_v13 = vrot.slane %v7528_v14, 6 }
 0xb0a   : > { %v3968_v34 = vsel %vm3958_vm10, %v6835_v53, -1e+30 }
 0xb0b   : > { %v3983_v57 = vsel %vm3970_vm2, %v3968_v34, -inf  ;;  %v3866_v41 = vperm.slane %v7537_v13, 0  ;;  %v3863_v34 = vperm.slane %v7539_v47, 0 }
 0xb0d   : > { %v6904_v13 = vmul.f32 %v3866_v41, %v6779_v39  ;;  %v6922_v39 = vmul.f32 %v3863_v34, %v6806_v38 }
 0xb10   : > { %v6844_v20 = vpop.permute.xlu1 %3818  ;;  %v3922_v10 = vpop.permute.xlu0 %3921 }
 0xb11   : > { %v6847_v61 = vmul.f32 %v3839_v15, %v6844_v20  ;;  %vm3950_vm6 = vcmp.eq.s32.totalorder %v3922_v10, 1  ;;  %v7538_v15 = vrot.slane %v7528_v14, 1 }
 0xb12   : > { %v3960_v18 = vsel %vm3950_vm6, %v6802_v6, -1e+30 }
 0xb13   : > { %v3971_v46 = vsel %vm3970_vm2, %v3960_v18, -inf  ;;  %v3861_v18 = vperm.slane %v7538_v15, 0  ;;  %v3962_v15 = vsel %vm3952_vm5, %v6815_v26, -1e+30 }
 0xb18   : > { %v3934_v22 = vpop.permute.xlu0 %3933 }
 0xb19   : > { %vm3954_vm7 = vcmp.eq.s32.totalorder %v3934_v22, 1  ;;  %v3925_v55 = vpop.permute.xlu1 %3924 }
 0xb1a   : > { %v3964_v29 = vsel %vm3954_vm7, %v6829_v31, -1e+30  ;;  %vm3951_vm13 = vcmp.eq.s32.totalorder %v3925_v55, 1 }
 0xb1b   : > { %v3975_v50 = vsel %vm3970_vm2, %v3964_v29, -inf  ;;  %v3961_v48 = vsel %vm3951_vm13, %v6796_v4, -1e+30  ;;  %v7540_v29 = vrot.slane %v7528_v14, 4 }
 0xb1c   : > { %v3976_v62 = vmax.f32 %v3971_v46, %v3975_v50  ;;  %v6871_v12 = vsel %vm3970_vm2, %v3961_v48, -inf  ;;  %v7541_v50 = vrot.slane %v7528_v14, 2 }
 0xb1d   : > { %v3978_v32 = vmax.f32 %v6871_v12, %v6868_v5  ;;  %v3864_v46 = vperm.slane %v7540_v29, 0 }
 0xb1e   : > { %v6876_v54 = vmax.f32 %v3976_v62, %v3983_v57  ;;  %v3862_v48 = vperm.slane %v7541_v50, 0  ;;  %v7542_v62 = vrot.slane %v7528_v14, 5  ;;  %v6913_v50 = vmul.f32 %v3861_v18, %v6792_v35 }
 0xb1f   : > { %v6910_v47 = vmul.f32 %v3864_v46, %v6826_v33  ;;  %v3973_v35 = vsel %vm3970_vm2, %v3962_v15, -inf }
 0xb20   : > { %v3943_v63 = vpop.permute.xlu0 %3942  ;;  %v3865_v57 = vperm.slane %v7542_v62, 0  ;;  %v6919_v62 = vmul.f32 %v3862_v48, %v6811_v1 }
 0xb21   : > { %vm3957_vm8 = vcmp.eq.s32.totalorder %v3943_v63, 1  ;;  %v3931_v43 = vpop.permute.xlu1 %3930  ;;  %v3995_v33 = vsel %vm3954_vm7, %v6910_v47, -1e+30 }
 0xb22   : > { %v3967_v19 = vsel %vm3957_vm8, %v6840_v40, -1e+30  ;;  %vm3953_vm14 = vcmp.eq.s32.totalorder %v3931_v43, 1  ;;  %v6925_v41 = vmul.f32 %v3865_v57, %v6819_v51  ;;  %v3992_v51 = vsel %vm3951_vm13, %v6913_v50, -1e+30 }
 0xb23   : > { %v3981_v16 = vsel %vm3970_vm2, %v3967_v19, -inf  ;;  %v3963_v9 = vsel %vm3953_vm14, %v6809_v17, -1e+30  ;;  %v3868_v19 = vperm.slane %v7535_v59, 0  ;;  %v3993_v34 = vsel %vm3952_vm5, %v6919_v62, -1e+30 }
 0xb24   : > { %v3974_v36 = vsel %vm3970_vm2, %v3963_v9, -inf  ;;  %v3996_v10 = vsel %vm3955_vm12, %v6925_v41, -1e+30  ;;  %v3994_v57 = vsel %vm3953_vm14, %v6922_v39, -1e+30  ;;  %v4003_v0 = vsel %vm4001_vm9, %v3992_v51, -inf }
 0xb25   : > { %v3982_v23 = vmax.f32 %v3974_v36, %v3981_v16  ;;  %v7543_v16 = vrot.slane %v7528_v14, 7  ;;  %v6916_v14 = vmul.f32 %v3860_v60, %v6798_v3  ;;  %v6932_v3 = vmul.f32 %v3868_v19, %v6832_v56 }
 0xb26   : > { %v7544_v56 = vrot.slane %v7535_v59, 1  ;;  %v4008_v43 = vsel %vm4001_vm9, %v3996_v10, -inf }
 0xb27   : > { %v3867_v9 = vperm.slane %v7543_v16, 0  ;;  %v3991_v38 = vsel %vm3950_vm6, %v6916_v14, -1e+30  ;;  %v3999_v45 = vsel %vm3958_vm10, %v6932_v3, -1e+30 }
 0xb28   : > { %v6901_v36 = vpop.permute.xlu0 %4024  ;;  %v3869_v48 = vperm.slane %v7544_v56, 0  ;;  %v4002_v16 = vsel %vm4001_vm9, %v3991_v38, -inf }
 0xb29   : > { %v3940_v29 = vpop.permute.xlu1 %3939  ;;  %v6935_v1 = vmul.f32 %v3867_v9, %v6837_v8  ;;  %v4006_v8 = vsel %vm4001_vm9, %v3995_v33, -inf  ;;  %v4004_v9 = vsel %vm4001_vm9, %v3993_v34, -inf  ;;  %v4005_v33 = vsel %vm4001_vm9, %v3994_v57, -inf }
 0xb2a   : > { %vm3956_vm4 = vcmp.eq.s32.totalorder %v3940_v29, 1  ;;  %v6964_v15 = vmul.f32 %v3869_v48, %v6844_v20  ;;  %v4007_v63 = vmax.f32 %v4002_v16, %v4006_v8  ;;  %v4014_v20 = vsel %vm4001_vm9, %v3999_v45, -inf }
 0xb2b   : > { %v3966_v46 = vsel %vm3956_vm4, %v6783_v44, -1e+30  ;;  %v3997_v18 = vsel %vm3956_vm4, %v6904_v13, -1e+30  ;;  %v3998_v55 = vsel %vm3957_vm8, %v6935_v1, -1e+30 }
 0xb2c   : > { %v3979_v60 = vsel %vm3970_vm2, %v3966_v46, -inf  ;;  %v4010_v59 = vsel %vm4001_vm9, %v3997_v18, -inf  ;;  %v4015_v18 = vmax.f32 %v4007_v63, %v4014_v20 }
 0xb2d   : > { %v3980_v22 = vmax.f32 %v3973_v35, %v3979_v60  ;;  %v4009_v35 = vmax.f32 %v4003_v0, %v4008_v43  ;;  %v4011_v60 = vmax.f32 %v4004_v9, %v4010_v59 }
 0xb2f   : > { %v3988_v19 = vmax.f32 %v3980_v22, %v3982_v23  ;;  %v4012_v23 = vsel %vm4001_vm9, %v3998_v55, -inf }
 0xb30   : > { %v6969_v46 = vpop.permute.xlu0 %4037  ;;  %v4013_v34 = vmax.f32 %v4005_v33, %v4012_v23 }
 0xb31   : > { %v3949_v29 = vpop.permute.xlu1 %3948  ;;  %vm4064_vm1 = vcmp.eq.s32.totalorder %v6969_v46, 1 }
 0xb32   : > { %vm3959_vm0 = vcmp.eq.s32.totalorder %v3949_v29, 1  ;;  %v4019_v8 = vmax.f32 %v4011_v60, %v4013_v34  ;;  %v4074_v12 = vsel %vm4064_vm1, %v6796_v4, -1e+30 }
 0xb33   : > { %v3969_v38 = vsel %vm3959_vm0, %v6847_v61, -1e+30  ;;  %v4000_v11 = vsel %vm3959_vm0, %v6964_v15, -1e+30 }
 0xb34   : > { %v3985_v51 = vsel %vm3970_vm2, %v3969_v38, -inf  ;;  %v4016_v22 = vsel %vm4001_vm9, %v4000_v11, -inf }
 0xb35   : > { %v3986_v56 = vmax.f32 %v3978_v32, %v3985_v51  ;;  %v4017_v48 = vmax.f32 %v4009_v35, %v4016_v22  ;;  %v4895_v35 = vld [vmem:[#allocation6 + $0x8] sm:$0xff] }
 0xb37   : > { %v3987_v10 = vmax.f32 %v6876_v54, %v3986_v56  ;;  %v4018_v55 = vmax.f32 %v4015_v18, %v4017_v48 }
 0xb38   : > { %v6980_v59 = vpop.permute.xlu0 %4052 }
 0xb39   : > { %v4020_v57 = vmax.f32 %v4018_v55, %v4019_v8  ;;  %v3989_v45 = vmax.f32 %v3987_v10, %v3988_v19  ;;  %v4084_v19 = vsel %vm3970_vm2, %v4074_v12, -inf  ;;  %vm4069_vm6 = vcmp.eq.s32.totalorder %v6980_v59, 1  ;;  %v4896_v55 = vld [vmem:[#allocation6 + $0x18] sm:$0xff] }
 0xb3a   : > { %v4035_v16 = vpop.permute.xlu1 %4034 }
 0xb3b   : > { %v4021_v0 = vmax.f32 %v4020_v57, 0.0  ;;  %vm4063_vm10 = vcmp.eq.s32.totalorder %v4035_v16, 1 }
 0xb3c   : > { %v4073_v34 = vsel %vm4063_vm10, %v6802_v6, -1e+30  ;;  %v4103_v48 = vsel %vm4063_vm10, %v6916_v14, -1e+30 }
 0xb3d   : > { %4029 = vrot.lane.b32.xlu2 %v4021_v0, %s4951_s15 }
 0xb40   : > { %v6986_v5 = vpop.permute.xlu0 %4061 }
 0xb41   : > { %vm4072_vm11 = vcmp.eq.s32.totalorder %v6986_v5, 1 }
 0xb42   : > { %v6983_v9 = vpop.permute.xlu1 %4043  ;;  %v4082_v54 = vsel %vm4072_vm11, %v6847_v61, -1e+30 }
 0xb43   : > { %v4097_v23 = vsel %vm3970_vm2, %v4082_v54, -inf  ;;  %vm4066_vm8 = vcmp.eq.s32.totalorder %v6983_v9, 1  ;;  %v4112_v9 = vsel %vm4072_vm11, %v6964_v15, -1e+30 }
 0xb44   : > { %v4127_v5 = vsel %vm4001_vm9, %v4112_v9, -inf }
 0xb45   : > { %4040 = vperm.xlu2 %4693, %v6706_v27  }
 0xb4a   : > { %v4050_v32 = vpop.permute.xlu1 %4049 }
 0xb4b   : > { %vm4068_vm3 = vcmp.eq.s32.totalorder %v4050_v32, 1  ;;  %v4104_v32 = vsel %vm4064_vm1, %v6913_v50, -1e+30 }
 0xb4c   : > { %v4078_v63 = vsel %vm4068_vm3, %v6824_v37, -1e+30  ;;  %v4108_v8 = vsel %vm4068_vm3, %v6925_v41, -1e+30  ;;  %vm7545_vm3 = vcmask 130048  }
 0xb4d   : > { %v4089_v29 = vsel %vm3970_vm2, %v4078_v63, -inf  ;;  %4046 = vperm.xlu2 %4693, %v6734_v7   ;;  %v4109_v63 = vsel %vm4069_vm6, %v6904_v13, -1e+30 }
 0xb4e   : > { %v4090_v43 = vmax.f32 %v4084_v19, %v4089_v29  ;;  %v4113_v19 = vsel %vm4001_vm9, %v4103_v48, -inf }
 0xb50   : > { %v7002_v33 = vmax.f32 %v4090_v43, %v4097_v23  ;;  %v4119_v43 = vsel %vm4001_vm9, %v4108_v8, -inf }
 0xb52   : > { %v4059_v22 = vpop.permute.xlu1 %4058 }
 0xb53   : > { %vm4071_vm7 = vcmp.eq.s32.totalorder %v4059_v22, 1 }
 0xb54   : > { %v4081_v57 = vsel %vm4071_vm7, %v6835_v53, -1e+30 }
 0xb55   : > { %4055 = vperm.xlu2 %4693, %v6748_v52   ;;  %v4095_v23 = vsel %vm3970_vm2, %v4081_v57, -inf }
 0xb5d   : > { %4135 = vrot.lane.b32.xlu2 %v4895_v35, %s4950_s7 }
 0xb5e   : > { %4695 = vset.pattern.permute.xlu2 %v7534_v2 }
 0xb65   : > { %4148 = vperm.xlu2 %4695, %v6737_v49   ;;  %v4079_v49 = vsel %vm4069_vm6, %v6783_v44, -1e+30 }
 0xb66   : > { %v4091_v20 = vsel %vm3970_vm2, %v4079_v49, -inf  ;;  %v4111_v49 = vsel %vm4071_vm7, %v6932_v3, -1e+30 }
 0xb67   : > { %v4125_v48 = vsel %vm4001_vm9, %v4111_v49, -inf }
 0xb6d   : > { %4160 = vperm.xlu2 %4695, %v6713_v28  }
 0xb75   : > { %4698 = vset.pattern.permute.xlu2 %v7536_v24 }
 0xb76   : > { %4268 = vperm.xlu2 %4698, %v6734_v7  }
 0xb7e   : > { %4699 = vset.pattern.permute.xlu2 %v7534_v2 }
 0xb7f   : > { %4151 = vperm.xlu2 %4699, %v6706_v27  }
 0xb87   : > { %4166 = vperm.xlu2 %4699, %v6748_v52  }
 0xb8f   : > { %4172 = vperm.xlu2 %4699, %v6765_v21  }
 0xb97   : > { %4703 = vset.pattern.permute.xlu2 %v7536_v24  ;;  %v4030_v60 = vpop.permute.xlu2 %4029 }
 0xb98   : > { %4274 = vperm.xlu2 %4703, %v6757_v58   ;;  %v3990_v58 = vmax.f32 %v3989_v45, 0.0  ;;  %v4083_v45 = vsel %vm3970_vm2, %v4073_v34, -inf  ;;  %v4106_v34 = vsel %vm4066_vm8, %v6922_v39, -1e+30 }
 0xb9a   : > { %v4022_v10 = vsub.f32 1.0, %v3990_v58  ;;  %v4076_v58 = vsel %vm4066_vm8, %v6809_v17, -1e+30 }
 0xb9b   : > { %v4086_v57 = vsel %vm3970_vm2, %v4076_v58, -inf }
 0xb9c   : > { %v4027_v35 = vmul.f32 %v6901_v36, %v4022_v10 }
 0xb9f   : > { %v4041_v38 = vpop.permute.xlu2 %4040 }
 0xba0   : > { %vm4065_vm12 = vcmp.eq.s32.totalorder %v4041_v38, 1  ;;  %4280 = vperm.xlu2 %4703, %v6718_v42   ;;  %v4121_v38 = vsel %vm4001_vm9, %v4109_v63, -inf }
 0xba1   : > { %v4075_v11 = vsel %vm4065_vm12, %v6815_v26, -1e+30  ;;  %v4105_v46 = vsel %vm4065_vm12, %v6919_v62, -1e+30 }
 0xba2   : > { %v4085_v51 = vsel %vm3970_vm2, %v4075_v11, -inf  ;;  %v4115_v8 = vsel %vm4001_vm9, %v4105_v46, -inf }
 0xba3   : > { %v4092_v18 = vmax.f32 %v4085_v51, %v4091_v20  ;;  %v4114_v20 = vsel %vm4001_vm9, %v4104_v32, -inf  ;;  %v4032_v51 = vadd.f32 %v4030_v60, %v4027_v35 }
 0xba4   : > { %v4120_v36 = vmax.f32 %v4114_v20, %v4119_v43 }
 0xba7   : > { %v4047_v56 = vpop.permute.xlu2 %4046 }
 0xba8   : > { %vm4067_vm13 = vcmp.eq.s32.totalorder %v4047_v56, 1  ;;  %4357 = vrot.lane.b32.xlu2 %v4896_v55, %s4950_s7 }
 0xba9   : > { %v4077_v16 = vsel %vm4067_vm13, %v6829_v31, -1e+30  ;;  %v4107_v0 = vsel %vm4067_vm13, %v6910_v47, -1e+30 }
 0xbaa   : > { %v4087_v12 = vsel %vm3970_vm2, %v4077_v16, -inf  ;;  %v4117_v54 = vsel %vm4001_vm9, %v4107_v0, -inf }
 0xbab   : > { %v4088_v29 = vmax.f32 %v4083_v45, %v4087_v12  ;;  %v4118_v59 = vmax.f32 %v4113_v19, %v4117_v54  ;;  %v4128_v45 = vmax.f32 %v4120_v36, %v4127_v5  ;;  %v4122_v12 = vmax.f32 %v4115_v8, %v4121_v38 }
 0xbad   : > { %v4096_v11 = vmax.f32 %v4088_v29, %v4095_v23  ;;  %v4126_v60 = vmax.f32 %v4118_v59, %v4125_v48 }
 0xbaf   : > { %v4056_v56 = vpop.permute.xlu2 %4055  ;;  %v4099_v22 = vmax.f32 %v4096_v11, %v7002_v33  ;;  %v4116_v33 = vsel %vm4001_vm9, %v4106_v34, -inf  ;;  %v4129_v63 = vmax.f32 %v4126_v60, %v4128_v45 }
 0xbb0   : > { %vm4070_vm14 = vcmp.eq.s32.totalorder %v4056_v56, 1  ;;  %4387 = vrot.lane.b32.xlu2 %v4032_v51, %s4952_s26 }
 0xbb1   : > { %v4080_v10 = vsel %vm4070_vm14, %v6840_v40, -1e+30  ;;  %v4110_v55 = vsel %vm4070_vm14, %v6935_v1, -1e+30 }
 0xbb2   : > { %v4093_v16 = vsel %vm3970_vm2, %v4080_v10, -inf  ;;  %v4123_v0 = vsel %vm4001_vm9, %v4110_v55, -inf }
 0xbb3   : > { %v4094_v54 = vmax.f32 %v4086_v57, %v4093_v16  ;;  %v4124_v32 = vmax.f32 %v4116_v33, %v4123_v0 }
 0xbb5   : > { %v4130_v19 = vmax.f32 %v4122_v12, %v4124_v32  ;;  %v4100_v29 = vmax.f32 %v4092_v18, %v4094_v54  ;;  %v7077_v18 = vpop.permute.xlu0 %4145 }
 0xbb6   : > { %vm4174_vm6 = vcmp.eq.s32.totalorder %v7077_v18, 1 }
 0xbb7   : > { %v4131_v43 = vmax.f32 %v4129_v63, %v4130_v19  ;;  %v4136_v23 = vpop.permute.xlu2 %4135  ;;  %v4101_v35 = vmax.f32 %v4099_v22, %v4100_v29 }
 0xbb9   : > { %v4102_v49 = vmax.f32 %v4101_v35, 0.0  ;;  %v4132_v46 = vmax.f32 %v4131_v43, 0.0 }
 0xbbb   : > { %v4133_v11 = vsub.f32 1.0, %v4102_v49  ;;  %4140 = vrot.lane.b32.xlu1 %v4132_v46, %s4951_s15 }
 0xbbd   : > { %v7072_v59 = vmul.f32 %v4136_v23, %v4133_v11  ;;  %v7087_v60 = vpop.permute.xlu0 %4163 }
 0xbbe   : > { %vm4180_vm0 = vcmp.eq.s32.totalorder %v7087_v60, 1 }
 0xbbf   : > { %v4149_v20 = vpop.permute.xlu2 %4148  ;;  %v4190_v10 = vsel %vm4180_vm0, %v6783_v44, -1e+30 }
 0xbc0   : > { %vm4175_vm5 = vcmp.eq.s32.totalorder %v4149_v20, 1 }
 0xbc1   : > { %v4185_v9 = vsel %vm4175_vm5, %v6796_v4, -1e+30  ;;  %v4215_v51 = vsel %vm4175_vm5, %v6913_v50, -1e+30 }
 0xbc2   : > { %v4195_v56 = vsel %vm3970_vm2, %v4185_v9, -inf  ;;  %v4225_v22 = vsel %vm4001_vm9, %v4215_v51, -inf }
 0xbc3   : > { %4157 = vperm.xlu1 %4696, %v6734_v7  }
 0xbc5   : > { %v7147_v9 = vpop.permute.xlu0 %4259 }
 0xbc6   : > { %vm4286_vm8 = vcmp.eq.s32.totalorder %v7147_v9, 1 }
 0xbc7   : > { %v4161_v58 = vpop.permute.xlu2 %4160 }
 0xbc8   : > { %vm4179_vm4 = vcmp.eq.s32.totalorder %v4161_v58, 1 }
 0xbc9   : > { %v4189_v34 = vsel %vm4179_vm4, %v6824_v37, -1e+30  ;;  %v4219_v36 = vsel %vm4179_vm4, %v6925_v41, -1e+30 }
 0xbca   : > { %v4200_v38 = vsel %vm3970_vm2, %v4189_v34, -inf  ;;  %v4230_v7 = vsel %vm4001_vm9, %v4219_v36, -inf }
 0xbcb   : > { %v4201_v48 = vmax.f32 %v4195_v56, %v4200_v38  ;;  %v4231_v8 = vmax.f32 %v4225_v22, %v4230_v7  ;;  %4697 = vset.pattern.permute.xlu1 %v7536_v24 }
 0xbcc   : > { %4256 = vperm.xlu1 %4697, %v6723_v30   ;;  %v7101_v30 = vsel %vm3970_vm2, %v4190_v10, -inf  ;;  %v4296_v10 = vsel %vm4286_vm8, %v6796_v4, -1e+30 }
 0xbd0   : > { %v4269_v5 = vpop.permute.xlu2 %4268 }
 0xbd1   : > { %vm4289_vm10 = vcmp.eq.s32.totalorder %v4269_v5, 1 }
 0xbd2   : > { %v4299_v49 = vsel %vm4289_vm10, %v6829_v31, -1e+30  ;;  %v4329_v46 = vsel %vm4289_vm10, %v6910_v47, -1e+30 }
 0xbd3   : > { %v4309_v36 = vsel %vm3970_vm2, %v4299_v49, -inf  ;;  %v4339_v56 = vsel %vm4001_vm9, %v4329_v46, -inf }
 0xbd4   : > { %4271 = vperm.xlu1 %4697, %v6713_v28  }
 0xbd9   : > { %v7094_v55 = vpop.permute.xlu2 %4151 }
 0xbda   : > { %vm4176_vm1 = vcmp.eq.s32.totalorder %v7094_v55, 1 }
 0xbdb   : > { %v4186_v57 = vsel %vm4176_vm1, %v6815_v26, -1e+30  ;;  %v4216_v4 = vsel %vm4176_vm1, %v6919_v62, -1e+30  ;;  %vm4411_vm1 = vcmask 80896  }
 0xbdc   : > { %v7104_v33 = vsel %vm3970_vm2, %v4186_v57, -inf  ;;  %4700 = vset.pattern.permute.xlu1 %v7534_v2 }
 0xbdd   : > { %v4203_v28 = vmax.f32 %v7104_v33, %v7101_v30  ;;  %4154 = vperm.xlu1 %4700, %v6750_v25   ;;  %v4409_v30 = vld [vmem:[%s7546_s11] sm:$0xff] }
 0xbde   : > { %4595 = vmatmul.msk.f32.vlgmr.msra.gmra.mxu2 %vm4411_vm1, %v4409_v30 }
 0xbe1   : > { %v4167_v16 = vpop.permute.xlu2 %4166 }
 0xbe2   : > { %vm4181_vm5 = vcmp.eq.s32.totalorder %v4167_v16, 1 }
 0xbe5   : > { %4169 = vperm.xlu1 %4700, %v6718_v42  }
 0xbe9   : > { %v4173_v0 = vpop.permute.xlu2 %4172 }
 0xbea   : > { %vm4183_vm11 = vcmp.eq.s32.totalorder %v4173_v0, 1 }
 0xbeb   : > { %v4193_v45 = vsel %vm4183_vm11, %v6847_v61, -1e+30  ;;  %v4223_v12 = vsel %vm4183_vm11, %v6964_v15, -1e+30 }
 0xbec   : > { %v4208_v54 = vsel %vm3970_vm2, %v4193_v45, -inf  ;;  %v4238_v32 = vsel %vm4001_vm9, %v4223_v12, -inf  ;;  %v7173_v45 = vsel %vm3970_vm2, %v4296_v10, -inf }
 0xbed   : > { %v7115_v63 = vmax.f32 %v4201_v48, %v4208_v54  ;;  %v7117_v2 = vmax.f32 %v4231_v8, %v4238_v32  ;;  %4702 = vset.pattern.permute.xlu1 %v7536_v24  ;;  %v4220_v32 = vsel %vm4180_vm0, %v6904_v13, -1e+30 }
 0xbee   : > { %4262 = vperm.xlu1 %4702, %v6706_v27   ;;  %v4184_v27 = vsel %vm4174_vm6, %v6802_v6, -1e+30 }
 0xbf2   : > { %v7121_v25 = vpop.permute.xlu2 %4274 }
 0xbf3   : > { %vm4291_vm11 = vcmp.eq.s32.totalorder %v7121_v25, 1 }
 0xbf6   : > { %4277 = vperm.xlu1 %4702, %v6748_v52  }
 0xbfa   : > { %v4281_v42 = vpop.permute.xlu2 %4280 }
 0xbfb   : > { %vm4293_vm7 = vcmp.eq.s32.totalorder %v4281_v42, 1  ;;  %v4221_v42 = vsel %vm4181_vm5, %v6935_v1, -1e+30 }
 0xbfc   : > { %v4303_v20 = vsel %vm4293_vm7, %v6835_v53, -1e+30  ;;  %v4333_v51 = vsel %vm4293_vm7, %v6932_v3, -1e+30 }
 0xbfd   : > { %v4317_v48 = vsel %vm3970_vm2, %v4303_v20, -inf  ;;  %v4347_v8 = vsel %vm4001_vm9, %v4333_v51, -inf }
 0xbfe   : > { %4283 = vperm.xlu1 %4702, %v6765_v21   ;;  %v7137_v21 = vsel %vm3970_vm2, %v4184_v27, -inf  ;;  %v4226_v27 = vsel %vm4001_vm9, %v4216_v4, -inf }
 0xc02   : > { %v7125_v19 = vpop.permute.xlu2 %4357 }
 0xc0a   : > { %v4388_v29 = vpop.permute.xlu2 %4387 }
 0xc0b   : > { %4390 = vst.msk [vmem:[#allocation6] sm:$0xff] %vm7545_vm3, %v4388_v29 }
 0xc2d   : > { %v7128_v43 = vpop.permute.xlu1 %4140 }
 0xc35   : > { %v4158_v24 = vpop.permute.xlu1 %4157 }
 0xc36   : > { %vm4178_vm12 = vcmp.eq.s32.totalorder %v4158_v24, 1 }
 0xc37   : > { %v4188_v52 = vsel %vm4178_vm12, %v6829_v31, -1e+30 }
 0xc38   : > { %v7140_v23 = vsel %vm3970_vm2, %v4188_v52, -inf  ;;  %v4232_v52 = vsel %vm4001_vm9, %v4220_v32, -inf  ;;  %v4410_v32 = vld [vmem:[%s7546_s11 + $0x8] sm:$0x3] }
 0xc39   : > { %v4199_v35 = vmax.f32 %v7137_v21, %v7140_v23  ;;  %v4234_v23 = vsel %vm4001_vm9, %v4221_v42, -inf  ;;  %v4233_v46 = vmax.f32 %v4226_v27, %v4232_v52  ;;  %4596 = vmatmul.msk.f32.gmra.mxu2 %vm4411_vm1, %v4410_v32 }
 0xc3e   : > { %v4257_v11 = vpop.permute.xlu1 %4256 }
 0xc3f   : > { %vm4285_vm13 = vcmp.eq.s32.totalorder %v4257_v11, 1  ;;  %v4218_v11 = vsel %vm4178_vm12, %v6910_v47, -1e+30 }
 0xc40   : > { %v4295_v58 = vsel %vm4285_vm13, %v6802_v6, -1e+30  ;;  %v4325_v34 = vsel %vm4285_vm13, %v6916_v14, -1e+30 }
 0xc41   : > { %v4305_v31 = vsel %vm3970_vm2, %v4295_v58, -inf  ;;  %v4335_v22 = vsel %vm4001_vm9, %v4325_v34, -inf  ;;  %v4214_v58 = vsel %vm4174_vm6, %v6916_v14, -1e+30 }
 0xc42   : > { %v4310_v38 = vmax.f32 %v4305_v31, %v4309_v36  ;;  %v4340_v7 = vmax.f32 %v4335_v22, %v4339_v56  ;;  %v4228_v56 = vsel %vm4001_vm9, %v4218_v11, -inf  ;;  %v4224_v22 = vsel %vm4001_vm9, %v4214_v58, -inf }
 0xc43   : > { %v4229_v24 = vmax.f32 %v4224_v22, %v4228_v56 }
 0xc44   : > { %v7159_v5 = vmax.f32 %v4310_v38, %v4317_v48  ;;  %v7161_v6 = vmax.f32 %v4340_v7, %v4347_v8 }
 0xc46   : > { %v7166_v57 = vpop.permute.xlu1 %4271 }
 0xc47   : > { %vm4290_vm14 = vcmp.eq.s32.totalorder %v7166_v57, 1 }
 0xc48   : > { %v4300_v0 = vsel %vm4290_vm14, %v6824_v37, -1e+30  ;;  %v4191_v37 = vsel %vm4181_vm5, %v6840_v40, -1e+30 }
 0xc49   : > { %v7176_v12 = vsel %vm3970_vm2, %v4300_v0, -inf  ;;  %v4204_v55 = vsel %vm3970_vm2, %v4191_v37, -inf  ;;  %v4266_v0 = vpop.permute.xlu0 %4265 }
 0xc4a   : > { %v4312_v54 = vmax.f32 %v7173_v45, %v7176_v12  ;;  %vm4288_vm6 = vcmp.eq.s32.totalorder %v4266_v0, 1  ;;  %v4451_v0 = vld [vmem:[%s7547_s16 + $0x8] sm:$0x3] }
 0xc4f   : > { %v4155_v29 = vpop.permute.xlu1 %4154 }
 0xc50   : > { %vm4177_vm4 = vcmp.eq.s32.totalorder %v4155_v29, 1  ;;  %v4143_v29 = vadd.f32 %v7128_v43, %v7072_v59  ;;  %v4326_v59 = vsel %vm4286_vm8, %v6913_v50, -1e+30  ;;  %v4328_v43 = vsel %vm4288_vm6, %v6922_v39, -1e+30 }
 0xc51   : > { %v4187_v16 = vsel %vm4177_vm4, %v6809_v17, -1e+30  ;;  %v4217_v21 = vsel %vm4177_vm4, %v6922_v39, -1e+30  ;;  %v4338_v9 = vsel %vm4001_vm9, %v4328_v43, -inf }
 0xc52   : > { %v4197_v60 = vsel %vm3970_vm2, %v4187_v16, -inf  ;;  %v4227_v49 = vsel %vm4001_vm9, %v4217_v21, -inf  ;;  %v4330_v16 = vsel %vm4290_vm14, %v6925_v41, -1e+30  ;;  %v4331_v41 = vsel %vm4291_vm11, %v6904_v13, -1e+30 }
 0xc53   : > { %v4205_v20 = vmax.f32 %v4197_v60, %v4204_v55  ;;  %v4235_v51 = vmax.f32 %v4227_v49, %v4234_v23  ;;  %v4341_v23 = vsel %vm4001_vm9, %v4330_v16, -inf  ;;  %v4343_v11 = vsel %vm4001_vm9, %v4331_v41, -inf }
 0xc55   : > { %v4241_v34 = vmax.f32 %v4233_v46, %v4235_v51  ;;  %v4211_v36 = vmax.f32 %v4203_v28, %v4205_v20 }
 0xc57   : > { %v4170_v31 = vpop.permute.xlu1 %4169 }
 0xc58   : > { %vm4182_vm0 = vcmp.eq.s32.totalorder %v4170_v31, 1 }
 0xc59   : > { %v4192_v47 = vsel %vm4182_vm0, %v6835_v53, -1e+30  ;;  %v4222_v38 = vsel %vm4182_vm0, %v6932_v3, -1e+30  ;;  %v4301_v3 = vsel %vm4291_vm11, %v6783_v44, -1e+30 }
 0xc5a   : > { %v4206_v7 = vsel %vm3970_vm2, %v4192_v47, -inf  ;;  %v4236_v14 = vsel %vm4001_vm9, %v4222_v38, -inf  ;;  %v4298_v44 = vsel %vm4288_vm6, %v6809_v17, -1e+30  ;;  %v4247_v47 = vpop.permute.xlu0 %4246 }
 0xc5b   : > { %v4207_v18 = vmax.f32 %v4199_v35, %v4206_v7  ;;  %v4237_v48 = vmax.f32 %v4229_v24, %v4236_v14  ;;  %v4308_v27 = vsel %vm3970_vm2, %v4298_v44, -inf }
 0xc5d   : > { %v4240_v33 = vmax.f32 %v4237_v48, %v7117_v2  ;;  %v4210_v28 = vmax.f32 %v4207_v18, %v7115_v63  ;;  %v4313_v2 = vsel %vm3970_vm2, %v4301_v3, -inf  ;;  %v4445_v18 = vld [vmem:[#allocation9 + $0x8] sm:$0x3]  ;;  %v4450_v48 = vld [vmem:[%s7547_s16] sm:$0xff] }
 0xc5f   : > { %v4242_v53 = vmax.f32 %v4240_v33, %v4241_v34  ;;  %v4212_v8 = vmax.f32 %v4210_v28, %v4211_v36 }
 0xc60   : > { %v4263_v10 = vpop.permute.xlu1 %4262 }
 0xc61   : > { %vm4287_vm3 = vcmp.eq.s32.totalorder %v4263_v10, 1  ;;  %v4243_v35 = vmax.f32 %v4242_v53, 0.0  ;;  %v4213_v22 = vmax.f32 %v4212_v8, 0.0  ;;  %v4438_v12 = vpop.f32.mrf.mxu2 }
 0xc62   : > { %v4297_v4 = vsel %vm4287_vm3, %v6815_v26, -1e+30 }
 0xc63   : > { %v4307_v63 = vsel %vm3970_vm2, %v4297_v4, -inf  ;;  %4251 = vrot.lane.b32.xlu1 %v4243_v35, %s4951_s15  ;;  %v4244_v24 = vsub.f32 1.0, %v4213_v22 }
 0xc64   : > { %v4314_v37 = vmax.f32 %v4307_v63, %v4313_v2 }
 0xc65   : > { %v4249_v38 = vmul.f32 %v4247_v47, %v4244_v24 }
 0xc68   : > { %v4278_v42 = vpop.permute.xlu1 %4277 }
 0xc69   : > { %vm4292_vm12 = vcmp.eq.s32.totalorder %v4278_v42, 1 }
 0xc6a   : > { %v4302_v26 = vsel %vm4292_vm12, %v6840_v40, -1e+30  ;;  %v4332_v17 = vsel %vm4292_vm12, %v6935_v1, -1e+30  ;;  %v4327_v40 = vsel %vm4287_vm3, %v6919_v62, -1e+30 }
 0xc6b   : > { %v4315_v52 = vsel %vm3970_vm2, %v4302_v26, -inf  ;;  %4392 = vrot.lane.b32.xlu1 %v4143_v29, %s4952_s26  ;;  %v4345_v60 = vsel %vm4001_vm9, %v4332_v17, -inf  ;;  %v4336_v1 = vsel %vm4001_vm9, %v4326_v59, -inf  ;;  %v4337_v50 = vsel %vm4001_vm9, %v4327_v40, -inf }
 0xc6c   : > { %v4316_v21 = vmax.f32 %v4308_v27, %v4315_v52  ;;  %v4342_v39 = vmax.f32 %v4336_v1, %v4341_v23  ;;  %v4346_v49 = vmax.f32 %v4338_v9, %v4345_v60  ;;  %v4344_v25 = vmax.f32 %v4337_v50, %v4343_v11 }
 0xc6e   : > { %v4322_v55 = vmax.f32 %v4314_v37, %v4316_v21  ;;  %v4352_v34 = vmax.f32 %v4344_v25, %v4346_v49 }
 0xc70   : > { %v4284_v57 = vpop.permute.xlu1 %4283 }
 0xc71   : > { %vm4294_vm10 = vcmp.eq.s32.totalorder %v4284_v57, 1 }
 0xc72   : > { %v4304_v62 = vsel %vm4294_vm10, %v6847_v61, -1e+30  ;;  %v4334_v46 = vsel %vm4294_vm10, %v6964_v15, -1e+30 }
 0xc73   : > { %v4319_v20 = vsel %vm3970_vm2, %v4304_v62, -inf  ;;  %v4349_v13 = vsel %vm4001_vm9, %v4334_v46, -inf  ;;  %vm7548_vm2 = vcmask 130048   ;;  %vm7549_vm9 = vcmask 15360  }
 0xc74   : > { %v4320_v51 = vmax.f32 %v4312_v54, %v4319_v20  ;;  %v4350_v58 = vmax.f32 %v4342_v39, %v4349_v13  ;;  %4458 = vst.msk [vmem:[#allocation8] sm:$0xff] %vm7549_vm9, %v4438_v12  ;;  %vm7550_vm7 = vmmov %vm7549_vm9 }
 0xc75   : > { %vm7551_vm13 = vmmov %vm7550_vm7 }
 0xc76   : > { %v4321_v36 = vmax.f32 %v7159_v5, %v4320_v51  ;;  %v4351_v56 = vmax.f32 %v7161_v6, %v4350_v58  ;;  %v4444_v5 = vld [vmem:[#allocation9] sm:$0xff]  ;;  %vm7552_vm8 = vmmov %vm7548_vm2 }
 0xc77   : > { %v4446_v6 = vadd.f32 %v4444_v5, %v4438_v12  ;;  %vm7553_vm14 = vmmov %vm7548_vm2 }
 0xc78   : > { %v4353_v61 = vmax.f32 %v4351_v56, %v4352_v34  ;;  %v4323_v15 = vmax.f32 %v4321_v36, %v4322_v55 }
 0xc79   : > { %4448 = vst.msk [vmem:[#allocation9] sm:$0xff] %vm7550_vm7, %v4446_v6 }
 0xc7a   : > { %v4354_v31 = vmax.f32 %v4353_v61, 0.0  ;;  %v4324_v54 = vmax.f32 %v4323_v15, 0.0 }
 0xc7c   : > { %4362 = vrot.lane.b32.xlu0 %v4354_v31, %s4951_s15  ;;  %v4355_v33 = vsub.f32 1.0, %v4324_v54 }
 0xc7e   : > { %v4360_v3 = vmul.f32 %v7125_v19, %v4355_v33 }
 0xc80   : > { %v4452_v53 = vld [vmem:[#allocation9] sm:$0xff] }
 0xc81   : > { %v4454_v8 = vadd.f32 %v4452_v53, %v4450_v48 }
 0xc83   : > { %4456 = vst.msk [vmem:[#allocation7] sm:$0xff] %vm7551_vm13, %v4454_v8 }
 0xcbc   : > { %v4441_v30 = vpop.f32.mrf.mxu2 }
 0xcbd   : > { %v4447_v28 = vadd.f32 %v4445_v18, %v4441_v30  ;;  %4459 = vst.msk [vmem:[#allocation8 + $0x8] sm:$0x3] %vm4367_vm15, %v4441_v30 }
 0xcbf   : > { %4449 = vst.msk [vmem:[#allocation9 + $0x8] sm:$0x3] %vm4367_vm15, %v4447_v28 }
 0xcc6   : > { %v4453_v4 = vld [vmem:[#allocation9 + $0x8] sm:$0x3] }
 0xcc7   : > { %v4455_v32 = vadd.f32 %v4453_v4, %v4451_v0 }
 0xcc9   : > { %4457 = vst.msk [vmem:[#allocation7 + $0x8] sm:$0x3] %vm4367_vm15, %v4455_v32 }
 0xcd5   : > { %v4252_v7 = vpop.permute.xlu1 %4251 }
 0xcd6   : > { %v4254_v14 = vadd.f32 %v4252_v7, %v4249_v38 }
 0xcd8   : > { %4398 = vrot.lane.b32.xlu0 %v4254_v14, %s4952_s26 }
 0xcdd   : > { %v4393_v45 = vpop.permute.xlu1 %4392 }
 0xcde   : > { %4396 = vst.msk [vmem:[#allocation6 + $0x8] sm:$0xff] %vm7548_vm2, %v4393_v45 }
 0xcee   : > { %v4363_v10 = vpop.permute.xlu0 %4362 }
 0xcef   : > { %v4365_v35 = vadd.f32 %v4363_v10, %v4360_v3 }
 0xcf1   : > { %4404 = vrot.lane.b32.xlu2 %v4365_v35, %s4952_s26 }
 0xd4a   : > { %v4399_v2 = vpop.permute.xlu0 %4398 }
 0xd4b   : > { %4402 = vst.msk [vmem:[#allocation6 + $0x10] sm:$0xff] %vm7552_vm8, %v4399_v2  ;;  %v4405_v63 = vpop.permute.xlu2 %4404 }
 0xd4c   : > { %4408 = vst.msk [vmem:[#allocation6 + $0x18] sm:$0xff] %vm7553_vm14, %v4405_v63 }
 0xd4d PF: > { %s75_s28 = sadd.s32 1, %s4903_s28  }
 0xd4e   : > { %p72_p5 = scmp.ge.s32.totalorder %s75_s28, 6  }
 0xd50   :  { %74 = sbr.rel (!%p72_p5) target bundleno = 51 (0x33), region = 215 }

</bundles_post_ra>
